<compile_context>
chip_gen: v7x
topology: tpu7x:2x2x1
jax: 0.10.0
libtpu: 0.0.40
codegen_flags: <defaults>
</compile_context>

<pallas_src>
import functools

import jax
import jax.numpy as jnp
from jax.experimental import pallas as pl
from jax.experimental.pallas import tpu as pltpu


# -----------------------------------------------------------------------------
# Kernel
# -----------------------------------------------------------------------------
def _mlp_kernel(xt_ref,
                w1_ref, b1_ref,
                w2b_ref, b2_ref,
                w3b_ref, b3_ref,
                w4t_ref, b4_ref,
                o_ref, *, pack):
    """Fused 4-layer MLP forward for one lane-dense tile of `tm` pixels.

    The tile is split into `pack` column sub-chunks of tc = tm // pack pixels.
    Each sub-chunk occupies a different 64-row sublane block of the packed
    hidden state, so layers 2/3 run as a single (64*pack, 64*pack)
    block-diagonal matmul that fills the MXU's K and output dims.

    xt_ref : (5, tm)              transposed input pixels (pixels on lanes)
    w1     : (64, 5)              b1 : (64*pack, 1)   (bias tiled per chunk)
    w2b,w3b: (64*pack, 64*pack)   block-diagonal, bf16 (or f32 for validation)
    b2,b3  : (64*pack, 1)         f32
    w4t    : (64, 2)              b4 : (2, 1)
    o_ref  : (2, tm)
    """
    tm = xt_ref.shape[1]
    tc = tm // pack

    xt = xt_ref[...].astype(jnp.float32)            # (5, tm)
    w1 = w1_ref[...]                                # (64, 5)

    # ---- Layer 1 on the VPU (K=5 would waste >96% of the MXU). -------------
    # Compute each pixel sub-chunk and stack along sublanes -> packed layout.
    chunks = []
    for p in range(pack):                           # static, unrolled
        xc = xt[:, p * tc:(p + 1) * tc]             # (5, tc) lane-aligned slice
        hc = w1[:, 0:1] * xc[0:1, :]                # (64, tc) outer product
        for k in range(1, 5):
            hc = hc + w1[:, k:k + 1] * xc[k:k + 1, :]
        chunks.append(hc)
    h = jnp.concatenate(chunks, axis=0)             # (64*pack, tc)
    h = jnp.maximum(h + b1_ref[...], 0.0)
    # TODO(synk): dropout (p=0.05) is identity at inference time; omitted.

    # ---- Layers 2 & 3: low-precision operands on the MXU, f32 accumulate, --
    # ---- biases + ReLU applied in f32. --------------------------------------
    h = jnp.dot(w2b_ref[...], h.astype(w2b_ref.dtype),
                preferred_element_type=jnp.float32) + b2_ref[...]
    h = jnp.maximum(h, 0.0)
    h = jnp.dot(w3b_ref[...], h.astype(w3b_ref.dtype),
                preferred_element_type=jnp.float32) + b3_ref[...]
    h = jnp.maximum(h, 0.0)

    # ---- Layer 4 (out=2) as fused reductions per sub-chunk on the VPU/XLU. --
    w4t = w4t_ref[...]                              # (64, 2)
    b4 = b4_ref[...]                                # (2, 1)
    outs = []
    for p in range(pack):
        hp = h[64 * p:64 * (p + 1), :]              # (64, tc) sublane-aligned
        g0 = jnp.sum(hp * w4t[:, 0:1], axis=0, keepdims=True) + b4[0:1, :]
        g1 = jnp.sum(hp * w4t[:, 1:2], axis=0, keepdims=True) + b4[1:2, :]
        outs.append(jnp.concatenate([g0, g1], axis=0))      # (2, tc)
    # Single full-tile store (no per-row masked stores).
    o_ref[...] = jnp.concatenate(outs, axis=1).astype(o_ref.dtype)


# -----------------------------------------------------------------------------
# Wrapper
# -----------------------------------------------------------------------------
def _round_up(n, m):
    return ((n + m - 1) // m) * m


def _default_pack_factor():
    """Block-diagonal K-packing factor.

    4 fills a 256x256 MXU (v6e / v7x); 2 fills a 128x128 MXU (v5e and older).
    Any value is functionally correct — this is a perf knob only.
    """
    try:
        kind = jax.devices()[0].device_kind.lower()
    except Exception:
        return 4
    if any(tag in kind for tag in ("v2", "v3", "v4", "v5")):
        return 2
    return 4


def _pick_tile(n, pack):
    """Smallest lane-aligned tile giving a >=2-step grid (keeps both v7x
    TensorCores busy), capped so per-tile intermediates stay far under VMEM."""
    lane_unit = 128 * pack
    tm = _round_up(max(1, -(-n // 2)), lane_unit)   # ceil(n/2), lane aligned
    return max(lane_unit, min(tm, 8192))


@functools.partial(jax.jit, static_argnames=("tm", "pack", "matmul_dtype"))
def _forward_impl(x, params, *, tm, pack, matmul_dtype):
    N = x.shape[0]
    assert x.shape[1] == 5
    assert tm % (128 * pack) == 0, "tile must be a multiple of 128*pack lanes"
    n_pad = _round_up(N, tm)

    # Transpose to the lane-dense (features, pixels) layout, then pad the lane
    # axis; XLA fuses this into the single copy feeding the kernel.
    xt = jnp.pad(x.T, ((0, 0), (0, n_pad - N)))     # (5, n_pad)

    w1, b1 = params["w1"], params["b1"]             # (64, 5),  (64, 1)
    w2, b2 = params["w2"], params["b2"]             # (64, 64), (64, 1)
    w3, b3 = params["w3"], params["b3"]             # (64, 64), (64, 1)
    w4t, b4 = params["w4t"], params["b4"]           # (64, 2),  (2, 1)

    # Block-diagonal K-packed weights for the MXU layers (bf16 by default),
    # biases tiled per sub-chunk and kept in f32.  Tiny ops, fused by XLA.
    eye = jnp.eye(pack, dtype=w2.dtype)
    w2b = jnp.kron(eye, w2).astype(matmul_dtype)    # (64P, 64P)
    w3b = jnp.kron(eye, w3).astype(matmul_dtype)
    b1t = jnp.tile(b1, (pack, 1))                   # (64P, 1) f32
    b2t = jnp.tile(b2, (pack, 1))
    b3t = jnp.tile(b3, (pack, 1))

    full = lambda a: pl.BlockSpec(a.shape, lambda i: (0, 0))

    out_t = pl.pallas_call(
        functools.partial(_mlp_kernel, pack=pack),
        out_shape=jax.ShapeDtypeStruct((2, n_pad), x.dtype),
        grid_spec=pltpu.PrefetchScalarGridSpec(
            num_scalar_prefetch=0,
            grid=(n_pad // tm,),
            in_specs=[
                pl.BlockSpec((5, tm), lambda i: (0, i)),   # x^T column tile
                full(w1), full(b1t),
                full(w2b), full(b2t),
                full(w3b), full(b3t),
                full(w4t), full(b4),
            ],
            out_specs=pl.BlockSpec((2, tm), lambda i: (0, i)),
        ),
        compiler_params=pltpu.CompilerParams(
            # Row tiles shard across v7x's 2 TensorCores; no-op on v5e/v6e.
            dimension_semantics=("parallel",),
            # Raise v5e's 16 MiB default scoped-VMEM limit; matches v6e/v7x.
            vmem_limit_bytes=32 * 1024 * 1024,
        ),
    )(xt, w1, b1t, w2b, b2t, w3b, b3t, w4t, b4)

    return out_t.T[:N]                              # (N, 2)


def pixel2grad_forward(x, params, *, tm=None, pack=None,
                       matmul_dtype=jnp.bfloat16):
    """x: (N, 5) float32 pixels (R, G, B, x, y). Returns (N, 2) gradients."""
    if pack is None:
        pack = _default_pack_factor()
    if tm is None:
        tm = _pick_tile(x.shape[0], pack)
    return _forward_impl(x, params, tm=tm, pack=pack, matmul_dtype=matmul_dtype)


# -----------------------------------------------------------------------------
# Parameters & pure-JAX reference
# -----------------------------------------------------------------------------
def init_params(key):
    """Deterministic synthetic parameters in kernel-ready shapes.

    PyTorch nn.Linear(in, out) stores weight (out, in) and bias (out,).
    Layers 1-3 keep the (out, in) orientation (kernel computes W @ x^T);
    the last weight is stored transposed as (64, 2); biases are columns.
    """
    shapes = {
        "w1": (64, 5),  "b1": (64, 1),
        "w2": (64, 64), "b2": (64, 1),
        "w3": (64, 64), "b3": (64, 1),
        "w4t": (64, 2), "b4": (2, 1),
    }
    fan_in = {"w1": 5, "b1": 5, "w2": 64, "b2": 64,
              "w3": 64, "b3": 64, "w4t": 64, "b4": 64}
    params = {}
    for name, shape in shapes.items():
        key, sub = jax.random.split(key)
        bound = 1.0 / jnp.sqrt(fan_in[name])        # torch Linear default init
        params[name] = jax.random.uniform(
            sub, shape, jnp.float32, minval=-bound, maxval=bound)
    return params


def reference_forward(x, params):
    """Pure-JAX f32 reference matching the PyTorch forward in eval mode."""
    hp = jax.lax.Precision.HIGHEST
    h = jnp.maximum(jnp.dot(x, params["w1"].T, precision=hp) + params["b1"].T, 0.0)
    h = jnp.maximum(jnp.dot(h, params["w2"].T, precision=hp) + params["b2"].T, 0.0)
    h = jnp.maximum(jnp.dot(h, params["w3"].T, precision=hp) + params["b3"].T, 0.0)
    return jnp.dot(h, params["w4t"], precision=hp) + params["b4"].T


# -----------------------------------------------------------------------------
# Demo / self-check
# -----------------------------------------------------------------------------
if __name__ == "__main__":
    key = jax.random.PRNGKey(0)
    k_params, k_x = jax.random.split(key)

    params = init_params(k_params)

    # 4096 visuo-tactile pixels, each with (R, G, B, x, y) features.
    # Auto-picked tile -> a 2-step "parallel" grid (both v7x TCs get work).
    N = 4096
    x = jax.random.uniform(k_x, (N, 5), jnp.float32)
    ref = reference_forward(x, params)

    # Default (bf16 MXU operands, f32 accumulate): loose tolerance vs the
    # HIGHEST-precision f32 reference.
    out = jax.block_until_ready(pixel2grad_forward(x, params))
    assert out.shape == (N, 2), out.shape
    assert jnp.allclose(out, ref, atol=3e-2, rtol=3e-2), \
        float(jnp.abs(out - ref).max())

    # f32 validation path (same packed-MXU structure, full precision).
    out_f32 = jax.block_until_ready(
        pixel2grad_forward(x, params, matmul_dtype=jnp.float32))
    assert jnp.allclose(out_f32, ref, atol=1e-4, rtol=1e-4), \
        float(jnp.abs(out_f32 - ref).max())

    # Non-multiple-of-tile N exercises the wrapper-side padding path.
    x_small = x[:300]
    out_small = jax.block_until_ready(pixel2grad_forward(x_small, params))
    assert out_small.shape == (300, 2), out_small.shape
    assert jnp.allclose(out_small, ref[:300], atol=3e-2, rtol=3e-2), \
        float(jnp.abs(out_small - ref[:300]).max())

    print("KERNEL_OK")
</pallas_src>

<mosaic_0001>
module attributes {stable_mosaic.version = 11 : i64} {
  func.func @_mlp_kernel(%arg0: i32, %arg1: memref<5x2048xf32, #tpu.memory_space<vmem>>, %arg2: memref<64x5xf32, #tpu.memory_space<vmem>>, %arg3: memref<256x1xf32, #tpu.memory_space<vmem>>, %arg4: memref<256x256xbf16, #tpu.memory_space<vmem>>, %arg5: memref<256x1xf32, #tpu.memory_space<vmem>>, %arg6: memref<256x256xbf16, #tpu.memory_space<vmem>>, %arg7: memref<256x1xf32, #tpu.memory_space<vmem>>, %arg8: memref<64x2xf32, #tpu.memory_space<vmem>>, %arg9: memref<2x1xf32, #tpu.memory_space<vmem>>, %arg10: memref<2x2048xf32, #tpu.memory_space<vmem>>) attributes {dimension_semantics = [#tpu.dimension_semantics<parallel>], iteration_bounds = array<i64: 2>, scalar_prefetch = 0 : i64, scratch_operands = 0 : i64, tpu.core_type = #tpu.core_type<tc>, window_params = [{transform_indices = @transform_0, window_bounds = array<i64: 5, 2048>}, {pipeline_mode = #tpu.pipeline_mode<synchronous>, transform_indices = @transform_1, window_bounds = array<i64: 64, 5>}, {pipeline_mode = #tpu.pipeline_mode<synchronous>, transform_indices = @transform_2, window_bounds = array<i64: 256, 1>}, {pipeline_mode = #tpu.pipeline_mode<synchronous>, transform_indices = @transform_3, window_bounds = array<i64: 256, 256>}, {pipeline_mode = #tpu.pipeline_mode<synchronous>, transform_indices = @transform_4, window_bounds = array<i64: 256, 1>}, {pipeline_mode = #tpu.pipeline_mode<synchronous>, transform_indices = @transform_5, window_bounds = array<i64: 256, 256>}, {pipeline_mode = #tpu.pipeline_mode<synchronous>, transform_indices = @transform_6, window_bounds = array<i64: 256, 1>}, {pipeline_mode = #tpu.pipeline_mode<synchronous>, transform_indices = @transform_7, window_bounds = array<i64: 64, 2>}, {pipeline_mode = #tpu.pipeline_mode<synchronous>, transform_indices = @transform_8, window_bounds = array<i64: 2, 1>}, {transform_indices = @transform_9, window_bounds = array<i64: 2, 2048>}]} {
    %c0 = arith.constant 0 : index
    %c0_0 = arith.constant 0 : index
    %0 = vector.load %arg1[%c0, %c0_0] : memref<5x2048xf32, #tpu.memory_space<vmem>>, vector<5x2048xf32>
    %c0_1 = arith.constant 0 : index
    %c0_2 = arith.constant 0 : index
    %1 = vector.load %arg2[%c0_1, %c0_2] : memref<64x5xf32, #tpu.memory_space<vmem>>, vector<64x5xf32>
    %2 = vector.extract_strided_slice %0 {offsets = [0, 0], sizes = [5, 512], strides = [1, 1]} : vector<5x2048xf32> to vector<5x512xf32>
    %3 = vector.extract_strided_slice %1 {offsets = [0, 0], sizes = [64, 1], strides = [1, 1]} : vector<64x5xf32> to vector<64x1xf32>
    %4 = vector.extract_strided_slice %2 {offsets = [0, 0], sizes = [1, 512], strides = [1, 1]} : vector<5x512xf32> to vector<1x512xf32>
    %5 = vector.broadcast %3 : vector<64x1xf32> to vector<64x512xf32>
    %6 = vector.broadcast %4 : vector<1x512xf32> to vector<64x512xf32>
    %7 = arith.mulf %5, %6 : vector<64x512xf32>
    %8 = vector.extract_strided_slice %1 {offsets = [0, 1], sizes = [64, 1], strides = [1, 1]} : vector<64x5xf32> to vector<64x1xf32>
    %9 = vector.extract_strided_slice %2 {offsets = [1, 0], sizes = [1, 512], strides = [1, 1]} : vector<5x512xf32> to vector<1x512xf32>
    %10 = vector.broadcast %8 : vector<64x1xf32> to vector<64x512xf32>
    %11 = vector.broadcast %9 : vector<1x512xf32> to vector<64x512xf32>
    %12 = arith.mulf %10, %11 : vector<64x512xf32>
    %13 = arith.addf %7, %12 : vector<64x512xf32>
    %14 = vector.extract_strided_slice %1 {offsets = [0, 2], sizes = [64, 1], strides = [1, 1]} : vector<64x5xf32> to vector<64x1xf32>
    %15 = vector.extract_strided_slice %2 {offsets = [2, 0], sizes = [1, 512], strides = [1, 1]} : vector<5x512xf32> to vector<1x512xf32>
    %16 = vector.broadcast %14 : vector<64x1xf32> to vector<64x512xf32>
    %17 = vector.broadcast %15 : vector<1x512xf32> to vector<64x512xf32>
    %18 = arith.mulf %16, %17 : vector<64x512xf32>
    %19 = arith.addf %13, %18 : vector<64x512xf32>
    %20 = vector.extract_strided_slice %1 {offsets = [0, 3], sizes = [64, 1], strides = [1, 1]} : vector<64x5xf32> to vector<64x1xf32>
    %21 = vector.extract_strided_slice %2 {offsets = [3, 0], sizes = [1, 512], strides = [1, 1]} : vector<5x512xf32> to vector<1x512xf32>
    %22 = vector.broadcast %20 : vector<64x1xf32> to vector<64x512xf32>
    %23 = vector.broadcast %21 : vector<1x512xf32> to vector<64x512xf32>
    %24 = arith.mulf %22, %23 : vector<64x512xf32>
    %25 = arith.addf %19, %24 : vector<64x512xf32>
    %26 = vector.extract_strided_slice %1 {offsets = [0, 4], sizes = [64, 1], strides = [1, 1]} : vector<64x5xf32> to vector<64x1xf32>
    %27 = vector.extract_strided_slice %2 {offsets = [4, 0], sizes = [1, 512], strides = [1, 1]} : vector<5x512xf32> to vector<1x512xf32>
    %28 = vector.broadcast %26 : vector<64x1xf32> to vector<64x512xf32>
    %29 = vector.broadcast %27 : vector<1x512xf32> to vector<64x512xf32>
    %30 = arith.mulf %28, %29 : vector<64x512xf32>
    %31 = arith.addf %25, %30 : vector<64x512xf32>
    %32 = vector.extract_strided_slice %0 {offsets = [0, 512], sizes = [5, 512], strides = [1, 1]} : vector<5x2048xf32> to vector<5x512xf32>
    %33 = vector.extract_strided_slice %1 {offsets = [0, 0], sizes = [64, 1], strides = [1, 1]} : vector<64x5xf32> to vector<64x1xf32>
    %34 = vector.extract_strided_slice %32 {offsets = [0, 0], sizes = [1, 512], strides = [1, 1]} : vector<5x512xf32> to vector<1x512xf32>
    %35 = vector.broadcast %33 : vector<64x1xf32> to vector<64x512xf32>
    %36 = vector.broadcast %34 : vector<1x512xf32> to vector<64x512xf32>
    %37 = arith.mulf %35, %36 : vector<64x512xf32>
    %38 = vector.extract_strided_slice %1 {offsets = [0, 1], sizes = [64, 1], strides = [1, 1]} : vector<64x5xf32> to vector<64x1xf32>
    %39 = vector.extract_strided_slice %32 {offsets = [1, 0], sizes = [1, 512], strides = [1, 1]} : vector<5x512xf32> to vector<1x512xf32>
    %40 = vector.broadcast %38 : vector<64x1xf32> to vector<64x512xf32>
    %41 = vector.broadcast %39 : vector<1x512xf32> to vector<64x512xf32>
    %42 = arith.mulf %40, %41 : vector<64x512xf32>
    %43 = arith.addf %37, %42 : vector<64x512xf32>
    %44 = vector.extract_strided_slice %1 {offsets = [0, 2], sizes = [64, 1], strides = [1, 1]} : vector<64x5xf32> to vector<64x1xf32>
    %45 = vector.extract_strided_slice %32 {offsets = [2, 0], sizes = [1, 512], strides = [1, 1]} : vector<5x512xf32> to vector<1x512xf32>
    %46 = vector.broadcast %44 : vector<64x1xf32> to vector<64x512xf32>
    %47 = vector.broadcast %45 : vector<1x512xf32> to vector<64x512xf32>
    %48 = arith.mulf %46, %47 : vector<64x512xf32>
    %49 = arith.addf %43, %48 : vector<64x512xf32>
    %50 = vector.extract_strided_slice %1 {offsets = [0, 3], sizes = [64, 1], strides = [1, 1]} : vector<64x5xf32> to vector<64x1xf32>
    %51 = vector.extract_strided_slice %32 {offsets = [3, 0], sizes = [1, 512], strides = [1, 1]} : vector<5x512xf32> to vector<1x512xf32>
    %52 = vector.broadcast %50 : vector<64x1xf32> to vector<64x512xf32>
    %53 = vector.broadcast %51 : vector<1x512xf32> to vector<64x512xf32>
    %54 = arith.mulf %52, %53 : vector<64x512xf32>
    %55 = arith.addf %49, %54 : vector<64x512xf32>
    %56 = vector.extract_strided_slice %1 {offsets = [0, 4], sizes = [64, 1], strides = [1, 1]} : vector<64x5xf32> to vector<64x1xf32>
    %57 = vector.extract_strided_slice %32 {offsets = [4, 0], sizes = [1, 512], strides = [1, 1]} : vector<5x512xf32> to vector<1x512xf32>
    %58 = vector.broadcast %56 : vector<64x1xf32> to vector<64x512xf32>
    %59 = vector.broadcast %57 : vector<1x512xf32> to vector<64x512xf32>
    %60 = arith.mulf %58, %59 : vector<64x512xf32>
    %61 = arith.addf %55, %60 : vector<64x512xf32>
    %62 = vector.extract_strided_slice %0 {offsets = [0, 1024], sizes = [5, 512], strides = [1, 1]} : vector<5x2048xf32> to vector<5x512xf32>
    %63 = vector.extract_strided_slice %1 {offsets = [0, 0], sizes = [64, 1], strides = [1, 1]} : vector<64x5xf32> to vector<64x1xf32>
    %64 = vector.extract_strided_slice %62 {offsets = [0, 0], sizes = [1, 512], strides = [1, 1]} : vector<5x512xf32> to vector<1x512xf32>
    %65 = vector.broadcast %63 : vector<64x1xf32> to vector<64x512xf32>
    %66 = vector.broadcast %64 : vector<1x512xf32> to vector<64x512xf32>
    %67 = arith.mulf %65, %66 : vector<64x512xf32>
    %68 = vector.extract_strided_slice %1 {offsets = [0, 1], sizes = [64, 1], strides = [1, 1]} : vector<64x5xf32> to vector<64x1xf32>
    %69 = vector.extract_strided_slice %62 {offsets = [1, 0], sizes = [1, 512], strides = [1, 1]} : vector<5x512xf32> to vector<1x512xf32>
    %70 = vector.broadcast %68 : vector<64x1xf32> to vector<64x512xf32>
    %71 = vector.broadcast %69 : vector<1x512xf32> to vector<64x512xf32>
    %72 = arith.mulf %70, %71 : vector<64x512xf32>
    %73 = arith.addf %67, %72 : vector<64x512xf32>
    %74 = vector.extract_strided_slice %1 {offsets = [0, 2], sizes = [64, 1], strides = [1, 1]} : vector<64x5xf32> to vector<64x1xf32>
    %75 = vector.extract_strided_slice %62 {offsets = [2, 0], sizes = [1, 512], strides = [1, 1]} : vector<5x512xf32> to vector<1x512xf32>
    %76 = vector.broadcast %74 : vector<64x1xf32> to vector<64x512xf32>
    %77 = vector.broadcast %75 : vector<1x512xf32> to vector<64x512xf32>
    %78 = arith.mulf %76, %77 : vector<64x512xf32>
    %79 = arith.addf %73, %78 : vector<64x512xf32>
    %80 = vector.extract_strided_slice %1 {offsets = [0, 3], sizes = [64, 1], strides = [1, 1]} : vector<64x5xf32> to vector<64x1xf32>
    %81 = vector.extract_strided_slice %62 {offsets = [3, 0], sizes = [1, 512], strides = [1, 1]} : vector<5x512xf32> to vector<1x512xf32>
    %82 = vector.broadcast %80 : vector<64x1xf32> to vector<64x512xf32>
    %83 = vector.broadcast %81 : vector<1x512xf32> to vector<64x512xf32>
    %84 = arith.mulf %82, %83 : vector<64x512xf32>
    %85 = arith.addf %79, %84 : vector<64x512xf32>
    %86 = vector.extract_strided_slice %1 {offsets = [0, 4], sizes = [64, 1], strides = [1, 1]} : vector<64x5xf32> to vector<64x1xf32>
    %87 = vector.extract_strided_slice %62 {offsets = [4, 0], sizes = [1, 512], strides = [1, 1]} : vector<5x512xf32> to vector<1x512xf32>
    %88 = vector.broadcast %86 : vector<64x1xf32> to vector<64x512xf32>
    %89 = vector.broadcast %87 : vector<1x512xf32> to vector<64x512xf32>
    %90 = arith.mulf %88, %89 : vector<64x512xf32>
    %91 = arith.addf %85, %90 : vector<64x512xf32>
    %92 = vector.extract_strided_slice %0 {offsets = [0, 1536], sizes = [5, 512], strides = [1, 1]} : vector<5x2048xf32> to vector<5x512xf32>
    %93 = vector.extract_strided_slice %1 {offsets = [0, 0], sizes = [64, 1], strides = [1, 1]} : vector<64x5xf32> to vector<64x1xf32>
    %94 = vector.extract_strided_slice %92 {offsets = [0, 0], sizes = [1, 512], strides = [1, 1]} : vector<5x512xf32> to vector<1x512xf32>
    %95 = vector.broadcast %93 : vector<64x1xf32> to vector<64x512xf32>
    %96 = vector.broadcast %94 : vector<1x512xf32> to vector<64x512xf32>
    %97 = arith.mulf %95, %96 : vector<64x512xf32>
    %98 = vector.extract_strided_slice %1 {offsets = [0, 1], sizes = [64, 1], strides = [1, 1]} : vector<64x5xf32> to vector<64x1xf32>
    %99 = vector.extract_strided_slice %92 {offsets = [1, 0], sizes = [1, 512], strides = [1, 1]} : vector<5x512xf32> to vector<1x512xf32>
    %100 = vector.broadcast %98 : vector<64x1xf32> to vector<64x512xf32>
    %101 = vector.broadcast %99 : vector<1x512xf32> to vector<64x512xf32>
    %102 = arith.mulf %100, %101 : vector<64x512xf32>
    %103 = arith.addf %97, %102 : vector<64x512xf32>
    %104 = vector.extract_strided_slice %1 {offsets = [0, 2], sizes = [64, 1], strides = [1, 1]} : vector<64x5xf32> to vector<64x1xf32>
    %105 = vector.extract_strided_slice %92 {offsets = [2, 0], sizes = [1, 512], strides = [1, 1]} : vector<5x512xf32> to vector<1x512xf32>
    %106 = vector.broadcast %104 : vector<64x1xf32> to vector<64x512xf32>
    %107 = vector.broadcast %105 : vector<1x512xf32> to vector<64x512xf32>
    %108 = arith.mulf %106, %107 : vector<64x512xf32>
    %109 = arith.addf %103, %108 : vector<64x512xf32>
    %110 = vector.extract_strided_slice %1 {offsets = [0, 3], sizes = [64, 1], strides = [1, 1]} : vector<64x5xf32> to vector<64x1xf32>
    %111 = vector.extract_strided_slice %92 {offsets = [3, 0], sizes = [1, 512], strides = [1, 1]} : vector<5x512xf32> to vector<1x512xf32>
    %112 = vector.broadcast %110 : vector<64x1xf32> to vector<64x512xf32>
    %113 = vector.broadcast %111 : vector<1x512xf32> to vector<64x512xf32>
    %114 = arith.mulf %112, %113 : vector<64x512xf32>
    %115 = arith.addf %109, %114 : vector<64x512xf32>
    %116 = vector.extract_strided_slice %1 {offsets = [0, 4], sizes = [64, 1], strides = [1, 1]} : vector<64x5xf32> to vector<64x1xf32>
    %117 = vector.extract_strided_slice %92 {offsets = [4, 0], sizes = [1, 512], strides = [1, 1]} : vector<5x512xf32> to vector<1x512xf32>
    %118 = vector.broadcast %116 : vector<64x1xf32> to vector<64x512xf32>
    %119 = vector.broadcast %117 : vector<1x512xf32> to vector<64x512xf32>
    %120 = arith.mulf %118, %119 : vector<64x512xf32>
    %121 = arith.addf %115, %120 : vector<64x512xf32>
    %122 = tpu.concatenate %31, %61, %91, %121 in 0 : vector<64x512xf32>, vector<64x512xf32>, vector<64x512xf32>, vector<64x512xf32> -> vector<256x512xf32>
    %c0_3 = arith.constant 0 : index
    %c0_4 = arith.constant 0 : index
    %123 = vector.load %arg3[%c0_3, %c0_4] : memref<256x1xf32, #tpu.memory_space<vmem>>, vector<256x1xf32>
    %124 = vector.broadcast %123 : vector<256x1xf32> to vector<256x512xf32>
    %125 = arith.addf %122, %124 : vector<256x512xf32>
    %cst = arith.constant 0.000000e+00 : f32
    %126 = vector.broadcast %cst : f32 to vector<256x512xf32>
    %127 = arith.maximumf %125, %126 : vector<256x512xf32>
    %c0_5 = arith.constant 0 : index
    %c0_6 = arith.constant 0 : index
    %128 = vector.load %arg4[%c0_5, %c0_6] : memref<256x256xbf16, #tpu.memory_space<vmem>>, vector<256x256xbf16>
    %129 = arith.truncf %127 : vector<256x512xf32> to vector<256x512xbf16>
    %cst_7 = arith.constant dense<0.000000e+00> : vector<256x512xf32>
    %130 = tpu.matmul %128, %129, %cst_7 {dimension_numbers = #tpu.dot_dimension_numbers<[1], [0], [0], [1], [0, 0, 1, 1], [], []>} : vector<256x256xbf16>, vector<256x512xbf16>, vector<256x512xf32> -> vector<256x512xf32>
    %c0_8 = arith.constant 0 : index
    %c0_9 = arith.constant 0 : index
    %131 = vector.load %arg5[%c0_8, %c0_9] : memref<256x1xf32, #tpu.memory_space<vmem>>, vector<256x1xf32>
    %132 = vector.broadcast %131 : vector<256x1xf32> to vector<256x512xf32>
    %133 = arith.addf %130, %132 : vector<256x512xf32>
    %cst_10 = arith.constant 0.000000e+00 : f32
    %134 = vector.broadcast %cst_10 : f32 to vector<256x512xf32>
    %135 = arith.maximumf %133, %134 : vector<256x512xf32>
    %c0_11 = arith.constant 0 : index
    %c0_12 = arith.constant 0 : index
    %136 = vector.load %arg6[%c0_11, %c0_12] : memref<256x256xbf16, #tpu.memory_space<vmem>>, vector<256x256xbf16>
    %137 = arith.truncf %135 : vector<256x512xf32> to vector<256x512xbf16>
    %cst_13 = arith.constant dense<0.000000e+00> : vector<256x512xf32>
    %138 = tpu.matmul %136, %137, %cst_13 {dimension_numbers = #tpu.dot_dimension_numbers<[1], [0], [0], [1], [0, 0, 1, 1], [], []>} : vector<256x256xbf16>, vector<256x512xbf16>, vector<256x512xf32> -> vector<256x512xf32>
    %c0_14 = arith.constant 0 : index
    %c0_15 = arith.constant 0 : index
    %139 = vector.load %arg7[%c0_14, %c0_15] : memref<256x1xf32, #tpu.memory_space<vmem>>, vector<256x1xf32>
    %140 = vector.broadcast %139 : vector<256x1xf32> to vector<256x512xf32>
    %141 = arith.addf %138, %140 : vector<256x512xf32>
    %cst_16 = arith.constant 0.000000e+00 : f32
    %142 = vector.broadcast %cst_16 : f32 to vector<256x512xf32>
    %143 = arith.maximumf %141, %142 : vector<256x512xf32>
    %c0_17 = arith.constant 0 : index
    %c0_18 = arith.constant 0 : index
    %144 = vector.load %arg8[%c0_17, %c0_18] : memref<64x2xf32, #tpu.memory_space<vmem>>, vector<64x2xf32>
    %c0_19 = arith.constant 0 : index
    %c0_20 = arith.constant 0 : index
    %145 = vector.load %arg9[%c0_19, %c0_20] : memref<2x1xf32, #tpu.memory_space<vmem>>, vector<2x1xf32>
    %146 = vector.extract_strided_slice %143 {offsets = [0, 0], sizes = [64, 512], strides = [1, 1]} : vector<256x512xf32> to vector<64x512xf32>
    %147 = vector.extract_strided_slice %144 {offsets = [0, 0], sizes = [64, 1], strides = [1, 1]} : vector<64x2xf32> to vector<64x1xf32>
    %148 = vector.broadcast %147 : vector<64x1xf32> to vector<64x512xf32>
    %149 = arith.mulf %146, %148 : vector<64x512xf32>
    %cst_21 = arith.constant dense<0.000000e+00> : vector<512xf32>
    %150 = vector.multi_reduction <add>, %149, %cst_21 [0] : vector<64x512xf32> to vector<512xf32>
    %151 = vector.shape_cast %150 : vector<512xf32> to vector<1x512xf32>
    %152 = vector.extract_strided_slice %145 {offsets = [0, 0], sizes = [1, 1], strides = [1, 1]} : vector<2x1xf32> to vector<1x1xf32>
    %153 = vector.broadcast %152 : vector<1x1xf32> to vector<1x512xf32>
    %154 = arith.addf %151, %153 : vector<1x512xf32>
    %155 = vector.extract_strided_slice %144 {offsets = [0, 1], sizes = [64, 1], strides = [1, 1]} : vector<64x2xf32> to vector<64x1xf32>
    %156 = vector.broadcast %155 : vector<64x1xf32> to vector<64x512xf32>
    %157 = arith.mulf %146, %156 : vector<64x512xf32>
    %cst_22 = arith.constant dense<0.000000e+00> : vector<512xf32>
    %158 = vector.multi_reduction <add>, %157, %cst_22 [0] : vector<64x512xf32> to vector<512xf32>
    %159 = vector.shape_cast %158 : vector<512xf32> to vector<1x512xf32>
    %160 = vector.extract_strided_slice %145 {offsets = [1, 0], sizes = [1, 1], strides = [1, 1]} : vector<2x1xf32> to vector<1x1xf32>
    %161 = vector.broadcast %160 : vector<1x1xf32> to vector<1x512xf32>
    %162 = arith.addf %159, %161 : vector<1x512xf32>
    %163 = tpu.concatenate %154, %162 in 0 : vector<1x512xf32>, vector<1x512xf32> -> vector<2x512xf32>
    %164 = vector.extract_strided_slice %143 {offsets = [64, 0], sizes = [64, 512], strides = [1, 1]} : vector<256x512xf32> to vector<64x512xf32>
    %165 = vector.extract_strided_slice %144 {offsets = [0, 0], sizes = [64, 1], strides = [1, 1]} : vector<64x2xf32> to vector<64x1xf32>
    %166 = vector.broadcast %165 : vector<64x1xf32> to vector<64x512xf32>
    %167 = arith.mulf %164, %166 : vector<64x512xf32>
    %cst_23 = arith.constant dense<0.000000e+00> : vector<512xf32>
    %168 = vector.multi_reduction <add>, %167, %cst_23 [0] : vector<64x512xf32> to vector<512xf32>
    %169 = vector.shape_cast %168 : vector<512xf32> to vector<1x512xf32>
    %170 = vector.extract_strided_slice %145 {offsets = [0, 0], sizes = [1, 1], strides = [1, 1]} : vector<2x1xf32> to vector<1x1xf32>
    %171 = vector.broadcast %170 : vector<1x1xf32> to vector<1x512xf32>
    %172 = arith.addf %169, %171 : vector<1x512xf32>
    %173 = vector.extract_strided_slice %144 {offsets = [0, 1], sizes = [64, 1], strides = [1, 1]} : vector<64x2xf32> to vector<64x1xf32>
    %174 = vector.broadcast %173 : vector<64x1xf32> to vector<64x512xf32>
    %175 = arith.mulf %164, %174 : vector<64x512xf32>
    %cst_24 = arith.constant dense<0.000000e+00> : vector<512xf32>
    %176 = vector.multi_reduction <add>, %175, %cst_24 [0] : vector<64x512xf32> to vector<512xf32>
    %177 = vector.shape_cast %176 : vector<512xf32> to vector<1x512xf32>
    %178 = vector.extract_strided_slice %145 {offsets = [1, 0], sizes = [1, 1], strides = [1, 1]} : vector<2x1xf32> to vector<1x1xf32>
    %179 = vector.broadcast %178 : vector<1x1xf32> to vector<1x512xf32>
    %180 = arith.addf %177, %179 : vector<1x512xf32>
    %181 = tpu.concatenate %172, %180 in 0 : vector<1x512xf32>, vector<1x512xf32> -> vector<2x512xf32>
    %182 = vector.extract_strided_slice %143 {offsets = [128, 0], sizes = [64, 512], strides = [1, 1]} : vector<256x512xf32> to vector<64x512xf32>
    %183 = vector.extract_strided_slice %144 {offsets = [0, 0], sizes = [64, 1], strides = [1, 1]} : vector<64x2xf32> to vector<64x1xf32>
    %184 = vector.broadcast %183 : vector<64x1xf32> to vector<64x512xf32>
    %185 = arith.mulf %182, %184 : vector<64x512xf32>
    %cst_25 = arith.constant dense<0.000000e+00> : vector<512xf32>
    %186 = vector.multi_reduction <add>, %185, %cst_25 [0] : vector<64x512xf32> to vector<512xf32>
    %187 = vector.shape_cast %186 : vector<512xf32> to vector<1x512xf32>
    %188 = vector.extract_strided_slice %145 {offsets = [0, 0], sizes = [1, 1], strides = [1, 1]} : vector<2x1xf32> to vector<1x1xf32>
    %189 = vector.broadcast %188 : vector<1x1xf32> to vector<1x512xf32>
    %190 = arith.addf %187, %189 : vector<1x512xf32>
    %191 = vector.extract_strided_slice %144 {offsets = [0, 1], sizes = [64, 1], strides = [1, 1]} : vector<64x2xf32> to vector<64x1xf32>
    %192 = vector.broadcast %191 : vector<64x1xf32> to vector<64x512xf32>
    %193 = arith.mulf %182, %192 : vector<64x512xf32>
    %cst_26 = arith.constant dense<0.000000e+00> : vector<512xf32>
    %194 = vector.multi_reduction <add>, %193, %cst_26 [0] : vector<64x512xf32> to vector<512xf32>
    %195 = vector.shape_cast %194 : vector<512xf32> to vector<1x512xf32>
    %196 = vector.extract_strided_slice %145 {offsets = [1, 0], sizes = [1, 1], strides = [1, 1]} : vector<2x1xf32> to vector<1x1xf32>
    %197 = vector.broadcast %196 : vector<1x1xf32> to vector<1x512xf32>
    %198 = arith.addf %195, %197 : vector<1x512xf32>
    %199 = tpu.concatenate %190, %198 in 0 : vector<1x512xf32>, vector<1x512xf32> -> vector<2x512xf32>
    %200 = vector.extract_strided_slice %143 {offsets = [192, 0], sizes = [64, 512], strides = [1, 1]} : vector<256x512xf32> to vector<64x512xf32>
    %201 = vector.extract_strided_slice %144 {offsets = [0, 0], sizes = [64, 1], strides = [1, 1]} : vector<64x2xf32> to vector<64x1xf32>
    %202 = vector.broadcast %201 : vector<64x1xf32> to vector<64x512xf32>
    %203 = arith.mulf %200, %202 : vector<64x512xf32>
    %cst_27 = arith.constant dense<0.000000e+00> : vector<512xf32>
    %204 = vector.multi_reduction <add>, %203, %cst_27 [0] : vector<64x512xf32> to vector<512xf32>
    %205 = vector.shape_cast %204 : vector<512xf32> to vector<1x512xf32>
    %206 = vector.extract_strided_slice %145 {offsets = [0, 0], sizes = [1, 1], strides = [1, 1]} : vector<2x1xf32> to vector<1x1xf32>
    %207 = vector.broadcast %206 : vector<1x1xf32> to vector<1x512xf32>
    %208 = arith.addf %205, %207 : vector<1x512xf32>
    %209 = vector.extract_strided_slice %144 {offsets = [0, 1], sizes = [64, 1], strides = [1, 1]} : vector<64x2xf32> to vector<64x1xf32>
    %210 = vector.broadcast %209 : vector<64x1xf32> to vector<64x512xf32>
    %211 = arith.mulf %200, %210 : vector<64x512xf32>
    %cst_28 = arith.constant dense<0.000000e+00> : vector<512xf32>
    %212 = vector.multi_reduction <add>, %211, %cst_28 [0] : vector<64x512xf32> to vector<512xf32>
    %213 = vector.shape_cast %212 : vector<512xf32> to vector<1x512xf32>
    %214 = vector.extract_strided_slice %145 {offsets = [1, 0], sizes = [1, 1], strides = [1, 1]} : vector<2x1xf32> to vector<1x1xf32>
    %215 = vector.broadcast %214 : vector<1x1xf32> to vector<1x512xf32>
    %216 = arith.addf %213, %215 : vector<1x512xf32>
    %217 = tpu.concatenate %208, %216 in 0 : vector<1x512xf32>, vector<1x512xf32> -> vector<2x512xf32>
    %218 = tpu.concatenate %163, %181, %199, %217 in 1 : vector<2x512xf32>, vector<2x512xf32>, vector<2x512xf32>, vector<2x512xf32> -> vector<2x2048xf32>
    %c0_29 = arith.constant 0 : index
    %c0_30 = arith.constant 0 : index
    %219 = vector.load %arg10[%c0_29, %c0_30] : memref<2x2048xf32, #tpu.memory_space<vmem>>, vector<2x2048xf32>
    tpu.vector_store %arg10[%c0_29, %c0_30], %218 {strides = array<i32>} : memref<2x2048xf32, #tpu.memory_space<vmem>>, vector<2x2048xf32>,
    return
  }
  func.func @transform_0(%arg0: i32) -> (i32, i32) {
    %c0_i32 = arith.constant 0 : i32
    %c0_i32_0 = arith.constant 0 : i32
    return %c0_i32, %arg0 : i32, i32
  }
  func.func @transform_1(%arg0: i32) -> (i32, i32) {
    %c0_i32 = arith.constant 0 : i32
    %c0_i32_0 = arith.constant 0 : i32
    %c0_i32_1 = arith.constant 0 : i32
    return %c0_i32, %c0_i32_0 : i32, i32
  }
  func.func @transform_2(%arg0: i32) -> (i32, i32) {
    %c0_i32 = arith.constant 0 : i32
    %c0_i32_0 = arith.constant 0 : i32
    %c0_i32_1 = arith.constant 0 : i32
    return %c0_i32, %c0_i32_0 : i32, i32
  }
  func.func @transform_3(%arg0: i32) -> (i32, i32) {
    %c0_i32 = arith.constant 0 : i32
    %c0_i32_0 = arith.constant 0 : i32
    %c0_i32_1 = arith.constant 0 : i32
    return %c0_i32, %c0_i32_0 : i32, i32
  }
  func.func @transform_4(%arg0: i32) -> (i32, i32) {
    %c0_i32 = arith.constant 0 : i32
    %c0_i32_0 = arith.constant 0 : i32
    %c0_i32_1 = arith.constant 0 : i32
    return %c0_i32, %c0_i32_0 : i32, i32
  }
  func.func @transform_5(%arg0: i32) -> (i32, i32) {
    %c0_i32 = arith.constant 0 : i32
    %c0_i32_0 = arith.constant 0 : i32
    %c0_i32_1 = arith.constant 0 : i32
    return %c0_i32, %c0_i32_0 : i32, i32
  }
  func.func @transform_6(%arg0: i32) -> (i32, i32) {
    %c0_i32 = arith.constant 0 : i32
    %c0_i32_0 = arith.constant 0 : i32
    %c0_i32_1 = arith.constant 0 : i32
    return %c0_i32, %c0_i32_0 : i32, i32
  }
  func.func @transform_7(%arg0: i32) -> (i32, i32) {
    %c0_i32 = arith.constant 0 : i32
    %c0_i32_0 = arith.constant 0 : i32
    %c0_i32_1 = arith.constant 0 : i32
    return %c0_i32, %c0_i32_0 : i32, i32
  }
  func.func @transform_8(%arg0: i32) -> (i32, i32) {
    %c0_i32 = arith.constant 0 : i32
    %c0_i32_0 = arith.constant 0 : i32
    %c0_i32_1 = arith.constant 0 : i32
    return %c0_i32, %c0_i32_0 : i32, i32
  }
  func.func @transform_9(%arg0: i32) -> (i32, i32) {
    %c0_i32 = arith.constant 0 : i32
    %c0_i32_0 = arith.constant 0 : i32
    return %c0_i32, %arg0 : i32, i32
  }
}

</mosaic_0001>

<bundles_post_ra>
// kernel: _forward_impl.1
= control target key start
LH: loop header
LB: loop body
LE: loop exit
PB: predicated region body
PF: predicated region fallthrough
CT: control target
= control target key end

     0   :  { %14 = vsyncpa [#allocation3], 0  ;;  %s9806_s0 = inlined_call_operand.vmem [shape: f32[5,4096], index: 0, kind: input, shape index: {}]   ;;  %s9807_s1 = inlined_call_operand.vmem [shape: f32[64,5], index: 1, kind: input, shape index: {}]   ;;  %s9808_s2 = inlined_call_operand.vmem [shape: f32[256,1], index: 2, kind: input, shape index: {}]   ;;  %s9809_s3 = inlined_call_operand.vmem [shape: bf16[256,256], index: 3, kind: input, shape index: {}]   ;;  %s9810_s4 = inlined_call_operand.vmem [shape: f32[256,1], index: 4, kind: input, shape index: {}]   ;;  %s9811_s5 = inlined_call_operand.vmem [shape: bf16[256,256], index: 5, kind: input, shape index: {}]   ;;  %s9812_s6 = inlined_call_operand.vmem [shape: f32[256,1], index: 6, kind: input, shape index: {}]   ;;  %s9813_s7 = inlined_call_operand.vmem [shape: f32[64,2], index: 7, kind: input, shape index: {}]   ;;  %s9814_s8 = inlined_call_operand.vmem [shape: f32[2,1], index: 8, kind: input, shape index: {}]   ;;  %s9815_s9 = inlined_call_operand.hbm [shape: f32[2,4096], index: 9, kind: output, shape index: {}]  }
   0x1   :  { %16 = vsyncpa [#allocation3 + $0x1], 0  ;;  %s5723_s30 = smov 0   ;;  %s5725_s10 = smov 0  }
   0x2   :  { %s5727_s11 = smov 0   ;;  %s5729_s12 = smov 0  }
   0x3 LB: > { %s5744_s13 = sadd.s32 4294967295, %s5664_s12   ;;  %s5343_s14 = sadd.s32 4294967294, %s5664_s12   ;;  %s5664_s12 = sphi %s5729_s12, %s10865_s12   ;;  %s5660_s11 = sphi %s5727_s11, %s10864_s11   ;;  %s5656_s10 = sphi %s5725_s10, %s10863_s10   ;;  %s5652_s30 = sphi %s5723_s30, %s10862_s30  }
   0x4   : > { %s5748_s15 = sadd.s32 1, %s5664_s12   ;;  %s223_s16 = sadd.s32 1, %s5660_s11 }
   0x5   : > { %s220_s17 = ssub.s32 %s5664_s12, %s5748_s15  ;;  %p233_p0 = scmp.ne.s32.totalorder %s5660_s11, %s5656_s10 }
   0x6   : > { %p221_p1 = scmp.eq.s32.totalorder %s220_s17, 0  ;;  %p234_p2 = scmp.eq.s32.totalorder %s5744_s13, 1 }
   0x7   : > { %p239_p3 = scmp.ne.s32.totalorder %s5656_s10, %s5652_s30  ;;  %p240_p4 = scmp.eq.s32.totalorder %s5343_s14, 1 }
   0x8   : > { %s5759_s18 = scalar_select %p221_p1, %s5660_s11, %s223_s16  }
   0x9   : > { %p5761_p5 = por %p234_p2, %p233_p0  ;;  %p5765_p6 = por %p240_p4, %p239_p3 }
   0xa   : > { %p5346_p7 = scmp.ge.s32.totalorder %s5664_s12, 1  ;;  %p291_p8 = scmp.lt.s32.totalorder %s5664_s12, 3 }
   0xc   : > { %p292_p9 = pnand %p5346_p7, %p291_p8 }
   0xe   : > { %295 = sbr.rel (%p292_p9) target bundleno = 1376 (0x560), region = 56 }
  0x15   : > { %v5774_v0 = vld [vmem:[%s9807_s1] sm:$0xff]  ;;  %v398_v1 = vlaneseq  ;;  %v9816_v2 = vmov 1   ;;  %v9818_v3 = vmov 0   ;;  %s5348_s23 = sshll.u32 %s5744_s13, 4  ;;  %v5784_v4 = vld [vmem:[%s9807_s1 + $0x8] sm:$0xff]  ;;  %v5793_v6 = vld [vmem:[%s9807_s1 + $0x18] sm:$0xff] }
  0x16   : > { %5466 = vset.pattern.permute.xlu1 %v9816_v2  ;;  %5465 = vset.pattern.permute.xlu0 %v9818_v3  ;;  %p328_p10 = scmp.lt.s32.totalorder %s5348_s23, 31  ;;  %v9820_v10 = vmov 2   ;;  %v5818_v12 = vld [vmem:[%s9807_s1 + $0x20] sm:$0xff]  ;;  %v5860_v23 = vld [vmem:[%s9807_s1 + $0x10] sm:$0xff]  ;;  %v5963_v49 = vld [vmem:[%s9807_s1 + $0x28] sm:$0xff]  ;;  %vm4632_vm0 = vcmask 1040384  }
  0x17   : > { %447 = vperm.xlu1 %5466, %v5774_v0   ;;  %360 = vperm.xlu0 %5465, %v5774_v0   ;;  %v5786_v5 = vshrl.u32 %v398_v1, 7  ;;  %v5896_v32 = vld [vmem:[%s9807_s1 + $0x30] sm:$0xff]  ;;  %v6023_v63 = vld [vmem:[%s9807_s1 + $0x38] sm:$0xff] }
  0x18   : > { %s10867_s23 = smov (!%p328_p10, %s5348_s23), 31 }
  0x19   : > { %10164 = vst [vmem:[#allocation5_spill] sm:$0xff] %v5786_v5  ;;  %s5349_s26 = sshll.u32 %s10867_s23, 3  ;;  %v5796_v7 = vsub.s32 0, %v5786_v5  ;;  %v5799_v8 = vsub.s32 1, %v5786_v5  ;;  %v5802_v9 = vsub.s32 2, %v5786_v5  ;;  %v6027_v1 = vsub.s32 3, %v5786_v5 }
  0x1a   : > { %s5807_s16 = scalar_lea.vmem %s9806_s0, %s5349_s26  ;;  %s5419_s26 = sshll.u32 %s5744_s13, 9 }
  0x1b   : > { %451 = vperm.xlu1 %5466, %v5784_v4   ;;  %365 = vperm.xlu0 %5465, %v5784_v4   ;;  %v5812_v11 = vld [vmem:[%s5807_s16 + $0x20] sm:$0x1f]  ;;  %v5821_v13 = vld [vmem:[%s5807_s16 + $0x28] sm:$0x1f]  ;;  %v5824_v14 = vld [vmem:[%s5807_s16 + $0x30] sm:$0x1f]  ;;  %s9761_s14 = scalar_lea.hbm %s9815_s9, %s5419_s26 }
  0x1c   : > { %v5828_v15 = vrot.slane %v5812_v11, %v5796_v7  ;;  %v5832_v16 = vrot.slane %v5812_v11, %v5799_v8  ;;  %v5836_v17 = vrot.slane %v5812_v11, %v5802_v9  ;;  %v5839_v18 = vld [vmem:[%s5807_s16 + $0x38] sm:$0x1f]  ;;  %v5843_v19 = vrot.slane %v5821_v13, %v5796_v7  ;;  %v5884_v29 = vld [vmem:[%s5807_s16 + $0x40] sm:$0x1f]  ;;  %v5887_v30 = vld [vmem:[%s5807_s16 + $0x48] sm:$0x1f] }
  0x1d   : > { %v5847_v20 = vrot.slane %v5824_v14, %v5796_v7  ;;  %v5851_v21 = vrot.slane %v5821_v13, %v5799_v8  ;;  %v5855_v22 = vrot.slane %v5824_v14, %v5799_v8  ;;  %v5864_v24 = vrot.slane %v5839_v18, %v5796_v7  ;;  %v5890_v31 = vld [vmem:[%s5807_s16 + $0x50] sm:$0x1f]  ;;  %v5899_v33 = vld [vmem:[%s5807_s16 + $0x58] sm:$0x1f]  ;;  %v5903_v34 = vld [vmem:[%s5807_s16 + $0x60] sm:$0x1f] }
  0x1e   : > { %10165 = vst [vmem:[#allocation6_spill] sm:$0xff] %v5828_v15  ;;  %10166 = vst [vmem:[#allocation7_spill] sm:$0xff] %v5832_v16  ;;  %v5868_v25 = vrot.slane %v5839_v18, %v5799_v8  ;;  %v5872_v26 = vrot.slane %v5821_v13, %v5802_v9  ;;  %v5876_v27 = vrot.slane %v5824_v14, %v5802_v9  ;;  %v5906_v35 = vld [vmem:[%s5807_s16 + $0x68] sm:$0x1f]  ;;  %v5909_v36 = vld [vmem:[%s5807_s16 + $0x70] sm:$0x1f] }
  0x1f   : > { %5467 = vset.pattern.permute.xlu1 %v9820_v10  ;;  %375 = vperm.xlu0 %5465, %v5793_v6   ;;  %10167 = vst [vmem:[#allocation8_spill] sm:$0xff] %v5836_v17  ;;  %10168 = vst [vmem:[#allocation9_spill] sm:$0xff] %v5843_v19  ;;  %v5881_v28 = vrot.slane %v5839_v18, %v5802_v9  ;;  %v5913_v37 = vrot.slane %v5884_v29, %v5796_v7  ;;  %v5941_v44 = vld [vmem:[%s5807_s16 + $0x78] sm:$0x1f]  ;;  %s5672_s13 = smov [#allocation2]  }
  0x20   : > { %563 = vperm.xlu1 %5467, %v5784_v4   ;;  %10169 = vst [vmem:[#allocation10_spill] sm:$0xff] %v5847_v20  ;;  %10170 = vst [vmem:[#allocation11_spill] sm:$0xff] %v5851_v21  ;;  %v5917_v38 = vrot.slane %v5887_v30, %v5796_v7  ;;  %v5921_v39 = vrot.slane %v5890_v31, %v5796_v7  ;;  %v5926_v40 = vrot.slane %v5899_v33, %v5796_v7  ;;  %s5606_s22 = sshll.u32 %s5672_s13, 4  ;;  %s5607_s22 = int_to_ptr.vmem [resolvable:$false] %s5606_s22 }
  0x21   : > { %10171 = vst [vmem:[#allocation12_spill] sm:$0xff] %v5855_v22  ;;  %10172 = vst [vmem:[#allocation13_spill] sm:$0xff] %v5864_v24  ;;  %v5930_v41 = vrot.slane %v5884_v29, %v5799_v8  ;;  %v5934_v42 = vrot.slane %v5887_v30, %v5799_v8  ;;  %v5938_v43 = vrot.slane %v5890_v31, %v5799_v8  ;;  %s5608_s23 = scalar_lea.vmem %s5607_s22, 1024 }
  0x22   : > { %10173 = vst [vmem:[#allocation14_spill] sm:$0xff] %v5868_v25  ;;  %10174 = vst [vmem:[#allocation15_spill] sm:$0xff] %v5872_v26  ;;  %v5945_v45 = vrot.slane %v5899_v33, %v5799_v8  ;;  %v5949_v46 = vrot.slane %v5884_v29, %v5802_v9  ;;  %v5953_v47 = vrot.slane %v5887_v30, %v5802_v9  ;;  %v10205_v26 = vmov 2  }
  0x23   : > { %10175 = vst [vmem:[#allocation16_spill] sm:$0xff] %v5876_v27  ;;  %380 = vperm.xlu0 %5465, %v5818_v12   ;;  %10176 = vst [vmem:[#allocation17_spill] sm:$0xff] %v5881_v28  ;;  %v5957_v48 = vrot.slane %v5890_v31, %v5802_v9  ;;  %v5967_v50 = vrot.slane %v5899_v33, %v5802_v9  ;;  %v5971_v51 = vrot.slane %v5903_v34, %v5796_v7  ;;  %v9828_v27 = vmov 3  }
  0x24   : > { %5468 = vset.pattern.permute.xlu1 %v9818_v3  ;;  %10177 = vst [vmem:[#allocation18_spill] sm:$0xff] %v5913_v37  ;;  %10178 = vst [vmem:[#allocation19_spill] sm:$0xff] %v5917_v38  ;;  %v5975_v52 = vrot.slane %v5906_v35, %v5796_v7  ;;  %v5979_v53 = vrot.slane %v5909_v36, %v5796_v7  ;;  %v5984_v54 = vrot.slane %v5941_v44, %v5796_v7 }
  0x25   : > { %370 = vperm.xlu1 %5468, %v5860_v23   ;;  %10179 = vst [vmem:[#allocation20_spill] sm:$0xff] %v5921_v39  ;;  %10180 = vst [vmem:[#allocation21_spill] sm:$0xff] %v5926_v40  ;;  %v5988_v55 = vrot.slane %v5903_v34, %v5799_v8  ;;  %v5992_v56 = vrot.slane %v5906_v35, %v5799_v8  ;;  %v5996_v57 = vrot.slane %v5909_v36, %v5799_v8 }
  0x26   : > { %10181 = vst [vmem:[#allocation22_spill] sm:$0xff] %v5930_v41  ;;  %10182 = vst [vmem:[#allocation23_spill] sm:$0xff] %v5934_v42  ;;  %v6001_v58 = vrot.slane %v5941_v44, %v5799_v8  ;;  %v6005_v59 = vrot.slane %v5903_v34, %v5802_v9  ;;  %v6009_v60 = vrot.slane %v5906_v35, %v5802_v9 }
  0x27   : > { %390 = vperm.xlu0 %5465, %v5896_v32   ;;  %10183 = vst [vmem:[#allocation24_spill] sm:$0xff] %v5938_v43  ;;  %10184 = vst [vmem:[#allocation25_spill] sm:$0xff] %v5945_v45  ;;  %v6013_v61 = vrot.slane %v5909_v36, %v5802_v9  ;;  %v6018_v62 = vrot.slane %v5941_v44, %v5802_v9  ;;  %v6036_v3 = vrot.slane %v5821_v13, %v6027_v1 }
  0x28   : > { %10185 = vst [vmem:[#allocation26_spill] sm:$0xff] %v5949_v46  ;;  %10186 = vst [vmem:[#allocation27_spill] sm:$0xff] %v5953_v47  ;;  %v6040_v10 = vrot.slane %v5824_v14, %v6027_v1  ;;  %v6044_v28 = vrot.slane %v5839_v18, %v6027_v1 }
  0x29   : > { %10187 = vst [vmem:[#allocation28_spill] sm:$0xff] %v5957_v48  ;;  %5469 = vset.pattern.permute.xlu1 %v9816_v2  ;;  %10188 = vst [vmem:[#allocation29_spill] sm:$0xff] %v5967_v50 }
  0x2a   : > { %10189 = vst [vmem:[#allocation30_spill] sm:$0xff] %v5971_v51  ;;  %10190 = vst [vmem:[#allocation31_spill] sm:$0xff] %v5975_v52  ;;  %455 = vperm.xlu1 %5469, %v5860_v23  }
  0x2b   : > { %10191 = vst [vmem:[#allocation32_spill] sm:$0xff] %v5979_v53  ;;  %10192 = vst [vmem:[#allocation33_spill] sm:$0xff] %v5984_v54  ;;  %5479 = vset.pattern.permute.xlu0 %v9816_v2  ;;  %v6032_v2 = vrot.slane %v5812_v11, %v6027_v1 }
  0x2c   : > { %10193 = vst [vmem:[#allocation34_spill] sm:$0xff] %v5988_v55  ;;  %10194 = vst [vmem:[#allocation35_spill] sm:$0xff] %v5992_v56  ;;  %467 = vperm.xlu0 %5479, %v5963_v49  }
  0x2d   : > { %10195 = vst [vmem:[#allocation36_spill] sm:$0xff] %v5996_v57  ;;  %10196 = vst [vmem:[#allocation37_spill] sm:$0xff] %v6001_v58 }
  0x2e   : > { %10197 = vst [vmem:[#allocation38_spill] sm:$0xff] %v6005_v59  ;;  %10198 = vst [vmem:[#allocation39_spill] sm:$0xff] %v6009_v60  ;;  %459 = vperm.xlu1 %5469, %v5793_v6  }
  0x2f   : > { %10199 = vst [vmem:[#allocation40_spill] sm:$0xff] %v6013_v61  ;;  %10200 = vst [vmem:[#allocation41_spill] sm:$0xff] %v6018_v62 }
  0x30   : > { %475 = vperm.xlu0 %5479, %v6023_v63   ;;  %10201 = vst [vmem:[#allocation42_spill] sm:$0xff] %v6032_v2  ;;  %10202 = vst [vmem:[#allocation43_spill] sm:$0xff] %v6036_v3  ;;  %v6053_v3 = vrot.slane %v5884_v29, %v6027_v1  ;;  %v6070_v2 = vsub.s32 4, %v5786_v5 }
  0x31   : > { %10203 = vst [vmem:[#allocation44_spill] sm:$0xff] %v6040_v10  ;;  %10204 = vst [vmem:[#allocation45_spill] sm:$0xff] %v6044_v28  ;;  %v6057_v10 = vrot.slane %v5887_v30, %v6027_v1  ;;  %v6061_v28 = vrot.slane %v5890_v31, %v6027_v1 }
  0x32   : > { %5470 = vset.pattern.permute.xlu1 %v9828_v27  ;;  %10206 = vst [vmem:[#allocation46_spill] sm:$0xff] %v6053_v3  ;;  %v6065_v27 = vrot.slane %v5899_v33, %v6027_v1  ;;  %v6074_v17 = vrot.slane %v5812_v11, %v6070_v2  ;;  %v9836_v3 = vmov 4   ;;  %v6093_v11 = vrot.slane %v5903_v34, %v6027_v1 }
  0x33   : > { %675 = vperm.xlu1 %5470, %v5784_v4   ;;  %10207 = vst [vmem:[#allocation47_spill] sm:$0xff] %v6057_v10  ;;  %10208 = vst [vmem:[#allocation48_spill] sm:$0xff] %v6061_v28  ;;  %v6078_v10 = vrot.slane %v5821_v13, %v6070_v2  ;;  %v6082_v28 = vrot.slane %v5824_v14, %v6070_v2  ;;  %v6097_v13 = vrot.slane %v5906_v35, %v6027_v1 }
  0x34   : > { %5481 = vset.pattern.permute.xlu0 %v10205_v26  ;;  %10209 = vst [vmem:[#allocation49_spill] sm:$0xff] %v6065_v27  ;;  %10210 = vst [vmem:[#allocation50_spill] sm:$0xff] %v6074_v17  ;;  %v6086_v27 = vrot.slane %v5839_v18, %v6070_v2  ;;  %v6101_v14 = vrot.slane %v5909_v36, %v6027_v1  ;;  %v6105_v18 = vrot.slane %v5941_v44, %v6027_v1  ;;  %v10228_v17 = vmov 1  }
  0x35   : > { %559 = vperm.xlu0 %5481, %v5774_v0   ;;  %10211 = vst [vmem:[#allocation51_spill] sm:$0xff] %v6078_v10  ;;  %10212 = vst [vmem:[#allocation52_spill] sm:$0xff] %v6082_v28  ;;  %v6115_v5 = vrot.slane %v5887_v30, %v6070_v2  ;;  %v6123_v28 = vrot.slane %v5899_v33, %v6070_v2  ;;  %v10222_v10 = vmov 0   ;;  %v6135_v30 = vrot.slane %v5906_v35, %v6070_v2  ;;  %v2007_v35 = vld [vmem:[%s9808_s2 + $0x48] sm:$0xff] }
  0x36   : > { %10213 = vst [vmem:[#allocation53_spill] sm:$0xff] %v6086_v27  ;;  %10214 = vst [vmem:[#allocation54_spill] sm:$0xff] %v6093_v11  ;;  %v6119_v27 = vrot.slane %v5890_v31, %v6070_v2  ;;  %v6139_v31 = vrot.slane %v5909_v36, %v6070_v2  ;;  %v6143_v33 = vrot.slane %v5941_v44, %v6070_v2  ;;  %v2009_v36 = vld [vmem:[%s9808_s2 + $0x58] sm:$0xff]  ;;  %v1999_v44 = vld [vmem:[%s9808_s2 + $0x8] sm:$0xff] }
  0x37   : > { %5471 = vset.pattern.permute.xlu1 %v10205_v26  ;;  %10215 = vst [vmem:[#allocation55_spill] sm:$0xff] %v6097_v13  ;;  %10216 = vst [vmem:[#allocation56_spill] sm:$0xff] %v6101_v14  ;;  %v2002_v13 = vld [vmem:[%s9808_s2 + $0x20] sm:$0xff] }
  0x38   : > { %567 = vperm.xlu1 %5471, %v5860_v23   ;;  %10217 = vst [vmem:[#allocation57_spill] sm:$0xff] %v6105_v18  ;;  %10219 = vst [vmem:[#allocation59_spill] sm:$0xff] %v6115_v5 }
  0x39   : > { %571 = vperm.xlu0 %5481, %v5793_v6   ;;  %10220 = vst [vmem:[#allocation60_spill] sm:$0xff] %v6119_v27  ;;  %10221 = vst [vmem:[#allocation61_spill] sm:$0xff] %v6123_v28 }
  0x3a   : > { %10225 = vst [vmem:[#allocation63_spill] sm:$0xff] %v6135_v30  ;;  %10226 = vst [vmem:[#allocation64_spill] sm:$0xff] %v6139_v31  ;;  %v2547_v30 = vld [vmem:[%s9810_s4 + $0x28] sm:$0xff] }
  0x3b   : > { %10227 = vst [vmem:[#allocation65_spill] sm:$0xff] %v6143_v33 }
  0x3c   : > { %5472 = vset.pattern.permute.xlu1 %v9836_v3  ;;  %v6111_v3 = vrot.slane %v5884_v29, %v6070_v2  ;;  %v6131_v29 = vrot.slane %v5903_v34, %v6070_v2  ;;  %v2004_v34 = vld [vmem:[%s9808_s2 + $0x30] sm:$0xff] }
  0x3d   : > { %783 = vperm.xlu1 %5472, %v5774_v0   ;;  %575 = vperm.xlu0 %5481, %v5818_v12  }
  0x3e   : > { %10218 = vst [vmem:[#allocation58_spill] sm:$0xff] %v6111_v3  ;;  %10224 = vst [vmem:[#allocation62_spill] sm:$0xff] %v6131_v29 }
  0x41   : > { %787 = vperm.xlu1 %5472, %v5784_v4   ;;  %583 = vperm.xlu0 %5481, %v5896_v32   ;;  %v10223_v4 = vmov 3  }
  0x45   : > { %5473 = vset.pattern.permute.xlu1 %v10222_v10  ;;  %5483 = vset.pattern.permute.xlu0 %v10223_v4 }
  0x46   : > { %385 = vperm.xlu1 %5473, %v5963_v49   ;;  %671 = vperm.xlu0 %5483, %v5774_v0   ;;  %v10229_v0 = vmov 4  }
  0x4a   : > { %5474 = vset.pattern.permute.xlu1 %v10228_v17  ;;  %695 = vperm.xlu0 %5483, %v5896_v32  }
  0x4b   : > { %463 = vperm.xlu1 %5474, %v5818_v12  }
  0x4e   : > { %5487 = vset.pattern.permute.xlu0 %v10229_v0 }
  0x4f   : > { %5475 = vset.pattern.permute.xlu1 %v10223_v4  ;;  %795 = vperm.xlu0 %5487, %v5793_v6  }
  0x50   : > { %679 = vperm.xlu1 %5475, %v5860_v23  }
  0x53   : > { %803 = vperm.xlu0 %5487, %v5963_v49  }
  0x54   : > { %683 = vperm.xlu1 %5475, %v5793_v6   ;;  %v1998_v6 = vld [vmem:[%s9808_s2] sm:$0xff] }
  0x57   : > { %811 = vperm.xlu0 %5487, %v6023_v63  }
  0x58   : > { %5476 = vset.pattern.permute.xlu1 %v10205_v26 }
  0x59   : > { %579 = vperm.xlu1 %5476, %v5963_v49  }
  0x5b   : > { %5491 = vset.pattern.permute.xlu0 %v10222_v10 }
  0x5c   : > { %2062 = vperm.xlu0 %5491, %v2004_v34   ;;  %v2013_v34 = vld [vmem:[%s9808_s2 + $0x78] sm:$0xff] }
  0x5d   : > { %5477 = vset.pattern.permute.xlu1 %v10229_v0 }
  0x5e   : > { %791 = vperm.xlu1 %5477, %v5860_v23   ;;  %v2011_v23 = vld [vmem:[%s9808_s2 + $0x68] sm:$0xff] }
  0x60   : > { %2077 = vperm.xlu0 %5491, %v2007_v35   ;;  %v2015_v35 = vld [vmem:[%s9808_s2 + $0x88] sm:$0xff] }
  0x62   : > { %5478 = vset.pattern.permute.xlu1 %v10222_v10 }
  0x63   : > { %2032 = vperm.xlu1 %5478, %v1998_v6   ;;  %v2017_v6 = vld [vmem:[%s9808_s2 + $0x98] sm:$0xff] }
  0x64   : > { %2087 = vperm.xlu0 %5491, %v2009_v36   ;;  %v2019_v36 = vld [vmem:[%s9808_s2 + $0xa8] sm:$0xff] }
  0x67   : > { %2037 = vperm.xlu1 %5478, %v1999_v44   ;;  %v2021_v44 = vld [vmem:[%s9808_s2 + $0xb8] sm:$0xff] }
  0x68   : > { %2097 = vperm.xlu0 %5491, %v2011_v23   ;;  %v2023_v23 = vld [vmem:[%s9808_s2 + $0xc8] sm:$0xff] }
  0x6b   : > { %395 = vperm.xlu1 %5478, %v6023_v63  }
  0x6c   : > { %2107 = vperm.xlu0 %5491, %v2013_v34   ;;  %v2025_v34 = vld [vmem:[%s9808_s2 + $0xd8] sm:$0xff] }
  0x6f   : > { %5480 = vset.pattern.permute.xlu1 %v10228_v17 }
  0x70   : > { %471 = vperm.xlu1 %5480, %v5896_v32   ;;  %2117 = vperm.xlu0 %5491, %v2015_v35   ;;  %v2001_v35 = vld [vmem:[%s9808_s2 + $0x18] sm:$0xff] }
  0x74   : > { %5482 = vset.pattern.permute.xlu1 %v10223_v4  ;;  %2127 = vperm.xlu0 %5491, %v2017_v6   ;;  %v2543_v6 = vld [vmem:[%s9810_s4 + $0x8] sm:$0xff] }
  0x75   : > { %687 = vperm.xlu1 %5482, %v5818_v12  }
  0x78   : > { %2137 = vperm.xlu0 %5491, %v2019_v36   ;;  %v335_v36 = vld [vmem:[%s5807_s16 + $0x8] sm:$0x1f] }
  0x79   : > { %691 = vperm.xlu1 %5482, %v5963_v49   ;;  %v2027_v49 = vld [vmem:[%s9808_s2 + $0xe8] sm:$0xff]  ;;  %v6284_v27 = vrot.slane %v335_v36, %v6070_v2 }
  0x7b   : > { %10245 = vst [vmem:[#allocation81_spill] sm:$0xff] %v6284_v27 }
  0x7c   : > { %2147 = vperm.xlu0 %5491, %v2021_v44   ;;  %v337_v44 = vld [vmem:[%s5807_s16 + $0x18] sm:$0x1f] }
  0x7d   : > { %5484 = vset.pattern.permute.xlu1 %v10205_v26  ;;  %v2000_v26 = vld [vmem:[%s9808_s2 + $0x10] sm:$0xff]  ;;  %v6270_v29 = vrot.slane %v337_v44, %v5802_v9  ;;  %v6287_v5 = vrot.slane %v337_v44, %v6027_v1 }
  0x7e   : > { %587 = vperm.xlu1 %5484, %v6023_v63  }
  0x7f   : > { %10240 = vst [vmem:[#allocation76_spill] sm:$0xff] %v6270_v29  ;;  %10246 = vst [vmem:[#allocation82_spill] sm:$0xff] %v6287_v5  ;;  %v6320_v5 = vrot.slane %v337_v44, %v6070_v2 }
  0x80   : > { %2157 = vperm.xlu0 %5491, %v2023_v23   ;;  %v2545_v23 = vld [vmem:[%s9810_s4 + $0x18] sm:$0xff] }
  0x81   : > { %10250 = vst [vmem:[#allocation86_spill] sm:$0xff] %v6320_v5 }
  0x82   : > { %5485 = vset.pattern.permute.xlu1 %v10229_v0 }
  0x83   : > { %799 = vperm.xlu1 %5485, %v5818_v12   ;;  %v2029_v12 = vld [vmem:[%s9808_s2 + $0xf8] sm:$0xff] }
  0x84   : > { %2167 = vperm.xlu0 %5491, %v2025_v34   ;;  %v334_v34 = vld [vmem:[%s5807_s16] sm:$0x1f] }
  0x85   : > { %v6254_v17 = vrot.slane %v334_v34, %v5799_v8  ;;  %v6273_v28 = vrot.slane %v334_v34, %v5802_v9  ;;  %v6290_v3 = vrot.slane %v334_v34, %v6027_v1 }
  0x87   : > { %5486 = vset.pattern.permute.xlu1 %v10222_v10  ;;  %10236 = vst [vmem:[#allocation72_spill] sm:$0xff] %v6254_v17  ;;  %10241 = vst [vmem:[#allocation77_spill] sm:$0xff] %v6273_v28 }
  0x88   : > { %2042 = vperm.xlu1 %5486, %v2000_v26   ;;  %2177 = vperm.xlu0 %5491, %v2027_v49   ;;  %v336_v26 = vld [vmem:[%s5807_s16 + $0x10] sm:$0x1f]  ;;  %v6236_v49 = vrot.slane %v335_v36, %v5796_v7  ;;  %10247 = vst [vmem:[#allocation83_spill] sm:$0xff] %v6290_v3  ;;  %s324_s16 = sand.u32 1, %s5656_s10  }
  0x89   : > { %v6257_v33 = vrot.slane %v336_v26, %v5796_v7  ;;  %v6260_v31 = vrot.slane %v336_v26, %v5799_v8  ;;  %v6293_v18 = vrot.slane %v336_v26, %v6027_v1  ;;  %v6326_v25 = vrot.slane %v336_v26, %v6070_v2  ;;  %s5347_s24 = sshll.u32 %s324_s16, 5  ;;  %s5270_s17 = scalar_lea.sflag [#allocation3], %s324_s16 }
  0x8a   : > { %10230 = vst [vmem:[#allocation66_spill] sm:$0xff] %v6236_v49  ;;  %s9735_s25 = scalar_lea.vmem [#allocation2], %s5347_s24 }
  0x8b   : > { %10237 = vst [vmem:[#allocation73_spill] sm:$0xff] %v6257_v33  ;;  %10238 = vst [vmem:[#allocation74_spill] sm:$0xff] %v6260_v31  ;;  %s5284_s27 = sshll.u32 %s9735_s25, 4  ;;  %s9763_s27 = int_to_ptr.vmem [resolvable:$true] %s5284_s27 }
  0x8c   : > { %2047 = vperm.xlu1 %5486, %v2001_v35   ;;  %2187 = vperm.xlu0 %5491, %v2029_v12   ;;  %v6239_v35 = vrot.slane %v335_v36, %v5799_v8  ;;  %v6242_v12 = vrot.slane %v335_v36, %v5802_v9  ;;  %10248 = vst [vmem:[#allocation84_spill] sm:$0xff] %v6293_v18  ;;  %10252 = vst [vmem:[#allocation88_spill] sm:$0xff] %v6326_v25  ;;  %s5602_s21 = scalar_lea.vmem %s9763_s27, 512  ;;  %p5609_p0 = scmp.lt.s32.totalorder %s9763_s27, %s5607_s22 }
  0x8d   : > { %p5603_p11 = scmp.ne.s32.totalorder %s9763_s27, %s5602_s21  ;;  %p5610_p1 = scmp.lt.s32.totalorder %s5608_s23, %s5602_s21 }
  0x8e   : > { %10231 = vst [vmem:[#allocation67_spill] sm:$0xff] %v6239_v35  ;;  %10232 = vst [vmem:[#allocation68_spill] sm:$0xff] %v6242_v12 }
  0x8f   : > { %p5604_p12 = pnand %p5603_p11, %p5761_p5  ;;  %p5611_p2 = por %p5610_p1, %p5609_p0 }
  0x90   : > { %5488 = vset.pattern.permute.xlu1 %v10223_v4  ;;  %2581 = vperm.xlu0 %5491, %v2543_v6   ;;  %v6245_v4 = vrot.slane %v337_v44, %v5796_v7  ;;  %v6251_v6 = vrot.slane %v334_v34, %v5796_v7  ;;  %v6276_v7 = vrot.slane %v336_v26, %v5802_v9 }
  0x91   : > { %699 = vperm.xlu1 %5488, %v6023_v63   ;;  %v6248_v63 = vrot.slane %v337_v44, %v5799_v8  ;;  %p5605_p13 = pneg %p5604_p12 }
  0x92   : > { %10233 = vst [vmem:[#allocation69_spill] sm:$0xff] %v6245_v4  ;;  %10235 = vst [vmem:[#allocation71_spill] sm:$0xff] %v6251_v6 }
  0x93   : > { %10234 = vst [vmem:[#allocation70_spill] sm:$0xff] %v6248_v63  ;;  %10242 = vst [vmem:[#allocation78_spill] sm:$0xff] %v6276_v7  ;;  %p5612_p3 = pnand %p5611_p2, %p5605_p13 }
  0x94   : > { %2591 = vperm.xlu0 %5491, %v2545_v23   ;;  %v6267_v23 = vrot.slane %v335_v36, %v6027_v1 }
  0x95   : > { %5489 = vset.pattern.permute.xlu1 %v10229_v0 }
  0x96   : > { %10239 = vst [vmem:[#allocation75_spill] sm:$0xff] %v6267_v23  ;;  %807 = vperm.xlu1 %5489, %v5896_v32   ;;  %v6279_v8 = vpop.permute.xlu1 %447  ;;  %v6281_v0 = vpop.permute.xlu0 %360  ;;  %v6323_v23 = vrot.slane %v334_v34, %v6070_v2 }
  0x97   : > { %10243 = vst [vmem:[#allocation79_spill] sm:$0xff] %v6279_v8  ;;  %10244 = vst [vmem:[#allocation80_spill] sm:$0xff] %v6281_v0  ;;  %v415_v9 = vmul.f32 %v6236_v49, %v6281_v0  ;;  %v495_v32 = vmul.f32 %v6239_v35, %v6279_v8  ;;  %v417_v14 = vmul.f32 %v6245_v4, %v6281_v0 }
  0x98   : > { %v497_v36 = vmul.f32 %v6248_v63, %v6279_v8  ;;  %2601 = vperm.xlu0 %5491, %v2547_v30   ;;  %v414_v1 = vmul.f32 %v6251_v6, %v6281_v0  ;;  %v494_v11 = vmul.f32 %v6254_v17, %v6279_v8  ;;  %v416_v27 = vmul.f32 %v6257_v33, %v6281_v0  ;;  %v2549_v30 = vld [vmem:[%s9810_s4 + $0x38] sm:$0xff] }
  0x99   : > { %v496_v18 = vmul.f32 %v6260_v31, %v6279_v8  ;;  %v6317_v3 = vadd.f32 %v495_v32, %v415_v9  ;;  %10251 = vst [vmem:[#allocation87_spill] sm:$0xff] %v6323_v23  ;;  %v6341_v44 = vmul.f32 %v5843_v19, %v6281_v0 }
  0x9a   : > { %5490 = vset.pattern.permute.xlu1 %v10222_v10  ;;  %v6329_v22 = vpop.permute.xlu1 %451  ;;  %v6331_v8 = vpop.permute.xlu0 %365  ;;  %v6333_v21 = vadd.f32 %v497_v36, %v417_v14  ;;  %v6335_v16 = vadd.f32 %v494_v11, %v414_v1  ;;  %v2551_v36 = vld [vmem:[%s9810_s4 + $0x48] sm:$0xff] }
  0x9b   : > { %10249 = vst [vmem:[#allocation85_spill] sm:$0xff] %v6317_v3  ;;  %10253 = vst [vmem:[#allocation89_spill] sm:$0xff] %v6329_v22  ;;  %v6337_v9 = vadd.f32 %v496_v18, %v416_v27  ;;  %2052 = vperm.xlu1 %5490, %v2002_v13   ;;  %v419_v2 = vmul.f32 %v6236_v49, %v6331_v8  ;;  %v499_v34 = vmul.f32 %v6239_v35, %v6329_v22  ;;  %v2003_v27 = vld [vmem:[%s9808_s2 + $0x28] sm:$0xff] }
  0x9c   : > { %10254 = vst [vmem:[#allocation90_spill] sm:$0xff] %v6331_v8  ;;  %10255 = vst [vmem:[#allocation91_spill] sm:$0xff] %v6333_v21  ;;  %v421_v26 = vmul.f32 %v6245_v4, %v6331_v8  ;;  %v501_v11 = vmul.f32 %v6248_v63, %v6329_v22  ;;  %2611 = vperm.xlu0 %5491, %v2549_v30   ;;  %v418_v13 = vmul.f32 %v6251_v6, %v6331_v8 }
  0x9d   : > { %10256 = vst [vmem:[#allocation92_spill] sm:$0xff] %v6335_v16  ;;  %10257 = vst [vmem:[#allocation93_spill] sm:$0xff] %v6337_v9  ;;  %v498_v14 = vmul.f32 %v6254_v17, %v6329_v22  ;;  %v420_v18 = vmul.f32 %v6257_v33, %v6331_v8  ;;  %v500_v32 = vmul.f32 %v6260_v31, %v6329_v22 }
  0x9e   : > { %10258 = vst [vmem:[#allocation94_spill] sm:$0xff] %v6341_v44  ;;  %v531_v1 = vadd.f32 %v499_v34, %v419_v2  ;;  %v533_v30 = vadd.f32 %v501_v11, %v421_v26  ;;  %v1282_v10 = vmul.f32 %v5913_v37, %v6331_v8  ;;  %v1283_v0 = vmul.f32 %v5917_v38, %v6331_v8  ;;  %v6369_v44 = vpop.permute.xlu0 %375 }
  0x9f   : > { %10259 = vst [vmem:[#allocation95_spill] sm:$0xff] %v6369_v44  ;;  %v530_v17 = vadd.f32 %v498_v14, %v418_v13  ;;  %v532_v6 = vadd.f32 %v500_v32, %v420_v18  ;;  %v1284_v33 = vmul.f32 %v5921_v39, %v6331_v8  ;;  %v1285_v31 = vmul.f32 %v5926_v40, %v6331_v8  ;;  %v6375_v63 = vpop.permute.xlu1 %563 }
  0xa0   : > { %2057 = vperm.xlu1 %5490, %v2003_v27   ;;  %10260 = vst [vmem:[#allocation96_spill] sm:$0xff] %v6375_v63  ;;  %v6379_v2 = vmul.f32 %v5828_v15, %v6369_v44  ;;  %v6383_v34 = vmul.f32 %v5843_v19, %v6369_v44  ;;  %v6387_v26 = vmul.f32 %v5847_v20, %v6369_v44  ;;  %v2005_v27 = vld [vmem:[%s9808_s2 + $0x38] sm:$0xff] }
  0xa1   : > { %v6391_v11 = vmul.f32 %v5864_v24, %v6369_v44  ;;  %2621 = vperm.xlu0 %5491, %v2551_v36   ;;  %v611_v13 = vmul.f32 %v6242_v12, %v6375_v63  ;;  %v613_v14 = vmul.f32 %v6270_v29, %v6375_v63  ;;  %v610_v18 = vmul.f32 %v6273_v28, %v6375_v63  ;;  %v2553_v36 = vld [vmem:[%s9810_s4 + $0x58] sm:$0xff] }
  0xa2   : > { %v612_v32 = vmul.f32 %v6276_v7, %v6375_v63  ;;  %v1330_v20 = vmul.f32 %v5930_v41, %v6329_v22  ;;  %v1331_v15 = vmul.f32 %v5934_v42, %v6329_v22  ;;  %v1332_v24 = vmul.f32 %v5938_v43, %v6329_v22  ;;  %v6415_v4 = vpop.permute.xlu0 %380 }
  0xa3   : > { %v1333_v19 = vmul.f32 %v5945_v45, %v6329_v22  ;;  %10261 = vst [vmem:[#allocation97_spill] sm:$0xff] %v6415_v4  ;;  %v6417_v35 = vadd.f32 %v611_v13, %v531_v1  ;;  %v6419_v49 = vadd.f32 %v613_v14, %v533_v30  ;;  %v6421_v25 = vadd.f32 %v610_v18, %v530_v17  ;;  %v2006_v4 = vld [vmem:[%s9808_s2 + $0x40] sm:$0xff] }
  0xa4   : > { %v6423_v23 = vadd.f32 %v612_v32, %v532_v6  ;;  %2067 = vperm.xlu1 %5490, %v2005_v27   ;;  %v1362_v5 = vadd.f32 %v1330_v20, %v1282_v10  ;;  %v1363_v9 = vadd.f32 %v1331_v15, %v1283_v0  ;;  %v1364_v16 = vadd.f32 %v1332_v24, %v1284_v33  ;;  %v6425_v3 = vpop.permute.xlu1 %370  ;;  %v2555_v15 = vld [vmem:[%s9810_s4 + $0x68] sm:$0xff] }
  0xa5   : > { %v1365_v21 = vadd.f32 %v1333_v19, %v1285_v31  ;;  %10262 = vst [vmem:[#allocation98_spill] sm:$0xff] %v6425_v3  ;;  %2631 = vperm.xlu0 %5491, %v2553_v36   ;;  %v1410_v1 = vmul.f32 %v5949_v46, %v6375_v63  ;;  %v1411_v17 = vmul.f32 %v5953_v47, %v6375_v63 }
  0xa6   : > { %v1412_v6 = vmul.f32 %v5957_v48, %v6375_v63  ;;  %v1413_v10 = vmul.f32 %v5967_v50, %v6375_v63  ;;  %v6443_v19 = vmul.f32 %v5913_v37, %v6369_v44  ;;  %v6447_v20 = vmul.f32 %v5917_v38, %v6369_v44  ;;  %v6457_v33 = vpop.permute.xlu0 %390 }
  0xa7   : > { %v6451_v24 = vmul.f32 %v5921_v39, %v6369_v44  ;;  %v6455_v31 = vmul.f32 %v5926_v40, %v6369_v44  ;;  %10263 = vst [vmem:[#allocation99_spill] sm:$0xff] %v6457_v33  ;;  %v6459_v0 = vadd.f32 %v1410_v1, %v1362_v5  ;;  %v6461_v30 = vadd.f32 %v1411_v17, %v1363_v9  ;;  %v2557_v17 = vld [vmem:[%s9810_s4 + $0x78] sm:$0xff] }
  0xa8   : > { %v6463_v27 = vadd.f32 %v1412_v6, %v1364_v16  ;;  %v6465_v13 = vadd.f32 %v1413_v10, %v1365_v21  ;;  %2072 = vperm.xlu1 %5490, %v2006_v4   ;;  %v1650_v14 = vmul.f32 %v5971_v51, %v6331_v8  ;;  %v1651_v18 = vmul.f32 %v5975_v52, %v6331_v8  ;;  %v2008_v16 = vld [vmem:[%s9808_s2 + $0x50] sm:$0xff] }
  0xa9   : > { %v1652_v32 = vmul.f32 %v5979_v53, %v6331_v8  ;;  %v1653_v5 = vmul.f32 %v5984_v54, %v6331_v8  ;;  %2641 = vperm.xlu0 %5491, %v2555_v15   ;;  %v1698_v21 = vmul.f32 %v5988_v55, %v6329_v22  ;;  %v1699_v4 = vmul.f32 %v5992_v56, %v6329_v22  ;;  %v6486_v1 = vpop.permute.xlu1 %455 }
  0xaa   : > { %v1700_v9 = vmul.f32 %v5996_v57, %v6329_v22  ;;  %v1701_v36 = vmul.f32 %v6001_v58, %v6329_v22  ;;  %10264 = vst [vmem:[#allocation100_spill] sm:$0xff] %v6486_v1  ;;  %v1778_v6 = vmul.f32 %v6005_v59, %v6375_v63  ;;  %v1779_v10 = vmul.f32 %v6009_v60, %v6375_v63 }
  0xab   : > { %v1780_v15 = vmul.f32 %v6013_v61, %v6375_v63  ;;  %v1781_v39 = vmul.f32 %v6018_v62, %v6375_v63  ;;  %v1730_v37 = vadd.f32 %v1698_v21, %v1650_v14  ;;  %v1731_v40 = vadd.f32 %v1699_v4, %v1651_v18  ;;  %v6499_v8 = vpop.permute.xlu0 %467  ;;  %v2010_v18 = vld [vmem:[%s9808_s2 + $0x60] sm:$0xff]  ;;  %v10274_v63 = vld [vmem:[#allocation14_spill] sm:$0xff] }
  0xac   : > { %v1732_v38 = vadd.f32 %v1700_v9, %v1652_v32  ;;  %v1733_v22 = vadd.f32 %v1701_v36, %v1653_v5  ;;  %2082 = vperm.xlu1 %5490, %v2008_v16   ;;  %10265 = vst [vmem:[#allocation101_spill] sm:$0xff] %v6499_v8  ;;  %v6503_v33 = vmul.f32 %v5971_v51, %v6369_v44  ;;  %v2559_v9 = vld [vmem:[%s9810_s4 + $0x88] sm:$0xff] }
  0xad   : > { %v6507_v1 = vmul.f32 %v5975_v52, %v6369_v44  ;;  %v6511_v3 = vmul.f32 %v5979_v53, %v6369_v44  ;;  %v6515_v14 = vmul.f32 %v5984_v54, %v6369_v44  ;;  %2651 = vperm.xlu0 %5491, %v2557_v17   ;;  %v6520_v32 = vadd.f32 %v1778_v6, %v1730_v37  ;;  %v6528_v4 = vpop.permute.xlu1 %459  ;;  %v10272_v17 = vld [vmem:[#allocation11_spill] sm:$0xff] }
  0xae   : > { %v6522_v5 = vadd.f32 %v1779_v10, %v1731_v40  ;;  %v6524_v16 = vadd.f32 %v1780_v15, %v1732_v38  ;;  %v6526_v21 = vadd.f32 %v1781_v39, %v1733_v22  ;;  %10266 = vst [vmem:[#allocation102_spill] sm:$0xff] %v6528_v4  ;;  %v6535_v36 = vmul.f32 %v5988_v55, %v6499_v8  ;;  %v10271_v39 = vld [vmem:[#allocation7_spill] sm:$0xff]  ;;  %v10273_v10 = vld [vmem:[#allocation12_spill] sm:$0xff] }
  0xaf   : > { %v6539_v37 = vmul.f32 %v5992_v56, %v6499_v8  ;;  %v6543_v38 = vmul.f32 %v5996_v57, %v6499_v8  ;;  %v6547_v22 = vmul.f32 %v6001_v58, %v6499_v8  ;;  %v970_v40 = vmul.f32 %v10271_v39, %v6528_v4 }
  0xb0   : > { %10267 = vst [vmem:[#allocation103_spill] sm:$0xff] %v6535_v36  ;;  %v971_v6 = vmul.f32 %v10272_v17, %v6528_v4  ;;  %v972_v15 = vmul.f32 %v10273_v10, %v6528_v4  ;;  %2092 = vperm.xlu1 %5490, %v2010_v18   ;;  %v6557_v36 = vpop.permute.xlu0 %475  ;;  %v1339_v8 = vmul.f32 %v5934_v42, %v6528_v4  ;;  %v2012_v10 = vld [vmem:[%s9808_s2 + $0x70] sm:$0xff] }
  0xb1   : > { %10268 = vst [vmem:[#allocation104_spill] sm:$0xff] %v6539_v37  ;;  %10269 = vst [vmem:[#allocation105_spill] sm:$0xff] %v6543_v38  ;;  %v973_v37 = vmul.f32 %v10274_v63, %v6528_v4  ;;  %v1338_v38 = vmul.f32 %v5930_v41, %v6528_v4  ;;  %v1340_v39 = vmul.f32 %v5938_v43, %v6528_v4  ;;  %2661 = vperm.xlu0 %5491, %v2559_v9   ;;  %v2561_v43 = vld [vmem:[%s9810_s4 + $0x98] sm:$0xff] }
  0xb2   : > { %10270 = vst [vmem:[#allocation106_spill] sm:$0xff] %v6547_v22  ;;  %10275 = vst [vmem:[#allocation107_spill] sm:$0xff] %v6557_v36  ;;  %v1341_v17 = vmul.f32 %v5945_v45, %v6528_v4  ;;  %v1002_v18 = vadd.f32 %v970_v40, %v6379_v2  ;;  %v1003_v63 = vadd.f32 %v971_v6, %v6383_v34  ;;  %v6581_v44 = vpop.permute.xlu1 %675  ;;  %v10282_v6 = vld [vmem:[#allocation46_spill] sm:$0xff] }
  0xb3   : > { %v1004_v41 = vadd.f32 %v972_v15, %v6387_v26  ;;  %v1005_v36 = vadd.f32 %v973_v37, %v6391_v11  ;;  %v1370_v42 = vadd.f32 %v1338_v38, %v6443_v19  ;;  %v1371_v9 = vadd.f32 %v1339_v8, %v6447_v20  ;;  %10276 = vst [vmem:[#allocation108_spill] sm:$0xff] %v6581_v44  ;;  %v10277_v11 = vld [vmem:[#allocation75_spill] sm:$0xff]  ;;  %v10278_v20 = vld [vmem:[#allocation82_spill] sm:$0xff]  ;;  %v10280_v38 = vld [vmem:[#allocation84_spill] sm:$0xff] }
  0xb4   : > { %v1372_v45 = vadd.f32 %v1340_v39, %v6451_v24  ;;  %v1373_v22 = vadd.f32 %v1341_v17, %v6455_v31  ;;  %v6585_v2 = vmul.f32 %v5988_v55, %v6528_v4  ;;  %v6589_v34 = vmul.f32 %v5992_v56, %v6528_v4  ;;  %2102 = vperm.xlu1 %5490, %v2012_v10   ;;  %v10279_v31 = vld [vmem:[#allocation83_spill] sm:$0xff]  ;;  %v6607_v40 = vpop.permute.xlu0 %559  ;;  %v2014_v17 = vld [vmem:[%s9808_s2 + $0x80] sm:$0xff] }
  0xb5   : > { %v6593_v26 = vmul.f32 %v5996_v57, %v6528_v4  ;;  %v6597_v8 = vmul.f32 %v6001_v58, %v6528_v4  ;;  %v723_v19 = vmul.f32 %v10277_v11, %v6581_v44  ;;  %v725_v24 = vmul.f32 %v10278_v20, %v6581_v44  ;;  %2671 = vperm.xlu0 %5491, %v2561_v43   ;;  %v10283_v15 = vld [vmem:[#allocation47_spill] sm:$0xff]  ;;  %v10284_v57 = vld [vmem:[#allocation48_spill] sm:$0xff]  ;;  %v10285_v55 = vld [vmem:[#allocation49_spill] sm:$0xff] }
  0xb6   : > { %v722_v37 = vmul.f32 %v10279_v31, %v6581_v44  ;;  %v724_v39 = vmul.f32 %v10280_v38, %v6581_v44  ;;  %10281 = vst [vmem:[#allocation75_spill] sm:$0xff] %v6607_v40  ;;  %v1490_v10 = vmul.f32 %v10282_v6, %v6581_v44  ;;  %v1491_v58 = vmul.f32 %v10283_v15, %v6581_v44  ;;  %v2563_v43 = vld [vmem:[%s9810_s4 + $0xa8] sm:$0xff] }
  0xb7   : > { %v1492_v56 = vmul.f32 %v10284_v57, %v6581_v44  ;;  %v1493_v4 = vmul.f32 %v10285_v55, %v6581_v44  ;;  %v607_v54 = vmul.f32 %v6242_v12, %v6607_v40  ;;  %v6626_v53 = vadd.f32 %v723_v19, %v6417_v35  ;;  %v6643_v35 = vpop.permute.xlu1 %567  ;;  %v10287_v19 = vld [vmem:[#allocation85_spill] sm:$0xff] }
  0xb8   : > { %v609_v6 = vmul.f32 %v6270_v29, %v6607_v40  ;;  %v6631_v15 = vadd.f32 %v725_v24, %v6419_v49  ;;  %v606_v57 = vmul.f32 %v6273_v28, %v6607_v40  ;;  %v6636_v55 = vadd.f32 %v722_v37, %v6421_v25  ;;  %2112 = vperm.xlu1 %5490, %v2014_v17   ;;  %v10288_v49 = vld [vmem:[#allocation91_spill] sm:$0xff]  ;;  %v6657_v37 = vpop.permute.xlu0 %571 }
  0xb9   : > { %v608_v52 = vmul.f32 %v6276_v7, %v6607_v40  ;;  %v6641_v12 = vadd.f32 %v724_v39, %v6423_v23  ;;  %10286 = vst [vmem:[#allocation109_spill] sm:$0xff] %v6643_v35  ;;  %v6646_v29 = vadd.f32 %v607_v54, %v10287_v19  ;;  %v6652_v28 = vadd.f32 %v1490_v10, %v6459_v0  ;;  %v2016_v23 = vld [vmem:[%s9808_s2 + $0x90] sm:$0xff]  ;;  %v10290_v39 = vld [vmem:[#allocation92_spill] sm:$0xff]  ;;  %v10291_v54 = vld [vmem:[#allocation93_spill] sm:$0xff] }
  0xba   : > { %v6649_v24 = vadd.f32 %v609_v6, %v10288_v49  ;;  %v6655_v25 = vadd.f32 %v1491_v58, %v6461_v30  ;;  %2681 = vperm.xlu0 %5491, %v2563_v43   ;;  %10289 = vst [vmem:[#allocation85_spill] sm:$0xff] %v6657_v37  ;;  %v6663_v17 = vadd.f32 %v606_v57, %v10290_v39  ;;  %v2565_v58 = vld [vmem:[%s9810_s4 + $0xb8] sm:$0xff]  ;;  %v10293_v43 = vld [vmem:[#allocation15_spill] sm:$0xff]  ;;  %v10295_v39 = vld [vmem:[#allocation17_spill] sm:$0xff] }
  0xbb   : > { %v6666_v19 = vadd.f32 %v608_v52, %v10291_v54  ;;  %v6669_v6 = vadd.f32 %v1492_v56, %v6463_v27  ;;  %v6672_v0 = vadd.f32 %v1493_v4, %v6465_v13  ;;  %v10292_v30 = vld [vmem:[#allocation8_spill] sm:$0xff]  ;;  %v1051_v57 = vmul.f32 %v10293_v43, %v6657_v37 }
  0xbc   : > { %v1050_v10 = vmul.f32 %v10292_v30, %v6657_v37  ;;  %v10294_v49 = vld [vmem:[#allocation16_spill] sm:$0xff]  ;;  %v1053_v56 = vmul.f32 %v10295_v39, %v6657_v37  ;;  %v1418_v27 = vmul.f32 %v5949_v46, %v6657_v37  ;;  %v1419_v13 = vmul.f32 %v5953_v47, %v6657_v37  ;;  %2122 = vperm.xlu1 %5490, %v2016_v23   ;;  %v6701_v40 = vpop.permute.xlu1 %783  ;;  %v6703_v46 = vpop.permute.xlu0 %575 }
  0xbd   : > { %v1052_v52 = vmul.f32 %v10294_v49, %v6657_v37  ;;  %v1420_v4 = vmul.f32 %v5957_v48, %v6657_v37  ;;  %v1421_v54 = vmul.f32 %v5967_v50, %v6657_v37  ;;  %v6695_v43 = vadd.f32 %v1051_v57, %v1003_v63  ;;  %10296 = vst [vmem:[#allocation91_spill] sm:$0xff] %v6701_v40  ;;  %v2018_v48 = vld [vmem:[%s9808_s2 + $0xa0] sm:$0xff] }
  0xbe   : > { %v6693_v30 = vadd.f32 %v1050_v10, %v1002_v18  ;;  %v6699_v39 = vadd.f32 %v1053_v56, %v1005_v36  ;;  %2691 = vperm.xlu0 %5491, %v2565_v58   ;;  %10297 = vst [vmem:[#allocation92_spill] sm:$0xff] %v6703_v46  ;;  %v6708_v47 = vadd.f32 %v1418_v27, %v1370_v42  ;;  %v10298_v36 = vld [vmem:[#allocation81_spill] sm:$0xff]  ;;  %v10299_v10 = vld [vmem:[#allocation86_spill] sm:$0xff]  ;;  %v10300_v42 = vld [vmem:[#allocation87_spill] sm:$0xff] }
  0xbf   : > { %v6697_v49 = vadd.f32 %v1052_v52, %v1004_v41  ;;  %v6710_v23 = vadd.f32 %v1419_v13, %v1371_v9  ;;  %v6712_v18 = vadd.f32 %v1420_v4, %v1372_v45  ;;  %v6714_v63 = vadd.f32 %v1421_v54, %v1373_v22  ;;  %v2567_v41 = vld [vmem:[%s9810_s4 + $0xc8] sm:$0xff]  ;;  %v10301_v45 = vld [vmem:[#allocation88_spill] sm:$0xff]  ;;  %v10303_v27 = vld [vmem:[#allocation55_spill] sm:$0xff] }
  0xc0   : > { %v6721_v58 = vmul.f32 %v10298_v36, %v6701_v40  ;;  %v6725_v57 = vmul.f32 %v10299_v10, %v6701_v40  ;;  %v6729_v9 = vmul.f32 %v10300_v42, %v6701_v40  ;;  %v6733_v22 = vmul.f32 %v10301_v45, %v6701_v40  ;;  %v10302_v52 = vld [vmem:[#allocation54_spill] sm:$0xff]  ;;  %v10304_v4 = vld [vmem:[#allocation56_spill] sm:$0xff]  ;;  %v10305_v50 = vld [vmem:[#allocation57_spill] sm:$0xff]  ;;  %2132 = vperm.xlu1 %5490, %v2018_v48   ;;  %v6761_v48 = vpop.permute.xlu0 %583 }
  0xc1   : > { %v1858_v56 = vmul.f32 %v10302_v52, %v6581_v44  ;;  %v1859_v13 = vmul.f32 %v10303_v27, %v6581_v44  ;;  %v1860_v54 = vmul.f32 %v10304_v4, %v6581_v44  ;;  %v1861_v46 = vmul.f32 %v10305_v50, %v6581_v44  ;;  %v6759_v4 = vpop.permute.xlu1 %787  ;;  %10307 = vst [vmem:[#allocation110_spill] sm:$0xff] %v6761_v48 }
  0xc2   : > { %v6745_v7 = vadd.f32 %v6585_v2, %v6503_v33  ;;  %v6749_v40 = vadd.f32 %v6589_v34, %v6507_v1  ;;  %v6753_v52 = vadd.f32 %v6593_v26, %v6511_v3  ;;  %v6757_v27 = vadd.f32 %v6597_v8, %v6515_v14  ;;  %10306 = vst [vmem:[#allocation93_spill] sm:$0xff] %v6759_v4  ;;  %v2020_v33 = vld [vmem:[%s9808_s2 + $0xb0] sm:$0xff]  ;;  %v2569_v14 = vld [vmem:[%s9810_s4 + $0xd8] sm:$0xff] }
  0xc3   : > { %2701 = vperm.xlu0 %5491, %v2567_v41   ;;  %v1890_v1 = vadd.f32 %v1858_v56, %v6520_v32  ;;  %v1891_v2 = vadd.f32 %v1859_v13, %v6522_v5  ;;  %v1892_v3 = vadd.f32 %v1860_v54, %v6524_v16  ;;  %v1893_v34 = vadd.f32 %v1861_v46, %v6526_v21  ;;  %v10308_v5 = vld [vmem:[#allocation58_spill] sm:$0xff]  ;;  %v10309_v46 = vld [vmem:[#allocation59_spill] sm:$0xff]  ;;  %v10310_v56 = vld [vmem:[#allocation60_spill] sm:$0xff] }
  0xc4   : > { %v835_v26 = vmul.f32 %v10298_v36, %v6759_v4  ;;  %v837_v8 = vmul.f32 %v10299_v10, %v6759_v4  ;;  %v834_v41 = vmul.f32 %v10300_v42, %v6759_v4  ;;  %v836_v32 = vmul.f32 %v10301_v45, %v6759_v4  ;;  %v10311_v54 = vld [vmem:[#allocation61_spill] sm:$0xff]  ;;  %2142 = vperm.xlu1 %5490, %v2020_v33  }
  0xc5   : > { %v1570_v16 = vmul.f32 %v10308_v5, %v6759_v4  ;;  %v1571_v21 = vmul.f32 %v10309_v46, %v6759_v4  ;;  %v1572_v13 = vmul.f32 %v10310_v56, %v6759_v4  ;;  %v1573_v44 = vmul.f32 %v10311_v54, %v6759_v4  ;;  %v2022_v36 = vld [vmem:[%s9808_s2 + $0xc0] sm:$0xff]  ;;  %v6816_v33 = vpop.permute.xlu1 %385 }
  0xc6   : > { %v6790_v48 = vadd.f32 %v835_v26, %v6626_v53  ;;  %v6793_v42 = vadd.f32 %v837_v8, %v6631_v15  ;;  %v6796_v45 = vadd.f32 %v834_v41, %v6636_v55  ;;  %v6799_v10 = vadd.f32 %v836_v32, %v6641_v12  ;;  %10320 = vst [vmem:[#allocation119_spill] sm:$0xff] %v6816_v33  ;;  %v6818_v12 = vpop.permute.xlu0 %671 }
  0xc7   : > { %2711 = vperm.xlu0 %5491, %v2569_v14   ;;  %v6805_v50 = vadd.f32 %v1570_v16, %v6652_v28  ;;  %v6808_v53 = vadd.f32 %v1571_v21, %v6655_v25  ;;  %v6811_v15 = vadd.f32 %v1572_v13, %v6669_v6  ;;  %v6814_v55 = vadd.f32 %v1573_v44, %v6672_v0  ;;  %v2571_v14 = vld [vmem:[%s9810_s4 + $0xe8] sm:$0xff]  ;;  %v10323_v25 = vld [vmem:[#allocation63_spill] sm:$0xff]  ;;  %v10324_v6 = vld [vmem:[#allocation64_spill] sm:$0xff] }
  0xc8   : > { %10312 = vst [vmem:[#allocation111_spill] sm:$0xff] %v6790_v48  ;;  %10313 = vst [vmem:[#allocation112_spill] sm:$0xff] %v6793_v42  ;;  %v10322_v28 = vld [vmem:[#allocation62_spill] sm:$0xff]  ;;  %v1939_v8 = vmul.f32 %v10323_v25, %v6759_v4  ;;  %v1940_v41 = vmul.f32 %v10324_v6, %v6759_v4  ;;  %v10325_v44 = vld [vmem:[#allocation65_spill] sm:$0xff]  ;;  %v719_v32 = vmul.f32 %v10277_v11, %v6818_v12  ;;  %2152 = vperm.xlu1 %5490, %v2022_v36  }
  0xc9   : > { %10314 = vst [vmem:[#allocation113_spill] sm:$0xff] %v6796_v45  ;;  %10315 = vst [vmem:[#allocation114_spill] sm:$0xff] %v6799_v10  ;;  %v1938_v26 = vmul.f32 %v10322_v28, %v6759_v4  ;;  %v1941_v0 = vmul.f32 %v10325_v44, %v6759_v4  ;;  %v721_v16 = vmul.f32 %v10278_v20, %v6818_v12  ;;  %v10365_v48 = vld [vmem:[#allocation46_spill] sm:$0xff] }
  0xca   : > { %10316 = vst [vmem:[#allocation115_spill] sm:$0xff] %v6805_v50  ;;  %10317 = vst [vmem:[#allocation116_spill] sm:$0xff] %v6808_v53  ;;  %v718_v21 = vmul.f32 %v10279_v31, %v6818_v12  ;;  %v720_v13 = vmul.f32 %v10280_v38, %v6818_v12  ;;  %v6843_v53 = vadd.f32 %v1940_v41, %v1892_v3  ;;  %v2024_v50 = vld [vmem:[%s9808_s2 + $0xd0] sm:$0xff] }
  0xcb   : > { %10318 = vst [vmem:[#allocation117_spill] sm:$0xff] %v6811_v15  ;;  %10319 = vst [vmem:[#allocation118_spill] sm:$0xff] %v6814_v55  ;;  %v6839_v55 = vadd.f32 %v1938_v26, %v1890_v1  ;;  %v6841_v15 = vadd.f32 %v1939_v8, %v1891_v2  ;;  %v6845_v4 = vadd.f32 %v1941_v0, %v1893_v34  ;;  %2721 = vperm.xlu0 %5491, %v2571_v14   ;;  %v6854_v1 = vpop.permute.xlu0 %695  ;;  %v2573_v2 = vld [vmem:[%s9810_s4 + $0xf8] sm:$0xff] }
  0xcc   : > { %10321 = vst [vmem:[#allocation120_spill] sm:$0xff] %v6818_v12  ;;  %10328 = vst [vmem:[#allocation123_spill] sm:$0xff] %v6843_v53  ;;  %v751_v10 = vadd.f32 %v719_v32, %v6646_v29  ;;  %v753_v31 = vadd.f32 %v721_v16, %v6649_v24  ;;  %v750_v12 = vadd.f32 %v718_v21, %v6663_v17  ;;  %v6867_v17 = vpop.permute.xlu1 %463  ;;  %2162 = vperm.xlu1 %5490, %v2024_v50   ;;  %v10341_v16 = vld [vmem:[#allocation95_spill] sm:$0xff] }
  0xcd   : > { %10326 = vst [vmem:[#allocation121_spill] sm:$0xff] %v6839_v55  ;;  %10327 = vst [vmem:[#allocation122_spill] sm:$0xff] %v6841_v15  ;;  %v752_v36 = vadd.f32 %v720_v13, %v6666_v19  ;;  %v1786_v3 = vmul.f32 %v6005_v59, %v6657_v37  ;;  %v1787_v34 = vmul.f32 %v6009_v60, %v6657_v37  ;;  %v10342_v13 = vld [vmem:[#allocation100_spill] sm:$0xff]  ;;  %v10350_v55 = vld [vmem:[#allocation50_spill] sm:$0xff] }
  0xce   : > { %10329 = vst [vmem:[#allocation124_spill] sm:$0xff] %v6845_v4  ;;  %10330 = vst [vmem:[#allocation125_spill] sm:$0xff] %v6854_v1  ;;  %v1788_v29 = vmul.f32 %v6013_v61, %v6657_v37  ;;  %v1789_v24 = vmul.f32 %v6018_v62, %v6657_v37  ;;  %v6870_v19 = vadd.f32 %v6721_v58, %v751_v10  ;;  %v10348_v4 = vld [vmem:[#allocation106_spill] sm:$0xff] }
  0xcf   : > { %10331 = vst [vmem:[#allocation126_spill] sm:$0xff] %v6867_v17  ;;  %v6873_v14 = vadd.f32 %v6725_v57, %v753_v31  ;;  %v6876_v26 = vadd.f32 %v6729_v9, %v750_v12  ;;  %v6879_v8 = vadd.f32 %v6733_v22, %v752_v36  ;;  %v6882_v41 = vadd.f32 %v1786_v3, %v6745_v7  ;;  %v2026_v31 = vld [vmem:[%s9808_s2 + $0xe0] sm:$0xff]  ;;  %v10336_v7 = vld [vmem:[#allocation31_spill] sm:$0xff]  ;;  %v10344_v3 = vld [vmem:[#allocation102_spill] sm:$0xff] }
  0xd0   : > { %10332 = vst [vmem:[#allocation127_spill] sm:$0xff] %v6870_v19  ;;  %v6885_v0 = vadd.f32 %v1787_v34, %v6749_v40  ;;  %v6888_v32 = vadd.f32 %v1788_v29, %v6753_v52  ;;  %v6891_v58 = vadd.f32 %v1789_v24, %v6757_v27  ;;  %2731 = vperm.xlu0 %5491, %v2573_v2   ;;  %v10337_v40 = vld [vmem:[#allocation32_spill] sm:$0xff]  ;;  %v10338_v9 = vld [vmem:[#allocation33_spill] sm:$0xff]  ;;  %v10339_v52 = vld [vmem:[#allocation98_spill] sm:$0xff]  ;;  %v6912_v29 = vpop.permute.xlu0 %795  ;;  %v6926_v15 = vpop.permute.xlu1 %679 }
  0xd1   : > { %10333 = vst [vmem:[#allocation128_spill] sm:$0xff] %v6873_v14  ;;  %10334 = vst [vmem:[#allocation129_spill] sm:$0xff] %v6876_v26  ;;  %v1666_v50 = vmul.f32 %v5971_v51, %v6816_v33  ;;  %v1667_v10 = vmul.f32 %v10336_v7, %v6816_v33  ;;  %v1668_v57 = vmul.f32 %v10337_v40, %v6816_v33  ;;  %v10340_v27 = vld [vmem:[#allocation66_spill] sm:$0xff]  ;;  %v10343_v36 = vld [vmem:[#allocation67_spill] sm:$0xff]  ;;  %2172 = vperm.xlu1 %5490, %v2026_v31  }
  0xd2   : > { %10335 = vst [vmem:[#allocation130_spill] sm:$0xff] %v6879_v8  ;;  %v1669_v22 = vmul.f32 %v10338_v9, %v6816_v33  ;;  %v423_v12 = vmul.f32 %v10340_v27, %v10339_v52  ;;  %v427_v21 = vmul.f32 %v10340_v27, %v10341_v16  ;;  %v503_v2 = vmul.f32 %v10343_v36, %v10342_v13  ;;  %v10345_v24 = vld [vmem:[#allocation103_spill] sm:$0xff]  ;;  %v10346_v40 = vld [vmem:[#allocation104_spill] sm:$0xff]  ;;  %v10347_v9 = vld [vmem:[#allocation105_spill] sm:$0xff] }
  0xd3   : > { %v507_v34 = vmul.f32 %v10343_v36, %v10344_v3  ;;  %v6915_v7 = vadd.f32 %v10345_v24, %v1666_v50  ;;  %v6918_v51 = vadd.f32 %v10346_v40, %v1667_v10  ;;  %v6921_v1 = vadd.f32 %v10347_v9, %v1668_v57  ;;  %10349 = vst [vmem:[#allocation95_spill] sm:$0xff] %v6926_v15  ;;  %v10351_v17 = vld [vmem:[#allocation51_spill] sm:$0xff]  ;;  %v10352_v50 = vld [vmem:[#allocation52_spill] sm:$0xff]  ;;  %v10353_v10 = vld [vmem:[#allocation53_spill] sm:$0xff] }
  0xd4   : > { %v6924_v53 = vadd.f32 %v10348_v4, %v1669_v22  ;;  %v1210_v36 = vmul.f32 %v10350_v55, %v6912_v29  ;;  %v1211_v33 = vmul.f32 %v10351_v17, %v6912_v29  ;;  %v1212_v24 = vmul.f32 %v10352_v50, %v6912_v29  ;;  %v2028_v4 = vld [vmem:[%s9808_s2 + $0xf0] sm:$0xff]  ;;  %v10356_v17 = vld [vmem:[#allocation68_spill] sm:$0xff]  ;;  %v6978_v45 = vpop.permute.xlu1 %683 }
  0xd5   : > { %v1213_v40 = vmul.f32 %v10353_v10, %v6912_v29  ;;  %v1578_v31 = vmul.f32 %v10308_v5, %v6912_v29  ;;  %v1579_v57 = vmul.f32 %v10309_v46, %v6912_v29  ;;  %v1580_v9 = vmul.f32 %v10310_v56, %v6912_v29  ;;  %v6964_v46 = vpop.permute.xlu0 %803  ;;  %2182 = vperm.xlu1 %5490, %v2028_v4   ;;  %v10361_v4 = vld [vmem:[#allocation42_spill] sm:$0xff]  ;;  %v10367_v8 = vld [vmem:[#allocation48_spill] sm:$0xff] }
  0xd6   : > { %v1581_v22 = vmul.f32 %v10311_v54, %v6912_v29  ;;  %v10354_v50 = vmov 1   ;;  %v6950_v55 = vmul.f32 %v10322_v28, %v6912_v29  ;;  %v6954_v10 = vmul.f32 %v10323_v25, %v6912_v29  ;;  %10355 = vst [vmem:[#allocation102_spill] sm:$0xff] %v6964_v46 }
  0xd7   : > { %5492 = vset.pattern.permute.xlu0 %v10354_v50  ;;  %v6958_v5 = vmul.f32 %v10324_v6, %v6912_v29  ;;  %v6962_v56 = vmul.f32 %v10325_v44, %v6912_v29  ;;  %v6966_v54 = vadd.f32 %v503_v2, %v423_v12  ;;  %v6968_v50 = vadd.f32 %v507_v34, %v427_v21  ;;  %v2542_v34 = vld [vmem:[%s9810_s4] sm:$0xff] }
  0xd8   : > { %v6972_v27 = vmul.f32 %v10356_v17, %v6643_v35  ;;  %v6976_v38 = vmul.f32 %v10356_v17, %v6657_v37  ;;  %v6982_v42 = vmul.f32 %v10322_v28, %v6964_v46  ;;  %v6986_v12 = vmul.f32 %v10323_v25, %v6964_v46  ;;  %v10363_v25 = vld [vmem:[#allocation44_spill] sm:$0xff] }
  0xd9   : > { %v6990_v21 = vmul.f32 %v10324_v6, %v6964_v46  ;;  %v6994_v2 = vmul.f32 %v10325_v44, %v6964_v46  ;;  %v1130_v28 = vmul.f32 %v10361_v4, %v6978_v45  ;;  %v10364_v6 = vld [vmem:[#allocation45_spill] sm:$0xff]  ;;  %v1498_v44 = vmul.f32 %v10365_v48, %v6978_v45  ;;  %v7015_v19 = vpop.permute.xlu0 %811  ;;  %2576 = vperm.xlu1 %5490, %v2542_v34  }
  0xda   : > { %10357 = vst [vmem:[#allocation103_spill] sm:$0xff] %v6982_v42  ;;  %10358 = vst [vmem:[#allocation104_spill] sm:$0xff] %v6986_v12  ;;  %v10362_v42 = vld [vmem:[#allocation43_spill] sm:$0xff]  ;;  %v1132_v12 = vmul.f32 %v10363_v25, %v6978_v45  ;;  %v1500_v26 = vmul.f32 %v10367_v8, %v6978_v45  ;;  %v10368_v4 = vld [vmem:[#allocation49_spill] sm:$0xff] }
  0xdb   : > { %10359 = vst [vmem:[#allocation105_spill] sm:$0xff] %v6990_v21  ;;  %10360 = vst [vmem:[#allocation106_spill] sm:$0xff] %v6994_v2  ;;  %v1131_v17 = vmul.f32 %v10362_v42, %v6978_v45  ;;  %v1133_v21 = vmul.f32 %v10364_v6, %v6978_v45  ;;  %v10366_v2 = vld [vmem:[#allocation47_spill] sm:$0xff]  ;;  %v1501_v14 = vmul.f32 %v10368_v4, %v6978_v45  ;;  %v7025_v4 = vpop.permute.xlu1 %579 }
  0xdc   : > { %v1499_v46 = vmul.f32 %v10366_v2, %v6978_v45  ;;  %10369 = vst [vmem:[#allocation131_spill] sm:$0xff] %v7015_v19  ;;  %v1162_v42 = vadd.f32 %v1130_v28, %v6693_v30  ;;  %v1164_v6 = vadd.f32 %v1132_v12, %v6697_v49  ;;  %v1530_v48 = vadd.f32 %v1498_v44, %v6708_v47  ;;  %v2544_v30 = vld [vmem:[%s9810_s4 + $0x10] sm:$0xff] }
  0xdd   : > { %v1163_v25 = vadd.f32 %v1131_v17, %v6695_v43  ;;  %v1165_v20 = vadd.f32 %v1133_v21, %v6699_v39  ;;  %v1532_v8 = vadd.f32 %v1500_v26, %v6712_v18  ;;  %v1533_v37 = vadd.f32 %v1501_v14, %v6714_v63  ;;  %v10370_v18 = vld [vmem:[#allocation54_spill] sm:$0xff]  ;;  %v10372_v14 = vld [vmem:[#allocation56_spill] sm:$0xff]  ;;  %2586 = vperm.xlu1 %5490, %v2544_v30  }
  0xde   : > { %v1531_v2 = vadd.f32 %v1499_v46, %v6710_v23  ;;  %v1242_v43 = vadd.f32 %v1210_v36, %v1162_v42  ;;  %v1244_v49 = vadd.f32 %v1212_v24, %v1164_v6  ;;  %v7030_v39 = vadd.f32 %v1578_v31, %v1530_v48  ;;  %v10371_v46 = vld [vmem:[#allocation55_spill] sm:$0xff]  ;;  %v7046_v48 = vpop.permute.xlu0 %2062 }
  0xdf   : > { %v1243_v28 = vadd.f32 %v1211_v33, %v1163_v25  ;;  %v1245_v17 = vadd.f32 %v1213_v40, %v1165_v20  ;;  %v7034_v47 = vadd.f32 %v1580_v9, %v1532_v8  ;;  %v7036_v23 = vadd.f32 %v1581_v22, %v1533_v37  ;;  %v10373_v33 = vld [vmem:[#allocation57_spill] sm:$0xff]  ;;  %10374 = vst [vmem:[#allocation132_spill] sm:$0xff] %v7046_v48 }
  0xe0   : > { %v7032_v12 = vadd.f32 %v1579_v57, %v1531_v2  ;;  %v1866_v63 = vmul.f32 %v10370_v18, %v6978_v45  ;;  %v1867_v44 = vmul.f32 %v10371_v46, %v6978_v45  ;;  %v1868_v42 = vmul.f32 %v10372_v14, %v6978_v45  ;;  %v2546_v8 = vld [vmem:[%s9810_s4 + $0x20] sm:$0xff]  ;;  %v7063_v57 = vpop.permute.xlu1 %791 }
  0xe1   : > { %v1869_v20 = vmul.f32 %v10373_v33, %v6978_v45  ;;  %v1794_v25 = vmul.f32 %v6005_v59, %v7025_v4  ;;  %v1795_v37 = vmul.f32 %v6009_v60, %v7025_v4  ;;  %v1796_v6 = vmul.f32 %v6013_v61, %v7025_v4  ;;  %10375 = vst [vmem:[#allocation133_spill] sm:$0xff] %v7063_v57  ;;  %v10390_v61 = vld [vmem:[#allocation130_spill] sm:$0xff] }
  0xe2   : > { %v1797_v26 = vmul.f32 %v6018_v62, %v7025_v4  ;;  %v1898_v36 = vadd.f32 %v1866_v63, %v6882_v41  ;;  %v1899_v24 = vadd.f32 %v1867_v44, %v6885_v0  ;;  %v1900_v40 = vadd.f32 %v1868_v42, %v6888_v32  ;;  %2596 = vperm.xlu1 %5490, %v2546_v8   ;;  %v10383_v63 = vld [vmem:[#allocation70_spill] sm:$0xff] }
  0xe3   : > { %v1901_v31 = vadd.f32 %v1869_v20, %v6891_v58  ;;  %v7066_v9 = vadd.f32 %v1794_v25, %v6915_v7  ;;  %v7069_v22 = vadd.f32 %v1795_v37, %v6918_v51  ;;  %v7072_v21 = vadd.f32 %v1796_v6, %v6921_v1  ;;  %v7089_v51 = vpop.permute.xlu0 %2077  ;;  %v10384_v25 = vld [vmem:[#allocation76_spill] sm:$0xff]  ;;  %v10385_v6 = vld [vmem:[#allocation85_spill] sm:$0xff]  ;;  %v10386_v8 = vld [vmem:[#allocation82_spill] sm:$0xff] }
  0xe4   : > { %v7075_v2 = vadd.f32 %v1797_v26, %v6924_v53  ;;  %v7078_v41 = vadd.f32 %v6950_v55, %v1898_v36  ;;  %v7081_v0 = vadd.f32 %v6954_v10, %v1899_v24  ;;  %v7084_v32 = vadd.f32 %v6958_v5, %v1900_v40  ;;  %10380 = vst [vmem:[#allocation138_spill] sm:$0xff] %v7089_v51  ;;  %v2548_v5 = vld [vmem:[%s9810_s4 + $0x30] sm:$0xff]  ;;  %v2033_v20 = vpop.permute.xlu1 %2032 }
  0xe5   : > { %v7087_v58 = vadd.f32 %v6962_v56, %v1901_v31  ;;  %v647_v1 = vadd.f32 %v6972_v27, %v6966_v54  ;;  %v651_v53 = vadd.f32 %v6976_v38, %v6968_v50  ;;  %v727_v55 = vmul.f32 %v10277_v11, %v6926_v15  ;;  %v10381_v56 = vld [vmem:[#allocation81_spill] sm:$0xff]  ;;  %v10387_v31 = vld [vmem:[#allocation127_spill] sm:$0xff] }
  0xe6   : > { %10376 = vst [vmem:[#allocation134_spill] sm:$0xff] %v7078_v41  ;;  %10377 = vst [vmem:[#allocation135_spill] sm:$0xff] %v7081_v0  ;;  %v731_v7 = vmul.f32 %v10277_v11, %v6978_v45  ;;  %v839_v10 = vmul.f32 %v10381_v56, %v7063_v57  ;;  %v843_v34 = vmul.f32 %v10381_v56, %v6912_v29  ;;  %v10382_v54 = vld [vmem:[#allocation69_spill] sm:$0xff]  ;;  %2606 = vperm.xlu1 %5490, %v2548_v5  }
  0xe7   : > { %10378 = vst [vmem:[#allocation136_spill] sm:$0xff] %v7084_v32  ;;  %10379 = vst [vmem:[#allocation137_spill] sm:$0xff] %v7087_v58  ;;  %v425_v27 = vmul.f32 %v10382_v54, %v10339_v52  ;;  %v429_v38 = vmul.f32 %v10382_v54, %v10341_v16  ;;  %v759_v50 = vadd.f32 %v727_v55, %v647_v1  ;;  %v2088_v40 = vpop.permute.xlu0 %2087  ;;  %v2550_v5 = vld [vmem:[%s9810_s4 + $0x40] sm:$0xff] }
  0xe8   : > { %v763_v30 = vadd.f32 %v731_v7, %v651_v53  ;;  %v505_v44 = vmul.f32 %v10383_v63, %v10342_v13  ;;  %v509_v42 = vmul.f32 %v10383_v63, %v10344_v3  ;;  %v617_v37 = vmul.f32 %v10384_v25, %v6643_v35  ;;  %v10388_v53 = vld [vmem:[#allocation128_spill] sm:$0xff]  ;;  %v10389_v7 = vld [vmem:[#allocation129_spill] sm:$0xff]  ;;  %v2038_v0 = vpop.permute.xlu1 %2037 }
  0xe9   : > { %v621_v26 = vmul.f32 %v10384_v25, %v10385_v6  ;;  %v729_v36 = vmul.f32 %v10386_v8, %v6926_v15  ;;  %v733_v24 = vmul.f32 %v10386_v8, %v6978_v45  ;;  %v2191_v1 = vadd.f32 %v2033_v20, %v10387_v31 }
  0xea   : > { %v2193_v55 = vadd.f32 %v2033_v20, %v10388_v53  ;;  %v2190_v62 = vadd.f32 %v2033_v20, %v10389_v7  ;;  %v2192_v60 = vadd.f32 %v2033_v20, %v10390_v61  ;;  %v7126_v59 = vadd.f32 %v2088_v40, %v1242_v43  ;;  %2616 = vperm.xlu1 %5490, %v2550_v5  }
  0xeb   : > { %v7128_v51 = vadd.f32 %v2088_v40, %v1243_v28  ;;  %v7130_v48 = vadd.f32 %v2088_v40, %v1244_v49  ;;  %v7132_v19 = vadd.f32 %v2088_v40, %v1245_v17  ;;  %v2319_v58 = vmax.f32 %v2191_v1, 0.0  ;;  %v7141_v49 = vpop.permute.xlu0 %2097  ;;  %v10396_v17 = vld [vmem:[#allocation111_spill] sm:$0xff]  ;;  %v10397_v40 = vld [vmem:[#allocation112_spill] sm:$0xff]  ;;  %v10399_v1 = vld [vmem:[#allocation114_spill] sm:$0xff] }
  0xec   : > { %10391 = vst [vmem:[#allocation81_spill] sm:$0xff] %v7126_v59  ;;  %v2321_v31 = vmax.f32 %v2193_v55, 0.0  ;;  %v2318_v32 = vmax.f32 %v2190_v62, 0.0  ;;  %v2320_v53 = vmax.f32 %v2192_v60, 0.0  ;;  %v7137_v7 = vadd.f32 %v839_v10, %v759_v50  ;;  %10395 = vst [vmem:[#allocation85_spill] sm:$0xff] %v7141_v49  ;;  %v10398_v59 = vld [vmem:[#allocation113_spill] sm:$0xff]  ;;  %v7154_v5 = vpop.permute.xlu1 %395 }
  0xed   : > { %10392 = vst [vmem:[#allocation69_spill] sm:$0xff] %v7128_v51  ;;  %10393 = vst [vmem:[#allocation70_spill] sm:$0xff] %v7130_v48  ;;  %v7139_v61 = vadd.f32 %v843_v34, %v763_v30  ;;  %v537_v43 = vadd.f32 %v505_v44, %v425_v27  ;;  %v541_v28 = vadd.f32 %v509_v42, %v429_v38  ;;  %v2552_v60 = vld [vmem:[%s9810_s4 + $0x50] sm:$0xff]  ;;  %v10400_v34 = vld [vmem:[#allocation86_spill] sm:$0xff] }
  0xee   : > { %10394 = vst [vmem:[#allocation76_spill] sm:$0xff] %v7132_v19  ;;  %v2195_v20 = vadd.f32 %v2038_v0, %v10396_v17  ;;  %v2197_v48 = vadd.f32 %v2038_v0, %v10397_v40  ;;  %v2194_v41 = vadd.f32 %v2038_v0, %v10398_v59  ;;  %v2196_v55 = vadd.f32 %v2038_v0, %v10399_v1  ;;  %v10402_v17 = vld [vmem:[#allocation71_spill] sm:$0xff] }
  0xef   : > { %v649_v62 = vadd.f32 %v617_v37, %v537_v43  ;;  %v653_v10 = vadd.f32 %v621_v26, %v541_v28  ;;  %v841_v27 = vmul.f32 %v10400_v34, %v7063_v57  ;;  %v845_v38 = vmul.f32 %v10400_v34, %v6912_v29  ;;  %10401 = vst [vmem:[#allocation82_spill] sm:$0xff] %v7154_v5  ;;  %v7160_v26 = vpop.permute.xlu0 %2107  ;;  %v2556_v49 = vld [vmem:[%s9810_s4 + $0x70] sm:$0xff] }
  0xf0   : > { %v2323_v50 = vmax.f32 %v2195_v20, 0.0  ;;  %v2325_v30 = vmax.f32 %v2197_v48, 0.0  ;;  %v2322_v44 = vmax.f32 %v2194_v41, 0.0  ;;  %v2324_v42 = vmax.f32 %v2196_v55, 0.0  ;;  %2626 = vperm.xlu1 %5490, %v2552_v60   ;;  %10403 = vst [vmem:[#allocation127_spill] sm:$0xff] %v7160_v26  ;;  %v2554_v48 = vld [vmem:[%s9810_s4 + $0x60] sm:$0xff] }
  0xf1   : > { %v761_v59 = vadd.f32 %v729_v36, %v649_v62  ;;  %v765_v0 = vadd.f32 %v733_v24, %v653_v10  ;;  %v422_v40 = vmul.f32 %v10402_v17, %v10339_v52  ;;  %v426_v37 = vmul.f32 %v10402_v17, %v10341_v16  ;;  %v10404_v24 = vld [vmem:[#allocation72_spill] sm:$0xff]  ;;  %v10416_v10 = vld [vmem:[#allocation118_spill] sm:$0xff] }
  0xf2   : > { %v2479_v43 = vpack.c.bf16 %v2323_v50, %v2319_v58  ;;  %v2481_v28 = vpack.c.bf16 %v2325_v30, %v2321_v31  ;;  %v2478_v1 = vpack.c.bf16 %v2322_v44, %v2318_v32  ;;  %v2480_v20 = vpack.c.bf16 %v2324_v42, %v2320_v53  ;;  %v10405_v58 = vld [vmem:[#allocation77_spill] sm:$0xff]  ;;  %v10406_v53 = vld [vmem:[#allocation83_spill] sm:$0xff]  ;;  %v7183_v44 = vpop.permute.xlu1 %471 }
  0xf3   : > { %v7165_v41 = vadd.f32 %v841_v27, %v761_v59  ;;  %v7167_v36 = vadd.f32 %v845_v38, %v765_v0  ;;  %v502_v55 = vmul.f32 %v10404_v24, %v10342_v13  ;;  %v506_v60 = vmul.f32 %v10404_v24, %v10344_v3  ;;  %10407 = vst [vmem:[#allocation128_spill] sm:$0xff] %v7183_v44  ;;  %v2118_v42 = vpop.permute.xlu0 %2117  ;;  %v10408_v59 = vld [vmem:[#allocation87_spill] sm:$0xff] }
  0xf4   : > { %2894 = vmatprep.subr.bf16.mxu0 %v2479_v43  ;;  %3087 = vmatprep.subr.bf16.mxu1 %v2481_v28  ;;  %v614_v32 = vmul.f32 %v10405_v58, %v6643_v35  ;;  %v618_v31 = vmul.f32 %v10405_v58, %v10385_v6  ;;  %v726_v62 = vmul.f32 %v10406_v53, %v6926_v15  ;;  %v10409_v28 = vld [vmem:[#allocation73_spill] sm:$0xff] }
  0xf5   : > { %2895 = vmatpush1.bf16.msra.mxu0 %v2478_v1  ;;  %3088 = vmatpush1.bf16.msra.mxu1 %v2480_v20  ;;  %v534_v27 = vadd.f32 %v502_v55, %v422_v40  ;;  %v538_v38 = vadd.f32 %v506_v60, %v426_v37  ;;  %v730_v50 = vmul.f32 %v10406_v53, %v6978_v45  ;;  %v10410_v37 = vld [vmem:[#allocation115_spill] sm:$0xff]  ;;  %v10412_v55 = vld [vmem:[#allocation116_spill] sm:$0xff]  ;;  %v10414_v60 = vld [vmem:[#allocation117_spill] sm:$0xff] }
  0xf6   : > { %2636 = vperm.xlu1 %5490, %v2554_v48   ;;  %v838_v0 = vmul.f32 %v10408_v59, %v7063_v57  ;;  %v842_v43 = vmul.f32 %v10408_v59, %v6912_v29  ;;  %v424_v1 = vmul.f32 %v10409_v28, %v10339_v52  ;;  %v428_v40 = vmul.f32 %v10409_v28, %v10341_v16  ;;  %v10418_v16 = vld [vmem:[#allocation74_spill] sm:$0xff] }
  0xf7   : > { %v7194_v20 = vadd.f32 %v2118_v42, %v10410_v37  ;;  %v7197_v48 = vadd.f32 %v2118_v42, %v10412_v55  ;;  %v7200_v30 = vadd.f32 %v2118_v42, %v10414_v60  ;;  %v7203_v26 = vadd.f32 %v2118_v42, %v10416_v10  ;;  %v10419_v55 = vld [vmem:[#allocation78_spill] sm:$0xff]  ;;  %v10420_v10 = vld [vmem:[#allocation84_spill] sm:$0xff] }
  0xf8   : > { %v646_v19 = vadd.f32 %v614_v32, %v534_v27  ;;  %v650_v51 = vadd.f32 %v618_v31, %v538_v38  ;;  %v504_v52 = vmul.f32 %v10418_v16, %v10342_v13  ;;  %v508_v37 = vmul.f32 %v10418_v16, %v10344_v3  ;;  %v2128_v32 = vpop.permute.xlu0 %2127 }
  0xf9   : > { %10411 = vst [vmem:[#allocation129_spill] sm:$0xff] %v7194_v20  ;;  %10413 = vst [vmem:[#allocation130_spill] sm:$0xff] %v7197_v48  ;;  %v616_v20 = vmul.f32 %v10419_v55, %v6643_v35  ;;  %v620_v60 = vmul.f32 %v10419_v55, %v10385_v6  ;;  %v728_v42 = vmul.f32 %v10420_v10, %v6926_v15 }
  0xfa   : > { %10415 = vst [vmem:[#allocation111_spill] sm:$0xff] %v7200_v30  ;;  %10417 = vst [vmem:[#allocation112_spill] sm:$0xff] %v7203_v26  ;;  %v732_v30 = vmul.f32 %v10420_v10, %v6978_v45  ;;  %2646 = vperm.xlu1 %5490, %v2556_v49   ;;  %v758_v31 = vadd.f32 %v726_v62, %v646_v19  ;;  %v762_v27 = vadd.f32 %v730_v50, %v650_v51  ;;  %v7232_v26 = vpop.permute.xlu1 %687  ;;  %v2558_v45 = vld [vmem:[%s9810_s4 + $0x80] sm:$0xff]  ;;  %v10428_v62 = vld [vmem:[#allocation66_spill] sm:$0xff] }
  0xfb   : > { %v536_v38 = vadd.f32 %v504_v52, %v424_v1  ;;  %v540_v13 = vadd.f32 %v508_v37, %v428_v40  ;;  %v7221_v3 = vadd.f32 %v2128_v32, %v7030_v39  ;;  %v7224_v35 = vadd.f32 %v2128_v32, %v7032_v12  ;;  %10425 = vst [vmem:[#allocation77_spill] sm:$0xff] %v7232_v26  ;;  %v10426_v12 = vld [vmem:[#allocation88_spill] sm:$0xff]  ;;  %v10429_v1 = vld [vmem:[#allocation119_spill] sm:$0xff] }
  0xfc   : > { %v7227_v6 = vadd.f32 %v2128_v32, %v7034_v47  ;;  %v7230_v15 = vadd.f32 %v2128_v32, %v7036_v23  ;;  %v7237_v19 = vadd.f32 %v838_v0, %v758_v31  ;;  %v7239_v52 = vadd.f32 %v842_v43, %v762_v27  ;;  %v10427_v23 = vld [vmem:[#allocation97_spill] sm:$0xff]  ;;  %v7249_v37 = vpop.permute.xlu0 %2137  ;;  %v10431_v32 = vld [vmem:[#allocation126_spill] sm:$0xff] }
  0xfd   : > { %10421 = vst [vmem:[#allocation113_spill] sm:$0xff] %v7221_v3  ;;  %10422 = vst [vmem:[#allocation114_spill] sm:$0xff] %v7224_v35  ;;  %v648_v39 = vadd.f32 %v616_v20, %v536_v38  ;;  %v652_v51 = vadd.f32 %v620_v60, %v540_v13  ;;  %v840_v49 = vmul.f32 %v10426_v12, %v7063_v57  ;;  %v10432_v20 = vld [vmem:[#allocation67_spill] sm:$0xff]  ;;  %v10433_v60 = vld [vmem:[#allocation101_spill] sm:$0xff] }
  0xfe   : > { %10423 = vst [vmem:[#allocation86_spill] sm:$0xff] %v7227_v6  ;;  %10424 = vst [vmem:[#allocation72_spill] sm:$0xff] %v7230_v15  ;;  %v844_v47 = vmul.f32 %v10426_v12, %v6912_v29  ;;  %v431_v50 = vmul.f32 %v10428_v62, %v10427_v23  ;;  %v435_v40 = vmul.f32 %v10428_v62, %v10429_v1  ;;  %2656 = vperm.xlu1 %5490, %v2558_v45   ;;  %v7255_v27 = vpop.permute.xlu1 %691  ;;  %v2560_v29 = vld [vmem:[%s9810_s4 + $0x90] sm:$0xff]  ;;  %v10435_v38 = vld [vmem:[#allocation92_spill] sm:$0xff] }
  0xff   : > { %10430 = vst [vmem:[#allocation83_spill] sm:$0xff] %v7249_v37  ;;  %v760_v0 = vadd.f32 %v728_v42, %v648_v39  ;;  %v764_v43 = vadd.f32 %v732_v30, %v652_v51  ;;  %v511_v13 = vmul.f32 %v10432_v20, %v10431_v32  ;;  %v515_v31 = vmul.f32 %v10432_v20, %v10433_v60  ;;  %v10436_v6 = vld [vmem:[#allocation68_spill] sm:$0xff]  ;;  %v10437_v42 = vld [vmem:[#allocation102_spill] sm:$0xff] }
 0x100   : > { %10434 = vst [vmem:[#allocation87_spill] sm:$0xff] %v7255_v27  ;;  %v623_v3 = vmul.f32 %v10436_v6, %v10435_v38  ;;  %v627_v45 = vmul.f32 %v10436_v6, %v7025_v4  ;;  %v735_v30 = vmul.f32 %v10277_v11, %v7232_v26  ;;  %v851_v39 = vmul.f32 %v10381_v56, %v10437_v42  ;;  %v7280_v44 = vpop.permute.xlu0 %2147 }
 0x101   : > { %v1874_v51 = vmul.f32 %v10370_v18, %v7255_v27  ;;  %v1875_v37 = vmul.f32 %v10371_v46, %v7255_v27  ;;  %v1876_v15 = vmul.f32 %v10372_v14, %v7255_v27  ;;  %v1877_v35 = vmul.f32 %v10373_v33, %v7255_v27  ;;  %10438 = vst [vmem:[#allocation73_spill] sm:$0xff] %v7280_v44  ;;  %v10458_v33 = vld [vmem:[#allocation136_spill] sm:$0xff] }
 0x102   : > { %v7276_v57 = vadd.f32 %v840_v49, %v760_v0  ;;  %v7278_v48 = vadd.f32 %v844_v47, %v764_v43  ;;  %v543_v6 = vadd.f32 %v511_v13, %v431_v50  ;;  %v547_v20 = vadd.f32 %v515_v31, %v435_v40  ;;  %2666 = vperm.xlu1 %5490, %v2560_v29   ;;  %v2562_v49 = vld [vmem:[%s9810_s4 + $0xa0] sm:$0xff]  ;;  %v7293_v43 = vpop.permute.xlu1 %587 }
 0x103   : > { %v1906_v18 = vadd.f32 %v1874_v51, %v7066_v9  ;;  %v1907_v5 = vadd.f32 %v1875_v37, %v7069_v22  ;;  %v1908_v46 = vadd.f32 %v1876_v15, %v7072_v21  ;;  %v1909_v14 = vadd.f32 %v1877_v35, %v7075_v2  ;;  %10439 = vst [vmem:[#allocation115_spill] sm:$0xff] %v7293_v43  ;;  %v10440_v9 = vld [vmem:[#allocation103_spill] sm:$0xff]  ;;  %v10441_v37 = vld [vmem:[#allocation104_spill] sm:$0xff]  ;;  %v10442_v21 = vld [vmem:[#allocation105_spill] sm:$0xff] }
 0x104   : > { %v655_v0 = vadd.f32 %v623_v3, %v543_v6  ;;  %v659_v47 = vadd.f32 %v627_v45, %v547_v20  ;;  %v739_v50 = vmul.f32 %v10277_v11, %v7255_v27  ;;  %v433_v40 = vmul.f32 %v10382_v54, %v10427_v23  ;;  %v10443_v2 = vld [vmem:[#allocation106_spill] sm:$0xff]  ;;  %v2158_v20 = vpop.permute.xlu0 %2157 }
 0x105   : > { %v1986_v22 = vadd.f32 %v10440_v9, %v1906_v18  ;;  %v1987_v15 = vadd.f32 %v10441_v37, %v1907_v5  ;;  %v1988_v35 = vadd.f32 %v10442_v21, %v1908_v46  ;;  %v1989_v13 = vadd.f32 %v10443_v2, %v1909_v14  ;;  %v10444_v5 = vld [vmem:[#allocation121_spill] sm:$0xff]  ;;  %v10446_v51 = vld [vmem:[#allocation122_spill] sm:$0xff]  ;;  %v2564_v37 = vld [vmem:[%s9810_s4 + $0xb0] sm:$0xff] }
 0x106   : > { %v767_v31 = vadd.f32 %v735_v30, %v655_v0  ;;  %v771_v29 = vadd.f32 %v739_v50, %v659_v47  ;;  %v437_v3 = vmul.f32 %v10382_v54, %v10429_v1  ;;  %v513_v6 = vmul.f32 %v10383_v63, %v10431_v32  ;;  %2676 = vperm.xlu1 %5490, %v2562_v49   ;;  %v10448_v49 = vld [vmem:[#allocation123_spill] sm:$0xff]  ;;  %v10450_v50 = vld [vmem:[#allocation124_spill] sm:$0xff] }
 0x107   : > { %v517_v45 = vmul.f32 %v10383_v63, %v10433_v60  ;;  %v625_v18 = vmul.f32 %v10384_v25, %v10435_v38  ;;  %v629_v46 = vmul.f32 %v10384_v25, %v7025_v4  ;;  %v737_v14 = vmul.f32 %v10386_v8, %v7232_v26 }
 0x108   : > { %v7312_v30 = vadd.f32 %v2158_v20, %v10444_v5  ;;  %v7315_v0 = vadd.f32 %v2158_v20, %v10446_v51  ;;  %v7318_v47 = vadd.f32 %v2158_v20, %v10448_v49  ;;  %v7321_v9 = vadd.f32 %v2158_v20, %v10450_v50  ;;  %v10454_v50 = vld [vmem:[#allocation134_spill] sm:$0xff] }
 0x109   : > { %v7326_v21 = vadd.f32 %v851_v39, %v771_v29  ;;  %v545_v2 = vadd.f32 %v513_v6, %v433_v40  ;;  %v549_v44 = vadd.f32 %v517_v45, %v437_v3  ;;  %v741_v5 = vmul.f32 %v10386_v8, %v7255_v27  ;;  %v2168_v40 = vpop.permute.xlu0 %2167 }
 0x10a   : > { %10445 = vst [vmem:[#allocation116_spill] sm:$0xff] %v7312_v30  ;;  %10447 = vst [vmem:[#allocation117_spill] sm:$0xff] %v7315_v0  ;;  %v7330_v30 = vpop.permute.xlu1 %799  ;;  %v853_v51 = vmul.f32 %v10400_v34, %v10437_v42  ;;  %v430_v20 = vmul.f32 %v10402_v17, %v10427_v23  ;;  %v434_v49 = vmul.f32 %v10402_v17, %v10429_v1  ;;  %2686 = vperm.xlu1 %5490, %v2564_v37  }
 0x10b   : > { %10449 = vst [vmem:[#allocation118_spill] sm:$0xff] %v7318_v47  ;;  %10451 = vst [vmem:[#allocation74_spill] sm:$0xff] %v7321_v9  ;;  %v510_v39 = vmul.f32 %v10404_v24, %v10431_v32  ;;  %v847_v29 = vmul.f32 %v10381_v56, %v7330_v30  ;;  %v657_v3 = vadd.f32 %v625_v18, %v545_v2  ;;  %v10456_v9 = vld [vmem:[#allocation135_spill] sm:$0xff]  ;;  %v2566_v18 = vld [vmem:[%s9810_s4 + $0xc0] sm:$0xff] }
 0x10c   : > { %10452 = vst [vmem:[#allocation78_spill] sm:$0xff] %v7326_v21  ;;  %10453 = vst [vmem:[#allocation84_spill] sm:$0xff] %v7330_v30  ;;  %v661_v6 = vadd.f32 %v629_v46, %v549_v44  ;;  %v849_v45 = vmul.f32 %v10400_v34, %v7330_v30  ;;  %v7345_v47 = vadd.f32 %v2168_v40, %v10454_v50  ;;  %v10460_v21 = vld [vmem:[#allocation137_spill] sm:$0xff] }
 0x10d   : > { %v7348_v0 = vadd.f32 %v2168_v40, %v10456_v9  ;;  %v7351_v17 = vadd.f32 %v2168_v40, %v10458_v33  ;;  %v7354_v37 = vadd.f32 %v2168_v40, %v10460_v21  ;;  %v7359_v44 = vadd.f32 %v847_v29, %v767_v31 }
 0x10e   : > { %10455 = vst [vmem:[#allocation88_spill] sm:$0xff] %v7345_v47  ;;  %v769_v46 = vadd.f32 %v737_v14, %v657_v3  ;;  %v773_v2 = vadd.f32 %v741_v5, %v661_v6  ;;  %v514_v50 = vmul.f32 %v10404_v24, %v10433_v60  ;;  %v542_v47 = vadd.f32 %v510_v39, %v430_v20  ;;  %v2043_v40 = vpop.permute.xlu1 %2042 }
 0x10f   : > { %10457 = vst [vmem:[#allocation66_spill] sm:$0xff] %v7348_v0  ;;  %10459 = vst [vmem:[#allocation119_spill] sm:$0xff] %v7351_v17  ;;  %v622_v9 = vmul.f32 %v10405_v58, %v10435_v38  ;;  %v626_v33 = vmul.f32 %v10405_v58, %v7025_v4  ;;  %v734_v21 = vmul.f32 %v10406_v53, %v7232_v26  ;;  %2696 = vperm.xlu1 %5490, %v2566_v18   ;;  %v2178_v17 = vpop.permute.xlu0 %2177  ;;  %v2568_v18 = vld [vmem:[%s9810_s4 + $0xd0] sm:$0xff] }
 0x110   : > { %10461 = vst [vmem:[#allocation101_spill] sm:$0xff] %v7354_v37  ;;  %v7369_v31 = vadd.f32 %v849_v45, %v769_v46  ;;  %v7371_v14 = vadd.f32 %v853_v51, %v773_v2  ;;  %v546_v5 = vadd.f32 %v514_v50, %v434_v49  ;;  %v738_v20 = vmul.f32 %v10406_v53, %v7255_v27 }
 0x111   : > { %v7375_v39 = vadd.f32 %v2178_v17, %v1986_v22  ;;  %v7377_v29 = vadd.f32 %v2178_v17, %v1987_v15  ;;  %v7379_v3 = vadd.f32 %v2178_v17, %v1988_v35  ;;  %v7381_v6 = vadd.f32 %v2178_v17, %v1989_v13 }
 0x112   : > { %v2199_v45 = vadd.f32 %v2043_v40, %v7137_v7  ;;  %v2201_v51 = vadd.f32 %v2043_v40, %v7165_v41  ;;  %v2198_v49 = vadd.f32 %v2043_v40, %v7237_v19  ;;  %v2200_v46 = vadd.f32 %v2043_v40, %v7276_v57  ;;  %v2048_v35 = vpop.permute.xlu1 %2047  ;;  %v2570_v41 = vld [vmem:[%s9810_s4 + $0xe0] sm:$0xff] }
 0x113   : > { %10462 = vst [vmem:[#allocation103_spill] sm:$0xff] %v7375_v39  ;;  %10463 = vst [vmem:[#allocation104_spill] sm:$0xff] %v7377_v29  ;;  %v654_v22 = vadd.f32 %v622_v9, %v542_v47  ;;  %v658_v2 = vadd.f32 %v626_v33, %v546_v5  ;;  %v846_v15 = vmul.f32 %v10408_v59, %v7330_v30  ;;  %2706 = vperm.xlu1 %5490, %v2568_v18   ;;  %v10477_v29 = vld [vmem:[#allocation125_spill] sm:$0xff] }
 0x114   : > { %10464 = vst [vmem:[#allocation105_spill] sm:$0xff] %v7379_v3  ;;  %10465 = vst [vmem:[#allocation106_spill] sm:$0xff] %v7381_v6  ;;  %v850_v17 = vmul.f32 %v10408_v59, %v10437_v42  ;;  %v2327_v13 = vmax.f32 %v2199_v45, 0.0  ;;  %v2329_v50 = vmax.f32 %v2201_v51, 0.0  ;;  %v2326_v3 = vmax.f32 %v2198_v49, 0.0 }
 0x115   : > { %v2328_v7 = vmax.f32 %v2200_v46, 0.0  ;;  %v2203_v57 = vadd.f32 %v2048_v35, %v7139_v61  ;;  %v2205_v19 = vadd.f32 %v2048_v35, %v7167_v36  ;;  %v2202_v47 = vadd.f32 %v2048_v35, %v7239_v52 }
 0x116   : > { %v2204_v9 = vadd.f32 %v2048_v35, %v7278_v48  ;;  %v766_v33 = vadd.f32 %v734_v21, %v654_v22  ;;  %v770_v40 = vadd.f32 %v738_v20, %v658_v2  ;;  %v432_v5 = vmul.f32 %v10409_v28, %v10427_v23  ;;  %v7413_v21 = vpop.permute.xlu1 %699  ;;  %v2572_v2 = vld [vmem:[%s9810_s4 + $0xf0] sm:$0xff] }
 0x117   : > { %v436_v18 = vmul.f32 %v10409_v28, %v10429_v1  ;;  %v2331_v45 = vmax.f32 %v2203_v57, 0.0  ;;  %v2333_v51 = vmax.f32 %v2205_v19, 0.0  ;;  %v2330_v49 = vmax.f32 %v2202_v47, 0.0  ;;  %2716 = vperm.xlu1 %5490, %v2570_v41   ;;  %10466 = vst [vmem:[#allocation121_spill] sm:$0xff] %v7413_v21 }
 0x118   : > { %v2332_v46 = vmax.f32 %v2204_v9, 0.0  ;;  %v7405_v61 = vadd.f32 %v846_v15, %v766_v33  ;;  %v7407_v36 = vadd.f32 %v850_v17, %v770_v40  ;;  %v512_v48 = vmul.f32 %v10418_v16, %v10431_v32 }
 0x119   : > { %v516_v52 = vmul.f32 %v10418_v16, %v10433_v60  ;;  %v2483_v20 = vpack.c.bf16 %v2331_v45, %v2327_v13  ;;  %v2485_v22 = vpack.c.bf16 %v2333_v51, %v2329_v50  ;;  %v2482_v35 = vpack.c.bf16 %v2330_v49, %v2326_v3  ;;  %v3504_v45 = vld [vmem:[%s9812_s6] sm:$0xff]  ;;  %v10469_v51 = vld [vmem:[#allocation99_spill] sm:$0xff] }
 0x11a   : > { %v2484_v41 = vpack.c.bf16 %v2332_v46, %v2328_v7  ;;  %v544_v15 = vadd.f32 %v512_v48, %v432_v5  ;;  %v624_v17 = vmul.f32 %v10419_v55, %v10435_v38  ;;  %v628_v19 = vmul.f32 %v10419_v55, %v7025_v4  ;;  %v10470_v46 = vld [vmem:[#allocation82_spill] sm:$0xff] }
 0x11b   : > { %v548_v57 = vadd.f32 %v516_v52, %v436_v18  ;;  %2896 = vmatprep.subr.bf16.mxu0 %v2483_v20  ;;  %3089 = vmatprep.subr.bf16.mxu1 %v2485_v22  ;;  %v736_v13 = vmul.f32 %v10420_v10, %v7232_v26  ;;  %v740_v50 = vmul.f32 %v10420_v10, %v7255_v27  ;;  %v10471_v52 = vld [vmem:[#allocation128_spill] sm:$0xff]  ;;  %v10472_v20 = vld [vmem:[#allocation67_spill] sm:$0xff] }
 0x11c   : > { %v848_v3 = vmul.f32 %v10426_v12, %v7330_v30  ;;  %2726 = vperm.xlu1 %5490, %v2572_v2   ;;  %2897 = vmatpush1.bf16.msra.mxu0 %v2482_v35  ;;  %v656_v9 = vadd.f32 %v624_v17, %v544_v15  ;;  %v852_v40 = vmul.f32 %v10426_v12, %v10437_v42  ;;  %v10473_v2 = vld [vmem:[#allocation107_spill] sm:$0xff]  ;;  %v7443_v15 = vpop.permute.xlu1 %807  ;;  %v10475_v17 = vld [vmem:[#allocation110_spill] sm:$0xff]  ;;  %v10479_v42 = vld [vmem:[#allocation132_spill] sm:$0xff] }
 0x11d   : > { %v660_v33 = vadd.f32 %v628_v19, %v548_v57  ;;  %3090 = vmatpush1.bf16.msra.mxu1 %v2484_v41  ;;  %v439_v49 = vmul.f32 %v10428_v62, %v10469_v51  ;;  %v443_v48 = vmul.f32 %v10428_v62, %v10470_v46  ;;  %v519_v22 = vmul.f32 %v10472_v20, %v10471_v52  ;;  %v10476_v19 = vld [vmem:[#allocation68_spill] sm:$0xff] }
 0x11e   : > { %v523_v35 = vmul.f32 %v10472_v20, %v10473_v2  ;;  %10474 = vst [vmem:[#allocation122_spill] sm:$0xff] %v7443_v15  ;;  %v768_v57 = vadd.f32 %v736_v13, %v656_v9  ;;  %v631_v18 = vmul.f32 %v10476_v19, %v10475_v17  ;;  %v635_v47 = vmul.f32 %v10476_v19, %v7293_v43 }
 0x11f   : > { %v772_v41 = vadd.f32 %v740_v50, %v660_v33  ;;  %v551_v39 = vadd.f32 %v519_v22, %v439_v49  ;;  %v743_v62 = vmul.f32 %v10277_v11, %v10477_v29  ;;  %v747_v37 = vmul.f32 %v10277_v11, %v7413_v21  ;;  %v10478_v50 = vld [vmem:[#allocation131_spill] sm:$0xff] }
 0x120   : > { %v555_v6 = vadd.f32 %v523_v35, %v443_v48  ;;  %3538 = vperm.xlu1 %5490, %v3504_v45   ;;  %v880_v20 = vadd.f32 %v848_v3, %v768_v57  ;;  %v855_v13 = vmul.f32 %v10381_v56, %v7443_v15  ;;  %v859_v9 = vmul.f32 %v10381_v56, %v10478_v50  ;;  %v3506_v33 = vld [vmem:[%s9812_s6 + $0x10] sm:$0xff] }
 0x121   : > { %v884_v0 = vadd.f32 %v852_v40, %v772_v41  ;;  %v663_v49 = vadd.f32 %v631_v18, %v551_v39  ;;  %v441_v22 = vmul.f32 %v10382_v54, %v10469_v51  ;;  %v445_v11 = vmul.f32 %v10382_v54, %v10470_v46  ;;  %v2053_v39 = vpop.permute.xlu1 %2052 }
 0x122   : > { %v667_v48 = vadd.f32 %v635_v47, %v555_v6  ;;  %v521_v3 = vmul.f32 %v10383_v63, %v10471_v52  ;;  %v525_v40 = vmul.f32 %v10383_v63, %v10473_v2  ;;  %v633_v56 = vmul.f32 %v10384_v25, %v10475_v17 }
 0x123   : > { %v637_v45 = vmul.f32 %v10384_v25, %v7293_v43  ;;  %v775_v6 = vadd.f32 %v743_v62, %v663_v49  ;;  %v745_v18 = vmul.f32 %v10386_v8, %v10477_v29  ;;  %v749_v54 = vmul.f32 %v10386_v8, %v7413_v21  ;;  %v3508_v25 = vld [vmem:[%s9812_s6 + $0x20] sm:$0xff] }
 0x124   : > { %v779_v47 = vadd.f32 %v747_v37, %v667_v48  ;;  %3548 = vperm.xlu1 %5490, %v3506_v33   ;;  %v2207_v35 = vadd.f32 %v2053_v39, %v7359_v44  ;;  %v2209_v63 = vadd.f32 %v2053_v39, %v7369_v31  ;;  %v2206_v57 = vadd.f32 %v2053_v39, %v7405_v61 }
 0x125   : > { %v2208_v41 = vadd.f32 %v2053_v39, %v880_v20  ;;  %v887_v19 = vadd.f32 %v855_v13, %v775_v6  ;;  %v553_v62 = vadd.f32 %v521_v3, %v441_v22  ;;  %v557_v49 = vadd.f32 %v525_v40, %v445_v11  ;;  %v2058_v33 = vpop.permute.xlu1 %2057  ;;  %v10480_v20 = vld [vmem:[#allocation78_spill] sm:$0xff]  ;;  %v3510_v11 = vld [vmem:[%s9812_s6 + $0x30] sm:$0xff] }
 0x126   : > { %v891_v37 = vadd.f32 %v859_v9, %v779_v47  ;;  %v2335_v48 = vmax.f32 %v2207_v35, 0.0  ;;  %v2337_v5 = vmax.f32 %v2209_v63, 0.0  ;;  %v2334_v7 = vmax.f32 %v2206_v57, 0.0 }
 0x127   : > { %v2336_v8 = vmax.f32 %v2208_v41, 0.0  ;;  %v2215_v44 = vadd.f32 %v10479_v42, %v887_v19  ;;  %v665_v30 = vadd.f32 %v633_v56, %v553_v62  ;;  %v669_v31 = vadd.f32 %v637_v45, %v557_v49 }
 0x128   : > { %v857_v61 = vmul.f32 %v10400_v34, %v7443_v15  ;;  %3558 = vperm.xlu1 %5490, %v3508_v25   ;;  %v2211_v39 = vadd.f32 %v2058_v33, %v10480_v20  ;;  %v2213_v13 = vadd.f32 %v2058_v33, %v7371_v14  ;;  %v2210_v9 = vadd.f32 %v2058_v33, %v7407_v36 }
 0x129   : > { %v2212_v22 = vadd.f32 %v2058_v33, %v884_v0  ;;  %v2343_v3 = vmax.f32 %v2215_v44, 0.0  ;;  %v777_v40 = vadd.f32 %v745_v18, %v665_v30  ;;  %v781_v6 = vadd.f32 %v749_v54, %v669_v31  ;;  %v7493_v57 = vpop.permute.xlu1 %2067  ;;  %v10481_v0 = vld [vmem:[#allocation71_spill] sm:$0xff] }
 0x12a   : > { %v861_v56 = vmul.f32 %v10400_v34, %v10478_v50  ;;  %v2339_v45 = vmax.f32 %v2211_v39, 0.0  ;;  %v2341_v47 = vmax.f32 %v2213_v13, 0.0  ;;  %v2338_v35 = vmax.f32 %v2210_v9, 0.0  ;;  %v3512_v34 = vld [vmem:[%s9812_s6 + $0x40] sm:$0xff] }
 0x12b   : > { %v2340_v63 = vmax.f32 %v2212_v22, 0.0  ;;  %v889_v14 = vadd.f32 %v857_v61, %v777_v40  ;;  %v438_v36 = vmul.f32 %v10481_v0, %v10469_v51  ;;  %v442_v25 = vmul.f32 %v10481_v0, %v10470_v46 }
 0x12c   : > { %v893_v41 = vadd.f32 %v861_v56, %v781_v6  ;;  %3568 = vperm.xlu1 %5490, %v3510_v11   ;;  %v2487_v30 = vpack.c.bf16 %v2339_v45, %v2335_v48  ;;  %v2489_v18 = vpack.c.bf16 %v2341_v47, %v2337_v5  ;;  %v2486_v54 = vpack.c.bf16 %v2338_v35, %v2334_v7  ;;  %v3514_v56 = vld [vmem:[%s9812_s6 + $0x50] sm:$0xff] }
 0x12d   : > { %v2488_v19 = vpack.c.bf16 %v2340_v63, %v2336_v8  ;;  %v2219_v62 = vadd.f32 %v7493_v57, %v891_v37  ;;  %v2217_v49 = vadd.f32 %v10479_v42, %v889_v14  ;;  %v518_v44 = vmul.f32 %v10404_v24, %v10471_v52 }
 0x12e   : > { %v2221_v33 = vadd.f32 %v7493_v57, %v893_v41  ;;  %2898 = vmatprep.subr.bf16.mxu0 %v2487_v30  ;;  %3091 = vmatprep.subr.bf16.mxu1 %v2489_v18  ;;  %v522_v5 = vmul.f32 %v10404_v24, %v10473_v2  ;;  %v630_v7 = vmul.f32 %v10405_v58, %v10475_v17  ;;  %v10504_v41 = vld [vmem:[#allocation138_spill] sm:$0xff] }
 0x12f   : > { %v634_v48 = vmul.f32 %v10405_v58, %v7293_v43  ;;  %2899 = vmatpush1.bf16.msra.mxu0 %v2486_v54  ;;  %3092 = vmatpush1.bf16.msra.mxu1 %v2488_v19  ;;  %v2347_v31 = vmax.f32 %v2219_v62, 0.0  ;;  %v2345_v61 = vmax.f32 %v2217_v49, 0.0  ;;  %v550_v39 = vadd.f32 %v518_v44, %v438_v36  ;;  %v3516_v19 = vld [vmem:[%s9812_s6 + $0x60] sm:$0xff]  ;;  %v10484_v49 = vld [vmem:[#allocation90_spill] sm:$0xff] }
 0x130   : > { %v2349_v20 = vmax.f32 %v2221_v33, 0.0  ;;  %3578 = vperm.xlu1 %5490, %v3512_v34   ;;  %v554_v13 = vadd.f32 %v522_v5, %v442_v25  ;;  %v742_v9 = vmul.f32 %v10406_v53, %v10477_v29  ;;  %v746_v24 = vmul.f32 %v10406_v53, %v7413_v21  ;;  %v10485_v33 = vld [vmem:[#allocation9_spill] sm:$0xff] }
 0x131   : > { %v854_v22 = vmul.f32 %v10408_v59, %v7443_v15  ;;  %v2491_v58 = vpack.c.bf16 %v2347_v31, %v2343_v3  ;;  %v662_v40 = vadd.f32 %v630_v7, %v550_v39  ;;  %v858_v6 = vmul.f32 %v10408_v59, %v10478_v50 }
 0x132   : > { %v2493_v11 = vpack.c.bf16 %v2349_v20, %v2345_v61  ;;  %v666_v45 = vadd.f32 %v634_v48, %v554_v13  ;;  %v440_v47 = vmul.f32 %v10409_v28, %v10469_v51  ;;  %v444_v53 = vmul.f32 %v10409_v28, %v10470_v46  ;;  %v10486_v48 = vld [vmem:[#allocation79_spill] sm:$0xff]  ;;  %v10488_v61 = vld [vmem:[#allocation89_spill] sm:$0xff] }
 0x133   : > { %v520_v35 = vmul.f32 %v10418_v16, %v10471_v52  ;;  %2900 = vmatprep.subr.bf16.mxu0 %v2491_v58  ;;  %v774_v3 = vadd.f32 %v742_v9, %v662_v40  ;;  %v524_v59 = vmul.f32 %v10418_v16, %v10473_v2  ;;  %v632_v63 = vmul.f32 %v10419_v55, %v10475_v17  ;;  %v10489_v9 = vld [vmem:[#allocation75_spill] sm:$0xff]  ;;  %v10491_v58 = vld [vmem:[#allocation96_spill] sm:$0xff] }
 0x134   : > { %3093 = vmatprep.subr.bf16.mxu1 %v2493_v11  ;;  %v778_v0 = vadd.f32 %v746_v24, %v666_v45  ;;  %v636_v25 = vmul.f32 %v10419_v55, %v7293_v43  ;;  %v744_v28 = vmul.f32 %v10420_v10, %v10477_v29  ;;  %3588 = vperm.xlu1 %5490, %v3514_v56   ;;  %v10490_v24 = vld [vmem:[#allocation15_spill] sm:$0xff]  ;;  %v10515_v43 = vld [vmem:[#allocation52_spill] sm:$0xff] }
 0x135   : > { %v552_v36 = vadd.f32 %v520_v35, %v440_v47  ;;  %v886_v30 = vadd.f32 %v854_v22, %v774_v3  ;;  %v556_v18 = vadd.f32 %v524_v59, %v444_v53  ;;  %v748_v54 = vmul.f32 %v10420_v10, %v7413_v21  ;;  %v10487_v10 = vld [vmem:[#allocation11_spill] sm:$0xff]  ;;  %v10493_v3 = vld [vmem:[#allocation120_spill] sm:$0xff] }
 0x136   : > { %v856_v16 = vmul.f32 %v10426_v12, %v7443_v15  ;;  %v890_v34 = vadd.f32 %v858_v6, %v778_v0  ;;  %v860_v55 = vmul.f32 %v10426_v12, %v10478_v50  ;;  %v915_v44 = vmul.f32 %v10485_v33, %v10484_v49  ;;  %v10492_v6 = vld [vmem:[#allocation94_spill] sm:$0xff]  ;;  %v3518_v47 = vld [vmem:[%s9812_s6 + $0x70] sm:$0xff]  ;;  %v10495_v0 = vld [vmem:[#allocation108_spill] sm:$0xff] }
 0x137   : > { %v664_v62 = vadd.f32 %v632_v63, %v552_v36  ;;  %v2214_v5 = vadd.f32 %v10479_v42, %v886_v30  ;;  %v668_v7 = vadd.f32 %v636_v25, %v556_v18  ;;  %v959_v31 = vmul.f32 %v10487_v10, %v10486_v48  ;;  %v10494_v59 = vld [vmem:[#allocation43_spill] sm:$0xff] }
 0x138   : > { %v963_v20 = vmul.f32 %v10487_v10, %v10488_v61  ;;  %v2218_v39 = vadd.f32 %v7493_v57, %v890_v34  ;;  %v1039_v22 = vmul.f32 %v10490_v24, %v10489_v9  ;;  %v1043_v12 = vmul.f32 %v10490_v24, %v10491_v58  ;;  %3598 = vperm.xlu1 %5490, %v3516_v19   ;;  %v10496_v18 = vld [vmem:[#allocation91_spill] sm:$0xff] }
 0x139   : > { %v776_v13 = vadd.f32 %v744_v28, %v664_v62  ;;  %v2342_v11 = vmax.f32 %v2214_v5, 0.0  ;;  %v780_v40 = vadd.f32 %v748_v54, %v668_v7  ;;  %v991_v56 = vadd.f32 %v959_v31, %v10492_v6  ;;  %v10497_v54 = vld [vmem:[#allocation51_spill] sm:$0xff]  ;;  %v10499_v7 = vld [vmem:[#allocation80_spill] sm:$0xff] }
 0x13a   : > { %v995_v45 = vadd.f32 %v963_v20, %v915_v44  ;;  %v2346_v53 = vmax.f32 %v2218_v39, 0.0  ;;  %v1119_v63 = vmul.f32 %v10494_v59, %v10493_v3  ;;  %v1123_v36 = vmul.f32 %v10494_v59, %v10495_v0  ;;  %v10498_v44 = vld [vmem:[#allocation93_spill] sm:$0xff] }
 0x13b   : > { %v888_v35 = vadd.f32 %v856_v16, %v776_v13  ;;  %v892_v25 = vadd.f32 %v860_v55, %v780_v40  ;;  %v1071_v28 = vadd.f32 %v1039_v22, %v991_v56  ;;  %v1199_v19 = vmul.f32 %v10497_v54, %v10496_v18  ;;  %v10500_v16 = vld [vmem:[#allocation13_spill] sm:$0xff] }
 0x13c   : > { %v1075_v30 = vadd.f32 %v1043_v12, %v995_v45  ;;  %v2490_v34 = vpack.c.bf16 %v2346_v53, %v2342_v11  ;;  %v1203_v5 = vmul.f32 %v10497_v54, %v10498_v44  ;;  %v913_v31 = vmul.f32 %v10500_v16, %v10499_v7  ;;  %3608 = vperm.xlu1 %5490, %v3518_v47   ;;  %v3520_v22 = vld [vmem:[%s9812_s6 + $0x80] sm:$0xff]  ;;  %v7582_v12 = vpop.permute.xlu1 %2072  ;;  %v10501_v11 = vld [vmem:[#allocation14_spill] sm:$0xff] }
 0x13d   : > { %v2216_v62 = vadd.f32 %v10479_v42, %v888_v35  ;;  %v2220_v20 = vadd.f32 %v7493_v57, %v892_v25  ;;  %v1151_v39 = vadd.f32 %v1119_v63, %v1071_v28  ;;  %v917_v55 = vmul.f32 %v10500_v16, %v10484_v49  ;;  %v10502_v57 = vld [vmem:[#allocation17_spill] sm:$0xff] }
 0x13e   : > { %v1155_v13 = vadd.f32 %v1123_v36, %v1075_v30  ;;  %2901 = vmatpush1.bf16.msra.mxu0 %v2490_v34  ;;  %v961_v40 = vmul.f32 %v10501_v11, %v10486_v48  ;;  %v965_v6 = vmul.f32 %v10501_v11, %v10488_v61  ;;  %v1041_v56 = vmul.f32 %v10502_v57, %v10489_v9  ;;  %v10503_v25 = vld [vmem:[#allocation45_spill] sm:$0xff] }
 0x13f   : > { %v2344_v42 = vmax.f32 %v2216_v62, 0.0  ;;  %v2348_v45 = vmax.f32 %v2220_v20, 0.0  ;;  %v1231_v47 = vadd.f32 %v1199_v19, %v1151_v39  ;;  %v1045_v35 = vmul.f32 %v10502_v57, %v10491_v58  ;;  %v10505_v19 = vld [vmem:[#allocation53_spill] sm:$0xff] }
 0x140   : > { %v1235_v53 = vadd.f32 %v1203_v5, %v1155_v13  ;;  %v993_v63 = vadd.f32 %v961_v40, %v913_v31  ;;  %v997_v36 = vadd.f32 %v965_v6, %v917_v55  ;;  %v1121_v28 = vmul.f32 %v10503_v25, %v10493_v3  ;;  %3618 = vperm.xlu1 %5490, %v3520_v22   ;;  %v3522_v31 = vld [vmem:[%s9812_s6 + $0x90] sm:$0xff]  ;;  %v10506_v55 = vld [vmem:[#allocation6_spill] sm:$0xff] }
 0x141   : > { %v1125_v30 = vmul.f32 %v10503_v25, %v10495_v0  ;;  %v2492_v34 = vpack.c.bf16 %v2348_v45, %v2344_v42  ;;  %v2223_v62 = vadd.f32 %v7582_v12, %v1231_v47  ;;  %v1201_v5 = vmul.f32 %v10505_v19, %v10496_v18  ;;  %v10507_v45 = vld [vmem:[#allocation7_spill] sm:$0xff] }
 0x142   : > { %v2227_v37 = vadd.f32 %v10504_v41, %v1235_v53  ;;  %v1073_v20 = vadd.f32 %v1041_v56, %v993_v63  ;;  %v1077_v39 = vadd.f32 %v1045_v35, %v997_v36  ;;  %v1205_v13 = vmul.f32 %v10505_v19, %v10498_v44  ;;  %v10508_v35 = vld [vmem:[#allocation8_spill] sm:$0xff] }
 0x143   : > { %v910_v22 = vmul.f32 %v10506_v55, %v10499_v7  ;;  %3094 = vmatpush1.bf16.msra.mxu1 %v2492_v34  ;;  %v2351_v42 = vmax.f32 %v2223_v62, 0.0  ;;  %v914_v6 = vmul.f32 %v10506_v55, %v10484_v49  ;;  %v958_v47 = vmul.f32 %v10507_v45, %v10486_v48  ;;  %v10509_v34 = vld [vmem:[#allocation42_spill] sm:$0xff] }
 0x144   : > { %v2355_v40 = vmax.f32 %v2227_v37, 0.0  ;;  %v1153_v53 = vadd.f32 %v1121_v28, %v1073_v20  ;;  %v1157_v14 = vadd.f32 %v1125_v30, %v1077_v39  ;;  %v962_v56 = vmul.f32 %v10507_v45, %v10488_v61  ;;  %3628 = vperm.xlu1 %5490, %v3522_v31   ;;  %v3524_v28 = vld [vmem:[%s9812_s6 + $0xa0] sm:$0xff] }
 0x145   : > { %v1038_v63 = vmul.f32 %v10508_v35, %v10489_v9  ;;  %v990_v8 = vadd.f32 %v958_v47, %v910_v22  ;;  %v1042_v37 = vmul.f32 %v10508_v35, %v10491_v58  ;;  %v1118_v62 = vmul.f32 %v10509_v34, %v10493_v3  ;;  %v10510_v22 = vld [vmem:[#allocation50_spill] sm:$0xff] }
 0x146   : > { %v2495_v36 = vpack.c.bf16 %v2355_v40, %v2351_v42  ;;  %v1233_v30 = vadd.f32 %v1201_v5, %v1153_v53  ;;  %v1237_v20 = vadd.f32 %v1205_v13, %v1157_v14  ;;  %v994_v39 = vadd.f32 %v962_v56, %v914_v6  ;;  %v10511_v47 = vld [vmem:[#allocation10_spill] sm:$0xff] }
 0x147   : > { %v1122_v50 = vmul.f32 %v10509_v34, %v10495_v0  ;;  %v1070_v31 = vadd.f32 %v1038_v63, %v990_v8  ;;  %v1198_v42 = vmul.f32 %v10510_v22, %v10496_v18  ;;  %v1202_v40 = vmul.f32 %v10510_v22, %v10498_v44  ;;  %v10512_v8 = vld [vmem:[#allocation12_spill] sm:$0xff] }
 0x148   : > { %2902 = vmatprep.subr.bf16.mxu0 %v2495_v36  ;;  %v912_v15 = vmul.f32 %v10511_v47, %v10499_v7  ;;  %v2225_v21 = vadd.f32 %v7582_v12, %v1233_v30  ;;  %v2229_v5 = vadd.f32 %v10504_v41, %v1237_v20  ;;  %v1074_v14 = vadd.f32 %v1042_v37, %v994_v39  ;;  %v10513_v63 = vld [vmem:[#allocation16_spill] sm:$0xff]  ;;  %v3526_v30 = vld [vmem:[%s9812_s6 + $0xb0] sm:$0xff] }
 0x149   : > { %v916_v13 = vmul.f32 %v10511_v47, %v10484_v49  ;;  %3638 = vperm.xlu1 %5490, %v3524_v28   ;;  %v1150_v6 = vadd.f32 %v1118_v62, %v1070_v31  ;;  %v960_v53 = vmul.f32 %v10512_v8, %v10486_v48  ;;  %v964_v56 = vmul.f32 %v10512_v8, %v10488_v61  ;;  %v10514_v48 = vld [vmem:[#allocation44_spill] sm:$0xff] }
 0x14a   : > { %v1040_v36 = vmul.f32 %v10513_v63, %v10489_v9  ;;  %v2353_v20 = vmax.f32 %v2225_v21, 0.0  ;;  %v2357_v37 = vmax.f32 %v2229_v5, 0.0  ;;  %v1154_v39 = vadd.f32 %v1122_v50, %v1074_v14  ;;  %v10517_v14 = vld [vmem:[#allocation100_spill] sm:$0xff] }
 0x14b   : > { %v1044_v49 = vmul.f32 %v10513_v63, %v10491_v58  ;;  %v1230_v62 = vadd.f32 %v1198_v42, %v1150_v6  ;;  %v992_v28 = vadd.f32 %v960_v53, %v912_v15  ;;  %v996_v31 = vadd.f32 %v964_v56, %v916_v13  ;;  %v10516_v42 = vld [vmem:[#allocation98_spill] sm:$0xff]  ;;  %v10518_v13 = vld [vmem:[#allocation109_spill] sm:$0xff] }
 0x14c   : > { %v1120_v7 = vmul.f32 %v10514_v48, %v10493_v3  ;;  %v2497_v61 = vpack.c.bf16 %v2357_v37, %v2353_v20  ;;  %v1234_v29 = vadd.f32 %v1202_v40, %v1154_v39  ;;  %v1124_v9 = vmul.f32 %v10514_v48, %v10495_v0  ;;  %v10520_v39 = vld [vmem:[#allocation133_spill] sm:$0xff] }
 0x14d   : > { %v1200_v17 = vmul.f32 %v10515_v43, %v10496_v18  ;;  %3648 = vperm.xlu1 %5490, %v3526_v30   ;;  %v2222_v21 = vadd.f32 %v7582_v12, %v1230_v62  ;;  %v1072_v50 = vadd.f32 %v1040_v36, %v992_v28  ;;  %v1076_v5 = vadd.f32 %v1044_v49, %v996_v31  ;;  %v10519_v36 = vld [vmem:[#allocation95_spill] sm:$0xff] }
 0x14e   : > { %v1204_v15 = vmul.f32 %v10515_v43, %v10498_v44  ;;  %3095 = vmatprep.subr.bf16.mxu1 %v2497_v61  ;;  %v2226_v58 = vadd.f32 %v10504_v41, %v1234_v29  ;;  %v919_v40 = vmul.f32 %v10485_v33, %v10516_v42  ;;  %v967_v0 = vmul.f32 %v10487_v10, %v10517_v14 }
 0x14f   : > { %v1047_v6 = vmul.f32 %v10490_v24, %v10518_v13  ;;  %v2350_v53 = vmax.f32 %v2222_v21, 0.0  ;;  %v1152_v56 = vadd.f32 %v1120_v7, %v1072_v50  ;;  %v1156_v30 = vadd.f32 %v1124_v9, %v1076_v5 }
 0x150   : > { %v1127_v20 = vmul.f32 %v10494_v59, %v10519_v36  ;;  %v2354_v37 = vmax.f32 %v2226_v58, 0.0  ;;  %v999_v44 = vadd.f32 %v967_v0, %v919_v40  ;;  %v1207_v29 = vmul.f32 %v10497_v54, %v10520_v39 }
 0x151   : > { %v921_v49 = vmul.f32 %v10500_v16, %v10516_v42  ;;  %v1232_v62 = vadd.f32 %v1200_v17, %v1152_v56  ;;  %v1236_v28 = vadd.f32 %v1204_v15, %v1156_v30  ;;  %v969_v31 = vmul.f32 %v10501_v11, %v10517_v14  ;;  %v2083_v56 = vpop.permute.xlu1 %2082 }
 0x152   : > { %v1049_v7 = vmul.f32 %v10502_v57, %v10518_v13  ;;  %v2494_v9 = vpack.c.bf16 %v2354_v37, %v2350_v53  ;;  %v1079_v61 = vadd.f32 %v1047_v6, %v999_v44  ;;  %v1129_v21 = vmul.f32 %v10503_v25, %v10519_v36 }
 0x153   : > { %v1209_v50 = vmul.f32 %v10505_v19, %v10520_v39  ;;  %v2224_v5 = vadd.f32 %v7582_v12, %v1232_v62  ;;  %v2228_v58 = vadd.f32 %v10504_v41, %v1236_v28  ;;  %v1001_v17 = vadd.f32 %v969_v31, %v921_v49 }
 0x154   : > { %v918_v15 = vmul.f32 %v10506_v55, %v10516_v42  ;;  %2903 = vmatpush1.bf16.msra.mxu0 %v2494_v9  ;;  %v1159_v40 = vadd.f32 %v1127_v20, %v1079_v61  ;;  %v966_v0 = vmul.f32 %v10507_v45, %v10517_v14  ;;  %v1046_v6 = vmul.f32 %v10508_v35, %v10518_v13 }
 0x155   : > { %v1126_v53 = vmul.f32 %v10509_v34, %v10519_v36  ;;  %v2352_v30 = vmax.f32 %v2224_v5, 0.0  ;;  %v2356_v12 = vmax.f32 %v2228_v58, 0.0  ;;  %v1081_v37 = vadd.f32 %v1049_v7, %v1001_v17 }
 0x156   : > { %v1206_v41 = vmul.f32 %v10510_v22, %v10520_v39  ;;  %v1239_v44 = vadd.f32 %v1207_v29, %v1159_v40  ;;  %v998_v49 = vadd.f32 %v966_v0, %v918_v15  ;;  %v920_v20 = vmul.f32 %v10511_v47, %v10516_v42 }
 0x157   : > { %v968_v62 = vmul.f32 %v10512_v8, %v10517_v14  ;;  %v2496_v28 = vpack.c.bf16 %v2356_v12, %v2352_v30  ;;  %v1161_v31 = vadd.f32 %v1129_v21, %v1081_v37  ;;  %v1048_v9 = vmul.f32 %v10513_v63, %v10518_v13  ;;  %v10523_v13 = vld [vmem:[#allocation84_spill] sm:$0xff] }
 0x158   : > { %v1128_v61 = vmul.f32 %v10514_v48, %v10519_v36  ;;  %v2231_v7 = vadd.f32 %v2083_v56, %v1239_v44  ;;  %v1078_v5 = vadd.f32 %v1046_v6, %v998_v49  ;;  %v1208_v29 = vmul.f32 %v10515_v43, %v10520_v39 }
 0x159   : > { %v1000_v58 = vadd.f32 %v968_v62, %v920_v20  ;;  %3096 = vmatpush1.bf16.msra.mxu1 %v2496_v28  ;;  %v1241_v17 = vadd.f32 %v1209_v50, %v1161_v31  ;;  %v927_v15 = vmul.f32 %v10485_v33, %v10427_v23  ;;  %v931_v21 = vmul.f32 %v10485_v33, %v10429_v1  ;;  %v3529_v20 = vld [vmem:[%s9812_s6 + $0xc8] sm:$0xff]  ;;  %v10521_v62 = vld [vmem:[#allocation69_spill] sm:$0xff] }
 0x15a   : > { %v975_v40 = vmul.f32 %v10487_v10, %v10431_v32  ;;  %v2359_v0 = vmax.f32 %v2231_v7, 0.0  ;;  %v1158_v30 = vadd.f32 %v1126_v53, %v1078_v5  ;;  %v979_v6 = vmul.f32 %v10487_v10, %v10433_v60  ;;  %3663 = vperm.xlu1 %5490, %v3529_v20  }
 0x15b   : > { %v1080_v12 = vadd.f32 %v1048_v9, %v1000_v58  ;;  %v2233_v37 = vadd.f32 %v2083_v56, %v1241_v17  ;;  %v1055_v50 = vmul.f32 %v10490_v24, %v10435_v38  ;;  %v1059_v49 = vmul.f32 %v10490_v24, %v7025_v4 }
 0x15c   : > { %v1007_v44 = vadd.f32 %v975_v40, %v927_v15  ;;  %v10522_v28 = vmax.f32 %v10521_v62, 0.0  ;;  %v1238_v53 = vadd.f32 %v1206_v41, %v1158_v30  ;;  %v1011_v7 = vadd.f32 %v979_v6, %v931_v21  ;;  %v10526_v30 = vld [vmem:[#allocation102_spill] sm:$0xff] }
 0x15d   : > { %v1160_v9 = vadd.f32 %v1128_v61, %v1080_v12  ;;  %v2361_v5 = vmax.f32 %v2233_v37, 0.0  ;;  %v1135_v17 = vmul.f32 %v10494_v59, %v7232_v26  ;;  %v1139_v15 = vmul.f32 %v10494_v59, %v7255_v27  ;;  %v7726_v37 = vpop.permute.xlu1 %2092 }
 0x15e   : > { %v2499_v31 = vpack.c.bf16 %v10522_v28, %v2359_v0  ;;  %v1087_v58 = vadd.f32 %v1055_v50, %v1007_v44  ;;  %v2230_v40 = vadd.f32 %v2083_v56, %v1238_v53  ;;  %v1091_v36 = vadd.f32 %v1059_v49, %v1011_v7  ;;  %v10524_v0 = vld [vmem:[#allocation76_spill] sm:$0xff] }
 0x15f   : > { %v1240_v39 = vadd.f32 %v1208_v29, %v1160_v9  ;;  %v1215_v62 = vmul.f32 %v10497_v54, %v10523_v13  ;;  %v10525_v41 = vmax.f32 %v10524_v0, 0.0  ;;  %v1219_v12 = vmul.f32 %v10497_v54, %v10526_v30  ;;  %v10527_v9 = vld [vmem:[#allocation81_spill] sm:$0xff] }
 0x160   : > { %2904 = vmatprep.subr.bf16.mxu0 %v2499_v31  ;;  %v1167_v21 = vadd.f32 %v1135_v17, %v1087_v58  ;;  %v929_v6 = vmul.f32 %v10500_v16, %v10427_v23  ;;  %v2358_v44 = vmax.f32 %v2230_v40, 0.0  ;;  %v1171_v20 = vadd.f32 %v1139_v15, %v1091_v36 }
 0x161   : > { %v2501_v61 = vpack.c.bf16 %v10525_v41, %v2361_v5  ;;  %v2232_v50 = vadd.f32 %v2083_v56, %v1240_v39  ;;  %v933_v29 = vmul.f32 %v10500_v16, %v10429_v1  ;;  %v977_v28 = vmul.f32 %v10501_v11, %v10431_v32 }
 0x162   : > { %v1247_v49 = vadd.f32 %v1215_v62, %v1167_v21  ;;  %v981_v31 = vmul.f32 %v10501_v11, %v10433_v60  ;;  %v1057_v53 = vmul.f32 %v10502_v57, %v10435_v38  ;;  %v10528_v7 = vmax.f32 %v10527_v9, 0.0  ;;  %v10529_v62 = vld [vmem:[#allocation70_spill] sm:$0xff] }
 0x163   : > { %3097 = vmatprep.subr.bf16.mxu1 %v2501_v61  ;;  %v2360_v58 = vmax.f32 %v2232_v50, 0.0  ;;  %v1251_v39 = vadd.f32 %v1219_v12, %v1171_v20  ;;  %v1061_v36 = vmul.f32 %v10502_v57, %v7025_v4  ;;  %v1009_v17 = vadd.f32 %v977_v28, %v929_v6  ;;  %v10531_v61 = vld [vmem:[#allocation85_spill] sm:$0xff] }
 0x164   : > { %v2498_v5 = vpack.c.bf16 %v10528_v7, %v2358_v44  ;;  %v2239_v56 = vadd.f32 %v7726_v37, %v1247_v49  ;;  %v1013_v15 = vadd.f32 %v981_v31, %v933_v29  ;;  %v1137_v40 = vmul.f32 %v10503_v25, %v7232_v26 }
 0x165   : > { %v10530_v0 = vmax.f32 %v10529_v62, 0.0  ;;  %v2243_v21 = vadd.f32 %v10531_v61, %v1251_v39  ;;  %v1141_v44 = vmul.f32 %v10503_v25, %v7255_v27  ;;  %v1217_v12 = vmul.f32 %v10505_v19, %v10523_v13 }
 0x166   : > { %2905 = vmatpush1.bf16.msra.mxu0 %v2498_v5  ;;  %v2367_v50 = vmax.f32 %v2239_v56, 0.0  ;;  %v1089_v20 = vadd.f32 %v1057_v53, %v1009_v17  ;;  %v1093_v49 = vadd.f32 %v1061_v36, %v1013_v15  ;;  %v1221_v6 = vmul.f32 %v10505_v19, %v10526_v30 }
 0x167   : > { %v2500_v41 = vpack.c.bf16 %v10530_v0, %v2360_v58  ;;  %v2371_v29 = vmax.f32 %v2243_v21, 0.0  ;;  %v926_v28 = vmul.f32 %v10506_v55, %v10427_v23  ;;  %v930_v31 = vmul.f32 %v10506_v55, %v10429_v1 }
 0x168   : > { %v974_v9 = vmul.f32 %v10507_v45, %v10431_v32  ;;  %v1169_v7 = vadd.f32 %v1137_v40, %v1089_v20  ;;  %v1173_v5 = vadd.f32 %v1141_v44, %v1093_v49  ;;  %v978_v53 = vmul.f32 %v10507_v45, %v10433_v60 }
 0x169   : > { %3098 = vmatpush1.bf16.msra.mxu1 %v2500_v41  ;;  %v1054_v58 = vmul.f32 %v10508_v35, %v10435_v38  ;;  %v2503_v39 = vpack.c.bf16 %v2371_v29, %v2367_v50  ;;  %v1058_v56 = vmul.f32 %v10508_v35, %v7025_v4  ;;  %v1134_v17 = vmul.f32 %v10509_v34, %v7232_v26 }
 0x16a   : > { %v1006_v36 = vadd.f32 %v974_v9, %v926_v28  ;;  %v1249_v15 = vadd.f32 %v1217_v12, %v1169_v7  ;;  %v1253_v62 = vadd.f32 %v1221_v6, %v1173_v5  ;;  %v1010_v0 = vadd.f32 %v978_v53, %v930_v31 }
 0x16b   : > { %v1138_v40 = vmul.f32 %v10509_v34, %v7255_v27  ;;  %2906 = vmatprep.subr.bf16.mxu0 %v2503_v39  ;;  %v1214_v21 = vmul.f32 %v10510_v22, %v10523_v13  ;;  %v1218_v44 = vmul.f32 %v10510_v22, %v10526_v30  ;;  %v928_v50 = vmul.f32 %v10511_v47, %v10427_v23 }
 0x16c   : > { %v1086_v41 = vadd.f32 %v1054_v58, %v1006_v36  ;;  %v2241_v20 = vadd.f32 %v7726_v37, %v1249_v15  ;;  %v2245_v12 = vadd.f32 %v10531_v61, %v1253_v62  ;;  %v1090_v49 = vadd.f32 %v1058_v56, %v1010_v0 }
 0x16d   : > { %v932_v6 = vmul.f32 %v10511_v47, %v10429_v1  ;;  %v976_v28 = vmul.f32 %v10512_v8, %v10431_v32  ;;  %v980_v31 = vmul.f32 %v10512_v8, %v10433_v60  ;;  %v1056_v9 = vmul.f32 %v10513_v63, %v10435_v38 }
 0x16e   : > { %v1166_v29 = vadd.f32 %v1134_v17, %v1086_v41  ;;  %v2369_v7 = vmax.f32 %v2241_v20, 0.0  ;;  %v2373_v5 = vmax.f32 %v2245_v12, 0.0  ;;  %v1170_v53 = vadd.f32 %v1138_v40, %v1090_v49 }
 0x16f   : > { %v1060_v58 = vmul.f32 %v10513_v63, %v7025_v4  ;;  %v1008_v36 = vadd.f32 %v976_v28, %v928_v50  ;;  %v1012_v56 = vadd.f32 %v980_v31, %v932_v6  ;;  %v1136_v17 = vmul.f32 %v10514_v48, %v7232_v26 }
 0x170   : > { %v1246_v39 = vadd.f32 %v1214_v21, %v1166_v29  ;;  %v2505_v15 = vpack.c.bf16 %v2373_v5, %v2369_v7  ;;  %v1250_v62 = vadd.f32 %v1218_v44, %v1170_v53  ;;  %v1140_v0 = vmul.f32 %v10514_v48, %v7255_v27  ;;  %v3531_v7 = vld [vmem:[%s9812_s6 + $0xd8] sm:$0xff] }
 0x171   : > { %v1216_v41 = vmul.f32 %v10515_v43, %v10523_v13  ;;  %v1088_v40 = vadd.f32 %v1056_v9, %v1008_v36  ;;  %v1092_v12 = vadd.f32 %v1060_v58, %v1012_v56  ;;  %v1220_v21 = vmul.f32 %v10515_v43, %v10526_v30  ;;  %v10532_v58 = vld [vmem:[#allocation110_spill] sm:$0xff]  ;;  %v10533_v36 = vld [vmem:[#allocation115_spill] sm:$0xff]  ;;  %3673 = vperm.xlu1 %5490, %v3531_v7  }
 0x172   : > { %v2238_v20 = vadd.f32 %v7726_v37, %v1246_v39  ;;  %3099 = vmatprep.subr.bf16.mxu1 %v2505_v15  ;;  %v2242_v50 = vadd.f32 %v10531_v61, %v1250_v62  ;;  %v935_v49 = vmul.f32 %v10485_v33, %v10469_v51  ;;  %v939_v44 = vmul.f32 %v10485_v33, %v10470_v46  ;;  %v10534_v62 = vld [vmem:[#allocation125_spill] sm:$0xff]  ;;  %v10537_v7 = vld [vmem:[#allocation131_spill] sm:$0xff] }
 0x173   : > { %v983_v6 = vmul.f32 %v10487_v10, %v10471_v52  ;;  %v1168_v28 = vadd.f32 %v1136_v17, %v1088_v40  ;;  %v1172_v31 = vadd.f32 %v1140_v0, %v1092_v12  ;;  %v987_v9 = vmul.f32 %v10487_v10, %v10473_v2  ;;  %v10535_v40 = vld [vmem:[#allocation121_spill] sm:$0xff] }
 0x174   : > { %v2366_v29 = vmax.f32 %v2238_v20, 0.0  ;;  %v2370_v5 = vmax.f32 %v2242_v50, 0.0  ;;  %v1063_v39 = vmul.f32 %v10490_v24, %v10532_v58  ;;  %v1067_v33 = vmul.f32 %v10490_v24, %v10533_v36  ;;  %v10536_v50 = vld [vmem:[#allocation122_spill] sm:$0xff] }
 0x175   : > { %v1015_v53 = vadd.f32 %v983_v6, %v935_v49  ;;  %v1248_v56 = vadd.f32 %v1216_v41, %v1168_v28  ;;  %v1252_v15 = vadd.f32 %v1220_v21, %v1172_v31  ;;  %v1019_v17 = vadd.f32 %v987_v9, %v939_v44  ;;  %v4371_v21 = vld [vmem:[%s9813_s7 + $0x8] sm:$0xff] }
 0x176   : > { %v1143_v0 = vmul.f32 %v10494_v59, %v10534_v62  ;;  %v2502_v10 = vpack.c.bf16 %v2370_v5, %v2366_v29  ;;  %v1147_v12 = vmul.f32 %v10494_v59, %v10535_v40  ;;  %v1223_v49 = vmul.f32 %v10497_v54, %v10536_v50  ;;  %4386 = vperm.xlu1 %5490, %v4371_v21  }
 0x177   : > { %v1095_v20 = vadd.f32 %v1063_v39, %v1015_v53  ;;  %v2240_v6 = vadd.f32 %v7726_v37, %v1248_v56  ;;  %v2244_v30 = vadd.f32 %v10531_v61, %v1252_v15  ;;  %v1099_v24 = vadd.f32 %v1067_v33, %v1019_v17  ;;  %v7830_v61 = vpop.permute.xlu1 %2102 }
 0x178   : > { %v1227_v41 = vmul.f32 %v10497_v54, %v10537_v7  ;;  %2907 = vmatpush1.bf16.msra.mxu0 %v2502_v10  ;;  %v937_v59 = vmul.f32 %v10500_v16, %v10469_v51  ;;  %v941_v29 = vmul.f32 %v10500_v16, %v10470_v46  ;;  %v985_v37 = vmul.f32 %v10501_v11, %v10471_v52 }
 0x179   : > { %v1175_v44 = vadd.f32 %v1143_v0, %v1095_v20  ;;  %v2368_v28 = vmax.f32 %v2240_v6, 0.0  ;;  %v2372_v31 = vmax.f32 %v2244_v30, 0.0  ;;  %v1179_v54 = vadd.f32 %v1147_v12, %v1099_v24  ;;  %v10538_v20 = vld [vmem:[#allocation127_spill] sm:$0xff] }
 0x17a   : > { %v989_v9 = vmul.f32 %v10501_v11, %v10473_v2  ;;  %v1017_v53 = vadd.f32 %v985_v37, %v937_v59  ;;  %v1065_v39 = vmul.f32 %v10502_v57, %v10532_v58  ;;  %v1069_v16 = vmul.f32 %v10502_v57, %v10533_v36 }
 0x17b   : > { %v1255_v5 = vadd.f32 %v1223_v49, %v1175_v44  ;;  %v2504_v33 = vpack.c.bf16 %v2372_v31, %v2368_v28  ;;  %v1259_v56 = vadd.f32 %v1227_v41, %v1179_v54  ;;  %v1145_v17 = vmul.f32 %v10503_v25, %v10534_v62 }
 0x17c   : > { %v1021_v15 = vadd.f32 %v989_v9, %v941_v29  ;;  %v1097_v0 = vadd.f32 %v1065_v39, %v1017_v53  ;;  %v1149_v11 = vmul.f32 %v10503_v25, %v10535_v40  ;;  %v1225_v10 = vmul.f32 %v10505_v19, %v10536_v50 }
 0x17d   : > { %v2247_v30 = vadd.f32 %v7830_v61, %v1255_v5  ;;  %3100 = vmatpush1.bf16.msra.mxu1 %v2504_v33  ;;  %v2251_v12 = vadd.f32 %v10538_v20, %v1259_v56  ;;  %v1229_v57 = vmul.f32 %v10505_v19, %v10537_v7  ;;  %v934_v6 = vmul.f32 %v10506_v55, %v10469_v51 }
 0x17e   : > { %v1101_v49 = vadd.f32 %v1069_v16, %v1021_v15  ;;  %v1177_v41 = vadd.f32 %v1145_v17, %v1097_v0  ;;  %v938_v44 = vmul.f32 %v10506_v55, %v10470_v46  ;;  %v982_v25 = vmul.f32 %v10507_v45, %v10471_v52 }
 0x17f   : > { %v2375_v24 = vmax.f32 %v2247_v30, 0.0  ;;  %v10539_v59 = vmov 1   ;;  %v2379_v29 = vmax.f32 %v2251_v12, 0.0  ;;  %v986_v28 = vmul.f32 %v10507_v45, %v10473_v2 }
 0x180   : > { %5494 = vset.pattern.permute.xlu1 %v10539_v59  ;;  %v1181_v37 = vadd.f32 %v1149_v11, %v1101_v49  ;;  %v1062_v19 = vmul.f32 %v10508_v35, %v10532_v58  ;;  %v1257_v31 = vadd.f32 %v1225_v10, %v1177_v41  ;;  %v1014_v54 = vadd.f32 %v982_v25, %v934_v6 }
 0x181   : > { %4517 = vperm.xlu1 %5494, %v4371_v21   ;;  %v1066_v9 = vmul.f32 %v10508_v35, %v10533_v36  ;;  %v1142_v55 = vmul.f32 %v10509_v34, %v10534_v62  ;;  %v2507_v5 = vpack.c.bf16 %v2379_v29, %v2375_v24  ;;  %v1018_v39 = vadd.f32 %v986_v28, %v938_v44 }
 0x182   : > { %v1261_v53 = vadd.f32 %v1229_v57, %v1181_v37  ;;  %v1146_v16 = vmul.f32 %v10509_v34, %v10535_v40  ;;  %v2249_v45 = vadd.f32 %v7830_v61, %v1257_v31  ;;  %v1094_v33 = vadd.f32 %v1062_v19, %v1014_v54 }
 0x183   : > { %v1222_v21 = vmul.f32 %v10510_v22, %v10536_v50  ;;  %v1226_v56 = vmul.f32 %v10510_v22, %v10537_v7  ;;  %2908 = vmatprep.subr.bf16.mxu0 %v2507_v5  ;;  %v1098_v15 = vadd.f32 %v1066_v9, %v1018_v39  ;;  %v936_v17 = vmul.f32 %v10511_v47, %v10469_v51  ;;  %v10541_v9 = vld [vmem:[#allocation80_spill] sm:$0xff]  ;;  %v10544_v39 = vld [vmem:[#allocation23_spill] sm:$0xff] }
 0x184   : > { %v2253_v35 = vadd.f32 %v10538_v20, %v1261_v53  ;;  %v940_v30 = vmul.f32 %v10511_v47, %v10470_v46  ;;  %v2377_v34 = vmax.f32 %v2249_v45, 0.0  ;;  %v1174_v0 = vadd.f32 %v1142_v55, %v1094_v33  ;;  %v10542_v55 = vld [vmem:[#allocation19_spill] sm:$0xff]  ;;  %v10577_v46 = vld [vmem:[#allocation114_spill] sm:$0xff] }
 0x185   : > { %v984_v11 = vmul.f32 %v10512_v8, %v10471_v52  ;;  %v988_v10 = vmul.f32 %v10512_v8, %v10473_v2  ;;  %v10540_v12 = vmov 0   ;;  %v1178_v49 = vadd.f32 %v1146_v16, %v1098_v15  ;;  %v10543_v53 = vld [vmem:[#allocation79_spill] sm:$0xff] }
 0x186   : > { %5495 = vset.pattern.permute.xlu1 %v10540_v12  ;;  %v2381_v22 = vmax.f32 %v2253_v35, 0.0  ;;  %v1064_v57 = vmul.f32 %v10513_v63, %v10532_v58  ;;  %v1068_v6 = vmul.f32 %v10513_v63, %v10533_v36  ;;  %v1254_v24 = vadd.f32 %v1222_v21, %v1174_v0  ;;  %v10546_v45 = vld [vmem:[#allocation27_spill] sm:$0xff]  ;;  %v10564_v36 = vld [vmem:[#allocation58_spill] sm:$0xff] }
 0x187   : > { %v1016_v47 = vadd.f32 %v984_v11, %v936_v17  ;;  %v1020_v41 = vadd.f32 %v988_v10, %v940_v30  ;;  %v1144_v44 = vmul.f32 %v10514_v48, %v10534_v62  ;;  %v1258_v29 = vadd.f32 %v1226_v56, %v1178_v49  ;;  %v10547_v15 = vld [vmem:[#allocation47_spill] sm:$0xff]  ;;  %v10549_v11 = vld [vmem:[#allocation21_spill] sm:$0xff] }
 0x188   : > { %v2509_v25 = vpack.c.bf16 %v2381_v22, %v2377_v34  ;;  %v1148_v8 = vmul.f32 %v10514_v48, %v10535_v40  ;;  %v1224_v37 = vmul.f32 %v10515_v43, %v10536_v50  ;;  %v2246_v28 = vadd.f32 %v7830_v61, %v1254_v24  ;;  %v10545_v48 = vld [vmem:[#allocation75_spill] sm:$0xff]  ;;  %v10551_v24 = vld [vmem:[#allocation29_spill] sm:$0xff] }
 0x189   : > { %v1096_v19 = vadd.f32 %v1064_v57, %v1016_v47  ;;  %v1100_v31 = vadd.f32 %v1068_v6, %v1020_v41  ;;  %v1228_v63 = vmul.f32 %v10515_v43, %v10537_v7  ;;  %v2250_v54 = vadd.f32 %v10538_v20, %v1258_v29  ;;  %v10548_v34 = vld [vmem:[#allocation59_spill] sm:$0xff]  ;;  %v10550_v57 = vld [vmem:[#allocation25_spill] sm:$0xff]  ;;  %v7910_v41 = vpop.permute.xlu1 %2112 }
 0x18a   : > { %3101 = vmatprep.subr.bf16.mxu1 %v2509_v25  ;;  %v1279_v5 = vmul.f32 %v10542_v55, %v10541_v9  ;;  %v1327_v16 = vmul.f32 %v10544_v39, %v10543_v53  ;;  %v1407_v33 = vmul.f32 %v10546_v45, %v10545_v48  ;;  %v2374_v21 = vmax.f32 %v2246_v28, 0.0  ;;  %v10552_v29 = vld [vmem:[#allocation49_spill] sm:$0xff] }
 0x18b   : > { %v1176_v56 = vadd.f32 %v1144_v44, %v1096_v19  ;;  %v1180_v35 = vadd.f32 %v1148_v8, %v1100_v31  ;;  %v1487_v17 = vmul.f32 %v10547_v15, %v10493_v3  ;;  %v2378_v30 = vmax.f32 %v2250_v54, 0.0  ;;  %v10553_v28 = vld [vmem:[#allocation61_spill] sm:$0xff]  ;;  %v10554_v54 = vld [vmem:[#allocation18_spill] sm:$0xff] }
 0x18c   : > { %v1359_v43 = vadd.f32 %v1327_v16, %v1279_v5  ;;  %v1567_v0 = vmul.f32 %v10548_v34, %v10496_v18  ;;  %v1281_v10 = vmul.f32 %v10549_v11, %v10541_v9  ;;  %v1329_v6 = vmul.f32 %v10550_v57, %v10543_v53 }
 0x18d   : > { %v1256_v22 = vadd.f32 %v1224_v37, %v1176_v56  ;;  %v1260_v49 = vadd.f32 %v1228_v63, %v1180_v35  ;;  %v1409_v47 = vmul.f32 %v10551_v24, %v10545_v48  ;;  %v2506_v44 = vpack.c.bf16 %v2378_v30, %v2374_v21 }
 0x18e   : > { %v1439_v25 = vadd.f32 %v1407_v33, %v1359_v43  ;;  %v1489_v8 = vmul.f32 %v10552_v29, %v10493_v3  ;;  %v1569_v19 = vmul.f32 %v10553_v28, %v10496_v18  ;;  %v1361_v63 = vadd.f32 %v1329_v6, %v1281_v10  ;;  %v10555_v33 = vld [vmem:[#allocation20_spill] sm:$0xff] }
 0x18f   : > { %v2248_v31 = vadd.f32 %v7830_v61, %v1256_v22  ;;  %v2252_v37 = vadd.f32 %v10538_v20, %v1260_v49  ;;  %v1294_v5 = vmul.f32 %v10554_v54, %v10427_v23  ;;  %2909 = vmatpush1.bf16.msra.mxu0 %v2506_v44  ;;  %v1295_v21 = vmul.f32 %v10542_v55, %v10427_v23  ;;  %v10556_v20 = vld [vmem:[#allocation22_spill] sm:$0xff] }
 0x190   : > { %v1519_v16 = vadd.f32 %v1487_v17, %v1439_v25  ;;  %v1296_v56 = vmul.f32 %v10555_v33, %v10427_v23  ;;  %v1297_v35 = vmul.f32 %v10549_v11, %v10427_v23  ;;  %v1441_v61 = vadd.f32 %v1409_v47, %v1361_v63  ;;  %v10557_v17 = vld [vmem:[#allocation24_spill] sm:$0xff]  ;;  %v7936_v47 = vpop.permute.xlu1 %2122 }
 0x191   : > { %v2376_v30 = vmax.f32 %v2248_v31, 0.0  ;;  %v2380_v43 = vmax.f32 %v2252_v37, 0.0  ;;  %v1342_v10 = vmul.f32 %v10556_v20, %v10431_v32  ;;  %v1343_v49 = vmul.f32 %v10544_v39, %v10431_v32  ;;  %v10558_v31 = vld [vmem:[#allocation26_spill] sm:$0xff] }
 0x192   : > { %v1599_v22 = vadd.f32 %v1567_v0, %v1519_v16  ;;  %v1344_v6 = vmul.f32 %v10557_v17, %v10431_v32  ;;  %v1345_v44 = vmul.f32 %v10550_v57, %v10431_v32  ;;  %v1521_v59 = vadd.f32 %v1489_v8, %v1441_v61  ;;  %v10559_v32 = vld [vmem:[#allocation28_spill] sm:$0xff]  ;;  %v10560_v61 = vld [vmem:[#allocation46_spill] sm:$0xff] }
 0x193   : > { %v2508_v25 = vpack.c.bf16 %v2380_v43, %v2376_v30  ;;  %v1374_v12 = vadd.f32 %v1342_v10, %v1294_v5  ;;  %v1422_v37 = vmul.f32 %v10558_v31, %v10435_v38  ;;  %v1375_v0 = vadd.f32 %v1343_v49, %v1295_v21 }
 0x194   : > { %v2255_v63 = vadd.f32 %v7910_v41, %v1599_v22  ;;  %v1376_v16 = vadd.f32 %v1344_v6, %v1296_v56  ;;  %v1377_v23 = vadd.f32 %v1345_v44, %v1297_v35  ;;  %v1601_v7 = vadd.f32 %v1569_v19, %v1521_v59  ;;  %v10561_v22 = vld [vmem:[#allocation130_spill] sm:$0xff]  ;;  %v10563_v44 = vld [vmem:[#allocation48_spill] sm:$0xff] }
 0x195   : > { %3102 = vmatpush1.bf16.msra.mxu1 %v2508_v25  ;;  %v1423_v40 = vmul.f32 %v10546_v45, %v10435_v38  ;;  %v1424_v30 = vmul.f32 %v10559_v32, %v10435_v38  ;;  %v1425_v8 = vmul.f32 %v10551_v24, %v10435_v38  ;;  %v1454_v43 = vadd.f32 %v1422_v37, %v1374_v12 }
 0x196   : > { %v2383_v5 = vmax.f32 %v2255_v63, 0.0  ;;  %v1502_v10 = vmul.f32 %v10560_v61, %v7232_v26  ;;  %v1503_v21 = vmul.f32 %v10547_v15, %v7232_v26  ;;  %v2257_v56 = vadd.f32 %v7910_v41, %v1601_v7 }
 0x197   : > { %v1455_v59 = vadd.f32 %v1423_v40, %v1375_v0  ;;  %v1456_v19 = vadd.f32 %v1424_v30, %v1376_v16  ;;  %v1457_v35 = vadd.f32 %v1425_v8, %v1377_v23  ;;  %v10562_v49 = vmax.f32 %v10561_v22, 0.0  ;;  %v2133_v23 = vpop.permute.xlu1 %2132  ;;  %v10565_v16 = vld [vmem:[#allocation60_spill] sm:$0xff] }
 0x198   : > { %v1504_v25 = vmul.f32 %v10563_v44, %v7232_v26  ;;  %v1505_v12 = vmul.f32 %v10552_v29, %v7232_v26  ;;  %v1534_v37 = vadd.f32 %v1502_v10, %v1454_v43  ;;  %v2385_v63 = vmax.f32 %v2257_v56, 0.0 }
 0x199   : > { %v2511_v6 = vpack.c.bf16 %v10562_v49, %v2383_v5  ;;  %v1535_v38 = vadd.f32 %v1503_v21, %v1455_v59  ;;  %v1582_v2 = vmul.f32 %v10564_v36, %v10523_v13  ;;  %v1583_v40 = vmul.f32 %v10548_v34, %v10523_v13  ;;  %v10566_v5 = vld [vmem:[#allocation112_spill] sm:$0xff] }
 0x19a   : > { %v1536_v7 = vadd.f32 %v1504_v25, %v1456_v19  ;;  %v1537_v0 = vadd.f32 %v1505_v12, %v1457_v35  ;;  %v1584_v30 = vmul.f32 %v10565_v16, %v10523_v13  ;;  %v1585_v8 = vmul.f32 %v10553_v28, %v10523_v13 }
 0x19b   : > { %2910 = vmatprep.subr.bf16.mxu0 %v2511_v6  ;;  %v10567_v43 = vmax.f32 %v10566_v5, 0.0  ;;  %v1614_v21 = vadd.f32 %v1582_v2, %v1534_v37  ;;  %v1615_v56 = vadd.f32 %v1583_v40, %v1535_v38  ;;  %v1278_v59 = vmul.f32 %v10554_v54, %v10541_v9  ;;  %v5508_v6 = vld [vmem:[%s9809_s3 + $0x4] ss:$8 sps:$4 sm:$0xff]  }
 0x19c   : > { %v1616_v22 = vadd.f32 %v1584_v30, %v1536_v7  ;;  %v1617_v49 = vadd.f32 %v1585_v8, %v1537_v0  ;;  %v1326_v19 = vmul.f32 %v10556_v20, %v10543_v53  ;;  %v1406_v35 = vmul.f32 %v10558_v31, %v10545_v48  ;;  %v10572_v7 = vld [vmem:[#allocation129_spill] sm:$0xff]  ;;  %2926 = vmatprep.mubr.bf16.mxu0 %v5508_v6 }
 0x19d   : > { %v2513_v10 = vpack.c.bf16 %v10567_v43, %v2385_v63  ;;  %v7975_v25 = vadd.f32 %v2133_v23, %v1614_v21  ;;  %v7977_v2 = vadd.f32 %v2133_v23, %v1615_v56  ;;  %v1486_v38 = vmul.f32 %v10560_v61, %v10493_v3  ;;  %3119 = vmatprep.mubr.bf16.mxu1 %v5508_v6  ;;  %v10573_v21 = vld [vmem:[#allocation111_spill] sm:$0xff] }
 0x19e   : > { %v1566_v12 = vmul.f32 %v10564_v36, %v10496_v18  ;;  %v7983_v37 = vadd.f32 %v2133_v23, %v1616_v22  ;;  %v7985_v63 = vadd.f32 %v2133_v23, %v1617_v49  ;;  %v1358_v40 = vadd.f32 %v1326_v19, %v1278_v59  ;;  %v10574_v19 = vld [vmem:[#allocation109_spill] sm:$0xff] }
 0x19f   : > { %3103 = vmatprep.subr.bf16.mxu1 %v2513_v10  ;;  %10568 = vst [vmem:[#allocation123_spill] sm:$0xff] %v7975_v25  ;;  %10569 = vst [vmem:[#allocation124_spill] sm:$0xff] %v7977_v2  ;;  %v2386_v0 = vmax.f32 %v10572_v7, 0.0  ;;  %v1280_v30 = vmul.f32 %v10555_v33, %v10541_v9  ;;  %v1328_v8 = vmul.f32 %v10557_v17, %v10543_v53  ;;  %v2388_v56 = vmax.f32 %v10573_v21, 0.0  ;;  %v10575_v7 = vld [vmem:[#allocation95_spill] sm:$0xff] }
 0x1a0   : > { %10570 = vst [vmem:[#allocation134_spill] sm:$0xff] %v7983_v37  ;;  %10571 = vst [vmem:[#allocation135_spill] sm:$0xff] %v7985_v63  ;;  %v1408_v5 = vmul.f32 %v10559_v32, %v10545_v48  ;;  %v1488_v43 = vmul.f32 %v10563_v44, %v10493_v3  ;;  %v1438_v10 = vadd.f32 %v1406_v35, %v1358_v40  ;;  %v10576_v35 = vld [vmem:[#allocation133_spill] sm:$0xff]  ;;  %v2395_v37 = vmax.f32 %v10577_v46, 0.0  ;;  %v10578_v48 = vld [vmem:[#allocation72_spill] sm:$0xff] }
 0x1a1   : > { %v1568_v23 = vmul.f32 %v10565_v16, %v10496_v18  ;;  %v1287_v59 = vmul.f32 %v10542_v55, %v10516_v42  ;;  %v1360_v22 = vadd.f32 %v1328_v8, %v1280_v30  ;;  %v1335_v49 = vmul.f32 %v10544_v39, %v10517_v14 }
 0x1a2   : > { %v1415_v6 = vmul.f32 %v10546_v45, %v10574_v19  ;;  %v1495_v13 = vmul.f32 %v10547_v15, %v10575_v7  ;;  %v1518_v26 = vadd.f32 %v1486_v38, %v1438_v10  ;;  %v1575_v40 = vmul.f32 %v10548_v34, %v10576_v35 }
 0x1a3   : > { %v1289_v21 = vmul.f32 %v10549_v11, %v10516_v42  ;;  %v1440_v25 = vadd.f32 %v1408_v5, %v1360_v22  ;;  %v1367_v30 = vadd.f32 %v1335_v49, %v1287_v59  ;;  %v1337_v8 = vmul.f32 %v10550_v57, %v10517_v14 }
 0x1a4   : > { %v1417_v18 = vmul.f32 %v10551_v24, %v10574_v19  ;;  %v1598_v3 = vadd.f32 %v1566_v12, %v1518_v26  ;;  %v1497_v38 = vmul.f32 %v10552_v29, %v10575_v7  ;;  %v1577_v10 = vmul.f32 %v10553_v28, %v10576_v35 }
 0x1a5   : > { %v2397_v46 = vmax.f32 %v10578_v48, 0.0  ;;  %v1520_v53 = vadd.f32 %v1488_v43, %v1440_v25  ;;  %v1447_v9 = vadd.f32 %v1415_v6, %v1367_v30  ;;  %v1369_v63 = vadd.f32 %v1337_v8, %v1289_v21 }
 0x1a6   : > { %v1302_v5 = vmul.f32 %v10554_v54, %v10469_v51  ;;  %v2254_v59 = vadd.f32 %v7910_v41, %v1598_v3  ;;  %v1303_v22 = vmul.f32 %v10542_v55, %v10469_v51  ;;  %v1304_v26 = vmul.f32 %v10555_v33, %v10469_v51 }
 0x1a7   : > { %v1305_v12 = vmul.f32 %v10549_v11, %v10469_v51  ;;  %v1600_v49 = vadd.f32 %v1568_v23, %v1520_v53  ;;  %v1527_v2 = vadd.f32 %v1495_v13, %v1447_v9  ;;  %v1449_v48 = vadd.f32 %v1417_v18, %v1369_v63 }
 0x1a8   : > { %v1350_v25 = vmul.f32 %v10556_v20, %v10471_v52  ;;  %v2382_v43 = vmax.f32 %v2254_v59, 0.0  ;;  %v1351_v6 = vmul.f32 %v10544_v39, %v10471_v52  ;;  %v1352_v3 = vmul.f32 %v10557_v17, %v10471_v52 }
 0x1a9   : > { %v1353_v21 = vmul.f32 %v10550_v57, %v10471_v52  ;;  %v2256_v30 = vadd.f32 %v7910_v41, %v1600_v49  ;;  %v1607_v8 = vadd.f32 %v1575_v40, %v1527_v2  ;;  %v1529_v51 = vadd.f32 %v1497_v38, %v1449_v48 }
 0x1aa   : > { %v1382_v53 = vadd.f32 %v1350_v25, %v1302_v5  ;;  %v2510_v13 = vpack.c.bf16 %v2386_v0, %v2382_v43  ;;  %v1383_v18 = vadd.f32 %v1351_v6, %v1303_v22  ;;  %v1384_v9 = vadd.f32 %v1352_v3, %v1304_v26  ;;  %v2143_v3 = vpop.permute.xlu1 %2142 }
 0x1ab   : > { %v1385_v63 = vadd.f32 %v1353_v21, %v1305_v12  ;;  %v2384_v23 = vmax.f32 %v2256_v30, 0.0  ;;  %v2263_v59 = vadd.f32 %v7936_v47, %v1607_v8  ;;  %v1609_v11 = vadd.f32 %v1577_v10, %v1529_v51 }
 0x1ac   : > { %v1430_v27 = vmul.f32 %v10558_v31, %v10532_v58  ;;  %2911 = vmatpush1.bf16.msra.mxu0 %v2510_v13  ;;  %v1431_v52 = vmul.f32 %v10546_v45, %v10532_v58  ;;  %v1432_v41 = vmul.f32 %v10559_v32, %v10532_v58  ;;  %v1433_v2 = vmul.f32 %v10551_v24, %v10532_v58 }
 0x1ad   : > { %v1510_v0 = vmul.f32 %v10560_v61, %v10534_v62  ;;  %v2512_v40 = vpack.c.bf16 %v2388_v56, %v2384_v23  ;;  %v2391_v38 = vmax.f32 %v2263_v59, 0.0  ;;  %v2265_v51 = vadd.f32 %v7936_v47, %v1609_v11 }
 0x1ae   : > { %v1462_v10 = vadd.f32 %v1430_v27, %v1382_v53  ;;  %v1463_v5 = vadd.f32 %v1431_v52, %v1383_v18  ;;  %v1464_v22 = vadd.f32 %v1432_v41, %v1384_v9  ;;  %v1465_v26 = vadd.f32 %v1433_v2, %v1385_v63 }
 0x1af   : > { %v1511_v12 = vmul.f32 %v10547_v15, %v10534_v62  ;;  %3104 = vmatpush1.bf16.msra.mxu1 %v2512_v40  ;;  %v2515_v49 = vpack.c.bf16 %v2395_v37, %v2391_v38  ;;  %v2393_v48 = vmax.f32 %v2265_v51, 0.0  ;;  %v1512_v25 = vmul.f32 %v10563_v44, %v10534_v62  ;;  %v10581_v51 = vld [vmem:[#allocation113_spill] sm:$0xff] }
 0x1b0   : > { %v1513_v43 = vmul.f32 %v10552_v29, %v10534_v62  ;;  %v1542_v56 = vadd.f32 %v1510_v0, %v1462_v10  ;;  %v1590_v27 = vmul.f32 %v10564_v36, %v10536_v50  ;;  %v1591_v52 = vmul.f32 %v10548_v34, %v10536_v50  ;;  %v10591_v62 = vld [vmem:[#allocation31_spill] sm:$0xff] }
 0x1b1   : > { %v1543_v6 = vadd.f32 %v1511_v12, %v1463_v5  ;;  %2912 = vmatprep.subr.bf16.mxu0 %v2515_v49  ;;  %v2517_v11 = vpack.c.bf16 %v2397_v46, %v2393_v48  ;;  %v1544_v21 = vadd.f32 %v1512_v25, %v1464_v22  ;;  %v1592_v30 = vmul.f32 %v10565_v16, %v10536_v50 }
 0x1b2   : > { %v1545_v37 = vadd.f32 %v1513_v43, %v1465_v26  ;;  %v1593_v8 = vmul.f32 %v10553_v28, %v10536_v50  ;;  %v1622_v53 = vadd.f32 %v1590_v27, %v1542_v56  ;;  %v1286_v18 = vmul.f32 %v10554_v54, %v10516_v42  ;;  %v10583_v43 = vld [vmem:[#allocation86_spill] sm:$0xff] }
 0x1b3   : > { %v1623_v13 = vadd.f32 %v1591_v52, %v1543_v6  ;;  %3105 = vmatprep.subr.bf16.mxu1 %v2517_v11  ;;  %v1624_v9 = vadd.f32 %v1592_v30, %v1544_v21  ;;  %v1334_v63 = vmul.f32 %v10556_v20, %v10517_v14  ;;  %v1414_v46 = vmul.f32 %v10558_v31, %v10574_v19  ;;  %v10585_v30 = vld [vmem:[#allocation102_spill] sm:$0xff] }
 0x1b4   : > { %v1494_v23 = vmul.f32 %v10560_v61, %v10575_v7  ;;  %v1625_v59 = vadd.f32 %v1593_v8, %v1545_v37  ;;  %v8073_v41 = vadd.f32 %v2143_v3, %v1622_v53  ;;  %v1574_v0 = vmul.f32 %v10564_v36, %v10576_v35  ;;  %v10586_v53 = vld [vmem:[#allocation124_spill] sm:$0xff] }
 0x1b5   : > { %v8075_v2 = vadd.f32 %v2143_v3, %v1623_v13  ;;  %v8079_v40 = vadd.f32 %v2143_v3, %v1624_v9  ;;  %v1366_v38 = vadd.f32 %v1334_v63, %v1286_v18  ;;  %v2394_v10 = vmax.f32 %v10581_v51, 0.0  ;;  %v10587_v18 = vld [vmem:[#allocation21_spill] sm:$0xff] }
 0x1b6   : > { %10579 = vst [vmem:[#allocation136_spill] sm:$0xff] %v8073_v41  ;;  %v1288_v5 = vmul.f32 %v10555_v33, %v10516_v42  ;;  %v8084_v22 = vadd.f32 %v2143_v3, %v1625_v59  ;;  %v1336_v26 = vmul.f32 %v10557_v17, %v10517_v14  ;;  %v1416_v12 = vmul.f32 %v10559_v32, %v10574_v19  ;;  %v10584_v3 = vld [vmem:[#allocation87_spill] sm:$0xff]  ;;  %v10598_v14 = vld [vmem:[#allocation37_spill] sm:$0xff]  ;;  %v10601_v42 = vld [vmem:[#allocation38_spill] sm:$0xff] }
 0x1b7   : > { %10580 = vst [vmem:[#allocation137_spill] sm:$0xff] %v8079_v40  ;;  %v1496_v49 = vmul.f32 %v10563_v44, %v10575_v7  ;;  %v1446_v48 = vadd.f32 %v1414_v46, %v1366_v38  ;;  %v1576_v25 = vmul.f32 %v10565_v16, %v10576_v35  ;;  %v2396_v56 = vmax.f32 %v10583_v43, 0.0  ;;  %v10593_v40 = vld [vmem:[#allocation33_spill] sm:$0xff] }
 0x1b8   : > { %10582 = vst [vmem:[#allocation67_spill] sm:$0xff] %v8084_v22  ;;  %v1299_v6 = vmul.f32 %v10542_v55, %v10429_v1  ;;  %v1368_v27 = vadd.f32 %v1336_v26, %v1288_v5  ;;  %v1347_v52 = vmul.f32 %v10544_v39, %v10433_v60  ;;  %v1427_v11 = vmul.f32 %v10546_v45, %v7025_v4  ;;  %v10588_v26 = vld [vmem:[#allocation135_spill] sm:$0xff] }
 0x1b9   : > { %v1507_v21 = vmul.f32 %v10547_v15, %v10584_v3  ;;  %v1526_v37 = vadd.f32 %v1494_v23, %v1446_v48  ;;  %v1587_v8 = vmul.f32 %v10548_v34, %v10585_v30  ;;  %v2399_v13 = vmax.f32 %v10586_v53, 0.0 }
 0x1ba   : > { %v1301_v9 = vmul.f32 %v10587_v18, %v10429_v1  ;;  %v1448_v63 = vadd.f32 %v1416_v12, %v1368_v27  ;;  %v1379_v46 = vadd.f32 %v1347_v52, %v1299_v6  ;;  %v1349_v59 = vmul.f32 %v10550_v57, %v10433_v60  ;;  %v10589_v12 = vld [vmem:[#allocation80_spill] sm:$0xff]  ;;  %v10590_v6 = vld [vmem:[#allocation30_spill] sm:$0xff] }
 0x1bb   : > { %v1429_v38 = vmul.f32 %v10551_v24, %v7025_v4  ;;  %v1606_v51 = vadd.f32 %v1574_v0, %v1526_v37  ;;  %v1509_v23 = vmul.f32 %v10552_v29, %v10584_v3  ;;  %v1589_v5 = vmul.f32 %v10553_v28, %v10585_v30  ;;  %v10592_v0 = vld [vmem:[#allocation32_spill] sm:$0xff] }
 0x1bc   : > { %v2401_v48 = vmax.f32 %v10588_v26, 0.0  ;;  %v1528_v43 = vadd.f32 %v1496_v49, %v1448_v63  ;;  %v1459_v53 = vadd.f32 %v1427_v11, %v1379_v46  ;;  %v1381_v50 = vadd.f32 %v1349_v59, %v1301_v9  ;;  %v10594_v49 = vld [vmem:[#allocation79_spill] sm:$0xff]  ;;  %v10595_v11 = vld [vmem:[#allocation34_spill] sm:$0xff] }
 0x1bd   : > { %v1646_v27 = vmul.f32 %v10590_v6, %v10589_v12  ;;  %v2262_v52 = vadd.f32 %v7936_v47, %v1606_v51  ;;  %v1647_v58 = vmul.f32 %v10591_v62, %v10589_v12  ;;  %v1648_v37 = vmul.f32 %v10592_v0, %v10589_v12  ;;  %v10596_v46 = vld [vmem:[#allocation35_spill] sm:$0xff]  ;;  %v10597_v51 = vld [vmem:[#allocation36_spill] sm:$0xff] }
 0x1be   : > { %v1649_v41 = vmul.f32 %v10593_v40, %v10589_v12  ;;  %v1608_v35 = vadd.f32 %v1576_v25, %v1528_v43  ;;  %v1539_v7 = vadd.f32 %v1507_v21, %v1459_v53  ;;  %v1461_v26 = vadd.f32 %v1429_v38, %v1381_v50 }
 0x1bf   : > { %v1694_v9 = vmul.f32 %v10595_v11, %v10594_v49  ;;  %v2390_v63 = vmax.f32 %v2262_v52, 0.0  ;;  %v1695_v59 = vmul.f32 %v10596_v46, %v10594_v49  ;;  %v1696_v19 = vmul.f32 %v10597_v51, %v10594_v49  ;;  %v10599_v52 = vld [vmem:[#allocation83_spill] sm:$0xff] }
 0x1c0   : > { %v1697_v62 = vmul.f32 %v10598_v14, %v10594_v49  ;;  %v2264_v0 = vadd.f32 %v7936_v47, %v1608_v35  ;;  %v1619_v6 = vadd.f32 %v1587_v8, %v1539_v7  ;;  %v1541_v12 = vadd.f32 %v1509_v23, %v1461_v26  ;;  %v10600_v46 = vld [vmem:[#allocation75_spill] sm:$0xff]  ;;  %v10603_v47 = vld [vmem:[#allocation40_spill] sm:$0xff]  ;;  %v10604_v35 = vld [vmem:[#allocation41_spill] sm:$0xff] }
 0x1c1   : > { %v1726_v25 = vadd.f32 %v1694_v9, %v1646_v27  ;;  %v2514_v21 = vpack.c.bf16 %v2394_v10, %v2390_v63  ;;  %v1727_v50 = vadd.f32 %v1695_v59, %v1647_v58  ;;  %v1728_v38 = vadd.f32 %v1696_v19, %v1648_v37  ;;  %v10602_v51 = vld [vmem:[#allocation39_spill] sm:$0xff]  ;;  %v10605_v58 = vld [vmem:[#allocation120_spill] sm:$0xff]  ;;  %v10606_v19 = vld [vmem:[#allocation54_spill] sm:$0xff] }
 0x1c2   : > { %v1729_v43 = vadd.f32 %v1697_v62, %v1649_v41  ;;  %v2392_v53 = vmax.f32 %v2264_v0, 0.0  ;;  %v2275_v11 = vadd.f32 %v10599_v52, %v1619_v6  ;;  %v1621_v40 = vadd.f32 %v1589_v5, %v1541_v12  ;;  %v10607_v37 = vld [vmem:[#allocation55_spill] sm:$0xff]  ;;  %v10608_v59 = vld [vmem:[#allocation56_spill] sm:$0xff]  ;;  %v10609_v12 = vld [vmem:[#allocation57_spill] sm:$0xff] }
 0x1c3   : > { %v1774_v22 = vmul.f32 %v10601_v42, %v10600_v46  ;;  %2913 = vmatpush1.bf16.msra.mxu0 %v2514_v21  ;;  %v1775_v49 = vmul.f32 %v10602_v51, %v10600_v46  ;;  %v1776_v7 = vmul.f32 %v10603_v47, %v10600_v46  ;;  %v1777_v10 = vmul.f32 %v10604_v35, %v10600_v46 }
 0x1c4   : > { %v1854_v62 = vmul.f32 %v10606_v19, %v10605_v58  ;;  %v2516_v41 = vpack.c.bf16 %v2396_v56, %v2392_v53  ;;  %v2403_v8 = vmax.f32 %v2275_v11, 0.0  ;;  %v2277_v23 = vadd.f32 %v10599_v52, %v1621_v40  ;;  %v10610_v53 = vld [vmem:[#allocation91_spill] sm:$0xff]  ;;  %v10611_v40 = vld [vmem:[#allocation62_spill] sm:$0xff] }
 0x1c5   : > { %v1806_v5 = vadd.f32 %v1774_v22, %v1726_v25  ;;  %v1807_v6 = vadd.f32 %v1775_v49, %v1727_v50  ;;  %v1808_v27 = vadd.f32 %v1776_v7, %v1728_v38  ;;  %v1809_v0 = vadd.f32 %v1777_v10, %v1729_v43  ;;  %v10612_v25 = vld [vmem:[#allocation63_spill] sm:$0xff]  ;;  %v2153_v43 = vpop.permute.xlu1 %2152  ;;  %v10613_v7 = vld [vmem:[#allocation64_spill] sm:$0xff] }
 0x1c6   : > { %v1855_v26 = vmul.f32 %v10607_v37, %v10605_v58  ;;  %3106 = vmatpush1.bf16.msra.mxu1 %v2516_v41  ;;  %v2519_v9 = vpack.c.bf16 %v2403_v8, %v2399_v13  ;;  %v2405_v63 = vmax.f32 %v2277_v23, 0.0  ;;  %v1856_v46 = vmul.f32 %v10608_v59, %v10605_v58  ;;  %v10614_v41 = vld [vmem:[#allocation65_spill] sm:$0xff] }
 0x1c7   : > { %v1857_v21 = vmul.f32 %v10609_v12, %v10605_v58  ;;  %v1886_v56 = vadd.f32 %v1854_v62, %v1806_v5  ;;  %v1934_v22 = vmul.f32 %v10611_v40, %v10610_v53  ;;  %v1935_v50 = vmul.f32 %v10612_v25, %v10610_v53 }
 0x1c8   : > { %v1887_v11 = vadd.f32 %v1855_v26, %v1807_v6  ;;  %2914 = vmatprep.subr.bf16.mxu0 %v2519_v9  ;;  %v2521_v38 = vpack.c.bf16 %v2405_v63, %v2401_v48  ;;  %v1888_v49 = vadd.f32 %v1856_v46, %v1808_v27  ;;  %v1936_v10 = vmul.f32 %v10613_v7, %v10610_v53 }
 0x1c9   : > { %v1889_v13 = vadd.f32 %v1857_v21, %v1809_v0  ;;  %v1937_v8 = vmul.f32 %v10614_v41, %v10610_v53  ;;  %v1966_v58 = vadd.f32 %v1934_v22, %v1886_v56  ;;  %v1298_v23 = vmul.f32 %v10554_v54, %v10429_v1  ;;  %v10618_v56 = vld [vmem:[#allocation123_spill] sm:$0xff] }
 0x1ca   : > { %v1967_v62 = vadd.f32 %v1935_v50, %v1887_v11  ;;  %3107 = vmatprep.subr.bf16.mxu1 %v2521_v38  ;;  %v1968_v5 = vadd.f32 %v1936_v10, %v1888_v49  ;;  %v1346_v6 = vmul.f32 %v10556_v20, %v10433_v60  ;;  %v1426_v48 = vmul.f32 %v10558_v31, %v7025_v4 }
 0x1cb   : > { %v1506_v27 = vmul.f32 %v10560_v61, %v10584_v3  ;;  %v1969_v0 = vadd.f32 %v1937_v8, %v1889_v13  ;;  %v8169_v26 = vadd.f32 %v2153_v43, %v1966_v58  ;;  %v1586_v63 = vmul.f32 %v10564_v36, %v10585_v30  ;;  %v10620_v8 = vld [vmem:[#allocation134_spill] sm:$0xff] }
 0x1cc   : > { %v8171_v9 = vadd.f32 %v2153_v43, %v1967_v62  ;;  %v8175_v46 = vadd.f32 %v2153_v43, %v1968_v5  ;;  %v1378_v21 = vadd.f32 %v1346_v6, %v1298_v23  ;;  %v2398_v11 = vmax.f32 %v10618_v56, 0.0  ;;  %v10621_v62 = vld [vmem:[#allocation82_spill] sm:$0xff]  ;;  %v10622_v23 = vld [vmem:[#allocation107_spill] sm:$0xff] }
 0x1cd   : > { %10615 = vst [vmem:[#allocation68_spill] sm:$0xff] %v8169_v26  ;;  %v1300_v53 = vmul.f32 %v10555_v33, %v10429_v1  ;;  %v8180_v22 = vadd.f32 %v2153_v43, %v1969_v0  ;;  %v1348_v50 = vmul.f32 %v10557_v17, %v10433_v60  ;;  %v1428_v38 = vmul.f32 %v10559_v32, %v7025_v4  ;;  %v10623_v60 = vld [vmem:[#allocation115_spill] sm:$0xff]  ;;  %v10624_v4 = vld [vmem:[#allocation121_spill] sm:$0xff] }
 0x1ce   : > { %10616 = vst [vmem:[#allocation132_spill] sm:$0xff] %v8171_v9  ;;  %10617 = vst [vmem:[#allocation78_spill] sm:$0xff] %v8175_v46  ;;  %v1508_v49 = vmul.f32 %v10563_v44, %v10584_v3  ;;  %v1458_v13 = vadd.f32 %v1426_v48, %v1378_v21  ;;  %v1588_v10 = vmul.f32 %v10565_v16, %v10585_v30  ;;  %v2400_v58 = vmax.f32 %v10620_v8, 0.0  ;;  %v10625_v48 = vld [vmem:[#allocation131_spill] sm:$0xff] }
 0x1cf   : > { %10619 = vst [vmem:[#allocation71_spill] sm:$0xff] %v8180_v22  ;;  %v1307_v1 = vmul.f32 %v10542_v55, %v10621_v62  ;;  %v1380_v43 = vadd.f32 %v1348_v50, %v1300_v53  ;;  %v1355_v5 = vmul.f32 %v10544_v39, %v10622_v23  ;;  %v1435_v6 = vmul.f32 %v10546_v45, %v10623_v60 }
 0x1d0   : > { %v1515_v0 = vmul.f32 %v10547_v15, %v10624_v4  ;;  %v1538_v3 = vadd.f32 %v1506_v27, %v1458_v13  ;;  %v1595_v21 = vmul.f32 %v10548_v34, %v10625_v48  ;;  %v2407_v30 = vmax.f32 %v8075_v2, 0.0  ;;  %v10626_v27 = vld [vmem:[#allocation67_spill] sm:$0xff] }
 0x1d1   : > { %v1309_v56 = vmul.f32 %v10587_v18, %v10621_v62  ;;  %v1460_v55 = vadd.f32 %v1428_v38, %v1380_v43  ;;  %v1387_v53 = vadd.f32 %v1355_v5, %v1307_v1  ;;  %v1357_v39 = vmul.f32 %v10550_v57, %v10622_v23  ;;  %v10627_v38 = vld [vmem:[#allocation98_spill] sm:$0xff]  ;;  %v10629_v5 = vld [vmem:[#allocation31_spill] sm:$0xff] }
 0x1d2   : > { %v1437_v45 = vmul.f32 %v10551_v24, %v10623_v60  ;;  %v1618_v50 = vadd.f32 %v1586_v63, %v1538_v3  ;;  %v1517_v15 = vmul.f32 %v10552_v29, %v10624_v4  ;;  %v1597_v34 = vmul.f32 %v10553_v28, %v10625_v48  ;;  %v10628_v1 = vld [vmem:[#allocation30_spill] sm:$0xff]  ;;  %v10630_v63 = vld [vmem:[#allocation32_spill] sm:$0xff]  ;;  %v10631_v29 = vld [vmem:[#allocation33_spill] sm:$0xff] }
 0x1d3   : > { %v2409_v2 = vmax.f32 %v10626_v27, 0.0  ;;  %v1540_v13 = vadd.f32 %v1508_v49, %v1460_v55  ;;  %v1467_v8 = vadd.f32 %v1435_v6, %v1387_v53  ;;  %v1389_v18 = vadd.f32 %v1357_v39, %v1309_v56  ;;  %v10632_v49 = vld [vmem:[#allocation100_spill] sm:$0xff]  ;;  %v10633_v6 = vld [vmem:[#allocation34_spill] sm:$0xff]  ;;  %v10634_v53 = vld [vmem:[#allocation35_spill] sm:$0xff] }
 0x1d4   : > { %v1654_v43 = vmul.f32 %v10628_v1, %v10627_v38  ;;  %v2274_v57 = vadd.f32 %v10599_v52, %v1618_v50  ;;  %v1655_v24 = vmul.f32 %v10629_v5, %v10627_v38  ;;  %v1656_v3 = vmul.f32 %v10630_v63, %v10627_v38  ;;  %v10635_v50 = vld [vmem:[#allocation36_spill] sm:$0xff] }
 0x1d5   : > { %v1657_v46 = vmul.f32 %v10631_v29, %v10627_v38  ;;  %v1620_v28 = vadd.f32 %v1588_v10, %v1540_v13  ;;  %v1547_v26 = vadd.f32 %v1515_v0, %v1467_v8  ;;  %v1469_v27 = vadd.f32 %v1437_v45, %v1389_v18 }
 0x1d6   : > { %v1702_v56 = vmul.f32 %v10633_v6, %v10632_v49  ;;  %v2402_v55 = vmax.f32 %v2274_v57, 0.0  ;;  %v1703_v39 = vmul.f32 %v10634_v53, %v10632_v49  ;;  %v1704_v1 = vmul.f32 %v10635_v50, %v10632_v49  ;;  %v10636_v57 = vld [vmem:[#allocation73_spill] sm:$0xff] }
 0x1d7   : > { %v1705_v5 = vmul.f32 %v10598_v14, %v10632_v49  ;;  %v2276_v63 = vadd.f32 %v10599_v52, %v1620_v28  ;;  %v1627_v22 = vadd.f32 %v1595_v21, %v1547_v26  ;;  %v1549_v38 = vadd.f32 %v1517_v15, %v1469_v27  ;;  %v10637_v53 = vld [vmem:[#allocation109_spill] sm:$0xff] }
 0x1d8   : > { %v1734_v10 = vadd.f32 %v1702_v56, %v1654_v43  ;;  %v2518_v0 = vpack.c.bf16 %v2402_v55, %v2398_v11  ;;  %v1735_v45 = vadd.f32 %v1703_v39, %v1655_v24  ;;  %v1736_v13 = vadd.f32 %v1704_v1, %v1656_v3  ;;  %v10638_v11 = vld [vmem:[#allocation95_spill] sm:$0xff]  ;;  %v10639_v56 = vld [vmem:[#allocation133_spill] sm:$0xff] }
 0x1d9   : > { %v1737_v8 = vadd.f32 %v1705_v5, %v1657_v46  ;;  %v2404_v18 = vmax.f32 %v2276_v63, 0.0  ;;  %v2283_v6 = vadd.f32 %v10636_v57, %v1627_v22  ;;  %v1629_v29 = vadd.f32 %v1597_v34, %v1549_v38 }
 0x1da   : > { %v1782_v9 = vmul.f32 %v10601_v42, %v10637_v53  ;;  %2915 = vmatpush1.bf16.msra.mxu0 %v2518_v0  ;;  %v1783_v49 = vmul.f32 %v10602_v51, %v10637_v53  ;;  %v1784_v52 = vmul.f32 %v10603_v47, %v10637_v53  ;;  %v1785_v26 = vmul.f32 %v10604_v35, %v10637_v53  ;;  %v2163_v53 = vpop.permute.xlu1 %2162 }
 0x1db   : > { %v1862_v46 = vmul.f32 %v10606_v19, %v10638_v11  ;;  %v2520_v21 = vpack.c.bf16 %v2404_v18, %v2400_v58  ;;  %v2411_v15 = vmax.f32 %v2283_v6, 0.0  ;;  %v2285_v22 = vadd.f32 %v10636_v57, %v1629_v29 }
 0x1dc   : > { %v1814_v34 = vadd.f32 %v1782_v9, %v1734_v10  ;;  %v1815_v1 = vadd.f32 %v1783_v49, %v1735_v45  ;;  %v1816_v43 = vadd.f32 %v1784_v52, %v1736_v13  ;;  %v1817_v5 = vadd.f32 %v1785_v26, %v1737_v8 }
 0x1dd   : > { %v1863_v24 = vmul.f32 %v10607_v37, %v10638_v11  ;;  %3108 = vmatpush1.bf16.msra.mxu1 %v2520_v21  ;;  %v2523_v63 = vpack.c.bf16 %v2411_v15, %v2407_v30  ;;  %v2413_v3 = vmax.f32 %v2285_v22, 0.0  ;;  %v1864_v28 = vmul.f32 %v10608_v59, %v10638_v11  ;;  %v10640_v15 = vld [vmem:[#allocation136_spill] sm:$0xff] }
 0x1de   : > { %v1865_v27 = vmul.f32 %v10609_v12, %v10638_v11  ;;  %v1894_v58 = vadd.f32 %v1862_v46, %v1814_v34  ;;  %v1942_v9 = vmul.f32 %v10611_v40, %v10639_v56  ;;  %v1943_v29 = vmul.f32 %v10612_v25, %v10639_v56 }
 0x1df   : > { %v1895_v6 = vadd.f32 %v1863_v24, %v1815_v1  ;;  %2916 = vmatprep.subr.bf16.mxu0 %v2523_v63  ;;  %v2525_v55 = vpack.c.bf16 %v2413_v3, %v2409_v2  ;;  %v1896_v39 = vadd.f32 %v1864_v28, %v1816_v43  ;;  %v1944_v38 = vmul.f32 %v10613_v7, %v10639_v56  ;;  %v10642_v63 = vld [vmem:[#allocation132_spill] sm:$0xff]  ;;  %v10643_v28 = vld [vmem:[#allocation117_spill] sm:$0xff] }
 0x1e0   : > { %v1897_v30 = vadd.f32 %v1865_v27, %v1817_v5  ;;  %v1945_v10 = vmul.f32 %v10614_v41, %v10639_v56  ;;  %v1974_v0 = vadd.f32 %v1942_v9, %v1894_v58  ;;  %v1306_v13 = vmul.f32 %v10554_v54, %v10621_v62  ;;  %v10641_v5 = vld [vmem:[#allocation137_spill] sm:$0xff]  ;;  %v10644_v58 = vld [vmem:[#allocation71_spill] sm:$0xff] }
 0x1e1   : > { %v1975_v45 = vadd.f32 %v1943_v29, %v1895_v6  ;;  %3109 = vmatprep.subr.bf16.mxu1 %v2525_v55  ;;  %v1976_v8 = vadd.f32 %v1944_v38, %v1896_v39  ;;  %v1354_v18 = vmul.f32 %v10556_v20, %v10622_v23  ;;  %v1434_v2 = vmul.f32 %v10558_v31, %v10623_v60  ;;  %v10647_v29 = vld [vmem:[#allocation30_spill] sm:$0xff] }
 0x1e2   : > { %v1514_v49 = vmul.f32 %v10560_v61, %v10624_v4  ;;  %v1977_v52 = vadd.f32 %v1945_v10, %v1897_v30  ;;  %v8265_v26 = vadd.f32 %v2163_v53, %v1974_v0  ;;  %v1594_v46 = vmul.f32 %v10564_v36, %v10625_v48  ;;  %v10650_v0 = vld [vmem:[#allocation33_spill] sm:$0xff] }
 0x1e3   : > { %v8267_v11 = vadd.f32 %v2163_v53, %v1975_v45  ;;  %v8271_v54 = vadd.f32 %v2163_v53, %v1976_v8  ;;  %v1386_v21 = vadd.f32 %v1354_v18, %v1306_v13  ;;  %v2406_v22 = vmax.f32 %v10640_v15, 0.0  ;;  %v10651_v8 = vld [vmem:[#allocation126_spill] sm:$0xff] }
 0x1e4   : > { %v1308_v20 = vmul.f32 %v10555_v33, %v10621_v62  ;;  %v8276_v31 = vadd.f32 %v2163_v53, %v1977_v52  ;;  %v1356_v61 = vmul.f32 %v10557_v17, %v10622_v23  ;;  %v1436_v34 = vmul.f32 %v10559_v32, %v10623_v60  ;;  %v10645_v17 = vld [vmem:[#allocation74_spill] sm:$0xff]  ;;  %v10646_v32 = vld [vmem:[#allocation97_spill] sm:$0xff] }
 0x1e5   : > { %v1516_v1 = vmul.f32 %v10563_v44, %v10624_v4  ;;  %v1466_v36 = vadd.f32 %v1434_v2, %v1386_v21  ;;  %v1596_v43 = vmul.f32 %v10565_v16, %v10625_v48  ;;  %v2408_v24 = vmax.f32 %v10641_v5, 0.0  ;;  %v10648_v44 = vld [vmem:[#allocation31_spill] sm:$0xff]  ;;  %v10649_v16 = vld [vmem:[#allocation32_spill] sm:$0xff]  ;;  %v10652_v18 = vld [vmem:[#allocation34_spill] sm:$0xff] }
 0x1e6   : > { %v2415_v3 = vmax.f32 %v10642_v63, 0.0  ;;  %v1388_v33 = vadd.f32 %v1356_v61, %v1308_v20  ;;  %v2419_v27 = vmax.f32 %v10643_v28, 0.0  ;;  %v2417_v6 = vmax.f32 %v10644_v58, 0.0  ;;  %v10654_v61 = vld [vmem:[#allocation92_spill] sm:$0xff] }
 0x1e7   : > { %v2421_v56 = vmax.f32 %v10645_v17, 0.0  ;;  %v1546_v9 = vadd.f32 %v1514_v49, %v1466_v36  ;;  %v1662_v55 = vmul.f32 %v10647_v29, %v10646_v32  ;;  %v1663_v53 = vmul.f32 %v10648_v44, %v10646_v32  ;;  %v10653_v49 = vld [vmem:[#allocation35_spill] sm:$0xff] }
 0x1e8   : > { %v1664_v39 = vmul.f32 %v10649_v16, %v10646_v32  ;;  %v1468_v30 = vadd.f32 %v1436_v34, %v1388_v33  ;;  %v2527_v38 = vpack.c.bf16 %v2419_v27, %v2415_v3  ;;  %v1665_v45 = vmul.f32 %v10650_v0, %v10646_v32 }
 0x1e9   : > { %v2529_v10 = vpack.c.bf16 %v2421_v56, %v2417_v6  ;;  %v1626_v13 = vadd.f32 %v1594_v46, %v1546_v9  ;;  %v1710_v2 = vmul.f32 %v10652_v18, %v10651_v8  ;;  %v1711_v52 = vmul.f32 %v10653_v49, %v10651_v8  ;;  %v10655_v56 = vld [vmem:[#allocation77_spill] sm:$0xff] }
 0x1ea   : > { %v1712_v21 = vmul.f32 %v10635_v50, %v10651_v8  ;;  %v1548_v15 = vadd.f32 %v1516_v1, %v1468_v30  ;;  %v1713_v20 = vmul.f32 %v10598_v14, %v10651_v8  ;;  %v1790_v34 = vmul.f32 %v10601_v42, %v10654_v61 }
 0x1eb   : > { %v1791_v36 = vmul.f32 %v10602_v51, %v10654_v61  ;;  %v2282_v46 = vadd.f32 %v10636_v57, %v1626_v13  ;;  %v1742_v5 = vadd.f32 %v1710_v2, %v1662_v55  ;;  %v1743_v63 = vadd.f32 %v1711_v52, %v1663_v53  ;;  %v10656_v52 = vld [vmem:[#allocation84_spill] sm:$0xff] }
 0x1ec   : > { %v1744_v3 = vadd.f32 %v1712_v21, %v1664_v39  ;;  %v1628_v33 = vadd.f32 %v1596_v43, %v1548_v15  ;;  %v1745_v28 = vadd.f32 %v1713_v20, %v1665_v45  ;;  %v1792_v27 = vmul.f32 %v10603_v47, %v10654_v61  ;;  %v2173_v15 = vpop.permute.xlu1 %2172 }
 0x1ed   : > { %v1793_v1 = vmul.f32 %v10604_v35, %v10654_v61  ;;  %v2410_v58 = vmax.f32 %v2282_v46, 0.0  ;;  %v1822_v6 = vadd.f32 %v1790_v34, %v1742_v5  ;;  %v1823_v17 = vadd.f32 %v1791_v36, %v1743_v63  ;;  %v10657_v63 = vld [vmem:[#allocation68_spill] sm:$0xff] }
 0x1ee   : > { %v1870_v9 = vmul.f32 %v10606_v19, %v10655_v56  ;;  %v2284_v32 = vadd.f32 %v10636_v57, %v1628_v33  ;;  %v1824_v30 = vadd.f32 %v1792_v27, %v1744_v3  ;;  %v1871_v43 = vmul.f32 %v10607_v37, %v10655_v56  ;;  %v10658_v27 = vld [vmem:[#allocation116_spill] sm:$0xff] }
 0x1ef   : > { %v1825_v55 = vadd.f32 %v1793_v1, %v1745_v28  ;;  %v2522_v53 = vpack.c.bf16 %v2410_v58, %v2406_v22  ;;  %v1872_v39 = vmul.f32 %v10608_v59, %v10655_v56  ;;  %v1873_v45 = vmul.f32 %v10609_v12, %v10655_v56  ;;  %v10659_v58 = vld [vmem:[#allocation78_spill] sm:$0xff] }
 0x1f0   : > { %v1902_v13 = vadd.f32 %v1870_v9, %v1822_v6  ;;  %v2412_v8 = vmax.f32 %v2284_v32, 0.0  ;;  %v1903_v2 = vadd.f32 %v1871_v43, %v1823_v17  ;;  %v1950_v21 = vmul.f32 %v10611_v40, %v10656_v52  ;;  %v10660_v9 = vld [vmem:[#allocation118_spill] sm:$0xff] }
 0x1f1   : > { %v1951_v57 = vmul.f32 %v10612_v25, %v10656_v52  ;;  %2917 = vmatpush1.bf16.msra.mxu0 %v2522_v53  ;;  %v1904_v20 = vadd.f32 %v1872_v39, %v1824_v30  ;;  %v1905_v61 = vadd.f32 %v1873_v45, %v1825_v55  ;;  %v1952_v22 = vmul.f32 %v10613_v7, %v10656_v52  ;;  %v10661_v43 = vld [vmem:[#allocation66_spill] sm:$0xff] }
 0x1f2   : > { %v1953_v34 = vmul.f32 %v10614_v41, %v10656_v52  ;;  %v2524_v36 = vpack.c.bf16 %v2412_v8, %v2408_v24  ;;  %2918 = vmatprep.subr.bf16.mxu0 %v2527_v38  ;;  %v1982_v46 = vadd.f32 %v1950_v21, %v1902_v13  ;;  %v2414_v3 = vmax.f32 %v10657_v63, 0.0  ;;  %v10662_v13 = vld [vmem:[#allocation101_spill] sm:$0xff] }
 0x1f3   : > { %v1983_v5 = vadd.f32 %v1951_v57, %v1903_v2  ;;  %v1984_v33 = vadd.f32 %v1952_v22, %v1904_v20  ;;  %v2418_v1 = vmax.f32 %v10658_v27, 0.0  ;;  %v2416_v6 = vmax.f32 %v10659_v58, 0.0  ;;  %v10663_v2 = vld [vmem:[#allocation99_spill] sm:$0xff]  ;;  %v10664_v20 = vld [vmem:[#allocation128_spill] sm:$0xff]  ;;  %v10666_v58 = vld [vmem:[#allocation125_spill] sm:$0xff] }
 0x1f4   : > { %v1985_v28 = vadd.f32 %v1953_v34, %v1905_v61  ;;  %3110 = vmatpush1.bf16.msra.mxu1 %v2524_v36  ;;  %v8336_v17 = vadd.f32 %v2173_v15, %v1982_v46  ;;  %v2420_v32 = vmax.f32 %v10660_v9, 0.0  ;;  %v2423_v24 = vmax.f32 %v8267_v11, 0.0  ;;  %v10665_v36 = vld [vmem:[#allocation110_spill] sm:$0xff] }
 0x1f5   : > { %v8338_v56 = vadd.f32 %v2173_v15, %v1983_v5  ;;  %3111 = vmatprep.subr.bf16.mxu1 %v2529_v10  ;;  %v8342_v38 = vadd.f32 %v2173_v15, %v1984_v33  ;;  %v2526_v55 = vpack.c.bf16 %v2418_v1, %v2414_v3  ;;  %v2427_v53 = vmax.f32 %v10661_v43, 0.0 }
 0x1f6   : > { %v8344_v30 = vadd.f32 %v2173_v15, %v1985_v28  ;;  %v2528_v39 = vpack.c.bf16 %v2420_v32, %v2416_v6  ;;  %v2425_v45 = vmax.f32 %v8276_v31, 0.0  ;;  %v2429_v8 = vmax.f32 %v10662_v13, 0.0 }
 0x1f7   : > { %v1670_v52 = vmul.f32 %v10647_v29, %v10663_v2  ;;  %2919 = vmatpush1.bf16.msra.mxu0 %v2526_v55  ;;  %v2531_v21 = vpack.c.bf16 %v2427_v53, %v2423_v24  ;;  %v1671_v11 = vmul.f32 %v10648_v44, %v10663_v2  ;;  %v1672_v10 = vmul.f32 %v10649_v16, %v10663_v2 }
 0x1f8   : > { %v1673_v57 = vmul.f32 %v10650_v0, %v10663_v2  ;;  %3112 = vmatpush1.bf16.msra.mxu1 %v2528_v39  ;;  %v2533_v15 = vpack.c.bf16 %v2429_v8, %v2425_v45  ;;  %v1718_v31 = vmul.f32 %v10652_v18, %v10664_v20  ;;  %v1719_v61 = vmul.f32 %v10653_v49, %v10664_v20  ;;  %v10667_v45 = vld [vmem:[#allocation122_spill] sm:$0xff] }
 0x1f9   : > { %v1720_v22 = vmul.f32 %v10635_v50, %v10664_v20  ;;  %2920 = vmatprep.subr.bf16.mxu0 %v2531_v21  ;;  %v1721_v34 = vmul.f32 %v10598_v14, %v10664_v20  ;;  %v1798_v46 = vmul.f32 %v10601_v42, %v10665_v36  ;;  %v1799_v5 = vmul.f32 %v10602_v51, %v10665_v36  ;;  %v10668_v20 = vld [vmem:[#allocation88_spill] sm:$0xff] }
 0x1fa   : > { %v1800_v63 = vmul.f32 %v10603_v47, %v10665_v36  ;;  %3113 = vmatprep.subr.bf16.mxu1 %v2533_v15  ;;  %v1750_v3 = vadd.f32 %v1718_v31, %v1670_v52  ;;  %v1751_v33 = vadd.f32 %v1719_v61, %v1671_v11  ;;  %v1801_v27 = vmul.f32 %v10604_v35, %v10665_v36 }
 0x1fb   : > { %v1752_v28 = vadd.f32 %v1720_v22, %v1672_v10  ;;  %v1753_v1 = vadd.f32 %v1721_v34, %v1673_v57  ;;  %v1878_v6 = vmul.f32 %v10606_v19, %v10666_v58  ;;  %v1879_v9 = vmul.f32 %v10607_v37, %v10666_v58 }
 0x1fc   : > { %v1880_v32 = vmul.f32 %v10608_v59, %v10666_v58  ;;  %v1830_v24 = vadd.f32 %v1798_v46, %v1750_v3  ;;  %v1831_v55 = vadd.f32 %v1799_v5, %v1751_v33  ;;  %v1881_v53 = vmul.f32 %v10609_v12, %v10666_v58  ;;  %v10669_v46 = vld [vmem:[#allocation119_spill] sm:$0xff] }
 0x1fd   : > { %v1832_v43 = vadd.f32 %v1800_v63, %v1752_v28  ;;  %v1833_v39 = vadd.f32 %v1801_v27, %v1753_v1  ;;  %v1958_v13 = vmul.f32 %v10611_v40, %v10667_v45  ;;  %v1959_v8 = vmul.f32 %v10612_v25, %v10667_v45  ;;  %v10670_v28 = vld [vmem:[#allocation104_spill] sm:$0xff] }
 0x1fe   : > { %v1960_v2 = vmul.f32 %v10613_v7, %v10667_v45  ;;  %v1910_v52 = vadd.f32 %v1878_v6, %v1830_v24  ;;  %v1911_v21 = vadd.f32 %v1879_v9, %v1831_v55  ;;  %v1961_v10 = vmul.f32 %v10614_v41, %v10667_v45  ;;  %v10671_v6 = vld [vmem:[#allocation106_spill] sm:$0xff] }
 0x1ff   : > { %v1912_v11 = vadd.f32 %v1880_v32, %v1832_v43  ;;  %v1913_v57 = vadd.f32 %v1881_v53, %v1833_v39  ;;  %v2422_v15 = vmax.f32 %v8265_v26, 0.0  ;;  %v2426_v31 = vmax.f32 %v10668_v20, 0.0  ;;  %v10672_v32 = vld [vmem:[#allocation103_spill] sm:$0xff]  ;;  %v10673_v43 = vld [vmem:[#allocation105_spill] sm:$0xff] }
 0x200   : > { %v2424_v61 = vmax.f32 %v8271_v54, 0.0  ;;  %v1990_v22 = vadd.f32 %v1958_v13, %v1910_v52  ;;  %v1991_v34 = vadd.f32 %v1959_v8, %v1911_v21  ;;  %v2428_v5 = vmax.f32 %v10669_v46, 0.0 }
 0x201   : > { %v8392_v36 = vadd.f32 %v1960_v2, %v1912_v11  ;;  %v1993_v63 = vadd.f32 %v1961_v10, %v1913_v57  ;;  %v2530_v3 = vpack.c.bf16 %v2426_v31, %v2422_v15  ;;  %v2431_v33 = vmax.f32 %v8338_v56, 0.0 }
 0x202   : > { %v2435_v27 = vmax.f32 %v10670_v28, 0.0  ;;  %v2532_v1 = vpack.c.bf16 %v2428_v5, %v2424_v61  ;;  %v2433_v26 = vmax.f32 %v8344_v30, 0.0  ;;  %v2437_v9 = vmax.f32 %v10671_v6, 0.0 }
 0x203   : > { %2921 = vmatpush1.bf16.msra.mxu0 %v2530_v3  ;;  %v2430_v54 = vmax.f32 %v8336_v17, 0.0  ;;  %v2434_v24 = vmax.f32 %v10672_v32, 0.0  ;;  %v2432_v55 = vmax.f32 %v8342_v38, 0.0  ;;  %v2436_v53 = vmax.f32 %v10673_v43, 0.0  ;;  %v2183_v17 = vpop.permute.xlu1 %2182 }
 0x204   : > { %v2535_v58 = vpack.c.bf16 %v2435_v27, %v2431_v33  ;;  %3114 = vmatpush1.bf16.msra.mxu1 %v2532_v1  ;;  %v2537_v56 = vpack.c.bf16 %v2437_v9, %v2433_v26  ;;  %v1675_v39 = vmul.f32 %v10648_v44, %v10621_v62  ;;  %v1723_v45 = vmul.f32 %v10653_v49, %v10622_v23 }
 0x205   : > { %v1803_v30 = vmul.f32 %v10602_v51, %v10623_v60  ;;  %v2534_v13 = vpack.c.bf16 %v2434_v24, %v2430_v54  ;;  %v2536_v8 = vpack.c.bf16 %v2436_v53, %v2432_v55  ;;  %v1883_v38 = vmul.f32 %v10607_v37, %v10624_v4  ;;  %v5511_v53 = vld [vmem:[%s9809_s3 + $0x10] ss:$8 sps:$4 sm:$0xff]  }
 0x206   : > { %2922 = vmatprep.subr.bf16.mxu0 %v2535_v58  ;;  %3115 = vmatprep.subr.bf16.mxu1 %v2537_v56  ;;  %v1755_v2 = vadd.f32 %v1723_v45, %v1675_v39  ;;  %v1677_v52 = vmul.f32 %v10650_v0, %v10621_v62  ;;  %v1725_v44 = vmul.f32 %v10598_v14, %v10622_v23  ;;  %v5512_v56 = vld [vmem:[%s9809_s3 + $0x24] ss:$8 sps:$4 sm:$0xff]   ;;  %v5514_v39 = vld [vmem:[%s9809_s3 + $0x20] ss:$8 sps:$4 sm:$0xff]   ;;  %v5515_v45 = vld [vmem:[%s9809_s3 + $0x34] ss:$8 sps:$4 sm:$0xff]  }
 0x207   : > { %2923 = vmatpush1.bf16.msra.mxu0 %v2534_v13  ;;  %v1963_v49 = vmul.f32 %v10612_v25, %v10625_v48  ;;  %v1805_v51 = vmul.f32 %v10604_v35, %v10623_v60  ;;  %v1885_v21 = vmul.f32 %v10609_v12, %v10624_v4  ;;  %v1674_v37 = vmul.f32 %v10647_v29, %v10621_v62  ;;  %v5518_v13 = vld [vmem:[%s9809_s3 + $0x44] ss:$8 sps:$4 sm:$0xff]  }
 0x208   : > { %3116 = vmatpush1.bf16.msra.mxu1 %v2536_v8  ;;  %v1835_v11 = vadd.f32 %v1803_v30, %v1755_v2  ;;  %v1757_v10 = vadd.f32 %v1725_v44, %v1677_v52  ;;  %v1722_v0 = vmul.f32 %v10652_v18, %v10622_v23  ;;  %v2311_v14 = vadd.f32 %v2183_v17, %v1991_v34  ;;  %v5517_v30 = vld [vmem:[%s9809_s3 + $0x30] ss:$8 sps:$4 sm:$0xff]   ;;  %v5520_v8 = vld [vmem:[%s9809_s3 + $0x40] ss:$8 sps:$4 sm:$0xff]   ;;  %v5527_v44 = vld [vmem:[%s9809_s3 + $0x74] ss:$8 sps:$4 sm:$0xff]  }
 0x209   : > { %v1965_v57 = vmul.f32 %v10614_v41, %v10625_v48  ;;  %v1802_v25 = vmul.f32 %v10601_v42, %v10623_v60  ;;  %v1882_v35 = vmul.f32 %v10606_v19, %v10624_v4  ;;  %v1676_v31 = vmul.f32 %v10649_v16, %v10621_v62  ;;  %v2188_v19 = vpop.permute.xlu0 %2187  ;;  %v5523_v2 = vld [vmem:[%s9809_s3 + $0x50] ss:$8 sps:$4 sm:$0xff]   ;;  %v5526_v52 = vld [vmem:[%s9809_s3 + $0x60] ss:$8 sps:$4 sm:$0xff]  }
 0x20a   : > { %v1915_v15 = vadd.f32 %v1883_v38, %v1835_v11  ;;  %v1837_v12 = vadd.f32 %v1805_v51, %v1757_v10  ;;  %v1754_v20 = vadd.f32 %v1722_v0, %v1674_v37  ;;  %v2313_v29 = vadd.f32 %v2183_v17, %v1993_v63  ;;  %v5524_v38 = vld [vmem:[%s9809_s3 + $0x64] ss:$8 sps:$4 sm:$0xff]   ;;  %v5533_v11 = vld [vmem:[%s9809_s3 + $0x94] ss:$8 sps:$4 sm:$0xff]   ;;  %v5535_v10 = vld [vmem:[%s9809_s3 + $0x90] ss:$8 sps:$4 sm:$0xff]  }
 0x20b   : > { %v1724_v18 = vmul.f32 %v10635_v50, %v10622_v23  ;;  %v1804_v61 = vmul.f32 %v10603_v47, %v10623_v60  ;;  %v1962_v42 = vmul.f32 %v10611_v40, %v10625_v48  ;;  %v2310_v5 = vadd.f32 %v2183_v17, %v1990_v22  ;;  %v5530_v51 = vld [vmem:[%s9809_s3 + $0x84] ss:$8 sps:$4 sm:$0xff]   ;;  %v5538_v0 = vld [vmem:[%s9809_s3 + $0xa0] ss:$8 sps:$4 sm:$0xff]  }
 0x20c   : > { %v1995_v41 = vadd.f32 %v1963_v49, %v1915_v15  ;;  %v1917_v34 = vadd.f32 %v1885_v21, %v1837_v12  ;;  %v1834_v46 = vadd.f32 %v1802_v25, %v1754_v20  ;;  %v1884_v33 = vmul.f32 %v10608_v59, %v10624_v4  ;;  %v5529_v49 = vld [vmem:[%s9809_s3 + $0x70] ss:$8 sps:$4 sm:$0xff]   ;;  %v5532_v21 = vld [vmem:[%s9809_s3 + $0x80] ss:$8 sps:$4 sm:$0xff]   ;;  %v5536_v37 = vld [vmem:[%s9809_s3 + $0xa4] ss:$8 sps:$4 sm:$0xff]  }
 0x20d   : > { %v1756_v3 = vadd.f32 %v1724_v18, %v1676_v31  ;;  %v2439_v16 = vmax.f32 %v2311_v14, 0.0  ;;  %v1964_v47 = vmul.f32 %v10613_v7, %v10625_v48  ;;  %v2441_v27 = vmax.f32 %v2313_v29, 0.0  ;;  %v5506_v48 = vld [vmem:[%s9809_s3] ss:$8 sps:$4 sm:$0xff]   ;;  %v5539_v14 = vld [vmem:[%s9809_s3 + $0xb4] ss:$8 sps:$4 sm:$0xff]  }
 0x20e   : > { %v2315_v62 = vadd.f32 %v2188_v19, %v1995_v41  ;;  %v1997_v63 = vadd.f32 %v1965_v57, %v1917_v34  ;;  %v1914_v28 = vadd.f32 %v1882_v35, %v1834_v46  ;;  %v2312_v40 = vadd.f32 %v2183_v17, %v8392_v36  ;;  %v5509_v36 = vld [vmem:[%s9809_s3 + $0x14] ss:$8 sps:$4 sm:$0xff]   ;;  %v5541_v57 = vld [vmem:[%s9809_s3 + $0xb0] ss:$8 sps:$4 sm:$0xff]   ;;  %v5542_v25 = vld [vmem:[%s9809_s3 + $0xc4] ss:$8 sps:$4 sm:$0xff]  }
 0x20f   : > { %v1836_v23 = vadd.f32 %v1804_v61, %v1756_v3  ;;  %v2438_v9 = vmax.f32 %v2310_v5, 0.0  ;;  %v5521_v17 = vld [vmem:[%s9809_s3 + $0x54] ss:$8 sps:$4 sm:$0xff]   ;;  %v5544_v35 = vld [vmem:[%s9809_s3 + $0xc0] ss:$8 sps:$4 sm:$0xff]   ;;  %v2577_v61 = vpop.permute.xlu1 %2576 }
 0x210   : > { %v2443_v60 = vmax.f32 %v2315_v62, 0.0  ;;  %v2317_v50 = vadd.f32 %v2188_v19, %v1997_v63  ;;  %v1994_v1 = vadd.f32 %v1962_v42, %v1914_v28  ;;  %v2440_v24 = vmax.f32 %v2312_v40, 0.0  ;;  %v5545_v15 = vld [vmem:[%s9809_s3 + $0xd4] ss:$8 sps:$4 sm:$0xff]   ;;  %v5547_v12 = vld [vmem:[%s9809_s3 + $0xd0] ss:$8 sps:$4 sm:$0xff]   ;;  %v2582_v42 = vpop.permute.xlu0 %2581 }
 0x211   : > { %v1916_v58 = vadd.f32 %v1884_v33, %v1836_v23  ;;  %v5548_v20 = vld [vmem:[%s9809_s3 + $0xe4] ss:$8 sps:$4 sm:$0xff]   ;;  %v5550_v31 = vld [vmem:[%s9809_s3 + $0xe0] ss:$8 sps:$4 sm:$0xff]   ;;  %v5551_v29 = vld [vmem:[%s9809_s3 + $0xf4] ss:$8 sps:$4 sm:$0xff]  }
 0x212   : > { %v2539_v22 = vpack.c.bf16 %v2443_v60, %v2439_v16  ;;  %v2445_v26 = vmax.f32 %v2317_v50, 0.0  ;;  %v2314_v6 = vadd.f32 %v2188_v19, %v1994_v1  ;;  %v5553_v18 = vld [vmem:[%s9809_s3 + $0xf0] ss:$8 sps:$4 sm:$0xff]  }
 0x213   : > { %v1996_v59 = vadd.f32 %v1964_v47, %v1916_v58 }
 0x214   : > { %2924 = vmatprep.subr.bf16.mxu0 %v2539_v22  ;;  %v2541_v4 = vpack.c.bf16 %v2445_v26, %v2441_v27  ;;  %v2442_v54 = vmax.f32 %v2314_v6, 0.0  ;;  %v5556_v6 = vld [vmem:[%s9811_s5 + $0x4] ss:$8 sps:$4 sm:$0xff]  }
 0x215   : > { %v2316_v32 = vadd.f32 %v2188_v19, %v1996_v59 }
 0x216   : > { %3117 = vmatprep.subr.bf16.mxu1 %v2541_v4  ;;  %v2538_v55 = vpack.c.bf16 %v2442_v54, %v2438_v9  ;;  %v2587_v9 = vpop.permute.xlu1 %2586 }
 0x217   : > { %v2444_v7 = vmax.f32 %v2316_v32, 0.0 }
 0x218   : > { %2925 = vmatpush1.bf16.msra.mxu0 %v2538_v55 }
 0x219   : > { %v2540_v43 = vpack.c.bf16 %v2444_v7, %v2440_v24 }
 0x21b   : > { %3118 = vmatpush1.bf16.msra.mxu1 %v2540_v43  ;;  %2927 = vmatmul.mubr.bf16.vlgmr.msra.gmra.mrb[0].mxu0 %v5506_v48 }
 0x21c   : > { %2936 = vmatprep.mubr.bf16.mxu0 %v5509_v36 }
 0x21e   : > { %3120 = vmatmul.mubr.bf16.vlgmr.msra.gmra.mrb[0].mxu1 %v5506_v48 }
 0x21f   : > { %3129 = vmatprep.mubr.bf16.mxu1 %v5509_v36  ;;  %v2592_v36 = vpop.permute.xlu0 %2591 }
 0x223   : > { %2937 = vmatmul.mubr.bf16.gmra.mrb[4].mxu0 %v5511_v53 }
 0x224   : > { %2946 = vmatprep.mubr.bf16.mxu0 %v5512_v56 }
 0x226   : > { %3130 = vmatmul.mubr.bf16.gmra.mrb[4].mxu1 %v5511_v53 }
 0x227   : > { %3139 = vmatprep.mubr.bf16.mxu1 %v5512_v56 }
 0x22b   : > { %2947 = vmatmul.mubr.bf16.gmra.mrb[8].mxu0 %v5514_v39 }
 0x22c   : > { %2956 = vmatprep.mubr.bf16.mxu0 %v5515_v45 }
 0x22e   : > { %3140 = vmatmul.mubr.bf16.gmra.mrb[8].mxu1 %v5514_v39 }
 0x22f   : > { %3149 = vmatprep.mubr.bf16.mxu1 %v5515_v45 }
 0x233   : > { %2957 = vmatmul.mubr.bf16.gmra.mrb[12].mxu0 %v5517_v30 }
 0x234   : > { %2966 = vmatprep.mubr.bf16.mxu0 %v5518_v13 }
 0x236   : > { %3150 = vmatmul.mubr.bf16.gmra.mrb[12].mxu1 %v5517_v30 }
 0x237   : > { %3159 = vmatprep.mubr.bf16.mxu1 %v5518_v13 }
 0x23b   : > { %2967 = vmatmul.mubr.bf16.gmra.mrb[16].mxu0 %v5520_v8 }
 0x23c   : > { %2976 = vmatprep.mubr.bf16.mxu0 %v5521_v17 }
 0x23e   : > { %3160 = vmatmul.mubr.bf16.gmra.mrb[16].mxu1 %v5520_v8 }
 0x23f   : > { %3169 = vmatprep.mubr.bf16.mxu1 %v5521_v17 }
 0x243   : > { %2977 = vmatmul.mubr.bf16.gmra.mrb[20].mxu0 %v5523_v2 }
 0x244   : > { %2986 = vmatprep.mubr.bf16.mxu0 %v5524_v38 }
 0x246   : > { %3170 = vmatmul.mubr.bf16.gmra.mrb[20].mxu1 %v5523_v2 }
 0x247   : > { %3179 = vmatprep.mubr.bf16.mxu1 %v5524_v38 }
 0x24b   : > { %2987 = vmatmul.mubr.bf16.gmra.mrb[24].mxu0 %v5526_v52 }
 0x24c   : > { %2996 = vmatprep.mubr.bf16.mxu0 %v5527_v44 }
 0x24e   : > { %3180 = vmatmul.mubr.bf16.gmra.mrb[24].mxu1 %v5526_v52 }
 0x24f   : > { %3189 = vmatprep.mubr.bf16.mxu1 %v5527_v44 }
 0x253   : > { %2997 = vmatmul.mubr.bf16.gmra.mrb[28].mxu0 %v5529_v49 }
 0x254   : > { %3006 = vmatprep.mubr.bf16.mxu0 %v5530_v51 }
 0x256   : > { %3190 = vmatmul.mubr.bf16.gmra.mrb[28].mxu1 %v5529_v49 }
 0x257   : > { %3199 = vmatprep.mubr.bf16.mxu1 %v5530_v51 }
 0x25b   : > { %3007 = vmatmul.mubr.bf16.gmra.mrb[32].mxu0 %v5532_v21 }
 0x25c   : > { %3016 = vmatprep.mubr.bf16.mxu0 %v5533_v11 }
 0x25e   : > { %3200 = vmatmul.mubr.bf16.gmra.mrb[32].mxu1 %v5532_v21 }
 0x25f   : > { %3209 = vmatprep.mubr.bf16.mxu1 %v5533_v11 }
 0x263   : > { %3017 = vmatmul.mubr.bf16.gmra.mrb[36].mxu0 %v5535_v10 }
 0x264   : > { %3026 = vmatprep.mubr.bf16.mxu0 %v5536_v37 }
 0x266   : > { %3210 = vmatmul.mubr.bf16.gmra.mrb[36].mxu1 %v5535_v10 }
 0x267   : > { %3219 = vmatprep.mubr.bf16.mxu1 %v5536_v37 }
 0x26b   : > { %3027 = vmatmul.mubr.bf16.gmra.mrb[40].mxu0 %v5538_v0 }
 0x26c   : > { %3036 = vmatprep.mubr.bf16.mxu0 %v5539_v14 }
 0x26e   : > { %3220 = vmatmul.mubr.bf16.gmra.mrb[40].mxu1 %v5538_v0 }
 0x26f   : > { %3229 = vmatprep.mubr.bf16.mxu1 %v5539_v14  ;;  %v2597_v14 = vpop.permute.xlu1 %2596 }
 0x273   : > { %3037 = vmatmul.mubr.bf16.gmra.mrb[44].mxu0 %v5541_v57 }
 0x274   : > { %3046 = vmatprep.mubr.bf16.mxu0 %v5542_v25 }
 0x276   : > { %3230 = vmatmul.mubr.bf16.gmra.mrb[44].mxu1 %v5541_v57 }
 0x277   : > { %3239 = vmatprep.mubr.bf16.mxu1 %v5542_v25 }
 0x27b   : > { %3047 = vmatmul.mubr.bf16.gmra.mrb[48].mxu0 %v5544_v35 }
 0x27c   : > { %3056 = vmatprep.mubr.bf16.mxu0 %v5545_v15 }
 0x27e   : > { %3240 = vmatmul.mubr.bf16.gmra.mrb[48].mxu1 %v5544_v35 }
 0x27f   : > { %3249 = vmatprep.mubr.bf16.mxu1 %v5545_v15 }
 0x283   : > { %3057 = vmatmul.mubr.bf16.gmra.mrb[52].mxu0 %v5547_v12 }
 0x284   : > { %3066 = vmatprep.mubr.bf16.mxu0 %v5548_v20 }
 0x286   : > { %3250 = vmatmul.mubr.bf16.gmra.mrb[52].mxu1 %v5547_v12 }
 0x287   : > { %3259 = vmatprep.mubr.bf16.mxu1 %v5548_v20 }
 0x28b   : > { %3067 = vmatmul.mubr.bf16.gmra.mrb[56].mxu0 %v5550_v31 }
 0x28c   : > { %3076 = vmatprep.mubr.bf16.mxu0 %v5551_v29 }
 0x28e   : > { %3260 = vmatmul.mubr.bf16.gmra.mrb[56].mxu1 %v5550_v31 }
 0x28f   : > { %3269 = vmatprep.mubr.bf16.mxu1 %v5551_v29 }
 0x293   : > { %3077 = vmatmul.mubr.bf16.gmra.mrb[60].mxu0 %v5553_v18 }
 0x294   : > { %3888 = vmatprep.mubr.bf16.mxu0 %v5556_v6 }
 0x296   : > { %3270 = vmatmul.mubr.bf16.gmra.mrb[60].mxu1 %v5553_v18  ;;  %v2602_v18 = vpop.permute.xlu0 %2601 }
 0x297   : > { %4081 = vmatprep.mubr.bf16.mxu1 %v5556_v6 }
 0x2ee   : > { %v2928_v41 = vpop.f32.mrb[0].mxu0 }
 0x2ef   : > { %v2929_v34 = vadd.f32 %v2928_v41, %v2577_v61  ;;  %v2930_v46 = vpop.f32.mrb[1].mxu0 }
 0x2f0   : > { %v2931_v19 = vadd.f32 %v2930_v46, %v2577_v61  ;;  %v2932_v5 = vpop.f32.mrb[2].mxu0 }
 0x2f1   : > { %v3121_v3 = vpop.f32.mrb[0].mxu1  ;;  %v2933_v33 = vadd.f32 %v2932_v5, %v2582_v42  ;;  %v2934_v62 = vpop.f32.mrb[3].mxu0  ;;  %v3280_v23 = vmax.f32 %v2929_v34, 0.0 }
 0x2f2   : > { %v3122_v16 = vadd.f32 %v3121_v3, %v2577_v61  ;;  %v3123_v63 = vpop.f32.mrb[1].mxu1  ;;  %v2935_v28 = vadd.f32 %v2934_v62, %v2582_v42  ;;  %v3281_v27 = vmax.f32 %v2931_v19, 0.0 }
 0x2f3   : > { %v3124_v47 = vadd.f32 %v3123_v63, %v2577_v61  ;;  %v3284_v60 = vmax.f32 %v2933_v33, 0.0  ;;  %v3125_v50 = vpop.f32.mrb[2].mxu1 }
 0x2f4   : > { %v3126_v1 = vadd.f32 %v3125_v50, %v2582_v42  ;;  %v3285_v40 = vmax.f32 %v2935_v28, 0.0  ;;  %v3127_v58 = vpop.f32.mrb[3].mxu1  ;;  %v3282_v59 = vmax.f32 %v3122_v16, 0.0 }
 0x2f5   : > { %v3440_v22 = vpack.c.bf16 %v3284_v60, %v3280_v23  ;;  %v3128_v26 = vadd.f32 %v3127_v58, %v2582_v42  ;;  %v3283_v24 = vmax.f32 %v3124_v47, 0.0  ;;  %v2607_v58 = vpop.permute.xlu1 %2606 }
 0x2f6   : > { %v3286_v4 = vmax.f32 %v3126_v1, 0.0  ;;  %v3441_v54 = vpack.c.bf16 %v3285_v40, %v3281_v27  ;;  %v2938_v32 = vpop.f32.mrb[4].mxu0 }
 0x2f7   : > { %v3287_v55 = vmax.f32 %v3128_v26, 0.0  ;;  %v2939_v7 = vadd.f32 %v2938_v32, %v2587_v9  ;;  %v2940_v48 = vpop.f32.mrb[5].mxu0 }
 0x2f8   : > { %v3442_v43 = vpack.c.bf16 %v3286_v4, %v3282_v59  ;;  %v2941_v53 = vadd.f32 %v2940_v48, %v2587_v9  ;;  %v2942_v56 = vpop.f32.mrb[6].mxu0  ;;  %3856 = vmatprep.subr.bf16.mxu0 %v3441_v54 }
 0x2f9   : > { %v3443_v39 = vpack.c.bf16 %v3287_v55, %v3283_v24  ;;  %v3131_v45 = vpop.f32.mrb[4].mxu1  ;;  %v2943_v30 = vadd.f32 %v2942_v56, %v2592_v36  ;;  %v2944_v13 = vpop.f32.mrb[7].mxu0  ;;  %3857 = vmatpush1.bf16.msra.mxu0 %v3440_v22  ;;  %v3288_v38 = vmax.f32 %v2939_v7, 0.0 }
 0x2fa   : > { %v3132_v8 = vadd.f32 %v3131_v45, %v2587_v9  ;;  %v3133_v17 = vpop.f32.mrb[5].mxu1  ;;  %v2945_v2 = vadd.f32 %v2944_v13, %v2592_v36  ;;  %v3289_v51 = vmax.f32 %v2941_v53, 0.0  ;;  %v2612_v24 = vpop.permute.xlu0 %2611 }
 0x2fb   : > { %v3134_v52 = vadd.f32 %v3133_v17, %v2587_v9  ;;  %v3292_v44 = vmax.f32 %v2943_v30, 0.0  ;;  %v3135_v49 = vpop.f32.mrb[6].mxu1  ;;  %4049 = vmatprep.subr.bf16.mxu1 %v3443_v39 }
 0x2fc   : > { %v3136_v21 = vadd.f32 %v3135_v49, %v2592_v36  ;;  %v3293_v11 = vmax.f32 %v2945_v2, 0.0  ;;  %v3137_v10 = vpop.f32.mrb[7].mxu1  ;;  %4050 = vmatpush1.bf16.msra.mxu1 %v3442_v43  ;;  %v3290_v57 = vmax.f32 %v3132_v8, 0.0 }
 0x2fd   : > { %v3444_v37 = vpack.c.bf16 %v3292_v44, %v3288_v38  ;;  %v3138_v0 = vadd.f32 %v3137_v10, %v2592_v36  ;;  %v3291_v12 = vmax.f32 %v3134_v52, 0.0 }
 0x2fe   : > { %v3294_v25 = vmax.f32 %v3136_v21, 0.0  ;;  %v3445_v35 = vpack.c.bf16 %v3293_v11, %v3289_v51  ;;  %v2948_v15 = vpop.f32.mrb[8].mxu0  ;;  %v2617_v11 = vpop.permute.xlu1 %2616 }
 0x2ff   : > { %v3295_v20 = vmax.f32 %v3138_v0, 0.0  ;;  %v2949_v31 = vadd.f32 %v2948_v15, %v2597_v14  ;;  %v2950_v29 = vpop.f32.mrb[9].mxu0 }
 0x300   : > { %v3446_v61 = vpack.c.bf16 %v3294_v25, %v3290_v57  ;;  %v2951_v41 = vadd.f32 %v2950_v29, %v2597_v14  ;;  %v2952_v34 = vpop.f32.mrb[10].mxu0  ;;  %3858 = vmatprep.subr.bf16.mxu0 %v3445_v35 }
 0x301   : > { %v3447_v46 = vpack.c.bf16 %v3295_v20, %v3291_v12  ;;  %v3141_v42 = vpop.f32.mrb[8].mxu1  ;;  %v2953_v19 = vadd.f32 %v2952_v34, %v2602_v18  ;;  %v2954_v5 = vpop.f32.mrb[11].mxu0  ;;  %3859 = vmatpush1.bf16.msra.mxu0 %v3444_v37  ;;  %v3296_v16 = vmax.f32 %v2949_v31, 0.0  ;;  %v8543_v12 = vld [vmem:[%s9813_s7] sm:$0xff] }
 0x302   : > { %v3142_v3 = vadd.f32 %v3141_v42, %v2597_v14  ;;  %v3143_v33 = vpop.f32.mrb[9].mxu1  ;;  %v2955_v62 = vadd.f32 %v2954_v5, %v2602_v18  ;;  %v3297_v47 = vmax.f32 %v2951_v41, 0.0  ;;  %v2622_v20 = vpop.permute.xlu0 %2621  ;;  %4513 = vperm.xlu0 %5492, %v8543_v12  }
 0x303   : > { %v3144_v63 = vadd.f32 %v3143_v33, %v2597_v14  ;;  %v3300_v28 = vmax.f32 %v2953_v19, 0.0  ;;  %v3145_v23 = vpop.f32.mrb[10].mxu1  ;;  %4051 = vmatprep.subr.bf16.mxu1 %v3447_v46 }
 0x304   : > { %v3146_v60 = vadd.f32 %v3145_v23, %v2602_v18  ;;  %v3301_v50 = vmax.f32 %v2955_v62, 0.0  ;;  %v3147_v27 = vpop.f32.mrb[11].mxu1  ;;  %4052 = vmatpush1.bf16.msra.mxu1 %v3446_v61  ;;  %v3298_v22 = vmax.f32 %v3142_v3, 0.0  ;;  %v3505_v3 = vld [vmem:[%s9812_s6 + $0x8] sm:$0xff] }
 0x305   : > { %v3448_v1 = vpack.c.bf16 %v3300_v28, %v3296_v16  ;;  %v3148_v40 = vadd.f32 %v3147_v27, %v2602_v18  ;;  %v3299_v59 = vmax.f32 %v3144_v63, 0.0 }
 0x306   : > { %v3302_v26 = vmax.f32 %v3146_v60, 0.0  ;;  %v3449_v6 = vpack.c.bf16 %v3301_v50, %v3297_v47  ;;  %v2958_v9 = vpop.f32.mrb[12].mxu0  ;;  %v10674_v50 = vmov 0  }
 0x307   : > { %v3303_v4 = vmax.f32 %v3148_v40, 0.0  ;;  %v2959_v54 = vadd.f32 %v2958_v9, %v2607_v58  ;;  %v2960_v32 = vpop.f32.mrb[13].mxu0  ;;  %5493 = vset.pattern.permute.xlu0 %v10674_v50  ;;  %v2627_v40 = vpop.permute.xlu1 %2626 }
 0x308   : > { %v3450_v55 = vpack.c.bf16 %v3302_v26, %v3298_v22  ;;  %v2961_v7 = vadd.f32 %v2960_v32, %v2607_v58  ;;  %v2962_v48 = vpop.f32.mrb[14].mxu0  ;;  %3860 = vmatprep.subr.bf16.mxu0 %v3449_v6  ;;  %3543 = vperm.xlu0 %5493, %v3505_v3   ;;  %v3507_v32 = vld [vmem:[%s9812_s6 + $0x18] sm:$0xff] }
 0x309   : > { %v3451_v36 = vpack.c.bf16 %v3303_v4, %v3299_v59  ;;  %v3151_v43 = vpop.f32.mrb[12].mxu1  ;;  %v2963_v53 = vadd.f32 %v2962_v48, %v2612_v24  ;;  %v2964_v56 = vpop.f32.mrb[15].mxu0  ;;  %3861 = vmatpush1.bf16.msra.mxu0 %v3448_v1  ;;  %v3304_v13 = vmax.f32 %v2959_v54, 0.0 }
 0x30a   : > { %v3152_v39 = vadd.f32 %v3151_v43, %v2607_v58  ;;  %v3153_v45 = vpop.f32.mrb[13].mxu1  ;;  %v2965_v30 = vadd.f32 %v2964_v56, %v2612_v24  ;;  %v3305_v38 = vmax.f32 %v2961_v7, 0.0 }
 0x30b   : > { %v3154_v8 = vadd.f32 %v3153_v45, %v2607_v58  ;;  %v3308_v17 = vmax.f32 %v2963_v53, 0.0  ;;  %v3155_v2 = vpop.f32.mrb[14].mxu1  ;;  %4053 = vmatprep.subr.bf16.mxu1 %v3451_v36 }
 0x30c   : > { %v3156_v52 = vadd.f32 %v3155_v2, %v2612_v24  ;;  %v3309_v44 = vmax.f32 %v2965_v30, 0.0  ;;  %v3157_v49 = vpop.f32.mrb[15].mxu1  ;;  %4054 = vmatpush1.bf16.msra.mxu1 %v3450_v55  ;;  %v3306_v10 = vmax.f32 %v3152_v39, 0.0  ;;  %3553 = vperm.xlu0 %5493, %v3507_v32  }
 0x30d   : > { %v3452_v51 = vpack.c.bf16 %v3308_v17, %v3304_v13  ;;  %v3158_v21 = vadd.f32 %v3157_v49, %v2612_v24  ;;  %v3307_v57 = vmax.f32 %v3154_v8, 0.0  ;;  %v2632_v24 = vpop.permute.xlu0 %2631  ;;  %v3509_v13 = vld [vmem:[%s9812_s6 + $0x28] sm:$0xff] }
 0x30e   : > { %v3310_v37 = vmax.f32 %v3156_v52, 0.0  ;;  %v3453_v0 = vpack.c.bf16 %v3309_v44, %v3305_v38  ;;  %v2968_v14 = vpop.f32.mrb[16].mxu0 }
 0x30f   : > { %v3311_v25 = vmax.f32 %v3158_v21, 0.0  ;;  %v2969_v35 = vadd.f32 %v2968_v14, %v2617_v11  ;;  %v2970_v15 = vpop.f32.mrb[17].mxu0 }
 0x310   : > { %v3454_v31 = vpack.c.bf16 %v3310_v37, %v3306_v10  ;;  %v2971_v29 = vadd.f32 %v2970_v15, %v2617_v11  ;;  %v2972_v18 = vpop.f32.mrb[18].mxu0  ;;  %3862 = vmatprep.subr.bf16.mxu0 %v3453_v0  ;;  %3563 = vperm.xlu0 %5493, %v3509_v13   ;;  %v2637_v10 = vpop.permute.xlu1 %2636 }
 0x311   : > { %v3455_v61 = vpack.c.bf16 %v3311_v25, %v3307_v57  ;;  %v3161_v41 = vpop.f32.mrb[16].mxu1  ;;  %v2973_v34 = vadd.f32 %v2972_v18, %v2622_v20  ;;  %v2974_v46 = vpop.f32.mrb[19].mxu0  ;;  %3863 = vmatpush1.bf16.msra.mxu0 %v3452_v51  ;;  %v3312_v33 = vmax.f32 %v2969_v35, 0.0 }
 0x312   : > { %v3162_v42 = vadd.f32 %v3161_v41, %v2617_v11  ;;  %v3163_v19 = vpop.f32.mrb[17].mxu1  ;;  %v2975_v5 = vadd.f32 %v2974_v46, %v2622_v20  ;;  %v3313_v28 = vmax.f32 %v2971_v29, 0.0  ;;  %v2642_v29 = vpop.permute.xlu0 %2641 }
 0x313   : > { %v3164_v62 = vadd.f32 %v3163_v19, %v2617_v11  ;;  %v3316_v16 = vmax.f32 %v2973_v34, 0.0  ;;  %v3165_v63 = vpop.f32.mrb[18].mxu1  ;;  %4055 = vmatprep.subr.bf16.mxu1 %v3455_v61 }
 0x314   : > { %v3166_v23 = vadd.f32 %v3165_v63, %v2622_v20  ;;  %v3317_v47 = vmax.f32 %v2975_v5, 0.0  ;;  %v3167_v60 = vpop.f32.mrb[19].mxu1  ;;  %4056 = vmatpush1.bf16.msra.mxu1 %v3454_v31  ;;  %v3314_v58 = vmax.f32 %v3162_v42, 0.0  ;;  %v3511_v31 = vld [vmem:[%s9812_s6 + $0x38] sm:$0xff] }
 0x315   : > { %v3456_v27 = vpack.c.bf16 %v3316_v16, %v3312_v33  ;;  %v3168_v1 = vadd.f32 %v3167_v60, %v2622_v20  ;;  %v3315_v9 = vmax.f32 %v3164_v62, 0.0  ;;  %3573 = vperm.xlu0 %5493, %v3511_v31   ;;  %v3513_v62 = vld [vmem:[%s9812_s6 + $0x48] sm:$0xff] }
 0x316   : > { %v3318_v22 = vmax.f32 %v3166_v23, 0.0  ;;  %v3457_v26 = vpack.c.bf16 %v3317_v47, %v3313_v28  ;;  %v2978_v6 = vpop.f32.mrb[20].mxu0 }
 0x317   : > { %v3319_v59 = vmax.f32 %v3168_v1, 0.0  ;;  %v2979_v4 = vadd.f32 %v2978_v6, %v2627_v40  ;;  %v2980_v54 = vpop.f32.mrb[21].mxu0 }
 0x318   : > { %v3458_v55 = vpack.c.bf16 %v3318_v22, %v3314_v58  ;;  %v2981_v7 = vadd.f32 %v2980_v54, %v2627_v40  ;;  %v2982_v48 = vpop.f32.mrb[22].mxu0  ;;  %3864 = vmatprep.subr.bf16.mxu0 %v3457_v26  ;;  %v2647_v22 = vpop.permute.xlu1 %2646 }
 0x319   : > { %v3459_v36 = vpack.c.bf16 %v3319_v59, %v3315_v9  ;;  %v3171_v43 = vpop.f32.mrb[20].mxu1  ;;  %v2983_v53 = vadd.f32 %v2982_v48, %v2632_v24  ;;  %v2984_v56 = vpop.f32.mrb[23].mxu0  ;;  %3865 = vmatpush1.bf16.msra.mxu0 %v3456_v27  ;;  %v3320_v8 = vmax.f32 %v2979_v4, 0.0  ;;  %3583 = vperm.xlu0 %5493, %v3513_v62  }
 0x31a   : > { %v3172_v39 = vadd.f32 %v3171_v43, %v2627_v40  ;;  %v3173_v45 = vpop.f32.mrb[21].mxu1  ;;  %v2985_v30 = vadd.f32 %v2984_v56, %v2632_v24  ;;  %v3321_v52 = vmax.f32 %v2981_v7, 0.0  ;;  %v2652_v7 = vpop.permute.xlu0 %2651 }
 0x31b   : > { %v3174_v17 = vadd.f32 %v3173_v45, %v2627_v40  ;;  %v3324_v2 = vmax.f32 %v2983_v53, 0.0  ;;  %v3175_v38 = vpop.f32.mrb[22].mxu1  ;;  %4057 = vmatprep.subr.bf16.mxu1 %v3459_v36 }
 0x31c   : > { %v3176_v44 = vadd.f32 %v3175_v38, %v2632_v24  ;;  %v3325_v49 = vmax.f32 %v2985_v30, 0.0  ;;  %v3177_v51 = vpop.f32.mrb[23].mxu1  ;;  %4058 = vmatpush1.bf16.msra.mxu1 %v3458_v55  ;;  %v3322_v37 = vmax.f32 %v3172_v39, 0.0  ;;  %v3515_v55 = vld [vmem:[%s9812_s6 + $0x58] sm:$0xff] }
 0x31d   : > { %v3460_v21 = vpack.c.bf16 %v3324_v2, %v3320_v8  ;;  %v3178_v11 = vadd.f32 %v3177_v51, %v2632_v24  ;;  %v3323_v25 = vmax.f32 %v3174_v17, 0.0  ;;  %3593 = vperm.xlu0 %5493, %v3515_v55   ;;  %v3517_v17 = vld [vmem:[%s9812_s6 + $0x68] sm:$0xff] }
 0x31e   : > { %v3326_v0 = vmax.f32 %v3176_v44, 0.0  ;;  %v3461_v14 = vpack.c.bf16 %v3325_v49, %v3321_v52  ;;  %v2988_v57 = vpop.f32.mrb[24].mxu0 }
 0x31f   : > { %v3327_v35 = vmax.f32 %v3178_v11, 0.0  ;;  %v2989_v15 = vadd.f32 %v2988_v57, %v2637_v10  ;;  %v2990_v20 = vpop.f32.mrb[25].mxu0 }
 0x320   : > { %v3462_v18 = vpack.c.bf16 %v3326_v0, %v3322_v37  ;;  %v2991_v61 = vadd.f32 %v2990_v20, %v2637_v10  ;;  %v2992_v41 = vpop.f32.mrb[26].mxu0  ;;  %3866 = vmatprep.subr.bf16.mxu0 %v3461_v14  ;;  %v2657_v0 = vpop.permute.xlu1 %2656 }
 0x321   : > { %v3463_v34 = vpack.c.bf16 %v3327_v35, %v3323_v25  ;;  %v3181_v46 = vpop.f32.mrb[24].mxu1  ;;  %v2993_v42 = vadd.f32 %v2992_v41, %v2642_v29  ;;  %v2994_v19 = vpop.f32.mrb[27].mxu0  ;;  %3867 = vmatpush1.bf16.msra.mxu0 %v3460_v21  ;;  %v3328_v16 = vmax.f32 %v2989_v15, 0.0  ;;  %3603 = vperm.xlu0 %5493, %v3517_v17  }
 0x322   : > { %v3182_v5 = vadd.f32 %v3181_v46, %v2637_v10  ;;  %v3183_v3 = vpop.f32.mrb[25].mxu1  ;;  %v2995_v33 = vadd.f32 %v2994_v19, %v2642_v29  ;;  %v3329_v47 = vmax.f32 %v2991_v61, 0.0  ;;  %v2662_v61 = vpop.permute.xlu0 %2661 }
 0x323   : > { %v3184_v63 = vadd.f32 %v3183_v3, %v2637_v10  ;;  %v3332_v28 = vmax.f32 %v2993_v42, 0.0  ;;  %v3185_v23 = vpop.f32.mrb[26].mxu1  ;;  %4059 = vmatprep.subr.bf16.mxu1 %v3463_v34 }
 0x324   : > { %v3186_v60 = vadd.f32 %v3185_v23, %v2642_v29  ;;  %v3333_v27 = vmax.f32 %v2995_v33, 0.0  ;;  %v3187_v1 = vpop.f32.mrb[27].mxu1  ;;  %4060 = vmatpush1.bf16.msra.mxu1 %v3462_v18  ;;  %v3330_v26 = vmax.f32 %v3182_v5, 0.0  ;;  %v3519_v18 = vld [vmem:[%s9812_s6 + $0x78] sm:$0xff] }
 0x325   : > { %v3464_v40 = vpack.c.bf16 %v3332_v28, %v3328_v16  ;;  %v3188_v58 = vadd.f32 %v3187_v1, %v2642_v29  ;;  %v3331_v4 = vmax.f32 %v3184_v63, 0.0  ;;  %3613 = vperm.xlu0 %5493, %v3519_v18   ;;  %v3521_v63 = vld [vmem:[%s9812_s6 + $0x88] sm:$0xff] }
 0x326   : > { %v3334_v6 = vmax.f32 %v3186_v60, 0.0  ;;  %v3465_v9 = vpack.c.bf16 %v3333_v27, %v3329_v47  ;;  %v2998_v59 = vpop.f32.mrb[28].mxu0 }
 0x327   : > { %v3335_v54 = vmax.f32 %v3188_v58, 0.0  ;;  %v2999_v32 = vadd.f32 %v2998_v59, %v2647_v22  ;;  %v3000_v24 = vpop.f32.mrb[29].mxu0 }
 0x328   : > { %v3466_v48 = vpack.c.bf16 %v3334_v6, %v3330_v26  ;;  %v3001_v36 = vadd.f32 %v3000_v24, %v2647_v22  ;;  %v3002_v43 = vpop.f32.mrb[30].mxu0  ;;  %3868 = vmatprep.subr.bf16.mxu0 %v3465_v9  ;;  %v2667_v6 = vpop.permute.xlu1 %2666 }
 0x329   : > { %v3467_v53 = vpack.c.bf16 %v3335_v54, %v3331_v4  ;;  %v3191_v56 = vpop.f32.mrb[28].mxu1  ;;  %v3003_v39 = vadd.f32 %v3002_v43, %v2652_v7  ;;  %v3004_v45 = vpop.f32.mrb[31].mxu0  ;;  %3869 = vmatpush1.bf16.msra.mxu0 %v3464_v40  ;;  %v3336_v2 = vmax.f32 %v2999_v32, 0.0  ;;  %3623 = vperm.xlu0 %5493, %v3521_v63  }
 0x32a   : > { %v3192_v30 = vadd.f32 %v3191_v56, %v2647_v22  ;;  %v3193_v13 = vpop.f32.mrb[29].mxu1  ;;  %v3005_v8 = vadd.f32 %v3004_v45, %v2652_v7  ;;  %v3337_v49 = vmax.f32 %v3001_v36, 0.0  ;;  %v3523_v36 = vld [vmem:[%s9812_s6 + $0x98] sm:$0xff]  ;;  %v2672_v43 = vpop.permute.xlu0 %2671 }
 0x32b   : > { %v3194_v38 = vadd.f32 %v3193_v13, %v2647_v22  ;;  %v3340_v52 = vmax.f32 %v3003_v39, 0.0  ;;  %v3195_v44 = vpop.f32.mrb[30].mxu1  ;;  %4061 = vmatprep.subr.bf16.mxu1 %v3467_v53 }
 0x32c   : > { %v3196_v51 = vadd.f32 %v3195_v44, %v2652_v7  ;;  %v3341_v21 = vmax.f32 %v3005_v8, 0.0  ;;  %v3197_v11 = vpop.f32.mrb[31].mxu1  ;;  %4062 = vmatpush1.bf16.msra.mxu1 %v3466_v48  ;;  %v3338_v14 = vmax.f32 %v3192_v30, 0.0  ;;  %v3532_v48 = vld [vmem:[%s9812_s6 + $0xe0] sm:$0xff]  ;;  %v8586_v44 = vld [vmem:[%s9813_s7 + $0x10] sm:$0xff] }
 0x32d   : > { %v3468_v10 = vpack.c.bf16 %v3340_v52, %v3336_v2  ;;  %v3198_v37 = vadd.f32 %v3197_v11, %v2652_v7  ;;  %v3339_v15 = vmax.f32 %v3194_v38, 0.0  ;;  %3678 = vperm.xlu1 %5495, %v3532_v48   ;;  %3633 = vperm.xlu0 %5493, %v3523_v36   ;;  %v3525_v52 = vld [vmem:[%s9812_s6 + $0xa8] sm:$0xff] }
 0x32e   : > { %v3342_v57 = vmax.f32 %v3196_v51, 0.0  ;;  %v3469_v25 = vpack.c.bf16 %v3341_v21, %v3337_v49  ;;  %v3008_v35 = vpop.f32.mrb[32].mxu0 }
 0x32f   : > { %v3343_v20 = vmax.f32 %v3198_v37, 0.0  ;;  %v3009_v31 = vadd.f32 %v3008_v35, %v2657_v0  ;;  %v3010_v29 = vpop.f32.mrb[33].mxu0 }
 0x330   : > { %v3470_v41 = vpack.c.bf16 %v3342_v57, %v3338_v14  ;;  %v3011_v34 = vadd.f32 %v3010_v29, %v2657_v0  ;;  %v3012_v46 = vpop.f32.mrb[34].mxu0  ;;  %3870 = vmatprep.subr.bf16.mxu0 %v3469_v25  ;;  %v10675_v57 = vmov 1  }
 0x331   : > { %v3471_v42 = vpack.c.bf16 %v3343_v20, %v3339_v15  ;;  %v3201_v19 = vpop.f32.mrb[32].mxu1  ;;  %v3013_v5 = vadd.f32 %v3012_v46, %v2662_v61  ;;  %v3014_v3 = vpop.f32.mrb[35].mxu0  ;;  %3871 = vmatpush1.bf16.msra.mxu0 %v3468_v10  ;;  %v3344_v28 = vmax.f32 %v3009_v31, 0.0  ;;  %5496 = vset.pattern.permute.xlu1 %v10675_v57 }
 0x332   : > { %v3202_v33 = vadd.f32 %v3201_v19, %v2657_v0  ;;  %v3203_v62 = vpop.f32.mrb[33].mxu1  ;;  %v3015_v16 = vadd.f32 %v3014_v3, %v2662_v61  ;;  %v3345_v27 = vmax.f32 %v3011_v34, 0.0  ;;  %3643 = vperm.xlu0 %5493, %v3525_v52   ;;  %4521 = vperm.xlu1 %5496, %v8586_v44   ;;  %v2677_v15 = vpop.permute.xlu1 %2676 }
 0x333   : > { %v3204_v23 = vadd.f32 %v3203_v62, %v2657_v0  ;;  %v3348_v47 = vmax.f32 %v3013_v5, 0.0  ;;  %v3205_v60 = vpop.f32.mrb[34].mxu1  ;;  %4063 = vmatprep.subr.bf16.mxu1 %v3471_v42  ;;  %v3528_v42 = vld [vmem:[%s9812_s6 + $0xc0] sm:$0xff]  ;;  %v2682_v19 = vpop.permute.xlu0 %2681  ;;  %v3533_v62 = vld [vmem:[%s9812_s6 + $0xe8] sm:$0xff] }
 0x334   : > { %v3206_v1 = vadd.f32 %v3205_v60, %v2662_v61  ;;  %v3349_v40 = vmax.f32 %v3015_v16, 0.0  ;;  %v3207_v58 = vpop.f32.mrb[35].mxu1  ;;  %4064 = vmatpush1.bf16.msra.mxu1 %v3470_v41  ;;  %v3346_v9 = vmax.f32 %v3202_v33, 0.0 }
 0x335   : > { %v3472_v22 = vpack.c.bf16 %v3348_v47, %v3344_v28  ;;  %v3208_v26 = vadd.f32 %v3207_v58, %v2662_v61  ;;  %v3347_v32 = vmax.f32 %v3204_v23, 0.0 }
 0x336   : > { %v3350_v59 = vmax.f32 %v3206_v1, 0.0  ;;  %v3473_v4 = vpack.c.bf16 %v3349_v40, %v3345_v27  ;;  %v3018_v54 = vpop.f32.mrb[36].mxu0  ;;  %3658 = vperm.xlu0 %5493, %v3528_v42   ;;  %5497 = vset.pattern.permute.xlu1 %v10674_v50  ;;  %v3530_v1 = vld [vmem:[%s9812_s6 + $0xd0] sm:$0xff] }
 0x337   : > { %v3351_v24 = vmax.f32 %v3208_v26, 0.0  ;;  %v3019_v55 = vadd.f32 %v3018_v54, %v2667_v6  ;;  %v3020_v7 = vpop.f32.mrb[37].mxu0  ;;  %3683 = vperm.xlu1 %5497, %v3533_v62  }
 0x338   : > { %v3474_v53 = vpack.c.bf16 %v3350_v59, %v3346_v9  ;;  %v3021_v56 = vadd.f32 %v3020_v7, %v2667_v6  ;;  %v3022_v39 = vpop.f32.mrb[38].mxu0  ;;  %3872 = vmatprep.subr.bf16.mxu0 %v3473_v4 }
 0x339   : > { %v3475_v45 = vpack.c.bf16 %v3351_v24, %v3347_v32  ;;  %v3211_v30 = vpop.f32.mrb[36].mxu1  ;;  %v3023_v13 = vadd.f32 %v3022_v39, %v2672_v43  ;;  %v3024_v8 = vpop.f32.mrb[39].mxu0  ;;  %3873 = vmatpush1.bf16.msra.mxu0 %v3472_v22  ;;  %v3352_v49 = vmax.f32 %v3019_v55, 0.0 }
 0x33a   : > { %v3212_v17 = vadd.f32 %v3211_v30, %v2667_v6  ;;  %v3213_v2 = vpop.f32.mrb[37].mxu1  ;;  %v3025_v38 = vadd.f32 %v3024_v8, %v2672_v43  ;;  %v3353_v10 = vmax.f32 %v3021_v56, 0.0  ;;  %3668 = vperm.xlu0 %5493, %v3530_v1   ;;  %v2687_v24 = vpop.permute.xlu1 %2686 }
 0x33b   : > { %v3214_v51 = vadd.f32 %v3213_v2, %v2667_v6  ;;  %v3356_v21 = vmax.f32 %v3023_v13, 0.0  ;;  %v3215_v11 = vpop.f32.mrb[38].mxu1  ;;  %4065 = vmatprep.subr.bf16.mxu1 %v3475_v45  ;;  %5498 = vset.pattern.permute.xlu1 %v10675_v57  ;;  %v4373_v45 = vld [vmem:[%s9813_s7 + $0x18] sm:$0xff]  ;;  %v2692_v30 = vpop.permute.xlu0 %2691 }
 0x33c   : > { %v3216_v37 = vadd.f32 %v3215_v11, %v2672_v43  ;;  %v3357_v0 = vmax.f32 %v3025_v38, 0.0  ;;  %v3217_v14 = vpop.f32.mrb[39].mxu1  ;;  %4066 = vmatpush1.bf16.msra.mxu1 %v3474_v53  ;;  %v3354_v20 = vmax.f32 %v3212_v17, 0.0  ;;  %4525 = vperm.xlu1 %5498, %v4373_v45  }
 0x33d   : > { %v3476_v25 = vpack.c.bf16 %v3356_v21, %v3352_v49  ;;  %v3218_v35 = vadd.f32 %v3217_v14, %v2672_v43  ;;  %v3355_v61 = vmax.f32 %v3214_v51, 0.0 }
 0x33e   : > { %v3358_v31 = vmax.f32 %v3216_v37, 0.0  ;;  %v3477_v29 = vpack.c.bf16 %v3357_v0, %v3353_v10  ;;  %v3028_v18 = vpop.f32.mrb[40].mxu0  ;;  %4381 = vperm.xlu0 %5493, %v8543_v12   ;;  %v8608_v10 = vld [vmem:[%s9813_s7 + $0x20] sm:$0xff] }
 0x33f   : > { %v3359_v41 = vmax.f32 %v3218_v35, 0.0  ;;  %v3029_v34 = vadd.f32 %v3028_v18, %v2677_v15  ;;  %v3030_v46 = vpop.f32.mrb[41].mxu0  ;;  %v2697_v18 = vpop.permute.xlu1 %2696 }
 0x340   : > { %v3478_v5 = vpack.c.bf16 %v3358_v31, %v3354_v20  ;;  %v3031_v3 = vadd.f32 %v3030_v46, %v2677_v15  ;;  %v3032_v33 = vpop.f32.mrb[42].mxu0  ;;  %3874 = vmatprep.subr.bf16.mxu0 %v3477_v29  ;;  %5499 = vset.pattern.permute.xlu1 %v10674_v50  ;;  %v2702_v62 = vpop.permute.xlu0 %2701 }
 0x341   : > { %v3479_v16 = vpack.c.bf16 %v3359_v41, %v3355_v61  ;;  %v3221_v63 = vpop.f32.mrb[40].mxu1  ;;  %v3033_v28 = vadd.f32 %v3032_v33, %v2682_v19  ;;  %v3034_v23 = vpop.f32.mrb[43].mxu0  ;;  %3875 = vmatpush1.bf16.msra.mxu0 %v3476_v25  ;;  %v3360_v40 = vmax.f32 %v3029_v34, 0.0  ;;  %4401 = vperm.xlu1 %5499, %v8608_v10   ;;  %v3527_v33 = vld [vmem:[%s9812_s6 + $0xb8] sm:$0xff] }
 0x342   : > { %v3222_v47 = vadd.f32 %v3221_v63, %v2677_v15  ;;  %v3223_v60 = vpop.f32.mrb[41].mxu1  ;;  %v3035_v27 = vadd.f32 %v3034_v23, %v2682_v19  ;;  %v3361_v6 = vmax.f32 %v3031_v3, 0.0  ;;  %4391 = vperm.xlu0 %5493, %v8586_v44  }
 0x343   : > { %v3224_v58 = vadd.f32 %v3223_v60, %v2677_v15  ;;  %v3364_v22 = vmax.f32 %v3033_v28, 0.0  ;;  %v3225_v26 = vpop.f32.mrb[42].mxu1  ;;  %4067 = vmatprep.subr.bf16.mxu1 %v3479_v16 }
 0x344   : > { %v3226_v9 = vadd.f32 %v3225_v26, %v2682_v19  ;;  %v3365_v59 = vmax.f32 %v3035_v27, 0.0  ;;  %v3227_v4 = vpop.f32.mrb[43].mxu1  ;;  %4068 = vmatpush1.bf16.msra.mxu1 %v3478_v5  ;;  %v3362_v55 = vmax.f32 %v3222_v47, 0.0 }
 0x345   : > { %v3480_v54 = vpack.c.bf16 %v3364_v22, %v3360_v40  ;;  %v3228_v32 = vadd.f32 %v3227_v4, %v2682_v19  ;;  %v3363_v43 = vmax.f32 %v3224_v58, 0.0  ;;  %3653 = vperm.xlu1 %5499, %v3527_v33   ;;  %v3535_v58 = vld [vmem:[%s9812_s6 + $0xf8] sm:$0xff] }
 0x346   : > { %v3366_v7 = vmax.f32 %v3226_v9, 0.0  ;;  %v3481_v48 = vpack.c.bf16 %v3365_v59, %v3361_v6  ;;  %v3038_v36 = vpop.f32.mrb[44].mxu0  ;;  %4396 = vperm.xlu0 %5493, %v4373_v45   ;;  %v3534_v59 = vld [vmem:[%s9812_s6 + $0xf0] sm:$0xff] }
 0x347   : > { %v3367_v53 = vmax.f32 %v3228_v32, 0.0  ;;  %v3039_v56 = vadd.f32 %v3038_v36, %v2687_v24  ;;  %v3040_v39 = vpop.f32.mrb[45].mxu0 }
 0x348   : > { %v3482_v13 = vpack.c.bf16 %v3366_v7, %v3362_v55  ;;  %v3041_v8 = vadd.f32 %v3040_v39, %v2687_v24  ;;  %v3042_v17 = vpop.f32.mrb[46].mxu0  ;;  %3876 = vmatprep.subr.bf16.mxu0 %v3481_v48  ;;  %v2707_v48 = vpop.permute.xlu1 %2706 }
 0x349   : > { %v3483_v2 = vpack.c.bf16 %v3367_v53, %v3363_v43  ;;  %v3231_v38 = vpop.f32.mrb[44].mxu1  ;;  %v3043_v52 = vadd.f32 %v3042_v17, %v2692_v30  ;;  %v3044_v49 = vpop.f32.mrb[47].mxu0  ;;  %3877 = vmatpush1.bf16.msra.mxu0 %v3480_v54  ;;  %v3368_v37 = vmax.f32 %v3039_v56, 0.0  ;;  %3693 = vperm.xlu1 %5499, %v3535_v58   ;;  %v4377_v58 = vld [vmem:[%s9813_s7 + $0x38] sm:$0xff] }
 0x34a   : > { %v3232_v51 = vadd.f32 %v3231_v38, %v2687_v24  ;;  %v3233_v21 = vpop.f32.mrb[45].mxu1  ;;  %v3045_v11 = vadd.f32 %v3044_v49, %v2692_v30  ;;  %v3369_v35 = vmax.f32 %v3041_v8, 0.0  ;;  %3688 = vperm.xlu0 %5493, %v3534_v59   ;;  %v4375_v8 = vld [vmem:[%s9813_s7 + $0x28] sm:$0xff]  ;;  %v2712_v17 = vpop.permute.xlu0 %2711 }
 0x34b   : > { %v3234_v0 = vadd.f32 %v3233_v21, %v2687_v24  ;;  %v3372_v14 = vmax.f32 %v3043_v52, 0.0  ;;  %v3235_v25 = vpop.f32.mrb[46].mxu1  ;;  %4069 = vmatprep.subr.bf16.mxu1 %v3483_v2 }
 0x34c   : > { %v3236_v15 = vadd.f32 %v3235_v25, %v2692_v30  ;;  %v3373_v20 = vmax.f32 %v3045_v11, 0.0  ;;  %v3237_v31 = vpop.f32.mrb[47].mxu1  ;;  %4070 = vmatpush1.bf16.msra.mxu1 %v3482_v13  ;;  %v3370_v61 = vmax.f32 %v3232_v51, 0.0 }
 0x34d   : > { %v3484_v12 = vpack.c.bf16 %v3372_v14, %v3368_v37  ;;  %v3238_v29 = vadd.f32 %v3237_v31, %v2692_v30  ;;  %v3371_v42 = vmax.f32 %v3234_v0, 0.0  ;;  %5501 = vset.pattern.permute.xlu1 %v10675_v57 }
 0x34e   : > { %v3374_v41 = vmax.f32 %v3236_v15, 0.0  ;;  %v3485_v34 = vpack.c.bf16 %v3373_v20, %v3369_v35  ;;  %v3048_v46 = vpop.f32.mrb[48].mxu0  ;;  %4406 = vperm.xlu0 %5493, %v4375_v8   ;;  %4533 = vperm.xlu1 %5501, %v4375_v8  }
 0x34f   : > { %v3375_v19 = vmax.f32 %v3238_v29, 0.0  ;;  %v3049_v5 = vadd.f32 %v3048_v46, %v2697_v18  ;;  %v3050_v3 = vpop.f32.mrb[49].mxu0 }
 0x350   : > { %v3486_v16 = vpack.c.bf16 %v3374_v41, %v3370_v61  ;;  %v3051_v63 = vadd.f32 %v3050_v3, %v2697_v18  ;;  %v3052_v28 = vpop.f32.mrb[50].mxu0  ;;  %3878 = vmatprep.subr.bf16.mxu0 %v3485_v34  ;;  %v2717_v34 = vpop.permute.xlu1 %2716 }
 0x351   : > { %v3487_v23 = vpack.c.bf16 %v3375_v19, %v3371_v42  ;;  %v3241_v44 = vpop.f32.mrb[48].mxu1  ;;  %v3053_v47 = vadd.f32 %v3052_v28, %v2702_v62  ;;  %v3054_v60 = vpop.f32.mrb[51].mxu0  ;;  %3879 = vmatpush1.bf16.msra.mxu0 %v3484_v12  ;;  %v3376_v22 = vmax.f32 %v3049_v5, 0.0 }
 0x352   : > { %v3242_v27 = vadd.f32 %v3241_v44, %v2697_v18  ;;  %v3243_v1 = vpop.f32.mrb[49].mxu1  ;;  %v3055_v40 = vadd.f32 %v3054_v60, %v2702_v62  ;;  %v3377_v4 = vmax.f32 %v3051_v63, 0.0  ;;  %5500 = vset.pattern.permute.xlu0 %v10675_v57  ;;  %5502 = vset.pattern.permute.xlu1 %v10674_v50  ;;  %v4376_v63 = vld [vmem:[%s9813_s7 + $0x30] sm:$0xff]  ;;  %v2722_v28 = vpop.permute.xlu0 %2721 }
 0x353   : > { %v3244_v26 = vadd.f32 %v3243_v1, %v2697_v18  ;;  %v3380_v6 = vmax.f32 %v3053_v47, 0.0  ;;  %v3245_v9 = vpop.f32.mrb[50].mxu1  ;;  %4071 = vmatprep.subr.bf16.mxu1 %v3487_v23  ;;  %4529 = vperm.xlu0 %5500, %v8608_v10  }
 0x354   : > { %v3246_v54 = vadd.f32 %v3245_v9, %v2702_v62  ;;  %v3381_v32 = vmax.f32 %v3055_v40, 0.0  ;;  %v3247_v24 = vpop.f32.mrb[51].mxu1  ;;  %4072 = vmatpush1.bf16.msra.mxu1 %v3486_v16  ;;  %v3378_v36 = vmax.f32 %v3242_v27, 0.0  ;;  %4411 = vperm.xlu1 %5502, %v4376_v63  }
 0x355   : > { %v3488_v55 = vpack.c.bf16 %v3380_v6, %v3376_v22  ;;  %v3248_v7 = vadd.f32 %v3247_v24, %v2702_v62  ;;  %v3379_v39 = vmax.f32 %v3244_v26, 0.0 }
 0x356   : > { %v3382_v43 = vmax.f32 %v3246_v54, 0.0  ;;  %v3489_v53 = vpack.c.bf16 %v3381_v32, %v3377_v4  ;;  %v3058_v56 = vpop.f32.mrb[52].mxu0 }
 0x357   : > { %v3383_v45 = vmax.f32 %v3248_v7, 0.0  ;;  %v3059_v30 = vadd.f32 %v3058_v56, %v2707_v48  ;;  %v3060_v13 = vpop.f32.mrb[53].mxu0  ;;  %4537 = vperm.xlu0 %5500, %v4376_v63   ;;  %v5559_v63 = vld [vmem:[%s9811_s5 + $0x10] ss:$8 sps:$4 sm:$0xff]  }
 0x358   : > { %v3490_v2 = vpack.c.bf16 %v3382_v43, %v3378_v36  ;;  %v3061_v38 = vadd.f32 %v3060_v13, %v2707_v48  ;;  %v3062_v52 = vpop.f32.mrb[54].mxu0  ;;  %3880 = vmatprep.subr.bf16.mxu0 %v3489_v53  ;;  %4416 = vperm.xlu1 %5502, %v4377_v58   ;;  %v2727_v36 = vpop.permute.xlu1 %2726 }
 0x359   : > { %v3491_v49 = vpack.c.bf16 %v3383_v45, %v3379_v39  ;;  %v3251_v51 = vpop.f32.mrb[52].mxu1  ;;  %v3063_v21 = vadd.f32 %v3062_v52, %v2712_v17  ;;  %v3064_v11 = vpop.f32.mrb[55].mxu0  ;;  %3881 = vmatpush1.bf16.msra.mxu0 %v3488_v55  ;;  %v3384_v25 = vmax.f32 %v3059_v30, 0.0 }
 0x35a   : > { %v3252_v37 = vadd.f32 %v3251_v51, %v2707_v48  ;;  %v3253_v0 = vpop.f32.mrb[53].mxu1  ;;  %v3065_v14 = vadd.f32 %v3064_v11, %v2712_v17  ;;  %v3385_v31 = vmax.f32 %v3061_v38, 0.0 }
 0x35b   : > { %v3254_v35 = vadd.f32 %v3253_v0, %v2707_v48  ;;  %v3388_v15 = vmax.f32 %v3063_v21, 0.0  ;;  %v3255_v20 = vpop.f32.mrb[54].mxu1  ;;  %4073 = vmatprep.subr.bf16.mxu1 %v3491_v49  ;;  %5504 = vset.pattern.permute.xlu0 %v10674_v50 }
 0x35c   : > { %v3256_v12 = vadd.f32 %v3255_v20, %v2712_v17  ;;  %v3389_v29 = vmax.f32 %v3065_v14, 0.0  ;;  %v3257_v18 = vpop.f32.mrb[55].mxu1  ;;  %4074 = vmatpush1.bf16.msra.mxu1 %v3490_v2  ;;  %v3386_v46 = vmax.f32 %v3252_v37, 0.0  ;;  %5503 = vset.pattern.permute.xlu1 %v10675_v57 }
 0x35d   : > { %v3492_v61 = vpack.c.bf16 %v3388_v15, %v3384_v25  ;;  %v3258_v41 = vadd.f32 %v3257_v18, %v2712_v17  ;;  %v3387_v3 = vmax.f32 %v3254_v35, 0.0  ;;  %v2732_v17 = vpop.permute.xlu0 %2731  ;;  %4541 = vperm.xlu1 %5503, %v4377_v58   ;;  %v5574_v58 = vld [vmem:[%s9811_s5 + $0x60] ss:$8 sps:$4 sm:$0xff]  }
 0x35e   : > { %v3390_v42 = vmax.f32 %v3256_v12, 0.0  ;;  %v3493_v19 = vpack.c.bf16 %v3389_v29, %v3385_v31  ;;  %v3068_v5 = vpop.f32.mrb[56].mxu0 }
 0x35f   : > { %v3391_v33 = vmax.f32 %v3258_v41, 0.0  ;;  %v3069_v62 = vadd.f32 %v3068_v5, %v2717_v34  ;;  %v3070_v16 = vpop.f32.mrb[57].mxu0  ;;  %v4378_v5 = vld [vmem:[%s9814_s8] sm:$0x3] }
 0x360   : > { %v3494_v23 = vpack.c.bf16 %v3390_v42, %v3386_v46  ;;  %v3071_v44 = vadd.f32 %v3070_v16, %v2717_v34  ;;  %v3072_v47 = vpop.f32.mrb[58].mxu0  ;;  %3882 = vmatprep.subr.bf16.mxu0 %v3493_v19  ;;  %4505 = vperm.xlu0 %5504, %v4378_v5   ;;  %v5557_v16 = vld [vmem:[%s9811_s5 + $0x14] ss:$8 sps:$4 sm:$0xff]  }
 0x361   : > { %v3495_v60 = vpack.c.bf16 %v3391_v33, %v3387_v3  ;;  %v3261_v27 = vpop.f32.mrb[56].mxu1  ;;  %v3073_v1 = vadd.f32 %v3072_v47, %v2722_v28  ;;  %v3074_v40 = vpop.f32.mrb[59].mxu0  ;;  %3883 = vmatpush1.bf16.msra.mxu0 %v3492_v61  ;;  %v3392_v6 = vmax.f32 %v3069_v62, 0.0  ;;  %v5554_v33 = vld [vmem:[%s9811_s5] ss:$8 sps:$4 sm:$0xff]  }
 0x362   : > { %v3262_v10 = vadd.f32 %v3261_v27, %v2717_v34  ;;  %v3263_v22 = vpop.f32.mrb[57].mxu1  ;;  %v3075_v26 = vadd.f32 %v3074_v40, %v2722_v28  ;;  %v3393_v54 = vmax.f32 %v3071_v44, 0.0  ;;  %v5565_v44 = vld [vmem:[%s9811_s5 + $0x30] ss:$8 sps:$4 sm:$0xff]   ;;  %v5566_v47 = vld [vmem:[%s9811_s5 + $0x44] ss:$8 sps:$4 sm:$0xff]  }
 0x363   : > { %v3264_v9 = vadd.f32 %v3263_v22, %v2717_v34  ;;  %v3396_v59 = vmax.f32 %v3073_v1, 0.0  ;;  %v3265_v4 = vpop.f32.mrb[58].mxu1  ;;  %4075 = vmatprep.subr.bf16.mxu1 %v3495_v60  ;;  %v5568_v60 = vld [vmem:[%s9811_s5 + $0x40] ss:$8 sps:$4 sm:$0xff]   ;;  %v5569_v27 = vld [vmem:[%s9811_s5 + $0x54] ss:$8 sps:$4 sm:$0xff]  }
 0x364   : > { %v3266_v32 = vadd.f32 %v3265_v4, %v2722_v28  ;;  %v3397_v24 = vmax.f32 %v3075_v26, 0.0  ;;  %v3267_v55 = vpop.f32.mrb[59].mxu1  ;;  %4076 = vmatpush1.bf16.msra.mxu1 %v3494_v23  ;;  %v3394_v43 = vmax.f32 %v3262_v10, 0.0  ;;  %5505 = vset.pattern.permute.xlu0 %v10675_v57  ;;  %v5562_v23 = vld [vmem:[%s9811_s5 + $0x20] ss:$8 sps:$4 sm:$0xff]  }
 0x365   : > { %v3496_v7 = vpack.c.bf16 %v3396_v59, %v3392_v6  ;;  %v3268_v48 = vadd.f32 %v3267_v55, %v2722_v28  ;;  %v3395_v45 = vmax.f32 %v3264_v9, 0.0  ;;  %v5560_v28 = vld [vmem:[%s9811_s5 + $0x24] ss:$8 sps:$4 sm:$0xff]   ;;  %v5563_v57 = vld [vmem:[%s9811_s5 + $0x34] ss:$8 sps:$4 sm:$0xff]  }
 0x366   : > { %v3398_v53 = vmax.f32 %v3266_v32, 0.0  ;;  %v3497_v56 = vpack.c.bf16 %v3397_v24, %v3393_v54  ;;  %v3078_v39 = vpop.f32.mrb[60].mxu0  ;;  %v5571_v1 = vld [vmem:[%s9811_s5 + $0x50] ss:$8 sps:$4 sm:$0xff]   ;;  %v5572_v40 = vld [vmem:[%s9811_s5 + $0x64] ss:$8 sps:$4 sm:$0xff]  }
 0x367   : > { %v3399_v30 = vmax.f32 %v3268_v48, 0.0  ;;  %v3079_v13 = vadd.f32 %v3078_v39, %v2727_v36  ;;  %v3080_v8 = vpop.f32.mrb[61].mxu0  ;;  %v5575_v10 = vld [vmem:[%s9811_s5 + $0x74] ss:$8 sps:$4 sm:$0xff]   ;;  %v5577_v22 = vld [vmem:[%s9811_s5 + $0x70] ss:$8 sps:$4 sm:$0xff]  }
 0x368   : > { %v3498_v2 = vpack.c.bf16 %v3398_v53, %v3394_v43  ;;  %v3081_v38 = vadd.f32 %v3080_v8, %v2727_v36  ;;  %v3082_v52 = vpop.f32.mrb[62].mxu0  ;;  %3884 = vmatprep.subr.bf16.mxu0 %v3497_v56  ;;  %v5578_v26 = vld [vmem:[%s9811_s5 + $0x84] ss:$8 sps:$4 sm:$0xff]   ;;  %v5580_v6 = vld [vmem:[%s9811_s5 + $0x80] ss:$8 sps:$4 sm:$0xff]   ;;  %v8722_v43 = vpop.permute.xlu1 %3538 }
 0x369   : > { %v3499_v49 = vpack.c.bf16 %v3399_v30, %v3395_v45  ;;  %v3271_v51 = vpop.f32.mrb[60].mxu1  ;;  %v3083_v21 = vadd.f32 %v3082_v52, %v2732_v17  ;;  %v3084_v11 = vpop.f32.mrb[63].mxu0  ;;  %3885 = vmatpush1.bf16.msra.mxu0 %v3496_v7  ;;  %v3400_v25 = vmax.f32 %v3079_v13, 0.0  ;;  %v5581_v9 = vld [vmem:[%s9811_s5 + $0x94] ss:$8 sps:$4 sm:$0xff]  }
 0x36a   : > { %v3272_v37 = vadd.f32 %v3271_v51, %v2727_v36  ;;  %v3273_v0 = vpop.f32.mrb[61].mxu1  ;;  %v3085_v14 = vadd.f32 %v3084_v11, %v2732_v17  ;;  %v3401_v20 = vmax.f32 %v3081_v38, 0.0  ;;  %v5583_v59 = vld [vmem:[%s9811_s5 + $0x90] ss:$8 sps:$4 sm:$0xff]   ;;  %v5584_v4 = vld [vmem:[%s9811_s5 + $0xa4] ss:$8 sps:$4 sm:$0xff]  }
 0x36b   : > { %v3274_v35 = vadd.f32 %v3273_v0, %v2727_v36  ;;  %v3404_v15 = vmax.f32 %v3083_v21, 0.0  ;;  %v3275_v50 = vpop.f32.mrb[62].mxu1  ;;  %4077 = vmatprep.subr.bf16.mxu1 %v3499_v49  ;;  %v5586_v54 = vld [vmem:[%s9811_s5 + $0xa0] ss:$8 sps:$4 sm:$0xff]   ;;  %v5587_v32 = vld [vmem:[%s9811_s5 + $0xb4] ss:$8 sps:$4 sm:$0xff]  }
 0x36c   : > { %v3276_v31 = vadd.f32 %v3275_v50, %v2732_v17  ;;  %v3405_v12 = vmax.f32 %v3085_v14, 0.0  ;;  %v3277_v29 = vpop.f32.mrb[63].mxu1  ;;  %4078 = vmatpush1.bf16.msra.mxu1 %v3498_v2  ;;  %v3402_v41 = vmax.f32 %v3272_v37, 0.0  ;;  %v5589_v24 = vld [vmem:[%s9811_s5 + $0xb0] ss:$8 sps:$4 sm:$0xff]   ;;  %v8727_v56 = vpop.permute.xlu1 %3548 }
 0x36d   : > { %v3500_v18 = vpack.c.bf16 %v3404_v15, %v3400_v25  ;;  %v3278_v61 = vadd.f32 %v3277_v29, %v2732_v17  ;;  %v3403_v42 = vmax.f32 %v3274_v35, 0.0  ;;  %v5590_v55 = vld [vmem:[%s9811_s5 + $0xc4] ss:$8 sps:$4 sm:$0xff]   ;;  %v5592_v7 = vld [vmem:[%s9811_s5 + $0xc0] ss:$8 sps:$4 sm:$0xff]  }
 0x36e   : > { %v3406_v34 = vmax.f32 %v3276_v31, 0.0  ;;  %v3501_v46 = vpack.c.bf16 %v3405_v12, %v3401_v20  ;;  %v5593_v48 = vld [vmem:[%s9811_s5 + $0xd4] ss:$8 sps:$4 sm:$0xff]   ;;  %v5595_v36 = vld [vmem:[%s9811_s5 + $0xd0] ss:$8 sps:$4 sm:$0xff]  }
 0x36f   : > { %v3407_v19 = vmax.f32 %v3278_v61, 0.0  ;;  %v5596_v53 = vld [vmem:[%s9811_s5 + $0xe4] ss:$8 sps:$4 sm:$0xff]   ;;  %v5598_v39 = vld [vmem:[%s9811_s5 + $0xe0] ss:$8 sps:$4 sm:$0xff]  }
 0x370   : > { %v3502_v3 = vpack.c.bf16 %v3406_v34, %v3402_v41  ;;  %3886 = vmatprep.subr.bf16.mxu0 %v3501_v46  ;;  %v5599_v45 = vld [vmem:[%s9811_s5 + $0xf4] ss:$8 sps:$4 sm:$0xff]   ;;  %v8735_v30 = vpop.permute.xlu1 %3558  ;;  %v5601_v13 = vld [vmem:[%s9811_s5 + $0xf0] ss:$8 sps:$4 sm:$0xff]  }
 0x371   : > { %v3503_v62 = vpack.c.bf16 %v3407_v19, %v3403_v42  ;;  %3887 = vmatpush1.bf16.msra.mxu0 %v3500_v18 }
 0x373   : > { %4079 = vmatprep.subr.bf16.mxu1 %v3503_v62 }
 0x374   : > { %4080 = vmatpush1.bf16.msra.mxu1 %v3502_v3  ;;  %3889 = vmatmul.mubr.bf16.vlgmr.msra.gmra.mrb[64].mxu0 %v5554_v33  ;;  %v8740_v8 = vpop.permute.xlu1 %3568 }
 0x375   : > { %3898 = vmatprep.mubr.bf16.mxu0 %v5557_v16 }
 0x377   : > { %4082 = vmatmul.mubr.bf16.vlgmr.msra.gmra.mrb[64].mxu1 %v5554_v33 }
 0x378   : > { %4091 = vmatprep.mubr.bf16.mxu1 %v5557_v16  ;;  %v8742_v17 = vpop.permute.xlu1 %3578 }
 0x37c   : > { %3899 = vmatmul.mubr.bf16.gmra.mrb[68].mxu0 %v5559_v63  ;;  %v8744_v2 = vpop.permute.xlu1 %3588 }
 0x37d   : > { %3908 = vmatprep.mubr.bf16.mxu0 %v5560_v28 }
 0x37f   : > { %4092 = vmatmul.mubr.bf16.gmra.mrb[68].mxu1 %v5559_v63 }
 0x380   : > { %4101 = vmatprep.mubr.bf16.mxu1 %v5560_v28  ;;  %v8748_v52 = vpop.permute.xlu1 %3598 }
 0x381   : > { %v8746_v38 = vpop.permute.xlu0 %4513 }
 0x382   : > { %10676 = vst [vmem:[#allocation90_spill] sm:$0xff] %v8746_v38 }
 0x384   : > { %3909 = vmatmul.mubr.bf16.gmra.mrb[72].mxu0 %v5562_v23  ;;  %v8750_v51 = vpop.permute.xlu1 %3608 }
 0x385   : > { %3918 = vmatprep.mubr.bf16.mxu0 %v5563_v57 }
 0x387   : > { %4102 = vmatmul.mubr.bf16.gmra.mrb[72].mxu1 %v5562_v23  ;;  %v3544_v49 = vpop.permute.xlu0 %3543 }
 0x388   : > { %4111 = vmatprep.mubr.bf16.mxu1 %v5563_v57  ;;  %v8754_v11 = vpop.permute.xlu1 %3618 }
 0x38b   : > { %v8752_v21 = vpop.permute.xlu0 %3553 }
 0x38c   : > { %3919 = vmatmul.mubr.bf16.gmra.mrb[76].mxu0 %v5565_v44  ;;  %v8758_v0 = vpop.permute.xlu1 %3628 }
 0x38d   : > { %3928 = vmatprep.mubr.bf16.mxu0 %v5566_v47  ;;  %10677 = vst [vmem:[#allocation9_spill] sm:$0xff] %v8758_v0 }
 0x38f   : > { %4112 = vmatmul.mubr.bf16.gmra.mrb[76].mxu1 %v5565_v44  ;;  %v8756_v37 = vpop.permute.xlu0 %3563 }
 0x390   : > { %4121 = vmatprep.mubr.bf16.mxu1 %v5566_v47  ;;  %v8762_v25 = vpop.permute.xlu1 %3638 }
 0x391   : > { %10678 = vst [vmem:[#allocation11_spill] sm:$0xff] %v8762_v25 }
 0x394   : > { %3929 = vmatmul.mubr.bf16.gmra.mrb[80].mxu0 %v5568_v60  ;;  %v8760_v14 = vpop.permute.xlu0 %3573  ;;  %v8766_v15 = vpop.permute.xlu1 %3648 }
 0x395   : > { %3938 = vmatprep.mubr.bf16.mxu0 %v5569_v27  ;;  %10679 = vst [vmem:[#allocation89_spill] sm:$0xff] %v8766_v15 }
 0x397   : > { %4122 = vmatmul.mubr.bf16.gmra.mrb[80].mxu1 %v5568_v60 }
 0x398   : > { %4131 = vmatprep.mubr.bf16.mxu1 %v5569_v27  ;;  %v8764_v35 = vpop.permute.xlu0 %3583  ;;  %v8770_v20 = vpop.permute.xlu1 %3663 }
 0x399   : > { %10680 = vst [vmem:[#allocation15_spill] sm:$0xff] %v8770_v20 }
 0x39c   : > { %3939 = vmatmul.mubr.bf16.gmra.mrb[84].mxu0 %v5571_v1  ;;  %v8768_v50 = vpop.permute.xlu0 %3593  ;;  %v8774_v12 = vpop.permute.xlu1 %3673 }
 0x39d   : > { %3948 = vmatprep.mubr.bf16.mxu0 %v5572_v40  ;;  %10681 = vst [vmem:[#allocation96_spill] sm:$0xff] %v8774_v12 }
 0x39f   : > { %4132 = vmatmul.mubr.bf16.gmra.mrb[84].mxu1 %v5571_v1 }
 0x3a0   : > { %4141 = vmatprep.mubr.bf16.mxu1 %v5572_v40  ;;  %v8772_v31 = vpop.permute.xlu0 %3603  ;;  %v8778_v18 = vpop.permute.xlu1 %4386 }
 0x3a1   : > { %10682 = vst [vmem:[#allocation94_spill] sm:$0xff] %v8778_v18 }
 0x3a4   : > { %3949 = vmatmul.mubr.bf16.gmra.mrb[88].mxu0 %v5574_v58  ;;  %v8776_v29 = vpop.permute.xlu0 %3613  ;;  %v8782_v41 = vpop.permute.xlu1 %4517 }
 0x3a5   : > { %3958 = vmatprep.mubr.bf16.mxu0 %v5575_v10  ;;  %10684 = vst [vmem:[#allocation108_spill] sm:$0xff] %v8782_v41 }
 0x3a7   : > { %4142 = vmatmul.mubr.bf16.gmra.mrb[88].mxu1 %v5574_v58 }
 0x3a8   : > { %4151 = vmatprep.mubr.bf16.mxu1 %v5575_v10  ;;  %v8780_v61 = vpop.permute.xlu0 %3623 }
 0x3a9   : > { %10683 = vst [vmem:[#allocation43_spill] sm:$0xff] %v8780_v61 }
 0x3ac   : > { %3959 = vmatmul.mubr.bf16.gmra.mrb[92].mxu0 %v5577_v22  ;;  %v8784_v34 = vpop.permute.xlu0 %3633  ;;  %v8786_v46 = vpop.permute.xlu1 %3678 }
 0x3ad   : > { %3968 = vmatprep.mubr.bf16.mxu0 %v5578_v26  ;;  %10685 = vst [vmem:[#allocation51_spill] sm:$0xff] %v8784_v34  ;;  %10686 = vst [vmem:[#allocation93_spill] sm:$0xff] %v8786_v46 }
 0x3af   : > { %4152 = vmatmul.mubr.bf16.gmra.mrb[92].mxu1 %v5577_v22 }
 0x3b0   : > { %4161 = vmatprep.mubr.bf16.mxu1 %v5578_v26 }
 0x3b1   : > { %v8788_v42 = vpop.permute.xlu0 %3643  ;;  %v8790_v19 = vpop.permute.xlu1 %4521 }
 0x3b2   : > { %10687 = vst [vmem:[#allocation13_spill] sm:$0xff] %v8788_v42  ;;  %10688 = vst [vmem:[#allocation14_spill] sm:$0xff] %v8790_v19 }
 0x3b4   : > { %3969 = vmatmul.mubr.bf16.gmra.mrb[96].mxu0 %v5580_v6 }
 0x3b5   : > { %3978 = vmatprep.mubr.bf16.mxu0 %v5581_v9  ;;  %v8792_v5 = vpop.permute.xlu0 %3658 }
 0x3b6   : > { %10689 = vst [vmem:[#allocation17_spill] sm:$0xff] %v8792_v5  ;;  %v8794_v3 = vpop.permute.xlu1 %3683 }
 0x3b7   : > { %4162 = vmatmul.mubr.bf16.gmra.mrb[96].mxu1 %v5580_v6  ;;  %10690 = vst [vmem:[#allocation45_spill] sm:$0xff] %v8794_v3 }
 0x3b8   : > { %4171 = vmatprep.mubr.bf16.mxu1 %v5581_v9 }
 0x3b9   : > { %v8796_v33 = vpop.permute.xlu0 %3668 }
 0x3ba   : > { %10691 = vst [vmem:[#allocation138_spill] sm:$0xff] %v8796_v33 }
 0x3bb   : > { %v8800_v23 = vpop.permute.xlu1 %4525 }
 0x3bc   : > { %3979 = vmatmul.mubr.bf16.gmra.mrb[100].mxu0 %v5583_v59  ;;  %10692 = vst [vmem:[#allocation53_spill] sm:$0xff] %v8800_v23 }
 0x3bd   : > { %3988 = vmatprep.mubr.bf16.mxu0 %v5584_v4  ;;  %v8802_v1 = vpop.permute.xlu0 %4381 }
 0x3be   : > { %10693 = vst [vmem:[#allocation6_spill] sm:$0xff] %v8802_v1 }
 0x3bf   : > { %4172 = vmatmul.mubr.bf16.gmra.mrb[100].mxu1 %v5583_v59 }
 0x3c0   : > { %4181 = vmatprep.mubr.bf16.mxu1 %v5584_v4 }
 0x3c4   : > { %3989 = vmatmul.mubr.bf16.gmra.mrb[104].mxu0 %v5586_v54 }
 0x3c5   : > { %3998 = vmatprep.mubr.bf16.mxu0 %v5587_v32 }
 0x3c7   : > { %4182 = vmatmul.mubr.bf16.gmra.mrb[104].mxu1 %v5586_v54 }
 0x3c8   : > { %4191 = vmatprep.mubr.bf16.mxu1 %v5587_v32 }
 0x3cc   : > { %3999 = vmatmul.mubr.bf16.gmra.mrb[108].mxu0 %v5589_v24 }
 0x3cd   : > { %4008 = vmatprep.mubr.bf16.mxu0 %v5590_v55 }
 0x3cf   : > { %4192 = vmatmul.mubr.bf16.gmra.mrb[108].mxu1 %v5589_v24 }
 0x3d0   : > { %4201 = vmatprep.mubr.bf16.mxu1 %v5590_v55 }
 0x3d4   : > { %4009 = vmatmul.mubr.bf16.gmra.mrb[112].mxu0 %v5592_v7 }
 0x3d5   : > { %4018 = vmatprep.mubr.bf16.mxu0 %v5593_v48 }
 0x3d7   : > { %4202 = vmatmul.mubr.bf16.gmra.mrb[112].mxu1 %v5592_v7 }
 0x3d8   : > { %4211 = vmatprep.mubr.bf16.mxu1 %v5593_v48 }
 0x3dc   : > { %4019 = vmatmul.mubr.bf16.gmra.mrb[116].mxu0 %v5595_v36 }
 0x3dd   : > { %4028 = vmatprep.mubr.bf16.mxu0 %v5596_v53 }
 0x3df   : > { %4212 = vmatmul.mubr.bf16.gmra.mrb[116].mxu1 %v5595_v36 }
 0x3e0   : > { %4221 = vmatprep.mubr.bf16.mxu1 %v5596_v53 }
 0x3e4   : > { %4029 = vmatmul.mubr.bf16.gmra.mrb[120].mxu0 %v5598_v39 }
 0x3e5   : > { %4038 = vmatprep.mubr.bf16.mxu0 %v5599_v45 }
 0x3e7   : > { %4222 = vmatmul.mubr.bf16.gmra.mrb[120].mxu1 %v5598_v39 }
 0x3e8   : > { %4231 = vmatprep.mubr.bf16.mxu1 %v5599_v45 }
 0x3ec   : > { %4039 = vmatmul.mubr.bf16.gmra.mrb[124].mxu0 %v5601_v13 }
 0x3ef   : > { %4232 = vmatmul.mubr.bf16.gmra.mrb[124].mxu1 %v5601_v13 }
 0x447   : > { %v3890_v62 = vpop.f32.mrb[64].mxu0 }
 0x448   : > { %v3891_v16 = vadd.f32 %v3890_v62, %v8722_v43  ;;  %v3892_v63 = vpop.f32.mrb[65].mxu0 }
 0x449   : > { %v3893_v28 = vadd.f32 %v3892_v63, %v8722_v43  ;;  %v3894_v57 = vpop.f32.mrb[66].mxu0 }
 0x44a   : > { %v4242_v44 = vmax.f32 %v3891_v16, 0.0  ;;  %v4083_v47 = vpop.f32.mrb[64].mxu1  ;;  %v3895_v60 = vadd.f32 %v3894_v57, %v3544_v49  ;;  %v3896_v27 = vpop.f32.mrb[67].mxu0 }
 0x44b   : > { %v4084_v40 = vadd.f32 %v4083_v47, %v8722_v43  ;;  %v4243_v58 = vmax.f32 %v3893_v28, 0.0  ;;  %v4085_v10 = vpop.f32.mrb[65].mxu1  ;;  %v3897_v22 = vadd.f32 %v3896_v27, %v3544_v49  ;;  %v8814_v16 = vpop.permute.xlu1 %4401 }
 0x44c   : > { %v4419_v26 = vmul.f32 %v8802_v1, %v4242_v44  ;;  %v4544_v6 = vmul.f32 %v8746_v38, %v4242_v44  ;;  %v4086_v9 = vadd.f32 %v4085_v10, %v8722_v43  ;;  %v4246_v59 = vmax.f32 %v3895_v60, 0.0  ;;  %v4087_v4 = vpop.f32.mrb[66].mxu1 }
 0x44d   : > { %v4244_v54 = vmax.f32 %v4084_v40, 0.0  ;;  %v4420_v32 = vmul.f32 %v8802_v1, %v4243_v58  ;;  %v4545_v24 = vmul.f32 %v8746_v38, %v4243_v58  ;;  %v4088_v55 = vadd.f32 %v4087_v4, %v3544_v49  ;;  %v4089_v7 = vpop.f32.mrb[67].mxu1 }
 0x44e   : > { %v4245_v48 = vmax.f32 %v4086_v9, 0.0  ;;  %v4423_v36 = vmul.f32 %v8778_v18, %v4246_v59  ;;  %v4548_v53 = vmul.f32 %v8782_v41, %v4246_v59  ;;  %v4247_v39 = vmax.f32 %v3897_v22, 0.0  ;;  %v8822_v22 = vpop.permute.xlu0 %4391 }
 0x44f   : > { %v4421_v45 = vmul.f32 %v8802_v1, %v4244_v54  ;;  %v4546_v13 = vmul.f32 %v8746_v38, %v4244_v54  ;;  %v4248_v43 = vmax.f32 %v4088_v55, 0.0  ;;  %v4090_v62 = vadd.f32 %v4089_v7, %v3544_v49  ;;  %v3900_v63 = vpop.f32.mrb[68].mxu0 }
 0x450   : > { %v4422_v28 = vmul.f32 %v8802_v1, %v4245_v48  ;;  %v4547_v57 = vmul.f32 %v8746_v38, %v4245_v48  ;;  %v4451_v44 = vadd.f32 %v4423_v36, %v4419_v26  ;;  %v4576_v47 = vadd.f32 %v4548_v53, %v4544_v6  ;;  %v3902_v60 = vpop.f32.mrb[69].mxu0 }
 0x451   : > { %v4425_v27 = vmul.f32 %v8778_v18, %v4248_v43  ;;  %v4550_v40 = vmul.f32 %v8782_v41, %v4248_v43  ;;  %v4424_v58 = vmul.f32 %v8778_v18, %v4247_v39  ;;  %v4549_v10 = vmul.f32 %v8782_v41, %v4247_v39  ;;  %v3904_v49 = vpop.f32.mrb[70].mxu0 }
 0x452   : > { %v4249_v9 = vmax.f32 %v4090_v62, 0.0  ;;  %v3901_v59 = vadd.f32 %v3900_v63, %v8727_v56  ;;  %v4093_v4 = vpop.f32.mrb[68].mxu1  ;;  %v3903_v54 = vadd.f32 %v3902_v60, %v8727_v56  ;;  %v3905_v26 = vadd.f32 %v3904_v49, %v8752_v21  ;;  %v3906_v6 = vpop.f32.mrb[71].mxu0 }
 0x453   : > { %v4477_v55 = vadd.f32 %v4425_v27, %v4421_v45  ;;  %v4602_v7 = vadd.f32 %v4550_v40, %v4546_v13  ;;  %v4464_v48 = vadd.f32 %v4424_v58, %v4420_v32  ;;  %v4589_v36 = vadd.f32 %v4549_v10, %v4545_v24  ;;  %v4095_v53 = vpop.f32.mrb[69].mxu1  ;;  %v8831_v60 = vpop.permute.xlu1 %3653 }
 0x454   : > { %v4426_v43 = vmul.f32 %v8778_v18, %v4249_v9  ;;  %v4551_v39 = vmul.f32 %v8782_v41, %v4249_v9  ;;  %v4250_v3 = vmax.f32 %v3901_v59, 0.0  ;;  %v4094_v62 = vadd.f32 %v4093_v4, %v8727_v56  ;;  %v4097_v46 = vpop.f32.mrb[70].mxu1  ;;  %10694 = vst [vmem:[#allocation7_spill] sm:$0xff] %v8831_v60  ;;  %v8836_v58 = vpop.permute.xlu0 %4396 }
 0x455   : > { %v4251_v63 = vmax.f32 %v3903_v54, 0.0  ;;  %v4096_v12 = vadd.f32 %v4095_v53, %v8727_v56  ;;  %v4254_v49 = vmax.f32 %v3905_v26, 0.0  ;;  %v4098_v45 = vadd.f32 %v4097_v46, %v8752_v21  ;;  %v4099_v13 = vpop.f32.mrb[71].mxu1 }
 0x456   : > { %v4490_v32 = vadd.f32 %v4426_v43, %v4422_v28  ;;  %v4615_v24 = vadd.f32 %v4551_v39, %v4547_v57  ;;  %v4427_v27 = vmul.f32 %v8822_v22, %v4250_v3  ;;  %v4552_v40 = vmul.f32 %v8790_v19, %v4250_v3 }
 0x457   : > { %v4252_v10 = vmax.f32 %v4094_v62, 0.0  ;;  %v4428_v9 = vmul.f32 %v8822_v22, %v4251_v63  ;;  %v4553_v59 = vmul.f32 %v8790_v19, %v4251_v63  ;;  %v4253_v56 = vmax.f32 %v4096_v12, 0.0  ;;  %v3910_v4 = vpop.f32.mrb[72].mxu0  ;;  %v8849_v60 = vpop.permute.xlu1 %3693 }
 0x458   : > { %v4452_v54 = vadd.f32 %v4451_v44, %v4427_v27  ;;  %v4577_v26 = vadd.f32 %v4576_v47, %v4552_v40  ;;  %v4431_v46 = vmul.f32 %v8836_v58, %v4254_v49  ;;  %v4556_v28 = vmul.f32 %v8800_v23, %v4254_v49  ;;  %v3912_v57 = vpop.f32.mrb[73].mxu0  ;;  %10696 = vst [vmem:[#allocation42_spill] sm:$0xff] %v8849_v60 }
 0x459   : > { %v4429_v53 = vmul.f32 %v8822_v22, %v4252_v10  ;;  %v4554_v3 = vmul.f32 %v8790_v19, %v4252_v10  ;;  %v4465_v43 = vadd.f32 %v4464_v48, %v4428_v9  ;;  %v4590_v39 = vadd.f32 %v4589_v36, %v4553_v59  ;;  %v3914_v62 = vpop.f32.mrb[74].mxu0 }
 0x45a   : > { %v4430_v33 = vmul.f32 %v8822_v22, %v4253_v56  ;;  %v4555_v63 = vmul.f32 %v8790_v19, %v4253_v56  ;;  %v4453_v12 = vadd.f32 %v4452_v54, %v4431_v46  ;;  %v8846_v20 = vadd.f32 %v4577_v26, %v4556_v28  ;;  %v4103_v44 = vpop.f32.mrb[72].mxu1  ;;  %v3916_v47 = vpop.f32.mrb[75].mxu0 }
 0x45b   : > { %v4478_v27 = vadd.f32 %v4477_v55, %v4429_v53  ;;  %v4603_v40 = vadd.f32 %v4602_v7, %v4554_v3  ;;  %v4256_v49 = vmax.f32 %v4098_v45, 0.0  ;;  %v3907_v5 = vadd.f32 %v3906_v6, %v8752_v21  ;;  %v4105_v10 = vpop.f32.mrb[73].mxu1  ;;  %v8873_v3 = vpop.permute.xlu0 %3688 }
 0x45c   : > { %10695 = vst [vmem:[#allocation8_spill] sm:$0xff] %v8846_v20  ;;  %v4491_v48 = vadd.f32 %v4490_v32, %v4430_v33  ;;  %v4616_v36 = vadd.f32 %v4615_v24, %v4555_v63  ;;  %v4100_v9 = vadd.f32 %v4099_v13, %v8752_v21  ;;  %v8853_v59 = vadd.f32 %v3910_v4, %v8735_v30  ;;  %v4107_v56 = vpop.f32.mrb[74].mxu1 }
 0x45d   : > { %v4433_v54 = vmul.f32 %v8836_v58, %v4256_v49  ;;  %v4558_v26 = vmul.f32 %v8800_v23, %v4256_v49  ;;  %v4255_v55 = vmax.f32 %v3907_v5, 0.0  ;;  %v8858_v7 = vadd.f32 %v4103_v44, %v8735_v30  ;;  %v4109_v6 = vpop.f32.mrb[75].mxu1  ;;  %10702 = vst [vmem:[#allocation52_spill] sm:$0xff] %v8873_v3 }
 0x45e   : > { %10697 = vst [vmem:[#allocation50_spill] sm:$0xff] %v8853_v59  ;;  %v4257_v45 = vmax.f32 %v4100_v9, 0.0  ;;  %v10093_v46 = vmax.f32 %v8853_v59, 0.0  ;;  %v8862_v33 = vadd.f32 %v3912_v57, %v8735_v30  ;;  %v8865_v21 = vadd.f32 %v4105_v10, %v8735_v30  ;;  %v8883_v10 = vpop.permute.xlu1 %4533 }
 0x45f   : > { %10698 = vst [vmem:[#allocation10_spill] sm:$0xff] %v8858_v7  ;;  %v4479_v13 = vadd.f32 %v4478_v27, %v4433_v54  ;;  %v8867_v32 = vadd.f32 %v4603_v40, %v4558_v26  ;;  %v4432_v24 = vmul.f32 %v8836_v58, %v4255_v55  ;;  %v4557_v5 = vmul.f32 %v8800_v23, %v4255_v55  ;;  %v3920_v4 = vpop.f32.mrb[76].mxu0 }
 0x460   : > { %10699 = vst [vmem:[#allocation12_spill] sm:$0xff] %v8862_v33  ;;  %10700 = vst [vmem:[#allocation16_spill] sm:$0xff] %v8865_v21  ;;  %v4434_v28 = vmul.f32 %v8836_v58, %v4257_v45  ;;  %v4559_v53 = vmul.f32 %v8800_v23, %v4257_v45  ;;  %v4435_v57 = vmul.f32 %v8814_v16, %v10093_v46  ;;  %v10094_v30 = vmax.f32 %v8858_v7, 0.0  ;;  %v3922_v63 = vpop.f32.mrb[77].mxu0 }
 0x461   : > { %10701 = vst [vmem:[#allocation44_spill] sm:$0xff] %v8867_v32  ;;  %v4466_v44 = vadd.f32 %v4465_v43, %v4432_v24  ;;  %v8879_v27 = vadd.f32 %v4590_v39, %v4557_v5  ;;  %v10096_v40 = vmax.f32 %v8862_v33, 0.0  ;;  %v10095_v49 = vmax.f32 %v8865_v21, 0.0  ;;  %10704 = vst [vmem:[#allocation76_spill] sm:$0xff] %v8883_v10  ;;  %v3924_v9 = vpop.f32.mrb[78].mxu0 }
 0x462   : > { %v4492_v54 = vadd.f32 %v4491_v48, %v4434_v28  ;;  %v8885_v26 = vadd.f32 %v4616_v36, %v4559_v53  ;;  %v4454_v55 = vadd.f32 %v4453_v12, %v4435_v57  ;;  %v4437_v45 = vmul.f32 %v8814_v16, %v10094_v30  ;;  %v4113_v46 = vpop.f32.mrb[76].mxu1  ;;  %v3926_v32 = vpop.f32.mrb[79].mxu0 }
 0x463   : > { %10703 = vst [vmem:[#allocation69_spill] sm:$0xff] %v8879_v27  ;;  %v4436_v43 = vmul.f32 %v8814_v16, %v10096_v40  ;;  %v4438_v39 = vmul.f32 %v8814_v16, %v10095_v49  ;;  %v8897_v24 = vadd.f32 %v3914_v62, %v8756_v37  ;;  %v8900_v48 = vadd.f32 %v4107_v56, %v8756_v37  ;;  %v4115_v12 = vpop.f32.mrb[77].mxu1 }
 0x464   : > { %10705 = vst [vmem:[#allocation81_spill] sm:$0xff] %v8885_v26  ;;  %v4480_v36 = vadd.f32 %v4479_v13, %v4437_v45  ;;  %v8903_v5 = vadd.f32 %v3916_v47, %v8756_v37  ;;  %v8906_v28 = vadd.f32 %v4109_v6, %v8756_v37  ;;  %v8909_v53 = vadd.f32 %v3920_v4, %v8740_v8  ;;  %v4117_v57 = vpop.f32.mrb[78].mxu1  ;;  %v8913_v26 = vpop.permute.xlu0 %4406 }
 0x465   : > { %v4467_v30 = vadd.f32 %v4466_v44, %v4436_v43  ;;  %v4493_v49 = vadd.f32 %v4492_v54, %v4438_v39  ;;  %v10097_v62 = vmax.f32 %v8897_v24, 0.0  ;;  %v10098_v40 = vmax.f32 %v8900_v48, 0.0  ;;  %v4119_v56 = vpop.f32.mrb[79].mxu1  ;;  %10707 = vst [vmem:[#allocation85_spill] sm:$0xff] %v8913_v26  ;;  %v8933_v39 = vpop.permute.xlu1 %4411 }
 0x466   : > { %10706 = vst [vmem:[#allocation70_spill] sm:$0xff] %v8909_v53  ;;  %v10102_v13 = vmax.f32 %v8903_v5, 0.0  ;;  %v10104_v47 = vmax.f32 %v8906_v28, 0.0  ;;  %v8919_v6 = vadd.f32 %v4113_v46, %v8740_v8  ;;  %10709 = vst [vmem:[#allocation19_spill] sm:$0xff] %v8933_v39  ;;  %v8943_v59 = vadd.f32 %v4115_v12, %v8740_v8 }
 0x467   : > { %v4439_v4 = vmul.f32 %v8913_v26, %v10097_v62  ;;  %v4441_v44 = vmul.f32 %v8913_v26, %v10098_v40  ;;  %v3930_v54 = vpop.f32.mrb[80].mxu0  ;;  %v10710_v62 = vmax.f32 %v8909_v53, 0.0  ;;  %v8959_v12 = vadd.f32 %v3926_v32, %v8760_v14 }
 0x468   : > { %10708 = vst [vmem:[#allocation127_spill] sm:$0xff] %v8919_v6  ;;  %v4440_v45 = vmul.f32 %v8913_v26, %v10102_v13  ;;  %v4442_v43 = vmul.f32 %v8913_v26, %v10104_v47  ;;  %v3932_v46 = vpop.f32.mrb[81].mxu0  ;;  %v10106_v40 = vmax.f32 %v8919_v6, 0.0  ;;  %v8940_v13 = vadd.f32 %v3922_v63, %v8740_v8  ;;  %10712 = vst [vmem:[#allocation27_spill] sm:$0xff] %v8943_v59 }
 0x469   : > { %v4455_v37 = vadd.f32 %v4454_v55, %v4439_v4  ;;  %v4481_v27 = vadd.f32 %v4480_v36, %v4441_v44  ;;  %v4443_v20 = vmul.f32 %v8933_v39, %v10710_v62  ;;  %v3934_v21 = vpop.f32.mrb[82].mxu0  ;;  %v8951_v62 = vadd.f32 %v3924_v9, %v8760_v14  ;;  %10715 = vst [vmem:[#allocation25_spill] sm:$0xff] %v8959_v12 }
 0x46a   : > { %v4468_v7 = vadd.f32 %v4467_v30, %v4440_v45  ;;  %v4494_v33 = vadd.f32 %v4493_v49, %v4442_v43  ;;  %10711 = vst [vmem:[#allocation23_spill] sm:$0xff] %v8940_v13  ;;  %v4123_v47 = vpop.f32.mrb[80].mxu1  ;;  %v8945_v60 = vpop.f32.mrb[83].mxu0  ;;  %v4445_v36 = vmul.f32 %v8933_v39, %v10106_v40  ;;  %v8954_v30 = vadd.f32 %v4117_v57, %v8760_v14 }
 0x46b   : > { %v4456_v55 = vadd.f32 %v4455_v37, %v4443_v20  ;;  %10713 = vst [vmem:[#allocation47_spill] sm:$0xff] %v8951_v62  ;;  %v4125_v49 = vpop.f32.mrb[81].mxu1  ;;  %v10107_v63 = vmax.f32 %v8940_v13, 0.0  ;;  %v10109_v8 = vmax.f32 %v8943_v59, 0.0  ;;  %v8962_v20 = vadd.f32 %v4119_v56, %v8760_v14  ;;  %v8974_v43 = vpop.permute.xlu1 %4416 }
 0x46c   : > { %10714 = vst [vmem:[#allocation59_spill] sm:$0xff] %v8954_v30  ;;  %v4127_v37 = vpop.f32.mrb[82].mxu1  ;;  %v4482_v4 = vadd.f32 %v4481_v27, %v4445_v36  ;;  %v10112_v44 = vmax.f32 %v8951_v62, 0.0  ;;  %v10115_v9 = vmax.f32 %v8954_v30, 0.0  ;;  %10717 = vst [vmem:[#allocation49_spill] sm:$0xff] %v8974_v43  ;;  %v10118_v14 = vmax.f32 %v8959_v12, 0.0 }
 0x46d   : > { %10716 = vst [vmem:[#allocation29_spill] sm:$0xff] %v8962_v20  ;;  %v8966_v45 = vpop.f32.mrb[83].mxu1  ;;  %v4444_v57 = vmul.f32 %v8933_v39, %v10107_v63  ;;  %v4446_v32 = vmul.f32 %v8933_v39, %v10109_v8  ;;  %v3931_v40 = vadd.f32 %v3930_v54, %v8742_v17  ;;  %v4124_v63 = vadd.f32 %v4123_v47, %v8742_v17 }
 0x46e   : > { %v4447_v56 = vmul.f32 %v8974_v43, %v10112_v44  ;;  %v4449_v36 = vmul.f32 %v8974_v43, %v10115_v9  ;;  %v4448_v27 = vmul.f32 %v8974_v43, %v10118_v14  ;;  %v10718_v62 = vmax.f32 %v8962_v20, 0.0 }
 0x46f   : > { %v8986_v59 = vpop.f32.mrb[84].mxu0  ;;  %v4469_v8 = vadd.f32 %v4468_v7, %v4444_v57  ;;  %v4495_v6 = vadd.f32 %v4494_v33, %v4446_v32  ;;  %v3935_v32 = vadd.f32 %v3934_v21, %v8764_v35  ;;  %v4274_v20 = vmax.f32 %v3931_v40, 0.0 }
 0x470   : > { %v4450_v44 = vmul.f32 %v8974_v43, %v10718_v62  ;;  %v8994_v13 = vpop.f32.mrb[85].mxu0  ;;  %v4457_v30 = vadd.f32 %v4456_v55, %v4447_v56  ;;  %v4483_v9 = vadd.f32 %v4482_v4, %v4449_v36  ;;  %v4276_v12 = vmax.f32 %v4124_v63, 0.0 }
 0x471   : > { %v8996_v53 = vpop.f32.mrb[86].mxu0  ;;  %v4470_v54 = vadd.f32 %v4469_v8, %v4448_v27  ;;  %v3933_v62 = vadd.f32 %v3932_v46, %v8742_v17  ;;  %v10719_v55 = vmax.f32 %v8897_v24, 0.0  ;;  %v10721_v27 = vmax.f32 %v8900_v48, 0.0 }
 0x472   : > { %v4496_v47 = vadd.f32 %v4495_v6, %v4450_v44  ;;  %v8998_v3 = vpop.f32.mrb[84].mxu1  ;;  %v9000_v7 = vpop.f32.mrb[87].mxu0  ;;  %v4458_v33 = vrot.slane %v4457_v30, 4  ;;  %v4484_v57 = vrot.slane %v4483_v9, 4  ;;  %v4126_v40 = vadd.f32 %v4125_v49, %v8742_v17 }
 0x473   : > { %v4135_v14 = vpop.f32.mrb[85].mxu1  ;;  %v9009_v8 = vmul.f32 %v8883_v10, %v10719_v55  ;;  %v4471_v6 = vrot.slane %v4470_v54, 4  ;;  %v9016_v21 = vmul.f32 %v8883_v10, %v10721_v27  ;;  %v4278_v63 = vmax.f32 %v3935_v32, 0.0 }
 0x474   : > { %v9004_v15 = vpop.f32.mrb[86].mxu1  ;;  %v4497_v4 = vrot.slane %v4496_v47, 4  ;;  %v4128_v46 = vadd.f32 %v4127_v37, %v8764_v35  ;;  %v10723_v56 = vmax.f32 %v8903_v5, 0.0  ;;  %v10725_v36 = vmax.f32 %v8906_v28, 0.0 }
 0x475   : > { %10720 = vst [vmem:[#allocation61_spill] sm:$0xff] %v9009_v8  ;;  %v9011_v44 = vpop.f32.mrb[87].mxu1  ;;  %10722 = vst [vmem:[#allocation18_spill] sm:$0xff] %v9016_v21  ;;  %v9030_v8 = vadd.f32 %v4458_v33, %v4457_v30  ;;  %v9032_v48 = vadd.f32 %v4484_v57, %v4483_v9  ;;  %v4637_v17 = vmul.f32 %v8802_v1, %v4274_v20  ;;  %v4275_v37 = vmax.f32 %v3933_v62, 0.0 }
 0x476   : > { %v9023_v24 = vmul.f32 %v8883_v10, %v10723_v56  ;;  %v9028_v55 = vmul.f32 %v8883_v10, %v10725_v36  ;;  %v4725_v49 = vmul.f32 %v8746_v38, %v4274_v20  ;;  %v4639_v5 = vmul.f32 %v8802_v1, %v4276_v12 }
 0x477   : > { %10727 = vst [vmem:[#allocation24_spill] sm:$0xff] %v9030_v8  ;;  %10728 = vst [vmem:[#allocation26_spill] sm:$0xff] %v9032_v48  ;;  %v9034_v27 = vpop.f32.mrb[88].mxu0  ;;  %v9041_v56 = vadd.f32 %v4471_v6, %v4470_v54  ;;  %v9043_v28 = vadd.f32 %v4497_v4, %v4496_v47  ;;  %v4641_v30 = vmul.f32 %v8778_v18, %v4278_v63  ;;  %v4277_v36 = vmax.f32 %v4126_v40, 0.0 }
 0x478   : > { %10724 = vst [vmem:[#allocation20_spill] sm:$0xff] %v9023_v24  ;;  %10726 = vst [vmem:[#allocation22_spill] sm:$0xff] %v9028_v55  ;;  %v9039_v32 = vpop.f32.mrb[89].mxu0  ;;  %v4729_v9 = vmul.f32 %v8782_v41, %v4278_v63  ;;  %v4727_v57 = vmul.f32 %v8746_v38, %v4276_v12  ;;  %v4280_v55 = vmax.f32 %v4128_v46, 0.0  ;;  %v3937_v20 = vadd.f32 %v8945_v60, %v8764_v35 }
 0x479   : > { %10729 = vst [vmem:[#allocation28_spill] sm:$0xff] %v9041_v56  ;;  %10730 = vst [vmem:[#allocation46_spill] sm:$0xff] %v9043_v28  ;;  %v9047_v33 = vpop.f32.mrb[90].mxu0  ;;  %v4669_v6 = vadd.f32 %v4641_v30, %v4637_v17  ;;  %v4638_v24 = vmul.f32 %v8802_v1, %v4275_v37  ;;  %v4726_v12 = vmul.f32 %v8746_v38, %v4275_v37 }
 0x47a   : > { %v9052_v62 = vpop.f32.mrb[88].mxu1  ;;  %v9054_v21 = vpop.f32.mrb[91].mxu0  ;;  %v4757_v4 = vadd.f32 %v4729_v9, %v4725_v49  ;;  %v4643_v40 = vmul.f32 %v8778_v18, %v4280_v55  ;;  %v4731_v60 = vmul.f32 %v8782_v41, %v4280_v55  ;;  %v4279_v8 = vmax.f32 %v3937_v20, 0.0 }
 0x47b   : > { %v9058_v63 = vpop.f32.mrb[89].mxu1  ;;  %v4130_v17 = vadd.f32 %v8966_v45, %v8764_v35  ;;  %v4640_v30 = vmul.f32 %v8802_v1, %v4277_v36  ;;  %v4728_v37 = vmul.f32 %v8746_v38, %v4277_v36  ;;  %v3941_v54 = vadd.f32 %v8986_v59, %v8744_v2 }
 0x47c   : > { %v9064_v46 = vpop.f32.mrb[90].mxu1  ;;  %v4695_v9 = vadd.f32 %v4643_v40, %v4639_v5  ;;  %v4783_v47 = vadd.f32 %v4731_v60, %v4727_v57  ;;  %v4642_v55 = vmul.f32 %v8778_v18, %v4279_v8  ;;  %v4730_v48 = vmul.f32 %v8782_v41, %v4279_v8 }
 0x47d   : > { %v9070_v49 = vpop.f32.mrb[91].mxu1  ;;  %v4281_v25 = vmax.f32 %v4130_v17, 0.0  ;;  %v4134_v35 = vadd.f32 %v8998_v3, %v8744_v2  ;;  %v3943_v45 = vadd.f32 %v8994_v13, %v8744_v2  ;;  %v4136_v36 = vadd.f32 %v4135_v14, %v8744_v2 }
 0x47e   : > { %v3945_v5 = vadd.f32 %v8996_v53, %v8768_v50  ;;  %v4682_v8 = vadd.f32 %v4642_v55, %v4638_v24  ;;  %v4770_v40 = vadd.f32 %v4730_v48, %v4726_v12  ;;  %v4282_v42 = vmax.f32 %v3941_v54, 0.0 }
 0x47f   : > { %v9078_v20 = vpop.f32.mrb[92].mxu0  ;;  %v4644_v60 = vmul.f32 %v8778_v18, %v4281_v25  ;;  %v4732_v59 = vmul.f32 %v8782_v41, %v4281_v25  ;;  %v4284_v3 = vmax.f32 %v4134_v35, 0.0  ;;  %v4283_v28 = vmax.f32 %v3943_v45, 0.0 }
 0x480   : > { %v9087_v57 = vpop.f32.mrb[93].mxu0  ;;  %v4285_v56 = vmax.f32 %v4136_v36, 0.0  ;;  %v4286_v34 = vmax.f32 %v3945_v5, 0.0  ;;  %v4138_v24 = vadd.f32 %v9004_v15, %v8768_v50  ;;  %v4645_v25 = vmul.f32 %v8822_v22, %v4282_v42 }
 0x481   : > { %v9091_v17 = vpop.f32.mrb[94].mxu0  ;;  %v4708_v14 = vadd.f32 %v4644_v60, %v4640_v30  ;;  %v4796_v53 = vadd.f32 %v4732_v59, %v4728_v37  ;;  %v4733_v12 = vmul.f32 %v8790_v19, %v4282_v42  ;;  %v4647_v54 = vmul.f32 %v8822_v22, %v4284_v3 }
 0x482   : > { %v9093_v13 = vpop.f32.mrb[92].mxu1  ;;  %v9095_v2 = vpop.f32.mrb[95].mxu0  ;;  %v4735_v55 = vmul.f32 %v8790_v19, %v4284_v3  ;;  %v4646_v45 = vmul.f32 %v8822_v22, %v4283_v28  ;;  %v4734_v30 = vmul.f32 %v8790_v19, %v4283_v28  ;;  %v4648_v37 = vmul.f32 %v8822_v22, %v4285_v56 }
 0x483   : > { %v9099_v48 = vpop.f32.mrb[93].mxu1  ;;  %v4736_v15 = vmul.f32 %v8790_v19, %v4285_v56  ;;  %v4670_v5 = vadd.f32 %v4669_v6, %v4645_v25  ;;  %v4758_v60 = vadd.f32 %v4757_v4, %v4733_v12  ;;  %v4696_v59 = vadd.f32 %v4695_v9, %v4647_v54 }
 0x484   : > { %v9105_v35 = vpop.f32.mrb[94].mxu1  ;;  %v4784_v42 = vadd.f32 %v4783_v47, %v4735_v55  ;;  %v4683_v0 = vadd.f32 %v4682_v8, %v4646_v45  ;;  %v4771_v41 = vadd.f32 %v4770_v40, %v4734_v30  ;;  %v4709_v18 = vadd.f32 %v4708_v14, %v4648_v37  ;;  %v9143_v45 = vpop.permute.xlu0 %4529 }
 0x485   : > { %v9111_v36 = vpop.f32.mrb[95].mxu1  ;;  %v4797_v3 = vadd.f32 %v4796_v53, %v4736_v15  ;;  %v4649_v38 = vmul.f32 %v8836_v58, %v4286_v34  ;;  %v4737_v28 = vmul.f32 %v8800_v23, %v4286_v34  ;;  %v4288_v1 = vmax.f32 %v4138_v24, 0.0  ;;  %10731 = vst [vmem:[#allocation130_spill] sm:$0xff] %v9143_v45 }
 0x486   : > { %v3947_v56 = vadd.f32 %v9000_v7, %v8768_v50  ;;  %v4140_v6 = vadd.f32 %v9011_v44, %v8768_v50  ;;  %v3951_v47 = vadd.f32 %v9034_v27, %v8748_v52  ;;  %v4144_v4 = vadd.f32 %v9052_v62, %v8748_v52 }
 0x487   : > { %v9113_v61 = vpop.f32.mrb[96].mxu0  ;;  %v3953_v9 = vadd.f32 %v9039_v32, %v8748_v52  ;;  %v4671_v34 = vadd.f32 %v4670_v5, %v4649_v38  ;;  %v4759_v40 = vadd.f32 %v4758_v60, %v4737_v28  ;;  %v4651_v7 = vmul.f32 %v8836_v58, %v4288_v1 }
 0x488   : > { %v9119_v19 = vpop.f32.mrb[97].mxu0  ;;  %v4739_v14 = vmul.f32 %v8800_v23, %v4288_v1  ;;  %v4287_v44 = vmax.f32 %v3947_v56, 0.0  ;;  %v4289_v27 = vmax.f32 %v4140_v6, 0.0  ;;  %v4290_v24 = vmax.f32 %v3951_v47, 0.0 }
 0x489   : > { %v9129_v8 = vpop.f32.mrb[98].mxu0  ;;  %v4292_v25 = vmax.f32 %v4144_v4, 0.0  ;;  %v4697_v12 = vadd.f32 %v4696_v59, %v4651_v7  ;;  %v4291_v54 = vmax.f32 %v3953_v9, 0.0  ;;  %v4146_v38 = vadd.f32 %v9058_v63, %v8748_v52 }
 0x48a   : > { %v9133_v53 = vpop.f32.mrb[96].mxu1  ;;  %v9135_v50 = vpop.f32.mrb[99].mxu0  ;;  %v4785_v32 = vadd.f32 %v4784_v42, %v4739_v14  ;;  %v4650_v1 = vmul.f32 %v8836_v58, %v4287_v44  ;;  %v4738_v30 = vmul.f32 %v8800_v23, %v4287_v44  ;;  %v4652_v37 = vmul.f32 %v8836_v58, %v4289_v27 }
 0x48b   : > { %v9137_v62 = vpop.f32.mrb[97].mxu1  ;;  %v4740_v15 = vmul.f32 %v8800_v23, %v4289_v27  ;;  %v4653_v60 = vmul.f32 %v8814_v16, %v4290_v24  ;;  %v4741_v59 = vmul.f32 %v9143_v45, %v4290_v24  ;;  %v4655_v52 = vmul.f32 %v8814_v16, %v4292_v25 }
 0x48c   : > { %v9141_v55 = vpop.f32.mrb[98].mxu1  ;;  %v4743_v63 = vmul.f32 %v9143_v45, %v4292_v25  ;;  %v4684_v42 = vadd.f32 %v4683_v0, %v4650_v1  ;;  %v4772_v28 = vadd.f32 %v4771_v41, %v4738_v30  ;;  %v4710_v56 = vadd.f32 %v4709_v18, %v4652_v37 }
 0x48d   : > { %v9149_v5 = vpop.f32.mrb[99].mxu1  ;;  %v4798_v6 = vadd.f32 %v4797_v3, %v4740_v15  ;;  %v4672_v4 = vadd.f32 %v4671_v34, %v4653_v60  ;;  %v4760_v9 = vadd.f32 %v4759_v40, %v4741_v59  ;;  %v4698_v7 = vadd.f32 %v4697_v12, %v4655_v52 }
 0x48e   : > { %v4786_v14 = vadd.f32 %v4785_v32, %v4743_v63  ;;  %v4654_v27 = vmul.f32 %v8814_v16, %v4291_v54  ;;  %v4742_v24 = vmul.f32 %v9143_v45, %v4291_v54  ;;  %v4293_v23 = vmax.f32 %v4146_v38, 0.0 }
 0x48f   : > { %v9155_v47 = vpop.f32.mrb[100].mxu0  ;;  %v3955_v25 = vadd.f32 %v9047_v33, %v8772_v31  ;;  %v4148_v18 = vadd.f32 %v9064_v46, %v8772_v31  ;;  %v3957_v41 = vadd.f32 %v9054_v21, %v8772_v31  ;;  %v4150_v3 = vadd.f32 %v9070_v49, %v8772_v31 }
 0x490   : > { %v9157_v44 = vpop.f32.mrb[101].mxu0  ;;  %v3961_v34 = vadd.f32 %v9078_v20, %v8750_v51  ;;  %v4685_v32 = vadd.f32 %v4684_v42, %v4654_v27  ;;  %v4773_v33 = vadd.f32 %v4772_v28, %v4742_v24  ;;  %v4656_v54 = vmul.f32 %v8814_v16, %v4293_v23 }
 0x491   : > { %v9163_v0 = vpop.f32.mrb[102].mxu0  ;;  %v4744_v38 = vmul.f32 %v9143_v45, %v4293_v23  ;;  %v4294_v1 = vmax.f32 %v3955_v25, 0.0  ;;  %v4296_v21 = vmax.f32 %v4148_v18, 0.0  ;;  %v4295_v30 = vmax.f32 %v3957_v41, 0.0 }
 0x492   : > { %v9173_v40 = vpop.f32.mrb[100].mxu1  ;;  %v9175_v12 = vpop.f32.mrb[103].mxu0  ;;  %v4297_v37 = vmax.f32 %v4150_v3, 0.0  ;;  %v4711_v49 = vadd.f32 %v4710_v56, %v4656_v54  ;;  %v4298_v15 = vmax.f32 %v3961_v34, 0.0  ;;  %v4154_v60 = vadd.f32 %v9093_v13, %v8750_v51 }
 0x493   : > { %v9179_v46 = vpop.f32.mrb[101].mxu1  ;;  %v4799_v20 = vadd.f32 %v4798_v6, %v4744_v38  ;;  %v4657_v52 = vmul.f32 %v8913_v26, %v4294_v1  ;;  %v4745_v23 = vmul.f32 %v8883_v10, %v4294_v1  ;;  %v4659_v63 = vmul.f32 %v8913_v26, %v4296_v21  ;;  %v9199_v34 = vpop.permute.xlu0 %4537 }
 0x494   : > { %v9181_v31 = vpop.f32.mrb[102].mxu1  ;;  %v4747_v42 = vmul.f32 %v8883_v10, %v4296_v21  ;;  %v4658_v28 = vmul.f32 %v8913_v26, %v4295_v30  ;;  %v4746_v27 = vmul.f32 %v8883_v10, %v4295_v30  ;;  %v4660_v56 = vmul.f32 %v8913_v26, %v4297_v37  ;;  %10732 = vst [vmem:[#allocation48_spill] sm:$0xff] %v9199_v34 }
 0x495   : > { %v9185_v59 = vpop.f32.mrb[103].mxu1  ;;  %v4748_v6 = vmul.f32 %v8883_v10, %v4297_v37  ;;  %v4673_v13 = vadd.f32 %v4672_v4, %v4657_v52  ;;  %v4761_v25 = vadd.f32 %v4760_v9, %v4745_v23  ;;  %v4699_v18 = vadd.f32 %v4698_v7, %v4659_v63 }
 0x496   : > { %v4787_v41 = vadd.f32 %v4786_v14, %v4747_v42  ;;  %v4686_v54 = vadd.f32 %v4685_v32, %v4658_v28  ;;  %v4774_v38 = vadd.f32 %v4773_v33, %v4746_v27  ;;  %v4712_v1 = vadd.f32 %v4711_v49, %v4660_v56  ;;  %v9229_v56 = vpop.permute.xlu1 %4541 }
 0x497   : > { %v9195_v24 = vpop.f32.mrb[104].mxu0  ;;  %v4800_v21 = vadd.f32 %v4799_v20, %v4748_v6  ;;  %v4661_v30 = vmul.f32 %v8933_v39, %v4298_v15  ;;  %v4749_v37 = vmul.f32 %v9199_v34, %v4298_v15  ;;  %v4300_v10 = vmax.f32 %v4154_v60, 0.0  ;;  %10733 = vst [vmem:[#allocation58_spill] sm:$0xff] %v9229_v56 }
 0x498   : > { %v9197_v3 = vpop.f32.mrb[105].mxu0  ;;  %v3963_v4 = vadd.f32 %v9087_v57, %v8750_v51  ;;  %v4156_v14 = vadd.f32 %v9099_v48, %v8750_v51  ;;  %v3965_v32 = vadd.f32 %v9091_v17, %v8776_v29  ;;  %v4158_v33 = vadd.f32 %v9105_v35, %v8776_v29 }
 0x499   : > { %v9201_v45 = vpop.f32.mrb[106].mxu0  ;;  %v3967_v49 = vadd.f32 %v9095_v2, %v8776_v29  ;;  %v4674_v15 = vadd.f32 %v4673_v13, %v4661_v30  ;;  %v4762_v57 = vadd.f32 %v4761_v25, %v4749_v37  ;;  %v4663_v60 = vmul.f32 %v8933_v39, %v4300_v10 }
 0x49a   : > { %v9207_v9 = vpop.f32.mrb[104].mxu1  ;;  %v9209_v7 = vpop.f32.mrb[107].mxu0  ;;  %v4751_v52 = vmul.f32 %v9199_v34, %v4300_v10  ;;  %v4299_v51 = vmax.f32 %v3963_v4, 0.0  ;;  %v4301_v48 = vmax.f32 %v4156_v14, 0.0  ;;  %v4302_v63 = vmax.f32 %v3965_v32, 0.0 }
 0x49b   : > { %v9219_v20 = vpop.f32.mrb[105].mxu1  ;;  %v4304_v17 = vmax.f32 %v4158_v33, 0.0  ;;  %v4700_v35 = vadd.f32 %v4699_v18, %v4663_v60  ;;  %v4303_v27 = vmax.f32 %v3967_v49, 0.0  ;;  %v4160_v2 = vadd.f32 %v9111_v36, %v8776_v29 }
 0x49c   : > { %v9223_v23 = vpop.f32.mrb[106].mxu1  ;;  %v4788_v28 = vadd.f32 %v4787_v41, %v4751_v52  ;;  %v4662_v6 = vmul.f32 %v8933_v39, %v4299_v51  ;;  %v4750_v10 = vmul.f32 %v9199_v34, %v4299_v51  ;;  %v4664_v13 = vmul.f32 %v8933_v39, %v4301_v48 }
 0x49d   : > { %v9225_v42 = vpop.f32.mrb[107].mxu1  ;;  %v4752_v25 = vmul.f32 %v9199_v34, %v4301_v48  ;;  %v4665_v37 = vmul.f32 %v8974_v43, %v4302_v63  ;;  %v4753_v18 = vmul.f32 %v9229_v56, %v4302_v63  ;;  %v4667_v41 = vmul.f32 %v8974_v43, %v4304_v17 }
 0x49e   : > { %v4755_v29 = vmul.f32 %v9229_v56, %v4304_v17  ;;  %v4687_v4 = vadd.f32 %v4686_v54, %v4662_v6  ;;  %v4775_v14 = vadd.f32 %v4774_v38, %v4750_v10  ;;  %v4713_v32 = vadd.f32 %v4712_v1, %v4664_v13 }
 0x49f   : > { %v9235_v30 = vpop.f32.mrb[108].mxu0  ;;  %v4801_v33 = vadd.f32 %v4800_v21, %v4752_v25  ;;  %v4675_v60 = vadd.f32 %v4674_v15, %v4665_v37  ;;  %v4763_v52 = vadd.f32 %v4762_v57, %v4753_v18  ;;  %v4701_v51 = vadd.f32 %v4700_v35, %v4667_v41 }
 0x4a0   : > { %v9241_v36 = vpop.f32.mrb[109].mxu0  ;;  %v4789_v48 = vadd.f32 %v4788_v28, %v4755_v29  ;;  %v4666_v63 = vmul.f32 %v8974_v43, %v4303_v27  ;;  %v4754_v17 = vmul.f32 %v9229_v56, %v4303_v27  ;;  %v4305_v26 = vmax.f32 %v4160_v2, 0.0 }
 0x4a1   : > { %v9243_v49 = vpop.f32.mrb[110].mxu0  ;;  %v9253_v54 = vadd.f32 %v9113_v61, %v8754_v11  ;;  %v4676_v1 = vrot.slane %v4675_v60, 4  ;;  %v4764_v21 = vrot.slane %v4763_v52, 4  ;;  %v4702_v15 = vrot.slane %v4701_v51, 4 }
 0x4a2   : > { %10734 = vst [vmem:[#allocation60_spill] sm:$0xff] %v9243_v49  ;;  %v9245_v34 = vpop.f32.mrb[108].mxu1  ;;  %v9247_v39 = vpop.f32.mrb[111].mxu0  ;;  %v4790_v57 = vrot.slane %v4789_v48, 4  ;;  %v4688_v28 = vadd.f32 %v4687_v4, %v4666_v63  ;;  %v4776_v6 = vadd.f32 %v4775_v14, %v4754_v17  ;;  %v4668_v10 = vmul.f32 %v8974_v43, %v4305_v26 }
 0x4a3   : > { %10735 = vst [vmem:[#allocation112_spill] sm:$0xff] %v9247_v39  ;;  %v9255_v38 = vpop.f32.mrb[109].mxu1  ;;  %v4756_v13 = vmul.f32 %v9229_v56, %v4305_v26  ;;  %v4677_v2 = vadd.f32 %v4676_v1, %v4675_v60  ;;  %v4765_v25 = vadd.f32 %v4764_v21, %v4763_v52  ;;  %v4703_v61 = vadd.f32 %v4702_v15, %v4701_v51 }
 0x4a4   : > { %10736 = vst [vmem:[#allocation129_spill] sm:$0xff] %v9255_v38  ;;  %v9257_v35 = vpop.f32.mrb[110].mxu1  ;;  %v4791_v37 = vadd.f32 %v4790_v57, %v4789_v48  ;;  %v4689_v18 = vrot.slane %v4688_v28, 4  ;;  %v4777_v41 = vrot.slane %v4776_v6, 4  ;;  %v4714_v29 = vadd.f32 %v4713_v32, %v4668_v10 }
 0x4a5   : > { %10737 = vst [vmem:[#allocation111_spill] sm:$0xff] %v9257_v35  ;;  %v9261_v27 = vpop.f32.mrb[111].mxu1  ;;  %v4802_v39 = vadd.f32 %v4801_v33, %v4756_v13  ;;  %v4678_v38 = vrot.slane %v4677_v2, 2  ;;  %v4766_v35 = vrot.slane %v4765_v25, 2  ;;  %v4704_v4 = vrot.slane %v4703_v61, 2 }
 0x4a6   : > { %v4792_v14 = vrot.slane %v4791_v37, 2  ;;  %v4690_v26 = vadd.f32 %v4689_v18, %v4688_v28  ;;  %v4778_v17 = vadd.f32 %v4777_v41, %v4776_v6  ;;  %v4715_v56 = vrot.slane %v4714_v29, 4 }
 0x4a7   : > { %v9263_v49 = vpop.f32.mrb[112].mxu0  ;;  %v4803_v60 = vrot.slane %v4802_v39, 4  ;;  %v4679_v51 = vadd.f32 %v4678_v38, %v4677_v2  ;;  %v4767_v48 = vadd.f32 %v4766_v35, %v4765_v25  ;;  %v4705_v1 = vadd.f32 %v4704_v4, %v4703_v61 }
 0x4a8   : > { %v9265_v63 = vpop.f32.mrb[113].mxu0  ;;  %v4793_v32 = vadd.f32 %v4792_v14, %v4791_v37  ;;  %v4691_v15 = vrot.slane %v4690_v26, 2  ;;  %v4779_v57 = vrot.slane %v4778_v17, 2  ;;  %v4716_v10 = vadd.f32 %v4715_v56, %v4714_v29  ;;  %v9279_v56 = vpop.permute.xlu0 %4505 }
 0x4a9   : > { %10738 = vst [vmem:[#allocation114_spill] sm:$0xff] %v9265_v63  ;;  %v9267_v52 = vpop.f32.mrb[114].mxu0  ;;  %v4804_v13 = vadd.f32 %v4803_v60, %v4802_v39  ;;  %v4680_v28 = vrot.slane %v4679_v51, 1  ;;  %v4768_v6 = vrot.slane %v4767_v48, 1  ;;  %v4706_v18 = vrot.slane %v4705_v1, 1 }
 0x4aa   : > { %10739 = vst [vmem:[#allocation72_spill] sm:$0xff] %v9267_v52  ;;  %v9269_v33 = vpop.f32.mrb[112].mxu1  ;;  %v9271_v21 = vpop.f32.mrb[115].mxu0  ;;  %v4794_v41 = vrot.slane %v4793_v32, 1  ;;  %v4692_v38 = vadd.f32 %v4691_v15, %v4690_v26  ;;  %v4780_v35 = vadd.f32 %v4779_v57, %v4778_v17  ;;  %v4717_v2 = vrot.slane %v4716_v10, 2 }
 0x4ab   : > { %10740 = vst [vmem:[#allocation113_spill] sm:$0xff] %v9271_v21  ;;  %v9273_v63 = vpop.f32.mrb[113].mxu1  ;;  %v4805_v25 = vrot.slane %v4804_v13, 2  ;;  %v4681_v37 = vadd.f32 %v4680_v28, %v4679_v51  ;;  %v4769_v4 = vadd.f32 %v4768_v6, %v4767_v48  ;;  %v4707_v14 = vadd.f32 %v4706_v18, %v4705_v1 }
 0x4ac   : > { %10741 = vst [vmem:[#allocation86_spill] sm:$0xff] %v9273_v63  ;;  %v9275_v43 = vpop.f32.mrb[114].mxu1  ;;  %v4795_v21 = vadd.f32 %v4794_v41, %v4793_v32  ;;  %v4693_v39 = vrot.slane %v4692_v38, 1  ;;  %v4781_v29 = vrot.slane %v4780_v35, 1  ;;  %v4718_v60 = vadd.f32 %v4717_v2, %v4716_v10 }
 0x4ad   : > { %10742 = vst [vmem:[#allocation87_spill] sm:$0xff] %v9275_v43  ;;  %v9277_v61 = vpop.f32.mrb[115].mxu1  ;;  %v4806_v52 = vadd.f32 %v4805_v25, %v4804_v13  ;;  %v4721_v43 = vadd.f32 %v4681_v37, %v9279_v56  ;;  %v4809_v26 = vadd.f32 %v4769_v4, %v9279_v56  ;;  %v4723_v17 = vadd.f32 %v4707_v14, %v9279_v56  ;;  %v10749_v37 = vld [vmem:[#allocation6_spill] sm:$0xff] }
 0x4ae   : > { %v4811_v15 = vadd.f32 %v4795_v21, %v9279_v56  ;;  %v4694_v48 = vadd.f32 %v4693_v39, %v4692_v38  ;;  %v4782_v1 = vadd.f32 %v4781_v29, %v4780_v35  ;;  %v4719_v32 = vrot.slane %v4718_v60, 1  ;;  %v10750_v14 = vld [vmem:[#allocation90_spill] sm:$0xff] }
 0x4af   : > { %v9281_v63 = vpop.f32.mrb[116].mxu0  ;;  %v4807_v57 = vrot.slane %v4806_v52, 1  ;;  %v9292_v10 = vsel %vm4632_vm0, %v4721_v43, %v4809_v26  ;;  %v4306_v6 = vmax.f32 %v9253_v54, 0.0  ;;  %v4164_v18 = vadd.f32 %v9133_v53, %v8754_v11 }
 0x4b0   : > { %v9287_v51 = vpop.f32.mrb[117].mxu0  ;;  %10745 = vst [vmem:[#allocation21_spill] sm:$0xff] %v9292_v10  ;;  %v9295_v13 = vsel %vm4632_vm0, %v4723_v17, %v4811_v15  ;;  %v4722_v38 = vadd.f32 %v4694_v48, %v9279_v56  ;;  %v4810_v35 = vadd.f32 %v4782_v1, %v9279_v56  ;;  %v4720_v2 = vadd.f32 %v4719_v32, %v4718_v60 }
 0x4b1   : > { %10743 = vst [vmem:[#allocation102_spill] sm:$0xff] %v9287_v51  ;;  %v9289_v28 = vpop.f32.mrb[118].mxu0  ;;  %10746 = vst [vmem:[#allocation135_spill] sm:$0xff] %v9295_v13  ;;  %v4808_v25 = vadd.f32 %v4807_v57, %v4806_v52  ;;  %v4817_v4 = vmul.f32 %v10749_v37, %v4306_v6  ;;  %v4905_v39 = vmul.f32 %v10750_v14, %v4306_v6  ;;  %v4308_v54 = vmax.f32 %v4164_v18, 0.0 }
 0x4b2   : > { %10744 = vst [vmem:[#allocation124_spill] sm:$0xff] %v9289_v28  ;;  %v9300_v21 = vpop.f32.mrb[116].mxu1  ;;  %v9302_v41 = vpop.f32.mrb[119].mxu0  ;;  %v3973_v53 = vadd.f32 %v9119_v19, %v8754_v11  ;;  %v9315_v26 = vsel %vm4632_vm0, %v4722_v38, %v4810_v35  ;;  %v4724_v17 = vadd.f32 %v4720_v2, %v9279_v56  ;;  %v4166_v52 = vadd.f32 %v9137_v62, %v8754_v11  ;;  %v10754_v19 = vld [vmem:[#allocation43_spill] sm:$0xff] }
 0x4b3   : > { %10747 = vst [vmem:[#allocation80_spill] sm:$0xff] %v9302_v41  ;;  %v9306_v43 = vpop.f32.mrb[117].mxu1  ;;  %10752 = vst [vmem:[#allocation83_spill] sm:$0xff] %v9315_v26  ;;  %v4812_v60 = vadd.f32 %v4808_v25, %v9279_v56  ;;  %v4819_v48 = vmul.f32 %v10749_v37, %v4308_v54  ;;  %v4907_v1 = vmul.f32 %v10750_v14, %v4308_v54 }
 0x4b4   : > { %10748 = vst [vmem:[#allocation79_spill] sm:$0xff] %v9306_v43  ;;  %v9312_v29 = vpop.f32.mrb[118].mxu1  ;;  %v4307_v32 = vmax.f32 %v3973_v53, 0.0  ;;  %v3975_v57 = vadd.f32 %v9129_v8, %v10754_v19  ;;  %v4309_v18 = vmax.f32 %v4166_v52, 0.0  ;;  %v4168_v38 = vadd.f32 %v9141_v55, %v10754_v19 }
 0x4b5   : > { %10751 = vst [vmem:[#allocation37_spill] sm:$0xff] %v9312_v29  ;;  %v9321_v15 = vpop.f32.mrb[119].mxu1  ;;  %v9328_v6 = vsel %vm4632_vm0, %v4724_v17, %v4812_v60  ;;  %v3977_v11 = vadd.f32 %v9135_v50, %v10754_v19  ;;  %v4170_v8 = vadd.f32 %v9149_v5, %v10754_v19  ;;  %v10759_v50 = vld [vmem:[#allocation94_spill] sm:$0xff] }
 0x4b6   : > { %10753 = vst [vmem:[#allocation75_spill] sm:$0xff] %v9321_v15  ;;  %10755 = vst [vmem:[#allocation38_spill] sm:$0xff] %v9328_v6  ;;  %v4818_v35 = vmul.f32 %v10749_v37, %v4307_v32  ;;  %v4906_v2 = vmul.f32 %v10750_v14, %v4307_v32  ;;  %v4310_v25 = vmax.f32 %v3975_v57, 0.0  ;;  %v4820_v53 = vmul.f32 %v10749_v37, %v4309_v18  ;;  %v10760_v6 = vld [vmem:[#allocation108_spill] sm:$0xff]  ;;  %v10761_v32 = vld [vmem:[#allocation9_spill] sm:$0xff] }
 0x4b7   : > { %v9334_v62 = vpop.f32.mrb[120].mxu0  ;;  %v4908_v17 = vmul.f32 %v10750_v14, %v4309_v18  ;;  %v4312_v55 = vmax.f32 %v4168_v38, 0.0  ;;  %v4311_v60 = vmax.f32 %v3977_v11, 0.0  ;;  %v4313_v26 = vmax.f32 %v4170_v8, 0.0 }
 0x4b8   : > { %10756 = vst [vmem:[#allocation39_spill] sm:$0xff] %v9334_v62  ;;  %v9340_v54 = vpop.f32.mrb[121].mxu0  ;;  %v4821_v13 = vmul.f32 %v10759_v50, %v4310_v25  ;;  %v4909_v10 = vmul.f32 %v10760_v6, %v4310_v25  ;;  %v3981_v57 = vadd.f32 %v9155_v47, %v10761_v32 }
 0x4b9   : > { %10757 = vst [vmem:[#allocation40_spill] sm:$0xff] %v9340_v54  ;;  %v9344_v52 = vpop.f32.mrb[122].mxu0  ;;  %v4823_v19 = vmul.f32 %v10759_v50, %v4312_v55  ;;  %v4911_v18 = vmul.f32 %v10760_v6, %v4312_v55  ;;  %v4822_v38 = vmul.f32 %v10759_v50, %v4311_v60  ;;  %v4910_v11 = vmul.f32 %v10760_v6, %v4311_v60 }
 0x4ba   : > { %10758 = vst [vmem:[#allocation41_spill] sm:$0xff] %v9344_v52  ;;  %v9350_v62 = vpop.f32.mrb[120].mxu1  ;;  %v9352_v5 = vpop.f32.mrb[123].mxu0  ;;  %v4849_v54 = vadd.f32 %v4821_v13, %v4817_v4  ;;  %v4937_v25 = vadd.f32 %v4909_v10, %v4905_v39  ;;  %v4824_v8 = vmul.f32 %v10759_v50, %v4313_v26  ;;  %v4912_v47 = vmul.f32 %v10760_v6, %v4313_v26  ;;  %v10764_v4 = vld [vmem:[#allocation51_spill] sm:$0xff] }
 0x4bb   : > { %10762 = vst [vmem:[#allocation120_spill] sm:$0xff] %v9350_v62  ;;  %10763 = vst [vmem:[#allocation54_spill] sm:$0xff] %v9352_v5  ;;  %v9358_v52 = vpop.f32.mrb[121].mxu1  ;;  %v4875_v62 = vadd.f32 %v4823_v19, %v4819_v48  ;;  %v4963_v5 = vadd.f32 %v4911_v18, %v4907_v1  ;;  %v4862_v41 = vadd.f32 %v4822_v38, %v4818_v35  ;;  %v4314_v51 = vmax.f32 %v3981_v57, 0.0  ;;  %v10765_v35 = vld [vmem:[#allocation14_spill] sm:$0xff] }
 0x4bc   : > { %v9362_v15 = vpop.f32.mrb[122].mxu1  ;;  %v4950_v29 = vadd.f32 %v4910_v11, %v4906_v2  ;;  %v4888_v55 = vadd.f32 %v4824_v8, %v4820_v53  ;;  %v4976_v43 = vadd.f32 %v4912_v47, %v4908_v17  ;;  %v4174_v60 = vadd.f32 %v9173_v40, %v10761_v32 }
 0x4bd   : > { %v9364_v28 = vpop.f32.mrb[123].mxu1  ;;  %v3983_v10 = vadd.f32 %v9157_v44, %v10761_v32  ;;  %v4176_v13 = vadd.f32 %v9179_v46, %v10761_v32  ;;  %v3985_v39 = vadd.f32 %v9163_v0, %v10764_v4  ;;  %v4178_v26 = vadd.f32 %v9181_v31, %v10764_v4 }
 0x4be   : > { %v4825_v1 = vmul.f32 %v8822_v22, %v4314_v51  ;;  %v4913_v2 = vmul.f32 %v10765_v35, %v4314_v51  ;;  %v4316_v53 = vmax.f32 %v4174_v60, 0.0  ;;  %v3987_v40 = vadd.f32 %v9175_v12, %v10764_v4 }
 0x4bf   : > { %v9376_v48 = vpop.f32.mrb[124].mxu0  ;;  %v4315_v17 = vmax.f32 %v3983_v10, 0.0  ;;  %v4317_v46 = vmax.f32 %v4176_v13, 0.0  ;;  %v4318_v32 = vmax.f32 %v3985_v39, 0.0  ;;  %v4320_v57 = vmax.f32 %v4178_v26, 0.0  ;;  %v10771_v39 = vld [vmem:[#allocation53_spill] sm:$0xff] }
 0x4c0   : > { %v9382_v44 = vpop.f32.mrb[125].mxu0  ;;  %v4850_v19 = vadd.f32 %v4849_v54, %v4825_v1  ;;  %v4938_v31 = vadd.f32 %v4937_v25, %v4913_v2  ;;  %v4827_v18 = vmul.f32 %v8822_v22, %v4316_v53  ;;  %v4915_v38 = vmul.f32 %v10765_v35, %v4316_v53 }
 0x4c1   : > { %10766 = vst [vmem:[#allocation55_spill] sm:$0xff] %v9382_v44  ;;  %v9384_v0 = vpop.f32.mrb[126].mxu0  ;;  %v4826_v12 = vmul.f32 %v8822_v22, %v4315_v17  ;;  %v4914_v8 = vmul.f32 %v10765_v35, %v4315_v17  ;;  %v4828_v47 = vmul.f32 %v8822_v22, %v4317_v46  ;;  %v4916_v60 = vmul.f32 %v10765_v35, %v4317_v46 }
 0x4c2   : > { %10767 = vst [vmem:[#allocation56_spill] sm:$0xff] %v9384_v0  ;;  %v9388_v11 = vpop.f32.mrb[124].mxu1  ;;  %v9390_v51 = vpop.f32.mrb[127].mxu0  ;;  %v4876_v54 = vadd.f32 %v4875_v62, %v4827_v18  ;;  %v4964_v25 = vadd.f32 %v4963_v5, %v4915_v38  ;;  %v4829_v13 = vmul.f32 %v8836_v58, %v4318_v32  ;;  %v4917_v26 = vmul.f32 %v10771_v39, %v4318_v32  ;;  %v10772_v18 = vld [vmem:[#allocation11_spill] sm:$0xff] }
 0x4c3   : > { %10768 = vst [vmem:[#allocation57_spill] sm:$0xff] %v9388_v11  ;;  %10769 = vst [vmem:[#allocation91_spill] sm:$0xff] %v9390_v51  ;;  %v9396_v10 = vpop.f32.mrb[125].mxu1  ;;  %v4863_v2 = vadd.f32 %v4862_v41, %v4826_v12  ;;  %v4951_v53 = vadd.f32 %v4950_v29, %v4914_v8  ;;  %v4889_v51 = vadd.f32 %v4888_v55, %v4828_v47  ;;  %v4319_v62 = vmax.f32 %v3987_v40, 0.0  ;;  %v10773_v12 = vld [vmem:[#allocation13_spill] sm:$0xff] }
 0x4c4   : > { %10770 = vst [vmem:[#allocation62_spill] sm:$0xff] %v9396_v10  ;;  %v9400_v1 = vpop.f32.mrb[126].mxu1  ;;  %v4977_v0 = vadd.f32 %v4976_v43, %v4916_v60  ;;  %v4851_v17 = vadd.f32 %v4850_v19, %v4829_v13  ;;  %v4939_v11 = vadd.f32 %v4938_v31, %v4917_v26  ;;  %v4831_v46 = vmul.f32 %v8836_v58, %v4320_v57 }
 0x4c5   : > { %v9402_v44 = vpop.f32.mrb[127].mxu1  ;;  %v4919_v10 = vmul.f32 %v10771_v39, %v4320_v57  ;;  %v4180_v5 = vadd.f32 %v9185_v59, %v10764_v4  ;;  %v3991_v32 = vadd.f32 %v9195_v24, %v10772_v18  ;;  %v4184_v41 = vadd.f32 %v9207_v9, %v10772_v18 }
 0x4c6   : > { %v4877_v29 = vadd.f32 %v4876_v54, %v4831_v46  ;;  %v3993_v55 = vadd.f32 %v9197_v3, %v10772_v18  ;;  %v4186_v19 = vadd.f32 %v9219_v20, %v10772_v18  ;;  %v4830_v57 = vmul.f32 %v8836_v58, %v4319_v62 }
 0x4c7   : > { %v4965_v43 = vadd.f32 %v4964_v25, %v4919_v10  ;;  %v4918_v40 = vmul.f32 %v10771_v39, %v4319_v62  ;;  %v4321_v31 = vmax.f32 %v4180_v5, 0.0  ;;  %v4322_v59 = vmax.f32 %v3991_v32, 0.0  ;;  %v10774_v10 = vld [vmem:[#allocation130_spill] sm:$0xff] }
 0x4c8   : > { %v4324_v4 = vmax.f32 %v4184_v41, 0.0  ;;  %v4323_v38 = vmax.f32 %v3993_v55, 0.0  ;;  %v4325_v24 = vmax.f32 %v4186_v19, 0.0  ;;  %v3995_v9 = vadd.f32 %v9201_v45, %v10773_v12 }
 0x4c9   : > { %v4864_v8 = vadd.f32 %v4863_v2, %v4830_v57  ;;  %v4952_v47 = vadd.f32 %v4951_v53, %v4918_v40  ;;  %v4832_v60 = vmul.f32 %v8836_v58, %v4321_v31  ;;  %v4920_v3 = vmul.f32 %v10771_v39, %v4321_v31 }
 0x4ca   : > { %v4833_v20 = vmul.f32 %v8814_v16, %v4322_v59  ;;  %v4921_v54 = vmul.f32 %v10774_v10, %v4322_v59  ;;  %v4835_v25 = vmul.f32 %v8814_v16, %v4324_v4  ;;  %v4923_v13 = vmul.f32 %v10774_v10, %v4324_v4  ;;  %v10776_v59 = vld [vmem:[#allocation85_spill] sm:$0xff] }
 0x4cb   : > { %v4890_v26 = vadd.f32 %v4889_v51, %v4832_v60  ;;  %v4978_v46 = vadd.f32 %v4977_v0, %v4920_v3  ;;  %v4834_v62 = vmul.f32 %v8814_v16, %v4323_v38  ;;  %v4922_v45 = vmul.f32 %v10774_v10, %v4323_v38  ;;  %v10777_v38 = vld [vmem:[#allocation76_spill] sm:$0xff] }
 0x4cc   : > { %v4852_v2 = vadd.f32 %v4851_v17, %v4833_v20  ;;  %v4940_v53 = vadd.f32 %v4939_v11, %v4921_v54  ;;  %v4878_v5 = vadd.f32 %v4877_v29, %v4835_v25  ;;  %v4966_v18 = vadd.f32 %v4965_v43, %v4923_v13  ;;  %v10775_v29 = vld [vmem:[#allocation89_spill] sm:$0xff] }
 0x4cd   : > { %v4865_v32 = vadd.f32 %v4864_v8, %v4834_v62  ;;  %v4953_v41 = vadd.f32 %v4952_v47, %v4922_v45  ;;  %v4836_v55 = vmul.f32 %v8814_v16, %v4325_v24  ;;  %v4924_v19 = vmul.f32 %v10774_v10, %v4325_v24  ;;  %v10779_v45 = vld [vmem:[#allocation48_spill] sm:$0xff] }
 0x4ce   : > { %v4326_v57 = vmax.f32 %v3995_v9, 0.0  ;;  %v4188_v40 = vadd.f32 %v9223_v23, %v10773_v12  ;;  %v3997_v0 = vadd.f32 %v9209_v7, %v10773_v12  ;;  %v4190_v51 = vadd.f32 %v9225_v42, %v10773_v12 }
 0x4cf   : > { %v4891_v17 = vadd.f32 %v4890_v26, %v4836_v55  ;;  %v4979_v11 = vadd.f32 %v4978_v46, %v4924_v19  ;;  %v4001_v43 = vadd.f32 %v9235_v30, %v10775_v29  ;;  %v4194_v31 = vadd.f32 %v9245_v34, %v10775_v29  ;;  %v10778_v46 = vld [vmem:[#allocation19_spill] sm:$0xff] }
 0x4d0   : > { %v4837_v4 = vmul.f32 %v10776_v59, %v4326_v57  ;;  %v4925_v24 = vmul.f32 %v10777_v38, %v4326_v57  ;;  %v4328_v9 = vmax.f32 %v4188_v40, 0.0  ;;  %v4327_v23 = vmax.f32 %v3997_v0, 0.0 }
 0x4d1   : > { %v4329_v8 = vmax.f32 %v4190_v51, 0.0  ;;  %v4330_v47 = vmax.f32 %v4001_v43, 0.0  ;;  %v4332_v7 = vmax.f32 %v4194_v31, 0.0  ;;  %v4003_v42 = vadd.f32 %v9241_v36, %v10775_v29  ;;  %v10780_v31 = vld [vmem:[#allocation129_spill] sm:$0xff] }
 0x4d2   : > { %v4853_v12 = vadd.f32 %v4852_v2, %v4837_v4  ;;  %v4941_v60 = vadd.f32 %v4940_v53, %v4925_v24  ;;  %v4839_v3 = vmul.f32 %v10776_v59, %v4328_v9  ;;  %v4927_v30 = vmul.f32 %v10777_v38, %v4328_v9  ;;  %v10783_v9 = vld [vmem:[#allocation111_spill] sm:$0xff] }
 0x4d3   : > { %v4838_v34 = vmul.f32 %v10776_v59, %v4327_v23  ;;  %v4926_v20 = vmul.f32 %v10777_v38, %v4327_v23  ;;  %v4840_v54 = vmul.f32 %v10776_v59, %v4329_v8  ;;  %v4928_v25 = vmul.f32 %v10777_v38, %v4329_v8 }
 0x4d4   : > { %v4879_v13 = vadd.f32 %v4878_v5, %v4839_v3  ;;  %v4967_v26 = vadd.f32 %v4966_v18, %v4927_v30  ;;  %v4841_v62 = vmul.f32 %v10778_v46, %v4330_v47  ;;  %v4929_v36 = vmul.f32 %v10779_v45, %v4330_v47  ;;  %v10781_v5 = vld [vmem:[#allocation7_spill] sm:$0xff]  ;;  %v10782_v18 = vld [vmem:[#allocation60_spill] sm:$0xff]  ;;  %v10785_v30 = vld [vmem:[#allocation17_spill] sm:$0xff] }
 0x4d5   : > { %v4866_v2 = vadd.f32 %v4865_v32, %v4838_v34  ;;  %v4954_v53 = vadd.f32 %v4953_v41, %v4926_v20  ;;  %v4892_v55 = vadd.f32 %v4891_v17, %v4840_v54  ;;  %v4980_v19 = vadd.f32 %v4979_v11, %v4928_v25  ;;  %v10784_v17 = vld [vmem:[#allocation112_spill] sm:$0xff] }
 0x4d6   : > { %v4854_v57 = vadd.f32 %v4853_v12, %v4841_v62  ;;  %v4942_v40 = vadd.f32 %v4941_v60, %v4929_v36  ;;  %v4843_v0 = vmul.f32 %v10778_v46, %v4332_v7  ;;  %v4931_v51 = vmul.f32 %v10779_v45, %v4332_v7  ;;  %v10787_v62 = vld [vmem:[#allocation58_spill] sm:$0xff] }
 0x4d7   : > { %v4331_v43 = vmax.f32 %v4003_v42, 0.0  ;;  %v4196_v4 = vadd.f32 %v10780_v31, %v10775_v29  ;;  %v4005_v24 = vadd.f32 %v10782_v18, %v10781_v5  ;;  %v4198_v23 = vadd.f32 %v10783_v9, %v10781_v5 }
 0x4d8   : > { %v4880_v32 = vadd.f32 %v4879_v13, %v4843_v0  ;;  %v4968_v41 = vadd.f32 %v4967_v26, %v4931_v51  ;;  %v4007_v11 = vadd.f32 %v10784_v17, %v10781_v5  ;;  %v4200_v8 = vadd.f32 %v9261_v27, %v10781_v5  ;;  %v10786_v27 = vld [vmem:[#allocation49_spill] sm:$0xff] }
 0x4d9   : > { %v4842_v47 = vmul.f32 %v10778_v46, %v4331_v43  ;;  %v4930_v7 = vmul.f32 %v10779_v45, %v4331_v43  ;;  %v4333_v42 = vmax.f32 %v4196_v4, 0.0  ;;  %v4334_v29 = vmax.f32 %v4005_v24, 0.0 }
 0x4da   : > { %v4336_v12 = vmax.f32 %v4198_v23, 0.0  ;;  %v4335_v60 = vmax.f32 %v4007_v11, 0.0  ;;  %v4337_v3 = vmax.f32 %v4200_v8, 0.0  ;;  %v9468_v34 = vadd.f32 %v9263_v49, %v10785_v30 }
 0x4db   : > { %v4867_v20 = vadd.f32 %v4866_v2, %v4842_v47  ;;  %v4955_v54 = vadd.f32 %v4954_v53, %v4930_v7  ;;  %v4844_v25 = vmul.f32 %v10778_v46, %v4333_v42  ;;  %v4932_v13 = vmul.f32 %v10779_v45, %v4333_v42 }
 0x4dc   : > { %v4845_v26 = vmul.f32 %v10786_v27, %v4334_v29  ;;  %v4933_v36 = vmul.f32 %v10787_v62, %v4334_v29  ;;  %v4847_v0 = vmul.f32 %v10786_v27, %v4336_v12  ;;  %v4935_v51 = vmul.f32 %v10787_v62, %v4336_v12 }
 0x4dd   : > { %v4893_v43 = vadd.f32 %v4892_v55, %v4844_v25  ;;  %v4981_v31 = vadd.f32 %v4980_v19, %v4932_v13  ;;  %v4846_v4 = vmul.f32 %v10786_v27, %v4335_v60  ;;  %v4934_v49 = vmul.f32 %v10787_v62, %v4335_v60 }
 0x4de   : > { %v4855_v2 = vadd.f32 %v4854_v57, %v4845_v26  ;;  %v4943_v53 = vadd.f32 %v4942_v40, %v4933_v36  ;;  %v4881_v5 = vadd.f32 %v4880_v32, %v4847_v0  ;;  %v4969_v18 = vadd.f32 %v4968_v41, %v4935_v51 }
 0x4df   : > { %v4868_v24 = vadd.f32 %v4867_v20, %v4846_v4  ;;  %v4956_v9 = vadd.f32 %v4955_v54, %v4934_v49  ;;  %v4848_v23 = vmul.f32 %v10786_v27, %v4337_v3  ;;  %v4936_v17 = vmul.f32 %v10787_v62, %v4337_v3 }
 0x4e0   : > { %v4856_v11 = vrot.slane %v4855_v2, 4  ;;  %v4944_v8 = vrot.slane %v4943_v53, 4  ;;  %v4882_v47 = vrot.slane %v4881_v5, 4  ;;  %v4970_v7 = vrot.slane %v4969_v18, 4 }
 0x4e1   : > { %v4869_v55 = vrot.slane %v4868_v24, 4  ;;  %v4957_v19 = vrot.slane %v4956_v9, 4  ;;  %v4894_v42 = vadd.f32 %v4893_v43, %v4848_v23  ;;  %v4982_v29 = vadd.f32 %v4981_v31, %v4936_v17 }
 0x4e2   : > { %v4857_v12 = vadd.f32 %v4856_v11, %v4855_v2  ;;  %v4945_v60 = vadd.f32 %v4944_v8, %v4943_v53  ;;  %v4883_v57 = vadd.f32 %v4882_v47, %v4881_v5  ;;  %v4971_v40 = vadd.f32 %v4970_v7, %v4969_v18 }
 0x4e3   : > { %v4870_v32 = vadd.f32 %v4869_v55, %v4868_v24  ;;  %v4958_v41 = vadd.f32 %v4957_v19, %v4956_v9  ;;  %v4895_v20 = vrot.slane %v4894_v42, 4  ;;  %v4983_v54 = vrot.slane %v4982_v29, 4 }
 0x4e4   : > { %v4858_v25 = vrot.slane %v4857_v12, 2  ;;  %v4946_v13 = vrot.slane %v4945_v60, 2  ;;  %v4884_v26 = vrot.slane %v4883_v57, 2  ;;  %v4972_v3 = vrot.slane %v4971_v40, 2 }
 0x4e5   : > { %v4871_v36 = vrot.slane %v4870_v32, 2  ;;  %v4959_v0 = vrot.slane %v4958_v41, 2  ;;  %v4896_v51 = vadd.f32 %v4895_v20, %v4894_v42  ;;  %v4984_v4 = vadd.f32 %v4983_v54, %v4982_v29 }
 0x4e6   : > { %v4859_v49 = vadd.f32 %v4858_v25, %v4857_v12  ;;  %v4947_v62 = vadd.f32 %v4946_v13, %v4945_v60  ;;  %v4885_v43 = vadd.f32 %v4884_v26, %v4883_v57  ;;  %v4973_v31 = vadd.f32 %v4972_v3, %v4971_v40 }
 0x4e7   : > { %v4872_v2 = vadd.f32 %v4871_v36, %v4870_v32  ;;  %v4960_v53 = vadd.f32 %v4959_v0, %v4958_v41  ;;  %v4897_v5 = vrot.slane %v4896_v51, 2  ;;  %v4985_v18 = vrot.slane %v4984_v4, 2 }
 0x4e8   : > { %v4860_v24 = vrot.slane %v4859_v49, 1  ;;  %v4948_v9 = vrot.slane %v4947_v62, 1  ;;  %v4886_v23 = vrot.slane %v4885_v43, 1  ;;  %v4974_v17 = vrot.slane %v4973_v31, 1 }
 0x4e9   : > { %v4873_v11 = vrot.slane %v4872_v2, 1  ;;  %v4961_v8 = vrot.slane %v4960_v53, 1  ;;  %v4898_v47 = vadd.f32 %v4897_v5, %v4896_v51  ;;  %v4986_v7 = vadd.f32 %v4985_v18, %v4984_v4 }
 0x4ea   : > { %v4861_v55 = vadd.f32 %v4860_v24, %v4859_v49  ;;  %v4949_v19 = vadd.f32 %v4948_v9, %v4947_v62  ;;  %v4887_v42 = vadd.f32 %v4886_v23, %v4885_v43  ;;  %v4975_v29 = vadd.f32 %v4974_v17, %v4973_v31  ;;  %v10788_v31 = vld [vmem:[#allocation114_spill] sm:$0xff]  ;;  %v10790_v23 = vld [vmem:[#allocation15_spill] sm:$0xff]  ;;  %v10791_v17 = vld [vmem:[#allocation72_spill] sm:$0xff] }
 0x4eb   : > { %v4874_v12 = vadd.f32 %v4873_v11, %v4872_v2  ;;  %v4962_v60 = vadd.f32 %v4961_v8, %v4960_v53  ;;  %v4899_v57 = vrot.slane %v4898_v47, 1  ;;  %v4987_v40 = vrot.slane %v4986_v7, 1  ;;  %v10792_v8 = vld [vmem:[#allocation87_spill] sm:$0xff] }
 0x4ec   : > { %v4901_v32 = vadd.f32 %v4861_v55, %v9279_v56  ;;  %v4989_v41 = vadd.f32 %v4949_v19, %v9279_v56  ;;  %v4903_v20 = vadd.f32 %v4887_v42, %v9279_v56  ;;  %v4991_v54 = vadd.f32 %v4975_v29, %v9279_v56  ;;  %v10793_v42 = vld [vmem:[#allocation113_spill] sm:$0xff] }
 0x4ed   : > { %v4902_v25 = vadd.f32 %v4874_v12, %v9279_v56  ;;  %v4990_v13 = vadd.f32 %v4962_v60, %v9279_v56  ;;  %v4900_v26 = vadd.f32 %v4899_v57, %v4898_v47  ;;  %v4988_v62 = vadd.f32 %v4987_v40, %v4986_v7 }
 0x4ee   : > { %v9487_v3 = vsel %vm4632_vm0, %v4901_v32, %v4989_v41  ;;  %v9490_v36 = vsel %vm4632_vm0, %v4903_v20, %v4991_v54  ;;  %v4338_v0 = vmax.f32 %v9468_v34, 0.0  ;;  %v4204_v51 = vadd.f32 %v9269_v33, %v10785_v30  ;;  %v10789_v34 = vld [vmem:[#allocation86_spill] sm:$0xff] }
 0x4ef   : > { %v9496_v4 = vsel %vm4632_vm0, %v4902_v25, %v4990_v13  ;;  %v4904_v49 = vadd.f32 %v4900_v26, %v9279_v56  ;;  %v4992_v43 = vadd.f32 %v4988_v62, %v9279_v56  ;;  %v4013_v2 = vadd.f32 %v10788_v31, %v10785_v30 }
 0x4f0   : > { %v4997_v53 = vmul.f32 %v10749_v37, %v4338_v0  ;;  %v5085_v5 = vmul.f32 %v10750_v14, %v4338_v0  ;;  %v4340_v18 = vmax.f32 %v4204_v51, 0.0  ;;  %v4206_v24 = vadd.f32 %v10789_v34, %v10785_v30 }
 0x4f1   : > { %v9507_v33 = vsel %vm4632_vm0, %v4904_v49, %v4992_v43  ;;  %v4339_v9 = vmax.f32 %v4013_v2, 0.0  ;;  %v4015_v11 = vadd.f32 %v10791_v17, %v10790_v23  ;;  %v4208_v47 = vadd.f32 %v10792_v8, %v10790_v23  ;;  %v10795_v17 = vld [vmem:[#allocation102_spill] sm:$0xff]  ;;  %v10796_v8 = vld [vmem:[#allocation79_spill] sm:$0xff] }
 0x4f2   : > { %v4999_v7 = vmul.f32 %v10749_v37, %v4340_v18  ;;  %v5087_v55 = vmul.f32 %v10750_v14, %v4340_v18  ;;  %v4341_v19 = vmax.f32 %v4206_v24, 0.0  ;;  %v4017_v29 = vadd.f32 %v10793_v42, %v10790_v23 }
 0x4f3   : > { %v4998_v30 = vmul.f32 %v10749_v37, %v4339_v9  ;;  %v5086_v12 = vmul.f32 %v10750_v14, %v4339_v9  ;;  %v4342_v60 = vmax.f32 %v4015_v11, 0.0  ;;  %v4344_v57 = vmax.f32 %v4208_v47, 0.0  ;;  %v10797_v47 = vld [vmem:[#allocation96_spill] sm:$0xff] }
 0x4f4   : > { %v5000_v40 = vmul.f32 %v10749_v37, %v4341_v19  ;;  %v5088_v32 = vmul.f32 %v10750_v14, %v4341_v19  ;;  %v4343_v41 = vmax.f32 %v4017_v29, 0.0  ;;  %v4210_v20 = vadd.f32 %v9277_v61, %v10790_v23  ;;  %v10794_v37 = vld [vmem:[#allocation138_spill] sm:$0xff]  ;;  %v10799_v19 = vld [vmem:[#allocation37_spill] sm:$0xff] }
 0x4f5   : > { %v5001_v54 = vmul.f32 %v10759_v50, %v4342_v60  ;;  %v5089_v25 = vmul.f32 %v10760_v6, %v4342_v60  ;;  %v5003_v13 = vmul.f32 %v10759_v50, %v4344_v57  ;;  %v5091_v26 = vmul.f32 %v10760_v6, %v4344_v57  ;;  %v10800_v57 = vld [vmem:[#allocation80_spill] sm:$0xff] }
 0x4f6   : > { %v5002_v62 = vmul.f32 %v10759_v50, %v4343_v41  ;;  %v5090_v0 = vmul.f32 %v10760_v6, %v4343_v41  ;;  %v4345_v51 = vmax.f32 %v4210_v20, 0.0  ;;  %v4021_v14 = vadd.f32 %v9281_v63, %v10794_v37 }
 0x4f7   : > { %v5029_v49 = vadd.f32 %v5001_v54, %v4997_v53  ;;  %v5117_v43 = vadd.f32 %v5089_v25, %v5085_v5  ;;  %v5055_v31 = vadd.f32 %v5003_v13, %v4999_v7  ;;  %v5143_v61 = vadd.f32 %v5091_v26, %v5087_v55  ;;  %v10798_v7 = vld [vmem:[#allocation124_spill] sm:$0xff] }
 0x4f8   : > { %v5042_v2 = vadd.f32 %v5002_v62, %v4998_v30  ;;  %v5130_v18 = vadd.f32 %v5090_v0, %v5086_v12  ;;  %v5004_v34 = vmul.f32 %v10759_v50, %v4345_v51  ;;  %v5092_v24 = vmul.f32 %v10760_v6, %v4345_v51 }
 0x4f9   : > { %v4346_v9 = vmax.f32 %v4021_v14, 0.0  ;;  %v4214_v23 = vadd.f32 %v9300_v21, %v10794_v37  ;;  %v4023_v11 = vadd.f32 %v10795_v17, %v10794_v37  ;;  %v4216_v63 = vadd.f32 %v10796_v8, %v10794_v37 }
 0x4fa   : > { %v5068_v53 = vadd.f32 %v5004_v34, %v5000_v40  ;;  %v5156_v5 = vadd.f32 %v5092_v24, %v5088_v32  ;;  %v4025_v55 = vadd.f32 %v10798_v7, %v10797_v47  ;;  %v4218_v50 = vadd.f32 %v10799_v19, %v10797_v47  ;;  %v10804_v7 = vld [vmem:[#allocation120_spill] sm:$0xff] }
 0x4fb   : > { %v5005_v6 = vmul.f32 %v8822_v22, %v4346_v9  ;;  %v5093_v42 = vmul.f32 %v10765_v35, %v4346_v9  ;;  %v4348_v29 = vmax.f32 %v4214_v23, 0.0  ;;  %v4347_v21 = vmax.f32 %v4023_v11, 0.0 }
 0x4fc   : > { %v4349_v30 = vmax.f32 %v4216_v63, 0.0  ;;  %v4350_v12 = vmax.f32 %v4025_v55, 0.0  ;;  %v4352_v60 = vmax.f32 %v4218_v50, 0.0  ;;  %v4027_v41 = vadd.f32 %v10800_v57, %v10797_v47 }
 0x4fd   : > { %v5030_v40 = vadd.f32 %v5029_v49, %v5005_v6  ;;  %v5118_v32 = vadd.f32 %v5117_v43, %v5093_v42  ;;  %v5007_v20 = vmul.f32 %v8822_v22, %v4348_v29  ;;  %v5095_v54 = vmul.f32 %v10765_v35, %v4348_v29 }
 0x4fe   : > { %v5006_v25 = vmul.f32 %v8822_v22, %v4347_v21  ;;  %v5094_v13 = vmul.f32 %v10765_v35, %v4347_v21  ;;  %v5008_v26 = vmul.f32 %v8822_v22, %v4349_v30  ;;  %v5096_v62 = vmul.f32 %v10765_v35, %v4349_v30  ;;  %v10801_v22 = vld [vmem:[#allocation75_spill] sm:$0xff] }
 0x4ff   : > { %v5056_v0 = vadd.f32 %v5055_v31, %v5007_v20  ;;  %v5144_v51 = vadd.f32 %v5143_v61, %v5095_v54  ;;  %v5009_v37 = vmul.f32 %v8836_v58, %v4350_v12  ;;  %v5097_v14 = vmul.f32 %v10771_v39, %v4350_v12  ;;  %v10802_v31 = vld [vmem:[#allocation93_spill] sm:$0xff]  ;;  %v10803_v61 = vld [vmem:[#allocation39_spill] sm:$0xff] }
 0x500   : > { %v5043_v49 = vadd.f32 %v5042_v2, %v5006_v25  ;;  %v5131_v43 = vadd.f32 %v5130_v18, %v5094_v13  ;;  %v5069_v34 = vadd.f32 %v5068_v53, %v5008_v26  ;;  %v5157_v24 = vadd.f32 %v5156_v5, %v5096_v62  ;;  %v10805_v53 = vld [vmem:[#allocation40_spill] sm:$0xff]  ;;  %v10806_v12 = vld [vmem:[#allocation45_spill] sm:$0xff] }
 0x501   : > { %v5031_v9 = vadd.f32 %v5030_v40, %v5009_v37  ;;  %v5119_v23 = vadd.f32 %v5118_v32, %v5097_v14  ;;  %v5011_v17 = vmul.f32 %v8836_v58, %v4352_v60  ;;  %v5099_v11 = vmul.f32 %v10771_v39, %v4352_v60  ;;  %v10807_v60 = vld [vmem:[#allocation41_spill] sm:$0xff] }
 0x502   : > { %v4351_v8 = vmax.f32 %v4027_v41, 0.0  ;;  %v4220_v35 = vadd.f32 %v10801_v22, %v10797_v47  ;;  %v4031_v63 = vadd.f32 %v10803_v61, %v10802_v31  ;;  %v4224_v55 = vadd.f32 %v10804_v7, %v10802_v31 }
 0x503   : > { %v5057_v2 = vadd.f32 %v5056_v0, %v5011_v17  ;;  %v5145_v18 = vadd.f32 %v5144_v51, %v5099_v11  ;;  %v4033_v5 = vadd.f32 %v10805_v53, %v10802_v31  ;;  %v4226_v19 = vadd.f32 %v9358_v52, %v10802_v31  ;;  %v10809_v31 = vld [vmem:[#allocation52_spill] sm:$0xff] }
 0x504   : > { %v5010_v50 = vmul.f32 %v8836_v58, %v4351_v8  ;;  %v5098_v6 = vmul.f32 %v10771_v39, %v4351_v8  ;;  %v4353_v42 = vmax.f32 %v4220_v35, 0.0  ;;  %v4354_v47 = vmax.f32 %v4031_v63, 0.0  ;;  %v10810_v63 = vld [vmem:[#allocation57_spill] sm:$0xff] }
 0x505   : > { %v4356_v29 = vmax.f32 %v4224_v55, 0.0  ;;  %v4355_v21 = vmax.f32 %v4033_v5, 0.0  ;;  %v4357_v30 = vmax.f32 %v4226_v19, 0.0  ;;  %v4035_v57 = vadd.f32 %v10807_v60, %v10806_v12  ;;  %v10811_v19 = vld [vmem:[#allocation55_spill] sm:$0xff] }
 0x506   : > { %v5044_v41 = vadd.f32 %v5043_v49, %v5010_v50  ;;  %v5132_v40 = vadd.f32 %v5131_v43, %v5098_v6  ;;  %v5012_v32 = vmul.f32 %v8836_v58, %v4353_v42  ;;  %v5100_v20 = vmul.f32 %v10771_v39, %v4353_v42 }
 0x507   : > { %v5013_v52 = vmul.f32 %v8814_v16, %v4354_v47  ;;  %v5101_v54 = vmul.f32 %v10774_v10, %v4354_v47  ;;  %v5015_v25 = vmul.f32 %v8814_v16, %v4356_v29  ;;  %v5103_v13 = vmul.f32 %v10774_v10, %v4356_v29 }
 0x508   : > { %v5070_v26 = vadd.f32 %v5069_v34, %v5012_v32  ;;  %v5158_v62 = vadd.f32 %v5157_v24, %v5100_v20  ;;  %v5014_v0 = vmul.f32 %v8814_v16, %v4355_v21  ;;  %v5102_v51 = vmul.f32 %v10774_v10, %v4355_v21  ;;  %v10808_v34 = vld [vmem:[#allocation54_spill] sm:$0xff] }
 0x509   : > { %v5032_v37 = vadd.f32 %v5031_v9, %v5013_v52  ;;  %v5120_v14 = vadd.f32 %v5119_v23, %v5101_v54  ;;  %v5058_v49 = vadd.f32 %v5057_v2, %v5015_v25  ;;  %v5146_v58 = vadd.f32 %v5145_v18, %v5103_v13 }
 0x50a   : > { %v5045_v43 = vadd.f32 %v5044_v41, %v5014_v0  ;;  %v5133_v39 = vadd.f32 %v5132_v40, %v5102_v51  ;;  %v5016_v17 = vmul.f32 %v8814_v16, %v4357_v30  ;;  %v5104_v11 = vmul.f32 %v10774_v10, %v4357_v30  ;;  %v10813_v0 = vld [vmem:[#allocation42_spill] sm:$0xff]  ;;  %v10814_v51 = vld [vmem:[#allocation56_spill] sm:$0xff] }
 0x50b   : > { %v4358_v8 = vmax.f32 %v4035_v57, 0.0  ;;  %v4228_v22 = vadd.f32 %v9362_v15, %v10806_v12  ;;  %v4037_v24 = vadd.f32 %v10808_v34, %v10806_v12  ;;  %v4230_v35 = vadd.f32 %v9364_v28, %v10806_v12 }
 0x50c   : > { %v5071_v9 = vadd.f32 %v5070_v26, %v5016_v17  ;;  %v5159_v23 = vadd.f32 %v5158_v62, %v5104_v11  ;;  %v4041_v61 = vadd.f32 %v9376_v48, %v10809_v31  ;;  %v4234_v16 = vadd.f32 %v10810_v63, %v10809_v31 }
 0x50d   : > { %v5017_v7 = vmul.f32 %v10776_v59, %v4358_v8  ;;  %v5105_v55 = vmul.f32 %v10777_v38, %v4358_v8  ;;  %v4360_v2 = vmax.f32 %v4228_v22, 0.0  ;;  %v4359_v15 = vmax.f32 %v4037_v24, 0.0  ;;  %v10816_v24 = vld [vmem:[#allocation24_spill] sm:$0xff] }
 0x50e   : > { %v4361_v18 = vmax.f32 %v4230_v35, 0.0  ;;  %v4362_v53 = vmax.f32 %v4041_v61, 0.0  ;;  %v4364_v5 = vmax.f32 %v4234_v16, 0.0  ;;  %v4043_v28 = vadd.f32 %v10811_v19, %v10809_v31 }
 0x50f   : > { %v5033_v50 = vadd.f32 %v5032_v37, %v5017_v7  ;;  %v5121_v6 = vadd.f32 %v5120_v14, %v5105_v55  ;;  %v5019_v42 = vmul.f32 %v10776_v59, %v4360_v2  ;;  %v5107_v48 = vmul.f32 %v10777_v38, %v4360_v2  ;;  %v10818_v55 = vld [vmem:[#allocation58_spill] sm:$0xff] }
 0x510   : > { %v5018_v47 = vmul.f32 %v10776_v59, %v4359_v15  ;;  %v5106_v29 = vmul.f32 %v10777_v38, %v4359_v15  ;;  %v5020_v21 = vmul.f32 %v10776_v59, %v4361_v18  ;;  %v5108_v30 = vmul.f32 %v10777_v38, %v4361_v18  ;;  %v10812_v59 = vld [vmem:[#allocation62_spill] sm:$0xff] }
 0x511   : > { %v5059_v12 = vadd.f32 %v5058_v49, %v5019_v42  ;;  %v5147_v60 = vadd.f32 %v5146_v58, %v5107_v48  ;;  %v5021_v57 = vmul.f32 %v10778_v46, %v4362_v53  ;;  %v5109_v41 = vmul.f32 %v10779_v45, %v4362_v53 }
 0x512   : > { %v5046_v40 = vadd.f32 %v5045_v43, %v5018_v47  ;;  %v5134_v32 = vadd.f32 %v5133_v39, %v5106_v29  ;;  %v5072_v20 = vadd.f32 %v5071_v9, %v5020_v21  ;;  %v5160_v52 = vadd.f32 %v5159_v23, %v5108_v30  ;;  %v10815_v43 = vld [vmem:[#allocation91_spill] sm:$0xff] }
 0x513   : > { %v5034_v54 = vadd.f32 %v5033_v50, %v5021_v57  ;;  %v5122_v25 = vadd.f32 %v5121_v6, %v5109_v41  ;;  %v5023_v13 = vmul.f32 %v10778_v46, %v4364_v5  ;;  %v5111_v26 = vmul.f32 %v10779_v45, %v4364_v5 }
 0x514   : > { %v4363_v62 = vmax.f32 %v4043_v28, 0.0  ;;  %v4236_v38 = vadd.f32 %v10812_v59, %v10809_v31  ;;  %v4045_v37 = vadd.f32 %v10814_v51, %v10813_v0  ;;  %v4238_v14 = vadd.f32 %v9400_v1, %v10813_v0 }
 0x515   : > { %v5060_v49 = vadd.f32 %v5059_v12, %v5023_v13  ;;  %v5148_v58 = vadd.f32 %v5147_v60, %v5111_v26  ;;  %v4047_v39 = vadd.f32 %v10815_v43, %v10813_v0  ;;  %v4240_v17 = vadd.f32 %v9402_v44, %v10813_v0 }
 0x516   : > { %v5022_v11 = vmul.f32 %v10778_v46, %v4363_v62  ;;  %v5110_v8 = vmul.f32 %v10779_v45, %v4363_v62  ;;  %v4365_v22 = vmax.f32 %v4236_v38, 0.0  ;;  %v4366_v34 = vmax.f32 %v4045_v37, 0.0 }
 0x517   : > { %v10817_v35 = vrot.slane %v10816_v24, 2  ;;  %v4368_v1 = vmax.f32 %v4238_v14, 0.0  ;;  %v4367_v23 = vmax.f32 %v4047_v39, 0.0  ;;  %v4369_v31 = vmax.f32 %v4240_v17, 0.0 }
 0x518   : > { %v5047_v61 = vadd.f32 %v5046_v40, %v5022_v11  ;;  %v5135_v63 = vadd.f32 %v5134_v32, %v5110_v8  ;;  %v5024_v16 = vmul.f32 %v10778_v46, %v4365_v22  ;;  %v5112_v44 = vmul.f32 %v10779_v45, %v4365_v22 }
 0x519   : > { %v9620_v9 = vadd.f32 %v10817_v35, %v10816_v24  ;;  %v5025_v7 = vmul.f32 %v10786_v27, %v4366_v34  ;;  %v5113_v2 = vmul.f32 %v10818_v55, %v4366_v34  ;;  %v5027_v15 = vmul.f32 %v10786_v27, %v4368_v1 }
 0x51a   : > { %v5115_v18 = vmul.f32 %v10818_v55, %v4368_v1  ;;  %v5073_v53 = vadd.f32 %v5072_v20, %v5024_v16  ;;  %v5161_v5 = vadd.f32 %v5160_v52, %v5112_v44  ;;  %v5026_v19 = vmul.f32 %v10786_v27, %v4367_v23 }
 0x51b   : > { %v5114_v28 = vmul.f32 %v10818_v55, %v4367_v23  ;;  %v5035_v50 = vadd.f32 %v5034_v54, %v5025_v7  ;;  %v5123_v6 = vadd.f32 %v5122_v25, %v5113_v2  ;;  %v5061_v42 = vadd.f32 %v5060_v49, %v5027_v15 }
 0x51c   : > { %v5149_v46 = vadd.f32 %v5148_v58, %v5115_v18  ;;  %v5048_v48 = vadd.f32 %v5047_v61, %v5026_v19  ;;  %v5028_v29 = vmul.f32 %v10786_v27, %v4369_v31  ;;  %v5116_v21 = vmul.f32 %v10818_v55, %v4369_v31 }
 0x51d   : > { %v5136_v47 = vadd.f32 %v5135_v63, %v5114_v28  ;;  %v5036_v30 = vrot.slane %v5035_v50, 4  ;;  %v5124_v12 = vrot.slane %v5123_v6, 4  ;;  %v5062_v60 = vrot.slane %v5061_v42, 4 }
 0x51e   : > { %v5150_v57 = vrot.slane %v5149_v46, 4  ;;  %v5049_v41 = vrot.slane %v5048_v48, 4  ;;  %v5074_v32 = vadd.f32 %v5073_v53, %v5028_v29  ;;  %v5162_v20 = vadd.f32 %v5161_v5, %v5116_v21 }
 0x51f   : > { %v5137_v40 = vrot.slane %v5136_v47, 4  ;;  %v5037_v52 = vadd.f32 %v5036_v30, %v5035_v50  ;;  %v5125_v13 = vadd.f32 %v5124_v12, %v5123_v6  ;;  %v5063_v54 = vadd.f32 %v5062_v60, %v5061_v42  ;;  %v10819_v12 = vld [vmem:[#allocation26_spill] sm:$0xff] }
 0x520   : > { %v5151_v25 = vadd.f32 %v5150_v57, %v5149_v46  ;;  %v5050_v26 = vadd.f32 %v5049_v41, %v5048_v48  ;;  %v5075_v59 = vrot.slane %v5074_v32, 4  ;;  %v5163_v38 = vrot.slane %v5162_v20, 4  ;;  %v10821_v41 = vld [vmem:[#allocation28_spill] sm:$0xff] }
 0x521   : > { %v5138_v62 = vadd.f32 %v5137_v40, %v5136_v47  ;;  %v5038_v0 = vrot.slane %v5037_v52, 2  ;;  %v5126_v27 = vrot.slane %v5125_v13, 2  ;;  %v5064_v51 = vrot.slane %v5063_v54, 2 }
 0x522   : > { %v5152_v37 = vrot.slane %v5151_v25, 2  ;;  %v5051_v14 = vrot.slane %v5050_v26, 2  ;;  %v5076_v58 = vadd.f32 %v5075_v59, %v5074_v32  ;;  %v5164_v43 = vadd.f32 %v5163_v38, %v5162_v20  ;;  %v10825_v38 = vld [vmem:[#allocation50_spill] sm:$0xff] }
 0x523   : > { %v5139_v49 = vrot.slane %v5138_v62, 2  ;;  %v5039_v39 = vadd.f32 %v5038_v0, %v5037_v52  ;;  %v5127_v17 = vadd.f32 %v5126_v27, %v5125_v13  ;;  %v5065_v11 = vadd.f32 %v5064_v51, %v5063_v54  ;;  %v10823_v13 = vld [vmem:[#allocation46_spill] sm:$0xff]  ;;  %v10827_v51 = vld [vmem:[#allocation12_spill] sm:$0xff] }
 0x524   : > { %v5153_v8 = vadd.f32 %v5152_v37, %v5151_v25  ;;  %v5052_v22 = vadd.f32 %v5051_v14, %v5050_v26  ;;  %v5077_v24 = vrot.slane %v5076_v58, 2  ;;  %v5165_v35 = vrot.slane %v5164_v43, 2 }
 0x525   : > { %v5140_v34 = vadd.f32 %v5139_v49, %v5138_v62  ;;  %v5040_v1 = vrot.slane %v5039_v39, 1  ;;  %v5128_v23 = vrot.slane %v5127_v17, 1  ;;  %v5066_v31 = vrot.slane %v5065_v11, 1  ;;  %v10829_v49 = vld [vmem:[#allocation10_spill] sm:$0xff] }
 0x526   : > { %v5154_v61 = vrot.slane %v5153_v8, 1  ;;  %v5053_v63 = vrot.slane %v5052_v22, 1  ;;  %v5078_v44 = vadd.f32 %v5077_v24, %v5076_v58  ;;  %v5166_v7 = vadd.f32 %v5165_v35, %v5164_v43  ;;  %v10835_v35 = vld [vmem:[#allocation23_spill] sm:$0xff] }
 0x527   : > { %v5141_v16 = vrot.slane %v5140_v34, 1  ;;  %v5041_v2 = vadd.f32 %v5040_v1, %v5039_v39  ;;  %v5129_v15 = vadd.f32 %v5128_v23, %v5127_v17  ;;  %v5067_v18 = vadd.f32 %v5066_v31, %v5065_v11  ;;  %v10831_v39 = vld [vmem:[#allocation16_spill] sm:$0xff]  ;;  %v10837_v31 = vld [vmem:[#allocation127_spill] sm:$0xff] }
 0x528   : > { %v5155_v53 = vadd.f32 %v5154_v61, %v5153_v8  ;;  %v5054_v5 = vadd.f32 %v5053_v63, %v5052_v22  ;;  %v5079_v28 = vrot.slane %v5078_v44, 1  ;;  %v5167_v50 = vrot.slane %v5166_v7, 1  ;;  %v10833_v22 = vld [vmem:[#allocation70_spill] sm:$0xff] }
 0x529   : > { %v5142_v19 = vadd.f32 %v5141_v16, %v5140_v34  ;;  %v5081_v6 = vadd.f32 %v5041_v2, %v9279_v56  ;;  %v5169_v42 = vadd.f32 %v5129_v15, %v9279_v56  ;;  %v5083_v46 = vadd.f32 %v5067_v18, %v9279_v56  ;;  %v10839_v16 = vld [vmem:[#allocation27_spill] sm:$0xff]  ;;  %v10843_v18 = vld [vmem:[#allocation25_spill] sm:$0xff] }
 0x52a   : > { %v5171_v48 = vadd.f32 %v5155_v53, %v9279_v56  ;;  %v5082_v47 = vadd.f32 %v5054_v5, %v9279_v56  ;;  %v5080_v21 = vadd.f32 %v5079_v28, %v5078_v44  ;;  %v5168_v30 = vadd.f32 %v5167_v50, %v5166_v7  ;;  %v10841_v2 = vld [vmem:[#allocation47_spill] sm:$0xff] }
 0x52b   : > { %v5170_v29 = vadd.f32 %v5142_v19, %v9279_v56  ;;  %v10820_v60 = vrot.slane %v10819_v12, 2  ;;  %v10822_v40 = vrot.slane %v10821_v41, 2  ;;  %v9649_v20 = vsel %vm4632_vm0, %v5081_v6, %v5169_v42  ;;  %v10845_v19 = vld [vmem:[#allocation59_spill] sm:$0xff]  ;;  %v10847_v6 = vld [vmem:[#allocation29_spill] sm:$0xff] }
 0x52c   : > { %v9652_v52 = vsel %vm4632_vm0, %v5083_v46, %v5171_v48  ;;  %v10824_v54 = vrot.slane %v10823_v13, 2  ;;  %v5084_v62 = vadd.f32 %v5080_v21, %v9279_v56  ;;  %v5172_v59 = vadd.f32 %v5168_v30, %v9279_v56  ;;  %v10849_v48 = vld [vmem:[#allocation8_spill] sm:$0xff] }
 0x52d   : > { %v9641_v57 = vadd.f32 %v10820_v60, %v10819_v12  ;;  %v9646_v32 = vadd.f32 %v10822_v40, %v10821_v41  ;;  %v5174_v26 = vsel %vm4632_vm0, %v5082_v47, %v5170_v29  ;;  %v10826_v0 = vmax.f32 %v10825_v38, 0.0  ;;  %v10850_v29 = vld [vmem:[#allocation69_spill] sm:$0xff]  ;;  %v10851_v21 = vld [vmem:[#allocation44_spill] sm:$0xff]  ;;  %v10853_v41 = vld [vmem:[#allocation83_spill] sm:$0xff] }
 0x52e   : > { %v9657_v25 = vadd.f32 %v10824_v54, %v10823_v13  ;;  %v10828_v37 = vmax.f32 %v10827_v51, 0.0  ;;  %v10830_v58 = vmax.f32 %v10829_v49, 0.0  ;;  %v10832_v17 = vmax.f32 %v10831_v39, 0.0  ;;  %v10852_v12 = vld [vmem:[#allocation81_spill] sm:$0xff]  ;;  %v10855_v54 = vld [vmem:[#allocation38_spill] sm:$0xff]  ;;  %v10858_v51 = vld [vmem:[#allocation20_spill] sm:$0xff] }
 0x52f   : > { %v4560_v27 = vmul.f32 %v10774_v10, %v10826_v0  ;;  %v5176_v8 = vsel %vm4632_vm0, %v5084_v62, %v5172_v59  ;;  %v10834_v34 = vmax.f32 %v10833_v22, 0.0  ;;  %v10836_v1 = vmax.f32 %v10835_v35, 0.0  ;;  %v10854_v40 = vld [vmem:[#allocation21_spill] sm:$0xff]  ;;  %v10856_v62 = vld [vmem:[#allocation135_spill] sm:$0xff] }
 0x530   : > { %v4561_v14 = vmul.f32 %v10774_v10, %v10828_v37  ;;  %v4562_v43 = vmul.f32 %v10774_v10, %v10830_v58  ;;  %v4563_v11 = vmul.f32 %v10774_v10, %v10832_v17  ;;  %v10838_v61 = vmax.f32 %v10837_v31, 0.0  ;;  %v10857_v38 = vld [vmem:[#allocation61_spill] sm:$0xff] }
 0x531   : > { %v4568_v24 = vmul.f32 %v10779_v45, %v10834_v34  ;;  %v4569_v23 = vmul.f32 %v10779_v45, %v10836_v1  ;;  %v10840_v44 = vmax.f32 %v10839_v16, 0.0  ;;  %v10842_v10 = vmax.f32 %v10841_v2, 0.0 }
 0x532   : > { %v4570_v63 = vmul.f32 %v10779_v45, %v10838_v61  ;;  %v10844_v53 = vmax.f32 %v10843_v18, 0.0  ;;  %v10846_v28 = vmax.f32 %v10845_v19, 0.0  ;;  %v10848_v42 = vmax.f32 %v10847_v6, 0.0 }
 0x533   : > { %v4571_v7 = vmul.f32 %v10779_v45, %v10840_v44  ;;  %v4572_v15 = vmul.f32 %v10818_v55, %v10842_v10  ;;  %v4579_v47 = vadd.f32 %v10849_v48, %v4560_v27  ;;  %v4592_v45 = vadd.f32 %v10850_v29, %v4561_v14  ;;  %v10860_v14 = vld [vmem:[#allocation22_spill] sm:$0xff] }
 0x534   : > { %v4573_v5 = vmul.f32 %v10818_v55, %v10844_v53  ;;  %v4574_v50 = vmul.f32 %v10818_v55, %v10846_v28  ;;  %v4575_v46 = vmul.f32 %v10818_v55, %v10848_v42  ;;  %v4605_v30 = vadd.f32 %v10851_v21, %v4562_v43  ;;  %v10859_v55 = vld [vmem:[#allocation18_spill] sm:$0xff] }
 0x535   : > { %v4618_v60 = vadd.f32 %v10852_v12, %v4563_v11  ;;  %v5210_v13 = vcombine.low %v10854_v40, %v10853_v41  ;;  %v5211_v59 = vcombine.low %v10856_v62, %v10855_v54  ;;  %v4580_v0 = vadd.f32 %v4579_v47, %v10857_v38 }
 0x536   : > { %v4593_v37 = vadd.f32 %v4592_v45, %v10858_v51  ;;  %v4606_v49 = vadd.f32 %v4605_v30, %v10859_v55  ;;  %v5671_v27 = vmov 1983009808   ;;  %v5227_v43 = vcombine.low %v9487_v3, %v9496_v4  ;;  %v10861_v3 = vld [vmem:[#allocation5_spill] sm:$0xff] }
 0x537   : > { %v5196_v58 = vunpack.c.l.s4 %v5671_v27  ;;  %v4619_v39 = vadd.f32 %v4618_v60, %v10860_v14  ;;  %v5228_v17 = vcombine.low %v9490_v36, %v9507_v33  ;;  %v5244_v11 = vcombine.low %v9649_v20, %v5174_v26 }
 0x538   : > { %v4581_v22 = vadd.f32 %v4580_v0, %v4568_v24  ;;  %v4594_v34 = vadd.f32 %v4593_v37, %v4569_v23  ;;  %v4607_v35 = vadd.f32 %v4606_v49, %v4570_v63  ;;  %v4462_v31 = vrot.slane %v9620_v9, 1 }
 0x539   : > { %v5197_v1 = vunpack.c.0.s8 %v5196_v58  ;;  %v4620_v61 = vadd.f32 %v4619_v39, %v4571_v7  ;;  %v5245_v16 = vcombine.low %v9652_v52, %v5176_v8  ;;  %v4488_v36 = vrot.slane %v9641_v57, 1 }
 0x53a   : > { %v4582_v44 = vadd.f32 %v4581_v22, %v4572_v15  ;;  %v4595_v2 = vadd.f32 %v4594_v34, %v4573_v5  ;;  %v4608_v10 = vadd.f32 %v4607_v35, %v4574_v50  ;;  %v4475_v33 = vrot.slane %v9646_v32, 1 }
 0x53b   : > { %v9720_v4 = vsub.s32 %v5197_v1, %v10861_v3  ;;  %v4501_v20 = vrot.slane %v9657_v25, 1  ;;  %v4621_v26 = vadd.f32 %v4620_v61, %v4575_v46  ;;  %v4463_v45 = vadd.f32 %v4462_v31, %v9620_v9 }
 0x53c   : > { %v4583_v24 = vrot.slane %v4582_v44, 4  ;;  %v4596_v23 = vrot.slane %v4595_v2, 4  ;;  %v4609_v63 = vrot.slane %v4608_v10, 4  ;;  %v4476_v21 = vadd.f32 %v4475_v33, %v9646_v32 }
 0x53d   : > { %v5218_v7 = vrot.slane %v5210_v13, %v9720_v4  ;;  %v4622_v52 = vrot.slane %v4621_v26, 4  ;;  %v5225_v8 = vrot.slane %v5211_v59, %v9720_v4  ;;  %v5235_v15 = vrot.slane %v5227_v43, %v9720_v4 }
 0x53e   : > { %v5242_v18 = vrot.slane %v5228_v17, %v9720_v4  ;;  %v4584_v53 = vadd.f32 %v4583_v24, %v4582_v44  ;;  %v4597_v5 = vadd.f32 %v4596_v23, %v4595_v2  ;;  %v4610_v19 = vadd.f32 %v4609_v63, %v4608_v10 }
 0x53f   : > { %v5252_v28 = vrot.slane %v5244_v11, %v9720_v4  ;;  %v4623_v50 = vadd.f32 %v4622_v52, %v4621_v26  ;;  %v5226_v6 = vcombine.low %v5218_v7, %v5225_v8  ;;  %v5259_v46 = vrot.slane %v5245_v16, %v9720_v4 }
 0x540   : > { %v5243_v42 = vcombine.low %v5235_v15, %v5242_v18  ;;  %v4585_v48 = vrot.slane %v4584_v53, 2  ;;  %v4598_v47 = vrot.slane %v4597_v5, 2  ;;  %v4611_v29 = vrot.slane %v4610_v19, 2 }
 0x541   : > { %v4624_v30 = vrot.slane %v4623_v50, 2  ;;  %v5260_v12 = vcombine.low %v5252_v28, %v5259_v46  ;;  %5266 = vst [vmem:[%s9735_s25 + $0x8] sm:$0xff] %v5226_v6  ;;  %v4489_v60 = vadd.f32 %v4488_v36, %v9641_v57  ;;  %v4502_v54 = vadd.f32 %v4501_v20, %v9657_v25 }
 0x542   : > { %5267 = vst [vmem:[%s9735_s25 + $0x10] sm:$0xff] %v5243_v42  ;;  %v4586_v41 = vadd.f32 %v4585_v48, %v4584_v53  ;;  %v4599_v40 = vadd.f32 %v4598_v47, %v4597_v5  ;;  %v4612_v13 = vadd.f32 %v4611_v29, %v4610_v19  ;;  %v4508_v38 = vadd.f32 %v9279_v56, %v4463_v45 }
 0x543   : > { %v4625_v62 = vadd.f32 %v4624_v30, %v4623_v50  ;;  %5268 = vst [vmem:[%s9735_s25 + $0x18] sm:$0xff] %v5260_v12  ;;  %v4509_v0 = vadd.f32 %v9279_v56, %v4476_v21  ;;  %v4510_v37 = vadd.f32 %v9279_v56, %v4489_v60  ;;  %v4511_v27 = vadd.f32 %v9279_v56, %v4502_v54 }
 0x544   : > { %v4587_v9 = vrot.slane %v4586_v41, 1  ;;  %v4600_v32 = vrot.slane %v4599_v40, 1  ;;  %v4613_v59 = vrot.slane %v4612_v13, 1 }
 0x545   : > { %v4626_v51 = vrot.slane %v4625_v62, 1 }
 0x546   : > { %v4588_v55 = vadd.f32 %v4587_v9, %v4586_v41  ;;  %v4601_v57 = vadd.f32 %v4600_v32, %v4599_v40  ;;  %v4614_v49 = vadd.f32 %v4613_v59, %v4612_v13 }
 0x547   : > { %v4627_v25 = vadd.f32 %v4626_v51, %v4625_v62 }
 0x548   : > { %v4628_v58 = vadd.f32 %v4588_v55, %v9279_v56  ;;  %v4629_v14 = vadd.f32 %v4601_v57, %v9279_v56  ;;  %v4630_v39 = vadd.f32 %v4614_v49, %v9279_v56 }
 0x549   : > { %v4631_v43 = vadd.f32 %v4627_v25, %v9279_v56 }
 0x54a   : > { %v4633_v17 = vsel %vm4632_vm0, %v4508_v38, %v4628_v58  ;;  %v4634_v11 = vsel %vm4632_vm0, %v4509_v0, %v4629_v14  ;;  %v4635_v22 = vsel %vm4632_vm0, %v4510_v37, %v4630_v39 }
 0x54b   : > { %v4636_v34 = vsel %vm4632_vm0, %v4511_v27, %v4631_v43  ;;  %v5193_v35 = vcombine.low %v4633_v17, %v4634_v11 }
 0x54c   : > { %v5194_v1 = vcombine.low %v4635_v22, %v4636_v34 }
 0x54d   : > { %v5201_v31 = vrot.slane %v5193_v35, %v9720_v4 }
 0x54e   : > { %v5208_v61 = vrot.slane %v5194_v1, %v9720_v4 }
 0x550   : > { %v5209_v16 = vcombine.low %v5201_v31, %v5208_v61 }
 0x552   : > { %5265 = vst [vmem:[%s9735_s25] sm:$0xff] %v5209_v16 }
 0x553   : > { %5615 = shalt.err (!%p5612_p3)
}
 0x554   : > { %s5616_s16 = scalar_lea.hbm %s9761_s14, 512  ;;  %s5620_s26 = scalar_lea.hbm %s9815_s9, 1024 }
 0x555   : > { %p5617_p4 = scmp.ne.s32.totalorder %s9761_s14, %s5616_s16  ;;  %p5621_p9 = scmp.lt.u32.totalorder %s9761_s14, %s9815_s9 }
 0x556   : > { %p5622_p10 = scmp.lt.u32.totalorder %s5620_s26, %s5616_s16  ;;  %p5624_p12 = scmp.lt.u32.totalorder %s5616_s16, %s9761_s14 }
 0x557   : > { %p5618_p7 = pnand %p5617_p4, %p5761_p5 }
 0x558   : > { %p5623_p11 = por %p5622_p10, %p5621_p9 }
 0x559   : > { %p5619_p8 = pneg %p5618_p7 }
 0x55a   : > { %p5625_p13 = por %p5624_p12, %p5623_p11 }
 0x55c   : > { %p5626_p0 = pnand %p5625_p13, %p5619_p8 }
 0x55e   : > { %5629 = shalt.err (!%p5626_p0)
}
 0x55f   : > { %5420 = dma.vmem_to_hbm [thread:$0]  (%p5761_p5), %s9763_s27, 512, %s9761_s14, %s5270_s17  }
 0x560 PF: > { %p5426_p1 = scmp.ge.s32.totalorder %s5664_s12, 2  ;;  %s5296_s21 = sand.u32 1, %s5652_s30  }
 0x561   : > { %s5297_s13 = scalar_lea.sflag [#allocation3], %s5296_s21 }
 0x562   : > { %p5423_p2 = pnand %p5426_p1, %p5765_p6 }
 0x564   : > { %5647 = dma.done.wait (!%p5423_p2), %s5297_s13, 512  }
 0x565   : > { %5649 = vsyncadd (!%p5423_p2), %s5297_s13, 4294966784  ;;  %p19_p3 = scmp.ge.s32.totalorder %s5748_s15, 4   ;;  %s10862_s30 = smov %s5656_s10 }
 0x566   : > { %s10863_s10 = smov %s5660_s11  ;;  %s10864_s11 = smov %s5759_s18 }
 0x567   : > { %s10865_s12 = smov %s5748_s15  ;;  %21 = sbr.rel (!%p19_p3) target bundleno = 3 (0x3), region = 91 }
 0x56e   :  { %5302 = vsyncpa [#allocation3], 1 }
 0x56f   :  { %5304 = vsyncpa [#allocation3 + $0x1], 1 }

</bundles_post_ra>
